<compile_context>
chip_gen: v6e
topology: v6e:2x2x1
jax: 0.10.0
libtpu: 0.0.40
codegen_flags: <defaults>
</compile_context>

<pallas_src>
import functools

import jax
import jax.numpy as jnp
import numpy as np
from jax.experimental import pallas as pl
from jax.experimental.pallas import tpu as pltpu


def _round_up(x, m):
    return ((x + m - 1) // m) * m


def _device_hints():
    """(tensorcores_per_chip, vmem_limit_cap_bytes) from the device kind."""
    try:
        kind = jax.devices()[0].device_kind.lower()
    except Exception:  # pragma: no cover - defensive
        kind = ""
    is_v7 = "v7" in kind
    n_tc = 2 if is_v7 else 1                      # v7x: 2 TCs/chip; v5e/v6e: 1
    vmem_cap = (48 << 20) if is_v7 else (100 << 20)  # v7x has 64 MiB physical
    return n_tc, vmem_cap


def _attention_kernel(*refs, add_pos, use_mask):
    it = iter(refs)
    v_ref = next(it)
    xyz_ref = next(it) if add_pos else None
    mask_ref = next(it) if use_mask else None
    w_e_ref = next(it)
    b_e_ref = next(it)
    w_v_ref = next(it)
    b_v_ref = next(it)
    w_t_ref = next(it)
    b_t_ref = next(it)
    o_ref = next(it)

    v = v_ref[...].astype(jnp.float32)

    # pos_norm (eval-mode BN) is folded into w_e/b_e and w_v/b_v, so the
    # kernel only needs u = v + xyz (or v).
    if add_pos:
        u = v + xyz_ref[...].astype(jnp.float32)
    else:
        u = v
    u16 = u.astype(jnp.bfloat16)

    # energy = energy_conv(pos_norm(u)); val = v_conv(pos_norm(u))
    # (BN folded into the bf16 weights; f32 accumulation on the MXU)
    energy = jnp.dot(u16, w_e_ref[...],
                     preferred_element_type=jnp.float32) + b_e_ref[...]
    val = jnp.dot(u16, w_v_ref[...],
                  preferred_element_type=jnp.float32) + b_v_ref[...]

    # energy = energy * mask   (original semantics: masked logits -> 0)
    if use_mask:
        energy = energy * mask_ref[...].astype(jnp.float32)

    # attention = softmax(energy, dim=-1) followed by
    # attention / (1e-9 + attention.sum(dim=1, keepdim=True)).
    # For 2-D [N, C] the dim=1 sum of a dim=-1 softmax is exactly 1, so both
    # steps collapse into a single per-row scale (EUP approx reciprocal).
    # TODO(synk): this fold assumes 2-D [N, C] input; a batched [B, N, C] call
    # would make dim=1 the point axis and need a real second reduction.
    e = energy - jnp.max(energy, axis=-1, keepdims=True)
    p = jnp.exp(e)
    s1 = jnp.sum(p, axis=-1, keepdims=True)
    attention = p * pl.reciprocal(s1 * (1.0 + 1e-9), approx=True)

    # x_r = val * attention ; x = relu(after_norm(trans_conv(x_r))) + v
    # (after_norm folded into w_t/b_t)
    x_r = val * attention
    t = jnp.dot(x_r.astype(jnp.bfloat16), w_t_ref[...],
                preferred_element_type=jnp.float32) + b_t_ref[...]
    o_ref[...] = (jnp.maximum(t, 0.0) + v).astype(o_ref.dtype)


@functools.partial(jax.jit, static_argnames=("add_pos", "tile_n"))
def attention_forward(v, xyz, params, mask=None, *, add_pos=True, tile_n=1024):
    """v, xyz, mask: [N, C] (any float dtype).  Returns [N, C] in v.dtype."""
    N, C = v.shape
    use_mask = mask is not None
    if use_mask and mask.dtype == jnp.bool_:
        mask = mask.astype(jnp.bfloat16)

    n_tc, vmem_cap = _device_hints()

    # ---- point tiling (rows only; channels stay at C in HBM) ------------
    tn = max(8, _round_up(min(int(tile_n), _round_up(N, 8)), 8))
    if n_tc > 1:
        # v7x megacore: want >= 2 grid steps per TensorCore so BlockSpec
        # double-buffering has something to overlap on each core.
        target = 2 * n_tc
        if _round_up(N, tn) // tn < target and N >= 8 * target:
            tn = _round_up(-(-N // target), 8)
    n_pad = _round_up(N, tn)

    # ---- fold eval-mode BatchNorm1d into the Linear weights -------------
    def bn_fold(w, b, rm, rv, eps=1e-5):
        scale = w.astype(jnp.float32) / jnp.sqrt(rv.astype(jnp.float32) + eps)
        shift = b.astype(jnp.float32) - rm.astype(jnp.float32) * scale
        return scale, shift

    we, be = [p.astype(jnp.float32) for p in params["energy_conv"]]
    wv, bv = [p.astype(jnp.float32) for p in params["v_conv"]]
    wt, bt = [p.astype(jnp.float32) for p in params["trans_conv"]]

    if add_pos:
        ps, psh = bn_fold(*params["pos_norm"])      # value = u*ps + psh
        w_e = ps[:, None] * we
        b_e = psh @ we + be
        w_v = ps[:, None] * wv
        b_v = psh @ wv + bv
    else:
        w_e, b_e, w_v, b_v = we, be, wv, bv

    asc, ash = bn_fold(*params["after_norm"])       # after_norm(x) = x*asc + ash
    w_t = wt * asc[None, :]
    b_t = bt * asc + ash

    w_e = w_e.astype(jnp.bfloat16)
    w_v = w_v.astype(jnp.bfloat16)
    w_t = w_t.astype(jnp.bfloat16)
    b_e = b_e.reshape(1, C).astype(jnp.float32)
    b_v = b_v.reshape(1, C).astype(jnp.float32)
    b_t = b_t.reshape(1, C).astype(jnp.float32)

    # ---- row padding only when the grid requires it ----------------------
    def pad_rows(x):
        if n_pad == N:
            return x
        return jnp.pad(x, ((0, n_pad - N), (0, 0)))

    row_spec = pl.BlockSpec((tn, C), lambda i: (i, 0))
    rep = lambda shape: pl.BlockSpec(shape, lambda i: (0, 0))

    args = [pad_rows(v)]
    specs = [row_spec]
    if add_pos:
        args.append(pad_rows(xyz))
        specs.append(row_spec)
    if use_mask:
        args.append(pad_rows(mask))
        specs.append(row_spec)

    args += [w_e, b_e, w_v, b_v, w_t, b_t]
    specs += [rep((C, C)), rep((1, C)), rep((C, C)), rep((1, C)),
              rep((C, C)), rep((1, C))]

    # ---- cost estimate + VMEM budget -------------------------------------
    flops = 6 * n_pad * C * C + 8 * n_pad * C
    transcendentals = n_pad * C + n_pad
    bytes_accessed = sum(int(np.prod(a.shape)) * a.dtype.itemsize for a in args)
    bytes_accessed += n_pad * C * jnp.dtype(v.dtype).itemsize
    cost = pl.CostEstimate(flops=flops, transcendentals=transcendentals,
                           bytes_accessed=bytes_accessed)

    stream = tn * C * (2 * jnp.dtype(v.dtype).itemsize)          # v + output
    if add_pos:
        stream += tn * C * xyz.dtype.itemsize
    if use_mask:
        stream += tn * C * mask.dtype.itemsize
    vmem_est = 2 * stream                       # double-buffered row tiles
    vmem_est += 10 * tn * C * 4                 # in-kernel f32 intermediates
    vmem_est += 4 * (3 * C * C * 2 + 3 * C * 4)  # weights / biases
    vmem_limit = int(min(vmem_cap, max(32 << 20, 4 * vmem_est)))

    kernel = functools.partial(_attention_kernel, add_pos=add_pos,
                               use_mask=use_mask)

    out = pl.pallas_call(
        kernel,
        out_shape=jax.ShapeDtypeStruct((n_pad, C), v.dtype),
        grid_spec=pltpu.PrefetchScalarGridSpec(
            num_scalar_prefetch=0,
            grid=(n_pad // tn,),
            in_specs=specs,
            out_specs=row_spec,
        ),
        compiler_params=pltpu.CompilerParams(
            dimension_semantics=("parallel",),
            vmem_limit_bytes=vmem_limit,
        ),
        cost_estimate=cost,
    )(*args)

    if n_pad != N:
        out = out[:N]
    return out


def _reference(v, xyz, params, mask, add_pos):
    # Pure-JAX reference mirroring the PyTorch forward (eval-mode BN), f32.
    def bn(x, w, b, rm, rv, eps=1e-5):
        return (x - rm) / jnp.sqrt(rv + eps) * w + b

    v = v.astype(jnp.float32)
    xyz = xyz.astype(jnp.float32)
    value = bn(v + xyz, *[p.astype(jnp.float32) for p in params["pos_norm"]]) \
        if add_pos else v
    we, be = params["energy_conv"]
    wv, bv = params["v_conv"]
    wt, bt = params["trans_conv"]
    energy = value @ we + be
    value2 = value @ wv + bv
    if mask is not None:
        energy = energy * mask.astype(jnp.float32)
    attention = jax.nn.softmax(energy, axis=-1)
    attention = attention / (1e-9 + attention.sum(axis=1, keepdims=True))
    x_r = value2 * attention
    t = bn(x_r @ wt + bt, *[p.astype(jnp.float32) for p in params["after_norm"]])
    return jnp.maximum(t, 0.0) + v


if __name__ == "__main__":
    # Point-cloud style problem: N points x C channels.
    N, C = 2048, 32
    key = jax.random.PRNGKey(0)
    ks = jax.random.split(key, 12)

    def linear_init(kw, kb):
        w = jax.random.normal(kw, (C, C), jnp.float32) * (1.0 / np.sqrt(C))
        b = jax.random.normal(kb, (C,), jnp.float32) * 0.05
        return w, b

    def bn_init(k):
        kw, kb, km, kv = jax.random.split(k, 4)
        w = 1.0 + 0.1 * jax.random.normal(kw, (C,), jnp.float32)
        b = 0.05 * jax.random.normal(kb, (C,), jnp.float32)
        rm = 0.1 * jax.random.normal(km, (C,), jnp.float32)
        rv = 1.0 + 0.1 * jnp.abs(jax.random.normal(kv, (C,), jnp.float32))
        return w, b, rm, rv

    params = {
        "energy_conv": linear_init(ks[0], ks[1]),
        "v_conv": linear_init(ks[2], ks[3]),
        "trans_conv": linear_init(ks[4], ks[5]),
        "pos_norm": bn_init(ks[6]),
        "after_norm": bn_init(ks[7]),
    }

    v = jax.random.normal(ks[8], (N, C), jnp.float32)
    # xyz / mask streamed narrow (bf16) per the perf review; v stays f32 for
    # the residual add.
    xyz = jax.random.normal(ks[9], (N, C), jnp.float32).astype(jnp.bfloat16)
    mask = (jax.random.uniform(ks[10], (N, C)) > 0.2).astype(jnp.bfloat16)

    # Tolerance accounts for bf16 MXU operands (f32 accumulation), bf16
    # streams and the approx reciprocal; elementwise math stays f32.
    TOL = dict(rtol=2e-2, atol=2e-2)

    # 1) main path: add_pos=True, with mask
    out = jax.block_until_ready(
        attention_forward(v, xyz, params, mask, add_pos=True, tile_n=1024))
    ref = _reference(v, xyz, params, mask, add_pos=True)
    np.testing.assert_allclose(np.asarray(out), np.asarray(ref), **TOL)

    # 2) no mask: the mask stream is not built / DMA'd at all
    out2 = jax.block_until_ready(
        attention_forward(v, xyz, params, None, add_pos=True, tile_n=1024))
    ref2 = _reference(v, xyz, params, None, add_pos=True)
    np.testing.assert_allclose(np.asarray(out2), np.asarray(ref2), **TOL)

    # 3) add_pos=False with a ragged point count (exercises row padding path)
    Nr = 2000
    out3 = jax.block_until_ready(
        attention_forward(v[:Nr], xyz[:Nr], params, mask[:Nr],
                          add_pos=False, tile_n=1024))
    ref3 = _reference(v[:Nr], xyz[:Nr], params, mask[:Nr], add_pos=False)
    np.testing.assert_allclose(np.asarray(out3), np.asarray(ref3), **TOL)

    print("KERNEL_OK")
</pallas_src>

<mosaic_0001>
module attributes {stable_mosaic.version = 11 : i64} {
  func.func @_attention_kernel(%arg0: i32, %arg1: memref<1024x32xf32, #tpu.memory_space<vmem>>, %arg2: memref<1024x32xbf16, #tpu.memory_space<vmem>>, %arg3: memref<1024x32xbf16, #tpu.memory_space<vmem>>, %arg4: memref<32x32xbf16, #tpu.memory_space<vmem>>, %arg5: memref<1x32xf32, #tpu.memory_space<vmem>>, %arg6: memref<32x32xbf16, #tpu.memory_space<vmem>>, %arg7: memref<1x32xf32, #tpu.memory_space<vmem>>, %arg8: memref<32x32xbf16, #tpu.memory_space<vmem>>, %arg9: memref<1x32xf32, #tpu.memory_space<vmem>>, %arg10: memref<1024x32xf32, #tpu.memory_space<vmem>>) attributes {dimension_semantics = [#tpu.dimension_semantics<parallel>], iteration_bounds = array<i64: 2>, scalar_prefetch = 0 : i64, scratch_operands = 0 : i64, tpu.core_type = #tpu.core_type<tc>, window_params = [{transform_indices = @transform_0, window_bounds = array<i64: 1024, 32>}, {transform_indices = @transform_1, window_bounds = array<i64: 1024, 32>}, {transform_indices = @transform_2, window_bounds = array<i64: 1024, 32>}, {pipeline_mode = #tpu.pipeline_mode<synchronous>, transform_indices = @transform_3, window_bounds = array<i64: 32, 32>}, {pipeline_mode = #tpu.pipeline_mode<synchronous>, transform_indices = @transform_4, window_bounds = array<i64: 1, 32>}, {pipeline_mode = #tpu.pipeline_mode<synchronous>, transform_indices = @transform_5, window_bounds = array<i64: 32, 32>}, {pipeline_mode = #tpu.pipeline_mode<synchronous>, transform_indices = @transform_6, window_bounds = array<i64: 1, 32>}, {pipeline_mode = #tpu.pipeline_mode<synchronous>, transform_indices = @transform_7, window_bounds = array<i64: 32, 32>}, {pipeline_mode = #tpu.pipeline_mode<synchronous>, transform_indices = @transform_8, window_bounds = array<i64: 1, 32>}, {transform_indices = @transform_9, window_bounds = array<i64: 1024, 32>}]} {
    %c0 = arith.constant 0 : index
    %c0_0 = arith.constant 0 : index
    %0 = vector.load %arg1[%c0, %c0_0] : memref<1024x32xf32, #tpu.memory_space<vmem>>, vector<1024x32xf32>
    %c0_1 = arith.constant 0 : index
    %c0_2 = arith.constant 0 : index
    %1 = vector.load %arg2[%c0_1, %c0_2] : memref<1024x32xbf16, #tpu.memory_space<vmem>>, vector<1024x32xbf16>
    %2 = arith.extf %1 : vector<1024x32xbf16> to vector<1024x32xf32>
    %3 = arith.addf %0, %2 : vector<1024x32xf32>
    %4 = arith.truncf %3 : vector<1024x32xf32> to vector<1024x32xbf16>
    %c0_3 = arith.constant 0 : index
    %c0_4 = arith.constant 0 : index
    %5 = vector.load %arg4[%c0_3, %c0_4] : memref<32x32xbf16, #tpu.memory_space<vmem>>, vector<32x32xbf16>
    %cst = arith.constant dense<0.000000e+00> : vector<1024x32xf32>
    %6 = tpu.matmul %4, %5, %cst {dimension_numbers = #tpu.dot_dimension_numbers<[1], [0], [0], [1], [0, 0, 1, 1], [], []>} : vector<1024x32xbf16>, vector<32x32xbf16>, vector<1024x32xf32> -> vector<1024x32xf32>
    %c0_5 = arith.constant 0 : index
    %c0_6 = arith.constant 0 : index
    %7 = vector.load %arg5[%c0_5, %c0_6] : memref<1x32xf32, #tpu.memory_space<vmem>>, vector<1x32xf32>
    %8 = vector.broadcast %7 : vector<1x32xf32> to vector<1024x32xf32>
    %9 = arith.addf %6, %8 : vector<1024x32xf32>
    %c0_7 = arith.constant 0 : index
    %c0_8 = arith.constant 0 : index
    %10 = vector.load %arg6[%c0_7, %c0_8] : memref<32x32xbf16, #tpu.memory_space<vmem>>, vector<32x32xbf16>
    %cst_9 = arith.constant dense<0.000000e+00> : vector<1024x32xf32>
    %11 = tpu.matmul %4, %10, %cst_9 {dimension_numbers = #tpu.dot_dimension_numbers<[1], [0], [0], [1], [0, 0, 1, 1], [], []>} : vector<1024x32xbf16>, vector<32x32xbf16>, vector<1024x32xf32> -> vector<1024x32xf32>
    %c0_10 = arith.constant 0 : index
    %c0_11 = arith.constant 0 : index
    %12 = vector.load %arg7[%c0_10, %c0_11] : memref<1x32xf32, #tpu.memory_space<vmem>>, vector<1x32xf32>
    %13 = vector.broadcast %12 : vector<1x32xf32> to vector<1024x32xf32>
    %14 = arith.addf %11, %13 : vector<1024x32xf32>
    %c0_12 = arith.constant 0 : index
    %c0_13 = arith.constant 0 : index
    %15 = vector.load %arg3[%c0_12, %c0_13] : memref<1024x32xbf16, #tpu.memory_space<vmem>>, vector<1024x32xbf16>
    %16 = arith.extf %15 : vector<1024x32xbf16> to vector<1024x32xf32>
    %17 = arith.mulf %9, %16 : vector<1024x32xf32>
    %cst_14 = arith.constant dense<0xFF800000> : vector<1024xf32>
    %18 = vector.multi_reduction <maximumf>, %17, %cst_14 [1] : vector<1024x32xf32> to vector<1024xf32>
    %19 = vector.shape_cast %18 : vector<1024xf32> to vector<1024x1xf32>
    %20 = vector.broadcast %19 : vector<1024x1xf32> to vector<1024x32xf32>
    %21 = arith.subf %17, %20 : vector<1024x32xf32>
    %22 = math.exp %21 : vector<1024x32xf32>
    %cst_15 = arith.constant dense<0.000000e+00> : vector<1024xf32>
    %23 = vector.multi_reduction <add>, %22, %cst_15 [1] : vector<1024x32xf32> to vector<1024xf32>
    %24 = vector.shape_cast %23 : vector<1024xf32> to vector<1024x1xf32>
    %cst_16 = arith.constant 1.000000e+00 : f32
    %25 = vector.broadcast %cst_16 : f32 to vector<1024x1xf32>
    %26 = arith.mulf %24, %25 : vector<1024x1xf32>
    %27 = tpu.reciprocal %26 {approx = true} : vector<1024x1xf32> -> vector<1024x1xf32>
    %28 = vector.broadcast %27 : vector<1024x1xf32> to vector<1024x32xf32>
    %29 = arith.mulf %22, %28 : vector<1024x32xf32>
    %30 = arith.mulf %14, %29 : vector<1024x32xf32>
    %31 = arith.truncf %30 : vector<1024x32xf32> to vector<1024x32xbf16>
    %c0_17 = arith.constant 0 : index
    %c0_18 = arith.constant 0 : index
    %32 = vector.load %arg8[%c0_17, %c0_18] : memref<32x32xbf16, #tpu.memory_space<vmem>>, vector<32x32xbf16>
    %cst_19 = arith.constant dense<0.000000e+00> : vector<1024x32xf32>
    %33 = tpu.matmul %31, %32, %cst_19 {dimension_numbers = #tpu.dot_dimension_numbers<[1], [0], [0], [1], [0, 0, 1, 1], [], []>} : vector<1024x32xbf16>, vector<32x32xbf16>, vector<1024x32xf32> -> vector<1024x32xf32>
    %c0_20 = arith.constant 0 : index
    %c0_21 = arith.constant 0 : index
    %34 = vector.load %arg9[%c0_20, %c0_21] : memref<1x32xf32, #tpu.memory_space<vmem>>, vector<1x32xf32>
    %35 = vector.broadcast %34 : vector<1x32xf32> to vector<1024x32xf32>
    %36 = arith.addf %33, %35 : vector<1024x32xf32>
    %cst_22 = arith.constant 0.000000e+00 : f32
    %37 = vector.broadcast %cst_22 : f32 to vector<1024x32xf32>
    %38 = arith.maximumf %36, %37 : vector<1024x32xf32>
    %39 = arith.addf %38, %0 : vector<1024x32xf32>
    %c0_23 = arith.constant 0 : index
    %c0_24 = arith.constant 0 : index
    %40 = vector.load %arg10[%c0_23, %c0_24] : memref<1024x32xf32, #tpu.memory_space<vmem>>, vector<1024x32xf32>
    tpu.vector_store %arg10[%c0_23, %c0_24], %39 {strides = array<i32>} : memref<1024x32xf32, #tpu.memory_space<vmem>>, vector<1024x32xf32>,
    return
  }
  func.func @transform_0(%arg0: i32) -> (i32, i32) {
    %c0_i32 = arith.constant 0 : i32
    %c0_i32_0 = arith.constant 0 : i32
    return %arg0, %c0_i32 : i32, i32
  }
  func.func @transform_1(%arg0: i32) -> (i32, i32) {
    %c0_i32 = arith.constant 0 : i32
    %c0_i32_0 = arith.constant 0 : i32
    return %arg0, %c0_i32 : i32, i32
  }
  func.func @transform_2(%arg0: i32) -> (i32, i32) {
    %c0_i32 = arith.constant 0 : i32
    %c0_i32_0 = arith.constant 0 : i32
    return %arg0, %c0_i32 : i32, i32
  }
  func.func @transform_3(%arg0: i32) -> (i32, i32) {
    %c0_i32 = arith.constant 0 : i32
    %c0_i32_0 = arith.constant 0 : i32
    %c0_i32_1 = arith.constant 0 : i32
    return %c0_i32, %c0_i32_0 : i32, i32
  }
  func.func @transform_4(%arg0: i32) -> (i32, i32) {
    %c0_i32 = arith.constant 0 : i32
    %c0_i32_0 = arith.constant 0 : i32
    %c0_i32_1 = arith.constant 0 : i32
    return %c0_i32, %c0_i32_0 : i32, i32
  }
  func.func @transform_5(%arg0: i32) -> (i32, i32) {
    %c0_i32 = arith.constant 0 : i32
    %c0_i32_0 = arith.constant 0 : i32
    %c0_i32_1 = arith.constant 0 : i32
    return %c0_i32, %c0_i32_0 : i32, i32
  }
  func.func @transform_6(%arg0: i32) -> (i32, i32) {
    %c0_i32 = arith.constant 0 : i32
    %c0_i32_0 = arith.constant 0 : i32
    %c0_i32_1 = arith.constant 0 : i32
    return %c0_i32, %c0_i32_0 : i32, i32
  }
  func.func @transform_7(%arg0: i32) -> (i32, i32) {
    %c0_i32 = arith.constant 0 : i32
    %c0_i32_0 = arith.constant 0 : i32
    %c0_i32_1 = arith.constant 0 : i32
    return %c0_i32, %c0_i32_0 : i32, i32
  }
  func.func @transform_8(%arg0: i32) -> (i32, i32) {
    %c0_i32 = arith.constant 0 : i32
    %c0_i32_0 = arith.constant 0 : i32
    %c0_i32_1 = arith.constant 0 : i32
    return %c0_i32, %c0_i32_0 : i32, i32
  }
  func.func @transform_9(%arg0: i32) -> (i32, i32) {
    %c0_i32 = arith.constant 0 : i32
    %c0_i32_0 = arith.constant 0 : i32
    return %arg0, %c0_i32 : i32, i32
  }
}

</mosaic_0001>

<bundles_post_ra>
// kernel: attention_forward.1
= control target key start
LH: loop header
LB: loop body
LE: loop exit
PB: predicated region body
PF: predicated region fallthrough
CT: control target
= control target key end

     0   :  { %s7664_s30 = smov 0   ;;  %s11474_s0 = inlined_call_operand.vmem [shape: f32[2048,32], index: 0, kind: input, shape index: {}]   ;;  %s11475_s1 = inlined_call_operand.vmem [shape: bf16[2048,32], index: 1, kind: input, shape index: {}]   ;;  %s11476_s2 = inlined_call_operand.vmem [shape: bf16[2048,32], index: 2, kind: input, shape index: {}]   ;;  %s11477_s3 = inlined_call_operand.vmem [shape: bf16[32,32], index: 3, kind: input, shape index: {}]   ;;  %s11478_s4 = inlined_call_operand.vmem [shape: f32[1,32], index: 4, kind: input, shape index: {}]   ;;  %s11479_s5 = inlined_call_operand.vmem [shape: bf16[32,32], index: 5, kind: input, shape index: {}]   ;;  %s11480_s6 = inlined_call_operand.vmem [shape: f32[1,32], index: 6, kind: input, shape index: {}]   ;;  %s11481_s7 = inlined_call_operand.vmem [shape: bf16[32,32], index: 7, kind: input, shape index: {}]   ;;  %s11482_s8 = inlined_call_operand.vmem [shape: f32[1,32], index: 8, kind: input, shape index: {}]   ;;  %s11483_s9 = inlined_call_operand.vmem [shape: f32[2048,32], index: 9, kind: output, shape index: {}]  }
   0x1 LB: > { %s5494_s10 = sadd.s32 4294967295, %s7612_s30   ;;  %p5498_p0 = scmp.ge.s32.totalorder %s7612_s30, 1  ;;  %s7612_s30 = sphi %s7664_s30, %s19_s30  }
   0x2   : > { %p310_p1 = scmp.lt.s32.totalorder %s7612_s30, 3 }
   0x4   : > { %p311_p2 = pnand %p5498_p0, %p310_p1 }
   0x6   : > { %314 = sbr.rel (%p311_p2) target bundleno = 1172 (0x494), region = 56 }
   0xb   : > { %v6954_v0 = vld [vmem:[%s11477_s3 + $0x8] sm:$0xff]   ;;  %s5499_s13 = sshll.u32 %s5494_s10, 7  ;;  %v6955_v1 = vld [vmem:[%s11477_s3] sm:$0xff]   ;;  %vm980_vm0 = vcmask 261120  }
   0xc   : > { %p357_p3 = scmp.lt.s32.totalorder %s5499_s13, 255  ;;  %6546 = vmatprep.subr.bf16.mxu0 %v6954_v0  ;;  %6942 = vmatprep.subr.bf16.mxu1 %v6954_v0 }
   0xd   : > { %6547 = vmatpush3.bf16.msra.mxu0 %v6954_v0  ;;  %6944 = vmatpush3.bf16.msra.mxu1 %v6954_v0 }
   0xe   : > { %s12342_s13 = smov (!%p357_p3, %s5499_s13), 255  ;;  %6548 = vmatprep.subr.bf16.mxu0 %v6955_v1  ;;  %6943 = vmatprep.subr.bf16.mxu1 %v6955_v1 }
   0xf   : > { %s5500_s16 = sshll.u32 %s12342_s13, 3  ;;  %s5502_s17 = sshll.u32 %s12342_s13, 2 }
  0x10   : > { %s7687_s20 = scalar_lea.vmem %s11474_s0, %s5500_s16  ;;  %s7694_s23 = scalar_lea.vmem %s11475_s1, %s5502_s17 }
  0x11   : > { %6549 = vmatpush3.bf16.msra.mxu0 %v6955_v1  ;;  %6945 = vmatpush3.bf16.msra.mxu1 %v6955_v1  ;;  %v381_v2 = vld [vmem:[%s7687_s20] sm:$0xff]  ;;  %v382_v3 = vld [vmem:[%s7687_s20 + $0x8] sm:$0xff]  ;;  %v383_v12 = vld [vmem:[%s7687_s20 + $0x10] sm:$0xff]  ;;  %s8181_s10 = scalar_lea.vmem %s11476_s2, %s5502_s17  ;;  %s10797_s15 = scalar_lea.vmem %s11483_s9, %s5500_s16 }
  0x12   : > { %v5711_v4 = vld [vmem:[%s7694_s23] sm:$0xff]   ;;  %v446_v8 = vld [vmem:[%s7687_s20 + $0x208] sm:$0xff]  ;;  %v384_v13 = vld [vmem:[%s7687_s20 + $0x18] sm:$0xff] }
  0x13   : > { %v5712_v5 = vunpack.c.l.bf16 %v5711_v4  ;;  %v5713_v6 = vunpack.c.h.bf16 %v5711_v4  ;;  %v445_v7 = vld [vmem:[%s7687_s20 + $0x200] sm:$0xff]  ;;  %v6222_v14 = vld [vmem:[%s7694_s23 + $0x8] sm:$0xff]   ;;  %v447_v19 = vld [vmem:[%s7687_s20 + $0x210] sm:$0xff] }
  0x14   : > { %v6253_v9 = vld [vmem:[%s7694_s23 + $0x100] sm:$0xff]   ;;  %v5716_v17 = vunpack.c.l.bf16 %v6222_v14  ;;  %v5717_v18 = vunpack.c.h.bf16 %v6222_v14  ;;  %v448_v20 = vld [vmem:[%s7687_s20 + $0x218] sm:$0xff]  ;;  %v6254_v21 = vld [vmem:[%s7694_s23 + $0x108] sm:$0xff]  }
  0x15   : > { %v5840_v10 = vunpack.c.l.bf16 %v6253_v9  ;;  %v5841_v11 = vunpack.c.h.bf16 %v6253_v9  ;;  %v765_v15 = vadd.f32 %v5712_v5, %v381_v2  ;;  %v766_v16 = vadd.f32 %v5713_v6, %v382_v3  ;;  %v385_v26 = vld [vmem:[%s7687_s20 + $0x20] sm:$0xff]  ;;  %v6223_v27 = vld [vmem:[%s7694_s23 + $0x10] sm:$0xff]   ;;  %v386_v31 = vld [vmem:[%s7687_s20 + $0x28] sm:$0xff] }
  0x16   : > { %v5844_v24 = vunpack.c.l.bf16 %v6254_v21  ;;  %v5845_v25 = vunpack.c.h.bf16 %v6254_v21  ;;  %v767_v29 = vadd.f32 %v5716_v17, %v383_v12  ;;  %v768_v30 = vadd.f32 %v5717_v18, %v384_v13  ;;  %v6224_v33 = vld [vmem:[%s7694_s23 + $0x18] sm:$0xff]   ;;  %v387_v38 = vld [vmem:[%s7687_s20 + $0x30] sm:$0xff]  ;;  %v449_v45 = vld [vmem:[%s7687_s20 + $0x220] sm:$0xff] }
  0x17   : > { %v829_v22 = vadd.f32 %v5840_v10, %v445_v7  ;;  %v830_v23 = vadd.f32 %v5841_v11, %v446_v8  ;;  %v7710_v28 = vpack.c.bf16 %v766_v16, %v765_v15  ;;  %v5720_v32 = vunpack.c.l.bf16 %v6223_v27  ;;  %v388_v39 = vld [vmem:[%s7687_s20 + $0x38] sm:$0xff]  ;;  %v6255_v40 = vld [vmem:[%s7694_s23 + $0x110] sm:$0xff]   ;;  %v450_v46 = vld [vmem:[%s7687_s20 + $0x228] sm:$0xff] }
  0x18   : > { %v831_v35 = vadd.f32 %v5844_v24, %v447_v19  ;;  %v832_v36 = vadd.f32 %v5845_v25, %v448_v20  ;;  %v5721_v37 = vunpack.c.h.bf16 %v6223_v27  ;;  %v7721_v41 = vpack.c.bf16 %v768_v30, %v767_v29  ;;  %v6256_v47 = vld [vmem:[%s7694_s23 + $0x118] sm:$0xff]   ;;  %v451_v52 = vld [vmem:[%s7687_s20 + $0x230] sm:$0xff]  ;;  %v6225_v54 = vld [vmem:[%s7694_s23 + $0x20] sm:$0xff]  }
  0x19   : > { %v7714_v34 = vpack.c.bf16 %v830_v23, %v829_v22  ;;  %6550 = vmatprep.mubr.msk.bf16.mxu0 %vm980_vm0, %v7710_v28  ;;  %v769_v42 = vadd.f32 %v5720_v32, %v385_v26  ;;  %v5724_v43 = vunpack.c.l.bf16 %v6224_v33  ;;  %v5725_v44 = vunpack.c.h.bf16 %v6224_v33  ;;  %v452_v53 = vld [vmem:[%s7687_s20 + $0x238] sm:$0xff]  ;;  %v389_v59 = vld [vmem:[%s7687_s20 + $0x40] sm:$0xff]  ;;  %v6226_v60 = vld [vmem:[%s7694_s23 + $0x28] sm:$0xff]  }
  0x1a   : > { %v7728_v48 = vpack.c.bf16 %v832_v36, %v831_v35  ;;  %v770_v49 = vadd.f32 %v5721_v37, %v386_v31  ;;  %v5848_v50 = vunpack.c.l.bf16 %v6255_v40  ;;  %v5849_v51 = vunpack.c.h.bf16 %v6255_v40  ;;  %6551 = vmatmul.mubr.msk.bf16.vlgmr.msra.gmra.mxu0 %vm980_vm0, %v7721_v41  ;;  %v390_v0 = vld [vmem:[%s7687_s20 + $0x48] sm:$0xff]  ;;  %v6257_v2 = vld [vmem:[%s7694_s23 + $0x120] sm:$0xff]   ;;  %v6227_v13 = vld [vmem:[%s7694_s23 + $0x30] sm:$0xff]  }
  0x1b   : > { %6614 = vmatprep.mubr.msk.bf16.mxu1 %vm980_vm0, %v7714_v34  ;;  %v771_v55 = vadd.f32 %v5724_v43, %v387_v38  ;;  %v772_v56 = vadd.f32 %v5725_v44, %v388_v39  ;;  %v5852_v57 = vunpack.c.l.bf16 %v6256_v47  ;;  %v5853_v58 = vunpack.c.h.bf16 %v6256_v47  ;;  %v6258_v6 = vld [vmem:[%s7694_s23 + $0x128] sm:$0xff]   ;;  %v453_v11 = vld [vmem:[%s7687_s20 + $0x240] sm:$0xff]  ;;  %v391_v16 = vld [vmem:[%s7687_s20 + $0x50] sm:$0xff] }
  0x1c   : > { %6615 = vmatmul.mubr.msk.bf16.vlgmr.msra.gmra.mxu1 %vm980_vm0, %v7728_v48  ;;  %v7739_v61 = vpack.c.bf16 %v770_v49, %v769_v42  ;;  %v833_v62 = vadd.f32 %v5848_v50, %v449_v45  ;;  %v834_v63 = vadd.f32 %v5849_v51, %v450_v46  ;;  %v5728_v1 = vunpack.c.l.bf16 %v6225_v54  ;;  %v454_v12 = vld [vmem:[%s7687_s20 + $0x248] sm:$0xff]  ;;  %v392_v17 = vld [vmem:[%s7687_s20 + $0x58] sm:$0xff]  ;;  %v455_v21 = vld [vmem:[%s7687_s20 + $0x250] sm:$0xff] }
  0x1d   : > { %v835_v3 = vadd.f32 %v5852_v57, %v451_v52  ;;  %v836_v4 = vadd.f32 %v5853_v58, %v452_v53  ;;  %v5729_v5 = vunpack.c.h.bf16 %v6225_v54  ;;  %v5732_v9 = vunpack.c.l.bf16 %v6226_v60  ;;  %v456_v22 = vld [vmem:[%s7687_s20 + $0x258] sm:$0xff]  ;;  %v393_v29 = vld [vmem:[%s7687_s20 + $0x60] sm:$0xff]  ;;  %v394_v30 = vld [vmem:[%s7687_s20 + $0x68] sm:$0xff] }
  0x1e   : > { %6554 = vmatprep.mubr.msk.bf16.mxu0 %vm980_vm0, %v7739_v61  ;;  %v7746_v7 = vpack.c.bf16 %v834_v63, %v833_v62  ;;  %v773_v8 = vadd.f32 %v5728_v1, %v389_v59  ;;  %v5733_v10 = vunpack.c.h.bf16 %v6226_v60  ;;  %v7751_v14 = vpack.c.bf16 %v772_v56, %v771_v55  ;;  %v6259_v32 = vld [vmem:[%s7694_s23 + $0x130] sm:$0xff]   ;;  %v457_v40 = vld [vmem:[%s7687_s20 + $0x260] sm:$0xff]  ;;  %v458_v42 = vld [vmem:[%s7687_s20 + $0x268] sm:$0xff] }
  0x1f   : > { %v774_v15 = vadd.f32 %v5729_v5, %v390_v0  ;;  %v5856_v18 = vunpack.c.l.bf16 %v6257_v2  ;;  %v5857_v19 = vunpack.c.h.bf16 %v6257_v2  ;;  %v7757_v20 = vpack.c.bf16 %v836_v4, %v835_v3  ;;  %v6228_v45 = vld [vmem:[%s7694_s23 + $0x38] sm:$0xff]   ;;  %v6229_v50 = vld [vmem:[%s7694_s23 + $0x40] sm:$0xff]   ;;  %v395_v60 = vld [vmem:[%s7687_s20 + $0x70] sm:$0xff] }
  0x20   : > { %6618 = vmatprep.mubr.msk.bf16.mxu1 %vm980_vm0, %v7746_v7  ;;  %v5860_v23 = vunpack.c.l.bf16 %v6258_v6  ;;  %v5861_v24 = vunpack.c.h.bf16 %v6258_v6  ;;  %v5736_v31 = vunpack.c.l.bf16 %v6227_v13  ;;  %v775_v33 = vadd.f32 %v5732_v9, %v391_v16  ;;  %v6260_v49 = vld [vmem:[%s7694_s23 + $0x138] sm:$0xff]   ;;  %v6261_v54 = vld [vmem:[%s7694_s23 + $0x140] sm:$0xff]   ;;  %v459_v63 = vld [vmem:[%s7687_s20 + $0x270] sm:$0xff] }
  0x21   : > { %v7761_v25 = vpack.c.bf16 %v774_v15, %v773_v8  ;;  %v837_v26 = vadd.f32 %v5856_v18, %v453_v11  ;;  %v838_v27 = vadd.f32 %v5857_v19, %v454_v12  ;;  %v776_v35 = vadd.f32 %v5733_v10, %v392_v17  ;;  %v396_v62 = vld [vmem:[%s7687_s20 + $0x78] sm:$0xff]  ;;  %v397_v5 = vld [vmem:[%s7687_s20 + $0x80] sm:$0xff]  ;;  %v398_v6 = vld [vmem:[%s7687_s20 + $0x88] sm:$0xff] }
  0x22   : > { %v5737_v36 = vunpack.c.h.bf16 %v6227_v13  ;;  %6555 = vmatmul.mubr.msk.bf16.gmra.mxu0 %vm980_vm0, %v7751_v14  ;;  %v839_v38 = vadd.f32 %v5860_v23, %v455_v21  ;;  %v840_v39 = vadd.f32 %v5861_v24, %v456_v22  ;;  %v777_v43 = vadd.f32 %v5736_v31, %v393_v29  ;;  %v460_v4 = vld [vmem:[%s7687_s20 + $0x278] sm:$0xff]  ;;  %v461_v10 = vld [vmem:[%s7687_s20 + $0x280] sm:$0xff]  ;;  %v462_v11 = vld [vmem:[%s7687_s20 + $0x288] sm:$0xff] }
  0x23   : > { %v7768_v37 = vpack.c.bf16 %v838_v27, %v837_v26  ;;  %6558 = vmatprep.mubr.msk.bf16.mxu0 %vm980_vm0, %v7761_v25  ;;  %v5864_v46 = vunpack.c.l.bf16 %v6259_v32  ;;  %v5865_v47 = vunpack.c.h.bf16 %v6259_v32  ;;  %v7781_v51 = vpack.c.bf16 %v776_v35, %v775_v33  ;;  %v6230_v16 = vld [vmem:[%s7694_s23 + $0x48] sm:$0xff]   ;;  %v6231_v24 = vld [vmem:[%s7694_s23 + $0x50] sm:$0xff]   ;;  %v400_v32 = vld [vmem:[%s7687_s20 + $0x98] sm:$0xff] }
  0x24   : > { %6619 = vmatmul.mubr.msk.bf16.gmra.mxu1 %vm980_vm0, %v7757_v20  ;;  %v778_v44 = vadd.f32 %v5737_v36, %v394_v30  ;;  %v7784_v55 = vpack.c.bf16 %v840_v39, %v839_v38  ;;  %v5740_v56 = vunpack.c.l.bf16 %v6228_v45  ;;  %v5741_v57 = vunpack.c.h.bf16 %v6228_v45  ;;  %v6262_v21 = vld [vmem:[%s7694_s23 + $0x148] sm:$0xff]   ;;  %v6263_v29 = vld [vmem:[%s7694_s23 + $0x150] sm:$0xff]   ;;  %v401_v45 = vld [vmem:[%s7687_s20 + $0xa0] sm:$0xff] }
  0x25   : > { %6622 = vmatprep.mubr.msk.bf16.mxu1 %vm980_vm0, %v7768_v37  ;;  %v841_v52 = vadd.f32 %v5864_v46, %v457_v40  ;;  %v842_v53 = vadd.f32 %v5865_v47, %v458_v42  ;;  %v5868_v58 = vunpack.c.l.bf16 %v6260_v49  ;;  %v5869_v0 = vunpack.c.h.bf16 %v6260_v49  ;;  %v399_v31 = vld [vmem:[%s7687_s20 + $0x90] sm:$0xff]  ;;  %v464_v40 = vld [vmem:[%s7687_s20 + $0x298] sm:$0xff]  ;;  %v402_v46 = vld [vmem:[%s7687_s20 + $0xa8] sm:$0xff] }
  0x26   : > { %v7786_v59 = vpack.c.bf16 %v778_v44, %v777_v43  ;;  %v5744_v1 = vunpack.c.l.bf16 %v6229_v50  ;;  %v5745_v2 = vunpack.c.h.bf16 %v6229_v50  ;;  %v5872_v8 = vunpack.c.l.bf16 %v6261_v54  ;;  %v463_v39 = vld [vmem:[%s7687_s20 + $0x290] sm:$0xff] }
  0x27   : > { %v7791_v3 = vpack.c.bf16 %v842_v53, %v841_v52  ;;  %v5873_v9 = vunpack.c.h.bf16 %v6261_v54  ;;  %v779_v12 = vadd.f32 %v5740_v56, %v395_v60  ;;  %v780_v13 = vadd.f32 %v5741_v57, %v396_v62  ;;  %v465_v53 = vld [vmem:[%s7687_s20 + $0x2a0] sm:$0xff]  ;;  %v466_v54 = vld [vmem:[%s7687_s20 + $0x2a8] sm:$0xff]  ;;  %v6232_v62 = vld [vmem:[%s7694_s23 + $0x58] sm:$0xff]  }
  0x28   : > { %v843_v15 = vadd.f32 %v5868_v58, %v459_v63  ;;  %v844_v17 = vadd.f32 %v5869_v0, %v460_v4  ;;  %v781_v18 = vadd.f32 %v5744_v1, %v397_v5  ;;  %v782_v19 = vadd.f32 %v5745_v2, %v398_v6  ;;  %v6264_v63 = vld [vmem:[%s7694_s23 + $0x158] sm:$0xff]   ;;  %v6233_v2 = vld [vmem:[%s7694_s23 + $0x60] sm:$0xff]  }
  0x29   : > { %v845_v22 = vadd.f32 %v5872_v8, %v461_v10  ;;  %v846_v23 = vadd.f32 %v5873_v9, %v462_v11  ;;  %v5748_v26 = vunpack.c.l.bf16 %v6230_v16  ;;  %v5749_v27 = vunpack.c.h.bf16 %v6230_v16  ;;  %v6265_v5 = vld [vmem:[%s7694_s23 + $0x160] sm:$0xff]  }
  0x2a   : > { %6559 = vmatmul.mubr.msk.bf16.gmra.mxu0 %vm980_vm0, %v7781_v51  ;;  %v7810_v30 = vpack.c.bf16 %v780_v13, %v779_v12  ;;  %v5876_v33 = vunpack.c.l.bf16 %v6262_v21  ;;  %v5877_v35 = vunpack.c.h.bf16 %v6262_v21  ;;  %v7814_v36 = vpack.c.bf16 %v844_v17, %v843_v15  ;;  %v403_v12 = vld [vmem:[%s7687_s20 + $0xb0] sm:$0xff]  ;;  %v404_v13 = vld [vmem:[%s7687_s20 + $0xb8] sm:$0xff] }
  0x2b   : > { %6562 = vmatprep.mubr.msk.bf16.mxu0 %vm980_vm0, %v7786_v59  ;;  %v7816_v38 = vpack.c.bf16 %v782_v19, %v781_v18  ;;  %v5752_v42 = vunpack.c.l.bf16 %v6231_v24  ;;  %v5753_v43 = vunpack.c.h.bf16 %v6231_v24  ;;  %v7820_v44 = vpack.c.bf16 %v846_v23, %v845_v22  ;;  %v467_v15 = vld [vmem:[%s7687_s20 + $0x2b0] sm:$0xff]  ;;  %v468_v21 = vld [vmem:[%s7687_s20 + $0x2b8] sm:$0xff]  ;;  %v405_v22 = vld [vmem:[%s7687_s20 + $0xc0] sm:$0xff] }
  0x2c   : > { %6623 = vmatmul.mubr.msk.bf16.gmra.mxu1 %vm980_vm0, %v7784_v55  ;;  %v5880_v47 = vunpack.c.l.bf16 %v6263_v29  ;;  %v5881_v49 = vunpack.c.h.bf16 %v6263_v29  ;;  %v783_v50 = vadd.f32 %v5748_v26, %v399_v31  ;;  %v784_v52 = vadd.f32 %v5749_v27, %v400_v32  ;;  %v406_v23 = vld [vmem:[%s7687_s20 + $0xc8] sm:$0xff]  ;;  %v469_v27 = vld [vmem:[%s7687_s20 + $0x2c0] sm:$0xff] }
  0x2d   : > { %6626 = vmatprep.mubr.msk.bf16.mxu1 %vm980_vm0, %v7791_v3  ;;  %v847_v56 = vadd.f32 %v5876_v33, %v463_v39  ;;  %v848_v57 = vadd.f32 %v5877_v35, %v464_v40  ;;  %v785_v58 = vadd.f32 %v5752_v42, %v401_v45  ;;  %v786_v60 = vadd.f32 %v5753_v43, %v402_v46  ;;  %v470_v29 = vld [vmem:[%s7687_s20 + $0x2c8] sm:$0xff] }
  0x2e   : > { %v849_v0 = vadd.f32 %v5880_v47, %v465_v53  ;;  %v850_v1 = vadd.f32 %v5881_v49, %v466_v54  ;;  %v7837_v4 = vpack.c.bf16 %v784_v52, %v783_v50  ;;  %v5756_v8 = vunpack.c.l.bf16 %v6232_v62  ;;  %v6234_v35 = vld [vmem:[%s7694_s23 + $0x68] sm:$0xff]   ;;  %v6235_v47 = vld [vmem:[%s7694_s23 + $0x70] sm:$0xff]  }
  0x2f   : > { %v7840_v6 = vpack.c.bf16 %v848_v57, %v847_v56  ;;  %v5757_v9 = vunpack.c.h.bf16 %v6232_v62  ;;  %v5884_v10 = vunpack.c.l.bf16 %v6264_v63  ;;  %v7842_v11 = vpack.c.bf16 %v786_v60, %v785_v58  ;;  %v6266_v43 = vld [vmem:[%s7694_s23 + $0x168] sm:$0xff]   ;;  %v6267_v52 = vld [vmem:[%s7694_s23 + $0x170] sm:$0xff]   ;;  %v408_v56 = vld [vmem:[%s7687_s20 + $0xd8] sm:$0xff] }
  0x30   : > { %v5885_v16 = vunpack.c.h.bf16 %v6264_v63  ;;  %v5760_v17 = vunpack.c.l.bf16 %v6233_v2  ;;  %v5761_v18 = vunpack.c.h.bf16 %v6233_v2  ;;  %v7847_v19 = vpack.c.bf16 %v850_v1, %v849_v0  ;;  %v407_v54 = vld [vmem:[%s7687_s20 + $0xd0] sm:$0xff]  ;;  %v472_v0 = vld [vmem:[%s7687_s20 + $0x2d8] sm:$0xff] }
  0x31   : > { %v5888_v24 = vunpack.c.l.bf16 %v6265_v5  ;;  %v5889_v26 = vunpack.c.h.bf16 %v6265_v5  ;;  %v787_v31 = vadd.f32 %v5756_v8, %v403_v12  ;;  %v788_v32 = vadd.f32 %v5757_v9, %v404_v13  ;;  %v471_v63 = vld [vmem:[%s7687_s20 + $0x2d0] sm:$0xff]  ;;  %v409_v8 = vld [vmem:[%s7687_s20 + $0xe0] sm:$0xff]  ;;  %v410_v9 = vld [vmem:[%s7687_s20 + $0xe8] sm:$0xff] }
  0x32   : > { %6563 = vmatmul.mubr.msk.bf16.gmra.mxu0 %vm980_vm0, %v7810_v30  ;;  %v851_v33 = vadd.f32 %v5884_v10, %v467_v15  ;;  %v852_v39 = vadd.f32 %v5885_v16, %v468_v21  ;;  %v789_v40 = vadd.f32 %v5760_v17, %v405_v22  ;;  %v790_v42 = vadd.f32 %v5761_v18, %v406_v23  ;;  %v473_v16 = vld [vmem:[%s7687_s20 + $0x2e0] sm:$0xff]  ;;  %v474_v17 = vld [vmem:[%s7687_s20 + $0x2e8] sm:$0xff] }
  0x33   : > { %6566 = vmatprep.mubr.msk.bf16.mxu0 %vm980_vm0, %v7816_v38  ;;  %v853_v45 = vadd.f32 %v5888_v24, %v469_v27  ;;  %v854_v46 = vadd.f32 %v5889_v26, %v470_v29  ;;  %v5764_v49 = vunpack.c.l.bf16 %v6234_v35  ;;  %v5765_v50 = vunpack.c.h.bf16 %v6234_v35  ;;  %v6236_v24 = vld [vmem:[%s7694_s23 + $0x78] sm:$0xff]  }
  0x34   : > { %6627 = vmatmul.mubr.msk.bf16.gmra.mxu1 %vm980_vm0, %v7814_v36  ;;  %v7866_v53 = vpack.c.bf16 %v788_v32, %v787_v31  ;;  %v5892_v57 = vunpack.c.l.bf16 %v6266_v43  ;;  %v5893_v58 = vunpack.c.h.bf16 %v6266_v43  ;;  %v7870_v60 = vpack.c.bf16 %v852_v39, %v851_v33  ;;  %v6268_v26 = vld [vmem:[%s7694_s23 + $0x178] sm:$0xff]   ;;  %v6237_v31 = vld [vmem:[%s7694_s23 + $0x80] sm:$0xff]  }
  0x35   : > { %6630 = vmatprep.mubr.msk.bf16.mxu1 %vm980_vm0, %v7820_v44  ;;  %v7872_v62 = vpack.c.bf16 %v790_v42, %v789_v40  ;;  %v5768_v1 = vunpack.c.l.bf16 %v6235_v47  ;;  %v5769_v2 = vunpack.c.h.bf16 %v6235_v47  ;;  %v7876_v5 = vpack.c.bf16 %v854_v46, %v853_v45  ;;  %v6269_v33 = vld [vmem:[%s7694_s23 + $0x180] sm:$0xff]   ;;  %v411_v45 = vld [vmem:[%s7687_s20 + $0xf0] sm:$0xff]  ;;  %v412_v46 = vld [vmem:[%s7687_s20 + $0xf8] sm:$0xff] }
  0x36   : > { %v5896_v10 = vunpack.c.l.bf16 %v6267_v52  ;;  %v5897_v12 = vunpack.c.h.bf16 %v6267_v52  ;;  %v791_v13 = vadd.f32 %v5764_v49, %v407_v54  ;;  %v792_v15 = vadd.f32 %v5765_v50, %v408_v56  ;;  %v475_v47 = vld [vmem:[%s7687_s20 + $0x2f0] sm:$0xff]  ;;  %v476_v56 = vld [vmem:[%s7687_s20 + $0x2f8] sm:$0xff] }
  0x37   : > { %11700 = vst [vmem:[#allocation2_spill] sm:$0xff] %v7876_v5  ;;  %v855_v18 = vadd.f32 %v5892_v57, %v471_v63  ;;  %v856_v21 = vadd.f32 %v5893_v58, %v472_v0  ;;  %v793_v22 = vadd.f32 %v5768_v1, %v409_v8  ;;  %v794_v23 = vadd.f32 %v5769_v2, %v410_v9  ;;  %v413_v57 = vld [vmem:[%s7687_s20 + $0x100] sm:$0xff]  ;;  %v414_v58 = vld [vmem:[%s7687_s20 + $0x108] sm:$0xff] }
  0x38   : > { %v857_v27 = vadd.f32 %v5896_v10, %v473_v16  ;;  %v858_v29 = vadd.f32 %v5897_v12, %v474_v17  ;;  %v7893_v32 = vpack.c.bf16 %v792_v15, %v791_v13  ;;  %v5772_v39 = vunpack.c.l.bf16 %v6236_v24  ;;  %v477_v1 = vld [vmem:[%s7687_s20 + $0x300] sm:$0xff]  ;;  %v478_v2 = vld [vmem:[%s7687_s20 + $0x308] sm:$0xff] }
  0x39   : > { %v7896_v35 = vpack.c.bf16 %v856_v21, %v855_v18  ;;  %v5773_v40 = vunpack.c.h.bf16 %v6236_v24  ;;  %v5900_v42 = vunpack.c.l.bf16 %v6268_v26  ;;  %v7898_v43 = vpack.c.bf16 %v794_v23, %v793_v22  ;;  %v6238_v12 = vld [vmem:[%s7694_s23 + $0x88] sm:$0xff]   ;;  %v6239_v22 = vld [vmem:[%s7694_s23 + $0x90] sm:$0xff]  }
  0x3a   : > { %6567 = vmatmul.mubr.msk.bf16.gmra.mxu0 %vm980_vm0, %v7837_v4  ;;  %v5901_v49 = vunpack.c.h.bf16 %v6268_v26  ;;  %v5776_v50 = vunpack.c.l.bf16 %v6237_v31  ;;  %v5777_v52 = vunpack.c.h.bf16 %v6237_v31  ;;  %v7903_v54 = vpack.c.bf16 %v858_v29, %v857_v27  ;;  %v6270_v17 = vld [vmem:[%s7694_s23 + $0x188] sm:$0xff]   ;;  %v6271_v26 = vld [vmem:[%s7694_s23 + $0x190] sm:$0xff]   ;;  %v416_v31 = vld [vmem:[%s7687_s20 + $0x118] sm:$0xff] }
  0x3b   : > { %6570 = vmatprep.mubr.msk.bf16.mxu0 %vm980_vm0, %v7842_v11  ;;  %11701 = vst [vmem:[#allocation3_spill] sm:$0xff] %v7896_v35  ;;  %v5904_v63 = vunpack.c.l.bf16 %v6269_v33  ;;  %v5905_v0 = vunpack.c.h.bf16 %v6269_v33  ;;  %v795_v8 = vadd.f32 %v5772_v39, %v411_v45  ;;  %v796_v9 = vadd.f32 %v5773_v40, %v412_v46  ;;  %v415_v29 = vld [vmem:[%s7687_s20 + $0x110] sm:$0xff]  ;;  %v480_v46 = vld [vmem:[%s7687_s20 + $0x318] sm:$0xff] }
  0x3c   : > { %6631 = vmatmul.mubr.msk.bf16.gmra.mxu1 %vm980_vm0, %v7840_v6  ;;  %11702 = vst [vmem:[#allocation4_spill] sm:$0xff] %v7903_v54  ;;  %v859_v10 = vadd.f32 %v5900_v42, %v475_v47  ;;  %v860_v13 = vadd.f32 %v5901_v49, %v476_v56  ;;  %v797_v15 = vadd.f32 %v5776_v50, %v413_v57  ;;  %v5780_v23 = vunpack.c.l.bf16 %v6238_v12  ;;  %v479_v45 = vld [vmem:[%s7687_s20 + $0x310] sm:$0xff]  ;;  %v418_v56 = vld [vmem:[%s7687_s20 + $0x128] sm:$0xff] }
  0x3d   : > { %6634 = vmatprep.mubr.msk.bf16.mxu1 %vm980_vm0, %v7847_v19  ;;  %v798_v16 = vadd.f32 %v5777_v52, %v414_v58  ;;  %v861_v18 = vadd.f32 %v5904_v63, %v477_v1  ;;  %v862_v21 = vadd.f32 %v5905_v0, %v478_v2  ;;  %v5781_v24 = vunpack.c.h.bf16 %v6238_v12  ;;  %v417_v52 = vld [vmem:[%s7687_s20 + $0x120] sm:$0xff]  ;;  %v482_v2 = vld [vmem:[%s7687_s20 + $0x328] sm:$0xff] }
  0x3e   : > { %v7922_v27 = vpack.c.bf16 %v796_v9, %v795_v8  ;;  %v5908_v33 = vunpack.c.l.bf16 %v6270_v17  ;;  %v5909_v39 = vunpack.c.h.bf16 %v6270_v17  ;;  %v7926_v40 = vpack.c.bf16 %v860_v13, %v859_v10  ;;  %v481_v1 = vld [vmem:[%s7687_s20 + $0x320] sm:$0xff]  ;;  %v6240_v13 = vld [vmem:[%s7694_s23 + $0x98] sm:$0xff]  }
  0x3f   : > { %v7928_v42 = vpack.c.bf16 %v798_v16, %v797_v15  ;;  %v5784_v47 = vunpack.c.l.bf16 %v6239_v22  ;;  %v5785_v49 = vunpack.c.h.bf16 %v6239_v22  ;;  %v7932_v50 = vpack.c.bf16 %v862_v21, %v861_v18  ;;  %v6272_v15 = vld [vmem:[%s7694_s23 + $0x198] sm:$0xff]   ;;  %v6241_v18 = vld [vmem:[%s7694_s23 + $0xa0] sm:$0xff]  }
  0x40   : > { %11703 = vst [vmem:[#allocation5_spill] sm:$0xff] %v7926_v40  ;;  %v5912_v57 = vunpack.c.l.bf16 %v6271_v26  ;;  %v5913_v58 = vunpack.c.h.bf16 %v6271_v26  ;;  %v799_v63 = vadd.f32 %v5780_v23, %v415_v29  ;;  %v800_v0 = vadd.f32 %v5781_v24, %v416_v31  ;;  %v6273_v22 = vld [vmem:[%s7694_s23 + $0x1a0] sm:$0xff]  }
  0x41   : > { %11704 = vst [vmem:[#allocation6_spill] sm:$0xff] %v7932_v50  ;;  %v863_v8 = vadd.f32 %v5908_v33, %v479_v45  ;;  %v864_v9 = vadd.f32 %v5909_v39, %v480_v46  ;;  %v801_v10 = vadd.f32 %v5784_v47, %v417_v52  ;;  %v802_v12 = vadd.f32 %v5785_v49, %v418_v56  ;;  %v419_v33 = vld [vmem:[%s7687_s20 + $0x130] sm:$0xff]  ;;  %v420_v39 = vld [vmem:[%s7687_s20 + $0x138] sm:$0xff] }
  0x42   : > { %6571 = vmatmul.mubr.msk.bf16.gmra.mxu0 %vm980_vm0, %v7866_v53  ;;  %v865_v16 = vadd.f32 %v5912_v57, %v481_v1  ;;  %v866_v17 = vadd.f32 %v5913_v58, %v482_v2  ;;  %v7949_v21 = vpack.c.bf16 %v800_v0, %v799_v63  ;;  %v5788_v24 = vunpack.c.l.bf16 %v6240_v13  ;;  %v483_v45 = vld [vmem:[%s7687_s20 + $0x330] sm:$0xff]  ;;  %v484_v56 = vld [vmem:[%s7687_s20 + $0x338] sm:$0xff]  ;;  %v421_v57 = vld [vmem:[%s7687_s20 + $0x140] sm:$0xff] }
  0x43   : > { %6574 = vmatprep.mubr.msk.bf16.mxu0 %vm980_vm0, %v7872_v62  ;;  %v7952_v23 = vpack.c.bf16 %v864_v9, %v863_v8  ;;  %v5789_v26 = vunpack.c.h.bf16 %v6240_v13  ;;  %v5916_v29 = vunpack.c.l.bf16 %v6272_v15  ;;  %v7954_v31 = vpack.c.bf16 %v802_v12, %v801_v10  ;;  %v422_v58 = vld [vmem:[%s7687_s20 + $0x148] sm:$0xff]  ;;  %v485_v1 = vld [vmem:[%s7687_s20 + $0x340] sm:$0xff] }
  0x44   : > { %6635 = vmatmul.mubr.msk.bf16.gmra.mxu1 %vm980_vm0, %v7870_v60  ;;  %v5917_v46 = vunpack.c.h.bf16 %v6272_v15  ;;  %v5792_v47 = vunpack.c.l.bf16 %v6241_v18  ;;  %v5793_v49 = vunpack.c.h.bf16 %v6241_v18  ;;  %v7959_v52 = vpack.c.bf16 %v866_v17, %v865_v16  ;;  %v486_v2 = vld [vmem:[%s7687_s20 + $0x348] sm:$0xff] }
  0x45   : > { %6638 = vmatprep.mubr.msk.bf16.mxu1 %vm980_vm0, %v7876_v5  ;;  %11705 = vst [vmem:[#allocation7_spill] sm:$0xff] %v7952_v23  ;;  %v5920_v63 = vunpack.c.l.bf16 %v6273_v22  ;;  %v5921_v0 = vunpack.c.h.bf16 %v6273_v22  ;;  %v803_v8 = vadd.f32 %v5788_v24, %v419_v33  ;;  %v804_v9 = vadd.f32 %v5789_v26, %v420_v39  ;;  %v6242_v12 = vld [vmem:[%s7694_s23 + $0xa8] sm:$0xff]   ;;  %v6243_v24 = vld [vmem:[%s7694_s23 + $0xb0] sm:$0xff]  }
  0x46   : > { %11706 = vst [vmem:[#allocation8_spill] sm:$0xff] %v7959_v52  ;;  %v867_v10 = vadd.f32 %v5916_v29, %v483_v45  ;;  %v868_v13 = vadd.f32 %v5917_v46, %v484_v56  ;;  %v805_v15 = vadd.f32 %v5792_v47, %v421_v57  ;;  %v806_v16 = vadd.f32 %v5793_v49, %v422_v58  ;;  %v6274_v17 = vld [vmem:[%s7694_s23 + $0x1a8] sm:$0xff]   ;;  %v6275_v33 = vld [vmem:[%s7694_s23 + $0x1b0] sm:$0xff]   ;;  %v424_v46 = vld [vmem:[%s7687_s20 + $0x158] sm:$0xff] }
  0x47   : > { %v869_v18 = vadd.f32 %v5920_v63, %v485_v1  ;;  %v870_v22 = vadd.f32 %v5921_v0, %v486_v2  ;;  %v5796_v26 = vunpack.c.l.bf16 %v6242_v12  ;;  %v5797_v29 = vunpack.c.h.bf16 %v6242_v12  ;;  %v423_v45 = vld [vmem:[%s7687_s20 + $0x150] sm:$0xff]  ;;  %v488_v63 = vld [vmem:[%s7687_s20 + $0x358] sm:$0xff]  ;;  %v425_v12 = vld [vmem:[%s7687_s20 + $0x160] sm:$0xff] }
  0x48   : > { %v7978_v39 = vpack.c.bf16 %v804_v9, %v803_v8  ;;  %v5924_v47 = vunpack.c.l.bf16 %v6274_v17  ;;  %v5925_v49 = vunpack.c.h.bf16 %v6274_v17  ;;  %v7982_v56 = vpack.c.bf16 %v868_v13, %v867_v10  ;;  %v487_v58 = vld [vmem:[%s7687_s20 + $0x350] sm:$0xff]  ;;  %v426_v8 = vld [vmem:[%s7687_s20 + $0x168] sm:$0xff]  ;;  %v489_v17 = vld [vmem:[%s7687_s20 + $0x360] sm:$0xff] }
  0x49   : > { %v7984_v57 = vpack.c.bf16 %v806_v16, %v805_v15  ;;  %v5800_v0 = vunpack.c.l.bf16 %v6243_v24  ;;  %v5801_v1 = vunpack.c.h.bf16 %v6243_v24  ;;  %v7988_v2 = vpack.c.bf16 %v870_v22, %v869_v18  ;;  %v490_v10 = vld [vmem:[%s7687_s20 + $0x368] sm:$0xff]  ;;  %v6244_v22 = vld [vmem:[%s7694_s23 + $0xb8] sm:$0xff]  }
  0x4a   : > { %6575 = vmatmul.mubr.msk.bf16.gmra.mxu0 %vm980_vm0, %v7893_v32  ;;  %11707 = vst [vmem:[#allocation9_spill] sm:$0xff] %v7982_v56  ;;  %v5928_v9 = vunpack.c.l.bf16 %v6275_v33  ;;  %v871_v13 = vadd.f32 %v5924_v47, %v487_v58  ;;  %v872_v15 = vadd.f32 %v5925_v49, %v488_v63  ;;  %v6276_v24 = vld [vmem:[%s7694_s23 + $0x1b8] sm:$0xff]   ;;  %v5804_v49 = vunpack.c.l.bf16 %v6244_v22 }
  0x4b   : > { %6578 = vmatprep.mubr.msk.bf16.mxu0 %vm980_vm0, %v7898_v43  ;;  %11708 = vst [vmem:[#allocation10_spill] sm:$0xff] %v7988_v2  ;;  %v809_v16 = vadd.f32 %v5800_v0, %v425_v12  ;;  %v810_v18 = vadd.f32 %v5801_v1, %v426_v8  ;;  %v5805_v58 = vunpack.c.h.bf16 %v6244_v22  ;;  %v5932_v63 = vunpack.c.l.bf16 %v6276_v24  ;;  %v427_v1 = vld [vmem:[%s7687_s20 + $0x170] sm:$0xff]  ;;  %v428_v12 = vld [vmem:[%s7687_s20 + $0x178] sm:$0xff]  ;;  %v493_v22 = vld [vmem:[%s7687_s20 + $0x380] sm:$0xff] }
  0x4c   : > { %6639 = vmatmul.mubr.msk.bf16.gmra.mxu1 %vm980_vm0, %v7896_v35  ;;  %v8008_v47 = vpack.c.bf16 %v872_v15, %v871_v13  ;;  %v491_v8 = vld [vmem:[%s7687_s20 + $0x370] sm:$0xff]  ;;  %v430_v13 = vld [vmem:[%s7687_s20 + $0x188] sm:$0xff] }
  0x4d   : > { %6642 = vmatprep.mubr.msk.bf16.mxu1 %vm980_vm0, %v7903_v54  ;;  %v8010_v0 = vpack.c.bf16 %v810_v18, %v809_v16  ;;  %v811_v16 = vadd.f32 %v5804_v49, %v427_v1  ;;  %v812_v18 = vadd.f32 %v5805_v58, %v428_v12  ;;  %v431_v54 = vld [vmem:[%s7687_s20 + $0x190] sm:$0xff] }
  0x4e   : > { %11709 = vst [vmem:[#allocation11_spill] sm:$0xff] %v8008_v47 }
  0x52   : > { %6579 = vmatmul.mubr.msk.bf16.gmra.mxu0 %vm980_vm0, %v7922_v27 }
  0x53   : > { %6582 = vmatprep.mubr.msk.bf16.mxu0 %vm980_vm0, %v7928_v42 }
  0x54   : > { %6643 = vmatmul.mubr.msk.bf16.gmra.mxu1 %vm980_vm0, %v7926_v40  ;;  %v6278_v40 = vld [vmem:[%s7694_s23 + $0x1c8] sm:$0xff]  }
  0x55   : > { %6646 = vmatprep.mubr.msk.bf16.mxu1 %vm980_vm0, %v7932_v50  ;;  %v808_v50 = vadd.f32 %v5797_v29, %v424_v46  ;;  %v6277_v46 = vld [vmem:[%s7694_s23 + $0x1c0] sm:$0xff]  }
  0x56   : > { %v5936_v15 = vunpack.c.l.bf16 %v6277_v46 }
  0x58   : > { %v877_v49 = vadd.f32 %v5936_v15, %v493_v22 }
  0x5a   : > { %6583 = vmatmul.mubr.msk.bf16.gmra.mxu0 %vm980_vm0, %v7949_v21 }
  0x5b   : > { %6586 = vmatprep.mubr.msk.bf16.mxu0 %vm980_vm0, %v7954_v31 }
  0x5c   : > { %6647 = vmatmul.mubr.msk.bf16.gmra.mxu1 %vm980_vm0, %v7952_v23  ;;  %v807_v23 = vadd.f32 %v5796_v26, %v423_v45  ;;  %v873_v26 = vadd.f32 %v5928_v9, %v489_v17 }
  0x5d   : > { %6650 = vmatprep.mubr.msk.bf16.mxu1 %vm980_vm0, %v7959_v52  ;;  %v5929_v52 = vunpack.c.h.bf16 %v6275_v33  ;;  %v6245_v33 = vld [vmem:[%s7694_s23 + $0xc0] sm:$0xff]  }
  0x5e   : > { %v8005_v45 = vpack.c.bf16 %v808_v50, %v807_v23  ;;  %v5808_v9 = vunpack.c.l.bf16 %v6245_v33  ;;  %v5809_v17 = vunpack.c.h.bf16 %v6245_v33  ;;  %v492_v23 = vld [vmem:[%s7687_s20 + $0x378] sm:$0xff]  ;;  %v6246_v33 = vld [vmem:[%s7694_s23 + $0xc8] sm:$0xff]  }
  0x5f   : > { %v874_v29 = vadd.f32 %v5929_v52, %v490_v10  ;;  %v5933_v52 = vunpack.c.h.bf16 %v6276_v24  ;;  %v429_v10 = vld [vmem:[%s7687_s20 + $0x180] sm:$0xff]  ;;  %v875_v24 = vadd.f32 %v5932_v63, %v491_v8  ;;  %v6247_v63 = vld [vmem:[%s7694_s23 + $0xd0] sm:$0xff]   ;;  %v5812_v1 = vunpack.c.l.bf16 %v6246_v33 }
  0x60   : > { %v5813_v12 = vunpack.c.h.bf16 %v6246_v33  ;;  %v6279_v8 = vld [vmem:[%s7694_s23 + $0x1d0] sm:$0xff]   ;;  %v5817_v15 = vunpack.c.h.bf16 %v6247_v63  ;;  %v433_v33 = vld [vmem:[%s7687_s20 + $0x1a0] sm:$0xff] }
  0x61   : > { %v8015_v50 = vpack.c.bf16 %v874_v29, %v873_v26  ;;  %v876_v26 = vadd.f32 %v5933_v52, %v492_v23  ;;  %v813_v29 = vadd.f32 %v5808_v9, %v429_v10  ;;  %v432_v52 = vld [vmem:[%s7687_s20 + $0x198] sm:$0xff]  ;;  %v5940_v9 = vunpack.c.l.bf16 %v6278_v40 }
  0x62   : > { %6587 = vmatmul.mubr.msk.bf16.gmra.mxu0 %vm980_vm0, %v7978_v39  ;;  %v815_v35 = vadd.f32 %v5812_v1, %v431_v54  ;;  %v816_v5 = vadd.f32 %v5813_v12, %v432_v52  ;;  %v6249_v12 = vld [vmem:[%s7694_s23 + $0xe0] sm:$0xff]  }
  0x63   : > { %6590 = vmatprep.mubr.msk.bf16.mxu0 %vm980_vm0, %v7984_v57  ;;  %11710 = vst [vmem:[#allocation12_spill] sm:$0xff] %v8015_v50  ;;  %v8038_v23 = vpack.c.bf16 %v876_v26, %v875_v24  ;;  %v498_v24 = vld [vmem:[%s7687_s20 + $0x3a8] sm:$0xff] }
  0x64   : > { %6651 = vmatmul.mubr.msk.bf16.gmra.mxu1 %vm980_vm0, %v7982_v56  ;;  %v494_v56 = vld [vmem:[%s7687_s20 + $0x388] sm:$0xff] }
  0x65   : > { %6654 = vmatprep.mubr.msk.bf16.mxu1 %vm980_vm0, %v7988_v2  ;;  %v5937_v2 = vunpack.c.h.bf16 %v6277_v46  ;;  %v814_v46 = vadd.f32 %v5809_v17, %v430_v13  ;;  %v5941_v17 = vunpack.c.h.bf16 %v6278_v40  ;;  %v495_v13 = vld [vmem:[%s7687_s20 + $0x390] sm:$0xff]  ;;  %v497_v40 = vld [vmem:[%s7687_s20 + $0x3a0] sm:$0xff] }
  0x66   : > { %v879_v26 = vadd.f32 %v5940_v9, %v495_v13 }
  0x67   : > { %v878_v58 = vadd.f32 %v5937_v2, %v494_v56  ;;  %v8040_v10 = vpack.c.bf16 %v814_v46, %v813_v29  ;;  %v496_v56 = vld [vmem:[%s7687_s20 + $0x398] sm:$0xff]  ;;  %v5816_v2 = vunpack.c.l.bf16 %v6247_v63 }
  0x68   : > { %v880_v29 = vadd.f32 %v5941_v17, %v496_v56 }
  0x69   : > { %v8044_v22 = vpack.c.bf16 %v878_v58, %v877_v49  ;;  %v817_v46 = vadd.f32 %v5816_v2, %v433_v33  ;;  %v6248_v49 = vld [vmem:[%s7694_s23 + $0xd8] sm:$0xff]   ;;  %v435_v2 = vld [vmem:[%s7687_s20 + $0x1b0] sm:$0xff] }
  0x6a   : > { %6591 = vmatmul.mubr.msk.bf16.gmra.mxu0 %vm980_vm0, %v8005_v45  ;;  %v6280_v58 = vld [vmem:[%s7694_s23 + $0x1d8] sm:$0xff]   ;;  %v8063_v52 = vpack.c.bf16 %v880_v29, %v879_v26  ;;  %v5820_v9 = vunpack.c.l.bf16 %v6248_v49  ;;  %v5821_v17 = vunpack.c.h.bf16 %v6248_v49  ;;  %v499_v33 = vld [vmem:[%s7687_s20 + $0x3b0] sm:$0xff] }
  0x6b   : > { %6594 = vmatprep.mubr.msk.bf16.mxu0 %vm980_vm0, %v8010_v0  ;;  %v5948_v13 = vunpack.c.l.bf16 %v6280_v58 }
  0x6c   : > { %6655 = vmatmul.mubr.msk.bf16.gmra.mxu1 %vm980_vm0, %v8008_v47  ;;  %v8034_v47 = vpack.c.bf16 %v812_v18, %v811_v16  ;;  %v434_v16 = vld [vmem:[%s7687_s20 + $0x1a8] sm:$0xff]  ;;  %v5944_v18 = vunpack.c.l.bf16 %v6279_v8  ;;  %v819_v26 = vadd.f32 %v5820_v9, %v435_v2 }
  0x6d   : > { %6658 = vmatprep.mubr.msk.bf16.mxu1 %vm980_vm0, %v8015_v50  ;;  %v5945_v50 = vunpack.c.h.bf16 %v6279_v8  ;;  %v818_v54 = vadd.f32 %v5817_v15, %v434_v16  ;;  %v8061_v8 = vpack.c.bf16 %v816_v5, %v815_v35  ;;  %v436_v15 = vld [vmem:[%s7687_s20 + $0x1b8] sm:$0xff]  ;;  %v5949_v16 = vunpack.c.h.bf16 %v6280_v58  ;;  %v437_v5 = vld [vmem:[%s7687_s20 + $0x1c0] sm:$0xff]  ;;  %v438_v35 = vld [vmem:[%s7687_s20 + $0x1c8] sm:$0xff] }
  0x6e   : > { %v881_v63 = vadd.f32 %v5944_v18, %v497_v40  ;;  %v5824_v18 = vunpack.c.l.bf16 %v6249_v12  ;;  %v5825_v40 = vunpack.c.h.bf16 %v6249_v12  ;;  %v820_v29 = vadd.f32 %v5821_v17, %v436_v15  ;;  %v439_v15 = vld [vmem:[%s7687_s20 + $0x1d0] sm:$0xff] }
  0x6f   : > { %v882_v1 = vadd.f32 %v5945_v50, %v498_v24  ;;  %v8065_v56 = vpack.c.bf16 %v818_v54, %v817_v46  ;;  %v500_v24 = vld [vmem:[%s7687_s20 + $0x3b8] sm:$0xff]  ;;  %v883_v46 = vadd.f32 %v5948_v13, %v499_v33 }
  0x70   : > { %v884_v54 = vadd.f32 %v5949_v16, %v500_v24  ;;  %v821_v49 = vadd.f32 %v5824_v18, %v437_v5  ;;  %v822_v58 = vadd.f32 %v5825_v40, %v438_v35  ;;  %v8085_v12 = vpack.c.bf16 %v820_v29, %v819_v26  ;;  %v440_v33 = vld [vmem:[%s7687_s20 + $0x1d8] sm:$0xff]  ;;  %v441_v40 = vld [vmem:[%s7687_s20 + $0x1e0] sm:$0xff]  ;;  %v442_v24 = vld [vmem:[%s7687_s20 + $0x1e8] sm:$0xff] }
  0x71   : > { %v8070_v50 = vpack.c.bf16 %v882_v1, %v881_v63  ;;  %v6250_v63 = vld [vmem:[%s7694_s23 + $0xe8] sm:$0xff]   ;;  %v6251_v1 = vld [vmem:[%s7694_s23 + $0xf0] sm:$0xff]  }
  0x72   : > { %6595 = vmatmul.mubr.msk.bf16.gmra.mxu0 %vm980_vm0, %v8034_v47  ;;  %v5828_v9 = vunpack.c.l.bf16 %v6250_v63  ;;  %v5829_v17 = vunpack.c.h.bf16 %v6250_v63  ;;  %v8087_v13 = vpack.c.bf16 %v884_v54, %v883_v46  ;;  %v8089_v2 = vpack.c.bf16 %v822_v58, %v821_v49  ;;  %v6252_v46 = vld [vmem:[%s7694_s23 + $0xf8] sm:$0xff]  }
  0x73   : > { %6598 = vmatprep.mubr.msk.bf16.mxu0 %vm980_vm0, %v8040_v10  ;;  %11711 = vst [vmem:[#allocation13_spill] sm:$0xff] %v8070_v50  ;;  %v5832_v16 = vunpack.c.l.bf16 %v6251_v1  ;;  %v5833_v18 = vunpack.c.h.bf16 %v6251_v1  ;;  %v5836_v49 = vunpack.c.l.bf16 %v6252_v46  ;;  %v5837_v58 = vunpack.c.h.bf16 %v6252_v46  ;;  %v443_v1 = vld [vmem:[%s7687_s20 + $0x1f0] sm:$0xff] }
  0x74   : > { %6659 = vmatmul.mubr.msk.bf16.gmra.mxu1 %vm980_vm0, %v8038_v23  ;;  %11712 = vst [vmem:[#allocation14_spill] sm:$0xff] %v8087_v13  ;;  %v823_v5 = vadd.f32 %v5828_v9, %v439_v15  ;;  %v824_v35 = vadd.f32 %v5829_v17, %v440_v33  ;;  %v444_v9 = vld [vmem:[%s7687_s20 + $0x1f8] sm:$0xff]  ;;  %v6281_v33 = vld [vmem:[%s7694_s23 + $0x1e0] sm:$0xff]  }
  0x75   : > { %6662 = vmatprep.mubr.msk.bf16.mxu1 %vm980_vm0, %v8044_v22  ;;  %v825_v26 = vadd.f32 %v5832_v16, %v441_v40  ;;  %v826_v29 = vadd.f32 %v5833_v18, %v442_v24  ;;  %v827_v17 = vadd.f32 %v5836_v49, %v443_v1  ;;  %v828_v15 = vadd.f32 %v5837_v58, %v444_v9  ;;  %v6282_v40 = vld [vmem:[%s7694_s23 + $0x1e8] sm:$0xff]   ;;  %v503_v58 = vld [vmem:[%s7687_s20 + $0x3d0] sm:$0xff]  ;;  %v504_v1 = vld [vmem:[%s7687_s20 + $0x3d8] sm:$0xff] }
  0x76   : > { %v8102_v54 = vpack.c.bf16 %v824_v35, %v823_v5  ;;  %v5952_v16 = vunpack.c.l.bf16 %v6281_v33  ;;  %v5953_v18 = vunpack.c.h.bf16 %v6281_v33  ;;  %v501_v5 = vld [vmem:[%s7687_s20 + $0x3c0] sm:$0xff]  ;;  %v502_v35 = vld [vmem:[%s7687_s20 + $0x3c8] sm:$0xff] }
  0x77   : > { %v8104_v63 = vpack.c.bf16 %v826_v29, %v825_v26  ;;  %v8114_v24 = vpack.c.bf16 %v828_v15, %v827_v17  ;;  %v5956_v26 = vunpack.c.l.bf16 %v6282_v40  ;;  %v5957_v29 = vunpack.c.h.bf16 %v6282_v40  ;;  %v6283_v15 = vld [vmem:[%s7694_s23 + $0x1f0] sm:$0xff]   ;;  %v505_v40 = vld [vmem:[%s7687_s20 + $0x3e0] sm:$0xff] }
  0x78   : > { %v885_v46 = vadd.f32 %v5952_v16, %v501_v5  ;;  %v886_v49 = vadd.f32 %v5953_v18, %v502_v35  ;;  %v5960_v33 = vunpack.c.l.bf16 %v6283_v15  ;;  %v5961_v16 = vunpack.c.h.bf16 %v6283_v15  ;;  %v6284_v18 = vld [vmem:[%s7694_s23 + $0x1f8] sm:$0xff]   ;;  %v506_v5 = vld [vmem:[%s7687_s20 + $0x3e8] sm:$0xff]  ;;  %v6957_v15 = vld [vmem:[%s11479_s5] sm:$0xff]  }
  0x79   : > { %v887_v9 = vadd.f32 %v5956_v26, %v503_v58  ;;  %v5964_v35 = vunpack.c.l.bf16 %v6284_v18  ;;  %v5965_v26 = vunpack.c.h.bf16 %v6284_v18  ;;  %v508_v58 = vld [vmem:[%s7687_s20 + $0x3f8] sm:$0xff] }
  0x7a   : > { %6599 = vmatmul.mubr.msk.bf16.gmra.mxu0 %vm980_vm0, %v8061_v8 }
  0x7b   : > { %6602 = vmatprep.mubr.msk.bf16.mxu0 %vm980_vm0, %v8065_v56 }
  0x7c   : > { %6663 = vmatmul.mubr.msk.bf16.gmra.mxu1 %vm980_vm0, %v8063_v52 }
  0x7d   : > { %6666 = vmatprep.mubr.msk.bf16.mxu1 %vm980_vm0, %v8070_v50  ;;  %v8120_v50 = vpack.c.bf16 %v886_v49, %v885_v46  ;;  %v890_v46 = vadd.f32 %v5961_v16, %v506_v5  ;;  %v507_v49 = vld [vmem:[%s7687_s20 + $0x3f0] sm:$0xff] }
  0x7f   : > { %11713 = vst [vmem:[#allocation15_spill] sm:$0xff] %v8120_v50 }
  0x82   : > { %6603 = vmatmul.mubr.msk.bf16.gmra.mxu0 %vm980_vm0, %v8085_v12 }
  0x83   : > { %6606 = vmatprep.mubr.msk.bf16.mxu0 %vm980_vm0, %v8089_v2 }
  0x84   : > { %6667 = vmatmul.mubr.msk.bf16.gmra.mxu1 %vm980_vm0, %v8087_v13  ;;  %v888_v13 = vadd.f32 %v5957_v29, %v504_v1  ;;  %v889_v29 = vadd.f32 %v5960_v33, %v505_v40  ;;  %v892_v1 = vadd.f32 %v5965_v26, %v508_v58 }
  0x85   : > { %6670 = vmatprep.mubr.msk.bf16.mxu1 %vm980_vm0, %v8120_v50 }
  0x86   : > { %v8124_v17 = vpack.c.bf16 %v888_v13, %v887_v9  ;;  %v891_v13 = vadd.f32 %v5964_v35, %v507_v49  ;;  %v8136_v9 = vpack.c.bf16 %v890_v46, %v889_v29 }
  0x88   : > { %11714 = vst [vmem:[#allocation16_spill] sm:$0xff] %v8124_v17  ;;  %v8141_v50 = vpack.c.bf16 %v892_v1, %v891_v13 }
  0x8a   : > { %6607 = vmatmul.mubr.msk.bf16.gmra.mxu0 %vm980_vm0, %v8102_v54 }
  0x8b   : > { %6610 = vmatprep.mubr.msk.bf16.mxu0 %vm980_vm0, %v8104_v63 }
  0x8c   : > { %6671 = vmatmul.mubr.msk.bf16.gmra.mxu1 %vm980_vm0, %v8124_v17  ;;  %v6956_v17 = vld [vmem:[%s11479_s5 + $0x8] sm:$0xff]  }
  0x8d   : > { %6674 = vmatprep.mubr.msk.bf16.mxu1 %vm980_vm0, %v8136_v9  ;;  %6678 = vmatprep.subr.bf16.mxu1 %v6956_v17 }
  0x8e   : > { %6679 = vmatpush3.bf16.msra.mxu1 %v6956_v17 }
  0x8f   : > { %6680 = vmatprep.subr.bf16.mxu1 %v6957_v15 }
  0x92   : > { %6611 = vmatmul.mubr.msk.bf16.gmra.mxu0 %vm980_vm0, %v8114_v24  ;;  %6681 = vmatpush3.bf16.msra.mxu1 %v6957_v15 }
  0x94   : > { %6675 = vmatmul.mubr.msk.bf16.gmra.mxu1 %vm980_vm0, %v8141_v50 }
  0x95   : > { %6682 = vmatprep.mubr.msk.bf16.mxu1 %vm980_vm0, %v7710_v28  ;;  %v6285_v28 = vld [vmem:[%s8181_s10 + $0x8] sm:$0xff]  }
  0x96   : > { %v5973_v33 = vunpack.c.h.bf16 %v6285_v28 }
  0x9c   : > { %6683 = vmatmul.mubr.msk.bf16.vlgmr.msra.gmra.mxu1 %vm980_vm0, %v7721_v41  ;;  %v6317_v41 = vld [vmem:[%s8181_s10 + $0x108] sm:$0xff]  }
  0x9d   : > { %6686 = vmatprep.mubr.msk.bf16.mxu1 %vm980_vm0, %v7739_v61  ;;  %v8192_v61 = vld [vmem:[%s11478_s4] ss:$0 sm:$0xff]  ;;  %v6101_v26 = vunpack.c.h.bf16 %v6317_v41 }
  0xa4   : > { %6687 = vmatmul.mubr.msk.bf16.gmra.mxu1 %vm980_vm0, %v7751_v14  ;;  %v5972_v14 = vunpack.c.l.bf16 %v6285_v28 }
  0xa5   : > { %6690 = vmatprep.mubr.msk.bf16.mxu1 %vm980_vm0, %v7761_v25  ;;  %v5967_v25 = vld [vmem:[%s8181_s10] sm:$0xff]  }
  0xac   : > { %6691 = vmatmul.mubr.msk.bf16.gmra.mxu1 %vm980_vm0, %v7781_v51 }
  0xad   : > { %6694 = vmatprep.mubr.msk.bf16.mxu1 %vm980_vm0, %v7786_v59  ;;  %v6100_v59 = vunpack.c.l.bf16 %v6317_v41 }
  0xb4   : > { %6695 = vmatmul.mubr.msk.bf16.gmra.mxu1 %vm980_vm0, %v7810_v30 }
  0xb5   : > { %6698 = vmatprep.mubr.msk.bf16.mxu1 %vm980_vm0, %v7816_v38 }
  0xbc   : > { %6699 = vmatmul.mubr.msk.bf16.gmra.mxu1 %vm980_vm0, %v7837_v4 }
  0xbd   : > { %6702 = vmatprep.mubr.msk.bf16.mxu1 %vm980_vm0, %v7842_v11 }
  0xc4   : > { %6703 = vmatmul.mubr.msk.bf16.gmra.mxu1 %vm980_vm0, %v7866_v53  ;;  %v5968_v53 = vunpack.c.l.bf16 %v5967_v25 }
  0xc5   : > { %6706 = vmatprep.mubr.msk.bf16.mxu1 %vm980_vm0, %v7872_v62  ;;  %v6316_v62 = vld [vmem:[%s8181_s10 + $0x100] sm:$0xff]  }
  0xcc   : > { %6707 = vmatmul.mubr.msk.bf16.gmra.mxu1 %vm980_vm0, %v7893_v32 }
  0xcd   : > { %6710 = vmatprep.mubr.msk.bf16.mxu1 %vm980_vm0, %v7898_v43 }
  0xd4   : > { %6711 = vmatmul.mubr.msk.bf16.gmra.mxu1 %vm980_vm0, %v7922_v27  ;;  %v6096_v27 = vunpack.c.l.bf16 %v6316_v62 }
  0xd5   : > { %6714 = vmatprep.mubr.msk.bf16.mxu1 %vm980_vm0, %v7928_v42 }
  0xda   : > { %v6552_v51 = vpop.f32.mrf.mxu0 }
  0xdb   : > { %v1216_v30 = vadd.f32 %v6552_v51, %v8192_v61 }
  0xdc   : > { %v6616_v38 = vpop.f32.mrf.mxu1  ;;  %v1207_v11 = vpop.f32.mrf.mxu0  ;;  %6715 = vmatmul.mubr.msk.bf16.gmra.mxu1 %vm980_vm0, %v7949_v21 }
  0xdd   : > { %v1472_v4 = vadd.f32 %v6616_v38, %v8192_v61  ;;  %v1208_v32 = vadd.f32 %v8192_v61, %v1207_v11  ;;  %v8201_v17 = vmul.f32 %v5972_v14, %v1216_v30  ;;  %6718 = vmatprep.mubr.msk.bf16.mxu1 %vm980_vm0, %v7954_v31  ;;  %v6319_v31 = vld [vmem:[%s8181_s10 + $0x118] sm:$0xff]  }
  0xde   : > { %v1463_v43 = vpop.f32.mrf.mxu1  ;;  %v6553_v16 = vpop.f32.mrf.mxu0 }
  0xdf   : > { %v8205_v18 = vmul.f32 %v6100_v59, %v1472_v4  ;;  %v1219_v40 = vadd.f32 %v6553_v16, %v8192_v61  ;;  %v2676_v35 = vsel %vm980_vm0, %v8201_v17, -inf  ;;  %v1464_v29 = vadd.f32 %v8192_v61, %v1463_v43 }
  0xe0   : > { %v6617_v5 = vpop.f32.mrf.mxu1  ;;  %2677 = vmax.xlane.f32.xlu1 %v2676_v35  ;;  %v1210_v42 = vpop.f32.mrf.mxu0  ;;  %v8214_v58 = vmul.f32 %v5968_v53, %v1208_v32  ;;  %v6097_v59 = vunpack.c.h.bf16 %v6316_v62  ;;  %v5969_v53 = vunpack.c.h.bf16 %v5967_v25  ;;  %v6287_v32 = vld [vmem:[%s8181_s10 + $0x18] sm:$0xff]  }
  0xe1   : > { %v1475_v46 = vadd.f32 %v6617_v5, %v8192_v61  ;;  %v2868_v49 = vsel %vm980_vm0, %v8205_v18, -inf  ;;  %v8216_v1 = vmul.f32 %v5973_v33, %v1219_v40  ;;  %v1211_v30 = vadd.f32 %v8192_v61, %v1210_v42 }
  0xe2   : > { %2869 = vmax.xlane.f32.xlu0 %v2868_v49  ;;  %v1466_v13 = vpop.f32.mrf.mxu1  ;;  %v6556_v15 = vpop.f32.mrf.mxu0  ;;  %v2670_v4 = vsel %vm980_vm0, %v8214_v58, -inf  ;;  %v8226_v11 = vmul.f32 %v6096_v27, %v1464_v29  ;;  %v5981_v25 = vunpack.c.h.bf16 %v6287_v32  ;;  %v5980_v27 = vunpack.c.l.bf16 %v6287_v32  ;;  %v6286_v32 = vld [vmem:[%s8181_s10 + $0x10] sm:$0xff]  }
  0xe3   : > { %v1467_v28 = vadd.f32 %v8192_v61, %v1466_v13  ;;  %v2679_v14 = vsel %vm980_vm0, %v8216_v1, -inf  ;;  %v8221_v51 = vmul.f32 %v6101_v26, %v1475_v46  ;;  %v1232_v35 = vadd.f32 %v6556_v15, %v8192_v61 }
  0xe4   : > { %v6620_v41 = vpop.f32.mrf.mxu1  ;;  %2680 = vmax.xlane.f32.xlu1 %v2679_v14  ;;  %v1223_v38 = vpop.f32.mrf.mxu0  ;;  %v2862_v21 = vsel %vm980_vm0, %v8226_v11, -inf  ;;  %v8241_v26 = vmul.f32 %v5969_v53, %v1211_v30  ;;  %v6109_v15 = vunpack.c.h.bf16 %v6319_v31  ;;  %6719 = vmatmul.mubr.msk.bf16.gmra.mxu1 %vm980_vm0, %v7978_v39 }
  0xe5   : > { %v2871_v40 = vsel %vm980_vm0, %v8221_v51, -inf  ;;  %v8236_v5 = vmul.f32 %v6097_v59, %v1467_v28  ;;  %v1488_v28 = vadd.f32 %v6620_v41, %v8192_v61  ;;  %v8252_v30 = vmul.f32 %v5980_v27, %v1232_v35  ;;  %6722 = vmatprep.mubr.msk.bf16.mxu1 %vm980_vm0, %v7984_v57  ;;  %v6318_v27 = vld [vmem:[%s8181_s10 + $0x110] sm:$0xff]  }
  0xe6   : > { %2671 = vmax.xlane.f32.xlu0 %v2670_v4  ;;  %v1479_v43 = vpop.f32.mrf.mxu1  ;;  %v6557_v62 = vpop.f32.mrf.mxu0  ;;  %v2673_v59 = vsel %vm980_vm0, %v8241_v26, -inf  ;;  %v6108_v4 = vunpack.c.l.bf16 %v6319_v31  ;;  %v1224_v39 = vadd.f32 %v8192_v61, %v1223_v38  ;;  %v5976_v57 = vunpack.c.l.bf16 %v6286_v32 }
  0xe7   : > { %v1235_v33 = vadd.f32 %v6557_v62, %v8192_v61  ;;  %v2865_v49 = vsel %vm980_vm0, %v8236_v5, -inf  ;;  %v2688_v35 = vsel %vm980_vm0, %v8252_v30, -inf  ;;  %v6105_v38 = vunpack.c.h.bf16 %v6318_v27 }
  0xe8   : > { %v6621_v16 = vpop.f32.mrf.mxu1  ;;  %2872 = vmax.xlane.f32.xlu1 %v2871_v40  ;;  %v1226_v14 = vpop.f32.mrf.mxu0 }
  0xe9   : > { %v1491_v46 = vadd.f32 %v6621_v16, %v8192_v61  ;;  %v8247_v42 = vmul.f32 %v5981_v25, %v1235_v33  ;;  %v1227_v62 = vadd.f32 %v8192_v61, %v1226_v14  ;;  %v5977_v25 = vunpack.c.h.bf16 %v6286_v32 }
  0xea   : > { %2863 = vmax.xlane.f32.xlu0 %v2862_v21  ;;  %v1482_v29 = vpop.f32.mrf.mxu1  ;;  %v6560_v41 = vpop.f32.mrf.mxu0  ;;  %v8269_v21 = vmul.f32 %v6108_v4, %v1488_v28  ;;  %v8282_v4 = vmul.f32 %v5976_v57, %v1224_v39  ;;  %v6104_v32 = vunpack.c.l.bf16 %v6318_v27 }
  0xeb   : > { %v2691_v33 = vsel %vm980_vm0, %v8247_v42, -inf  ;;  %v8264_v16 = vmul.f32 %v6109_v15, %v1491_v46  ;;  %v1483_v14 = vadd.f32 %v8192_v61, %v1482_v29  ;;  %v8275_v15 = vmul.f32 %v5977_v25, %v1227_v62 }
  0xec   : > { %v6624_v13 = vpop.f32.mrf.mxu1  ;;  %2866 = vmax.xlane.f32.xlu1 %v2865_v49  ;;  %11716 = vst [vmem:[#allocation18_spill] sm:$0xff] %v8269_v21  ;;  %v1239_v49 = vpop.f32.mrf.mxu0  ;;  %v2880_v28 = vsel %vm980_vm0, %v8269_v21, -inf  ;;  %11718 = vst [vmem:[#allocation20_spill] sm:$0xff] %v8282_v4  ;;  %6723 = vmatmul.mubr.msk.bf16.gmra.mxu1 %vm980_vm0, %v8005_v45  ;;  %v2682_v45 = vsel %vm980_vm0, %v8282_v4, -inf  ;;  %v6321_v21 = vld [vmem:[%s8181_s10 + $0x128] sm:$0xff]  }
  0xed   : > { %11715 = vst [vmem:[#allocation17_spill] sm:$0xff] %v8264_v16  ;;  %v2883_v46 = vsel %vm980_vm0, %v8264_v16, -inf  ;;  %11717 = vst [vmem:[#allocation19_spill] sm:$0xff] %v8275_v15  ;;  %6726 = vmatprep.mubr.msk.bf16.mxu1 %vm980_vm0, %v8010_v0  ;;  %v2685_v25 = vsel %vm980_vm0, %v8275_v15, -inf  ;;  %v8294_v39 = vmul.f32 %v6105_v38, %v1483_v14  ;;  %v1504_v4 = vadd.f32 %v6624_v13, %v8192_v61  ;;  %v6288_v16 = vld [vmem:[%s8181_s10 + $0x20] sm:$0xff]  }
  0xee   : > { %2674 = vmax.xlane.f32.xlu0 %v2673_v59  ;;  %v8256_v53 = vpop.f32.mrf.mxu1  ;;  %v6561_v62 = vpop.f32.mrf.mxu0 }
  0xef   : > { %11719 = vst [vmem:[#allocation21_spill] sm:$0xff] %v8294_v39  ;;  %v2877_v38 = vsel %vm980_vm0, %v8294_v39, -inf }
  0xf0   : > { %v6625_v40 = vpop.f32.mrf.mxu1  ;;  %2692 = vmax.xlane.f32.xlu1 %v2691_v33  ;;  %v1480_v33 = vadd.f32 %v8192_v61, %v1479_v43  ;;  %v1251_v43 = vadd.f32 %v6561_v62, %v8192_v61 }
  0xf1   : > { %v1507_v14 = vadd.f32 %v6625_v40, %v8192_v61 }
  0xf2   : > { %2689 = vmax.xlane.f32.xlu0 %v2688_v35  ;;  %v1498_v31 = vpop.f32.mrf.mxu1  ;;  %v6289_v35 = vld [vmem:[%s8181_s10 + $0x28] sm:$0xff]  }
  0xf3   : > { %v5989_v57 = vunpack.c.h.bf16 %v6289_v35  ;;  %v5988_v0 = vunpack.c.l.bf16 %v6289_v35 }
  0xf4   : > { %v8277_v59 = vpop.f32.mrf.mxu1  ;;  %2884 = vmax.xlane.f32.xlu1 %v2883_v46  ;;  %v1248_v46 = vadd.f32 %v6560_v41, %v8192_v61  ;;  %v6117_v41 = vunpack.c.h.bf16 %v6321_v21  ;;  %6727 = vmatmul.mubr.msk.bf16.gmra.mxu1 %vm980_vm0, %v8034_v47 }
  0xf5   : > { %v8309_v15 = vmul.f32 %v5989_v57, %v1251_v43  ;;  %6730 = vmatprep.mubr.msk.bf16.mxu1 %vm980_vm0, %v8040_v10  ;;  %v5984_v10 = vunpack.c.l.bf16 %v6288_v16 }
  0xf6   : > { %2881 = vmax.xlane.f32.xlu0 %v2880_v28  ;;  %v8287_v29 = vpop.f32.mrf.mxu1  ;;  %v8301_v28 = vmul.f32 %v6104_v32, %v1480_v33  ;;  %v1242_v33 = vpop.f32.mrf.mxu0  ;;  %v8316_v35 = vmul.f32 %v5988_v0, %v1248_v46  ;;  %v8328_v46 = vmul.f32 %v6117_v41, %v1507_v14  ;;  %v1499_v14 = vadd.f32 %v8192_v61, %v1498_v31 }
  0xf7   : > { %11721 = vst [vmem:[#allocation23_spill] sm:$0xff] %v8309_v15  ;;  %v1243_v43 = vadd.f32 %v8192_v61, %v1242_v33  ;;  %v2703_v57 = vsel %vm980_vm0, %v8309_v15, -inf }
  0xf8   : > { %v8296_v27 = vpop.f32.mrf.mxu1  ;;  %2686 = vmax.xlane.f32.xlu1 %v2685_v25  ;;  %11720 = vst [vmem:[#allocation22_spill] sm:$0xff] %v8301_v28  ;;  %v2874_v32 = vsel %vm980_vm0, %v8301_v28, -inf  ;;  %11722 = vst [vmem:[#allocation24_spill] sm:$0xff] %v8316_v35  ;;  %v6564_v13 = vpop.f32.mrf.mxu0  ;;  %v2700_v47 = vsel %vm980_vm0, %v8316_v35, -inf  ;;  %v6320_v28 = vld [vmem:[%s8181_s10 + $0x120] sm:$0xff]   ;;  %v2895_v41 = vsel %vm980_vm0, %v8328_v46, -inf }
  0xf9   : > { %11723 = vst [vmem:[#allocation25_spill] sm:$0xff] %v8328_v46  ;;  %v6291_v35 = vld [vmem:[%s8181_s10 + $0x38] sm:$0xff]  }
  0xfa   : > { %2683 = vmax.xlane.f32.xlu0 %v2682_v45  ;;  %v8304_v62 = vpop.f32.mrf.mxu1  ;;  %v6116_v45 = vunpack.c.l.bf16 %v6321_v21  ;;  %v5985_v21 = vunpack.c.h.bf16 %v6288_v16  ;;  %v1255_v15 = vpop.f32.mrf.mxu0 }
  0xfc   : > { %v8311_v25 = vpop.f32.mrf.mxu1  ;;  %2878 = vmax.xlane.f32.xlu1 %v2877_v38  ;;  %v1240_v38 = vadd.f32 %v8192_v61, %v1239_v49  ;;  %v8343_v39 = vmul.f32 %v5985_v21, %v1243_v43  ;;  %v6113_v49 = vunpack.c.h.bf16 %v6320_v28  ;;  %6731 = vmatmul.mubr.msk.bf16.gmra.mxu1 %vm980_vm0, %v8061_v8  ;;  %v6565_v43 = vpop.f32.mrf.mxu0 }
  0xfd   : > { %6734 = vmatprep.mubr.msk.bf16.mxu1 %vm980_vm0, %v8065_v56  ;;  %v5996_v56 = vunpack.c.l.bf16 %v6291_v35 }
  0xfe   : > { %2875 = vmax.xlane.f32.xlu0 %v2874_v32  ;;  %v8321_v40 = vpop.f32.mrf.mxu1  ;;  %v8335_v32 = vmul.f32 %v6116_v45, %v1504_v4  ;;  %11725 = vst [vmem:[#allocation27_spill] sm:$0xff] %v8343_v39  ;;  %v1496_v4 = vadd.f32 %v8192_v61, %v8256_v53  ;;  %v8351_v45 = vmul.f32 %v5984_v10, %v1240_v38  ;;  %v2697_v21 = vsel %vm980_vm0, %v8343_v39, -inf }
  0xff   : > { %v1267_v53 = vadd.f32 %v6565_v43, %v8192_v61  ;;  %v8363_v38 = vmul.f32 %v6113_v49, %v1499_v14  ;;  %v1523_v14 = vadd.f32 %v8296_v27, %v8192_v61  ;;  %v6290_v27 = vld [vmem:[%s8181_s10 + $0x30] sm:$0xff]  }
 0x100   : > { %v8330_v0 = vpop.f32.mrf.mxu1  ;;  %2704 = vmax.xlane.f32.xlu1 %v2703_v57  ;;  %11724 = vst [vmem:[#allocation26_spill] sm:$0xff] %v8335_v32  ;;  %v2892_v16 = vsel %vm980_vm0, %v8335_v32, -inf  ;;  %11726 = vst [vmem:[#allocation28_spill] sm:$0xff] %v8351_v45  ;;  %v2694_v8 = vsel %vm980_vm0, %v8351_v45, -inf  ;;  %v6323_v32 = vld [vmem:[%s8181_s10 + $0x138] sm:$0xff]  }
 0x101   : > { %11727 = vst [vmem:[#allocation29_spill] sm:$0xff] %v8363_v38  ;;  %v2889_v49 = vsel %vm980_vm0, %v8363_v38, -inf  ;;  %v6124_v45 = vunpack.c.l.bf16 %v6323_v32  ;;  %v6322_v38 = vld [vmem:[%s8181_s10 + $0x130] sm:$0xff]  }
 0x102   : > { %2701 = vmax.xlane.f32.xlu0 %v2700_v47  ;;  %v8338_v33 = vpop.f32.mrf.mxu1  ;;  %v6112_v47 = vunpack.c.l.bf16 %v6320_v28  ;;  %v5997_v28 = vunpack.c.h.bf16 %v6291_v35 }
 0x104   : > { %v8345_v57 = vpop.f32.mrf.mxu1  ;;  %2896 = vmax.xlane.f32.xlu1 %v2895_v41  ;;  %v1264_v41 = vadd.f32 %v6564_v13, %v8192_v61  ;;  %v8379_v46 = vmul.f32 %v5997_v28, %v1267_v53  ;;  %v6125_v13 = vunpack.c.h.bf16 %v6323_v32  ;;  %6735 = vmatmul.mubr.msk.bf16.gmra.mxu1 %vm980_vm0, %v8085_v12  ;;  %v5993_v32 = vunpack.c.h.bf16 %v6290_v27 }
 0x105   : > { %6738 = vmatprep.mubr.msk.bf16.mxu1 %vm980_vm0, %v8089_v2  ;;  %v5992_v2 = vunpack.c.l.bf16 %v6290_v27 }
 0x106   : > { %2893 = vmax.xlane.f32.xlu0 %v2892_v16  ;;  %v8356_v31 = vpop.f32.mrf.mxu1  ;;  %v8370_v16 = vmul.f32 %v6112_v47, %v1496_v4  ;;  %11729 = vst [vmem:[#allocation31_spill] sm:$0xff] %v8379_v46  ;;  %v1520_v4 = vadd.f32 %v8277_v59, %v8192_v61  ;;  %v1258_v47 = vpop.f32.mrf.mxu0 }
 0x107   : > { %v1259_v28 = vadd.f32 %v8192_v61, %v1258_v47 }
 0x108   : > { %v8365_v10 = vpop.f32.mrf.mxu1  ;;  %2698 = vmax.xlane.f32.xlu1 %v2697_v21  ;;  %11728 = vst [vmem:[#allocation30_spill] sm:$0xff] %v8370_v16  ;;  %v2886_v35 = vsel %vm980_vm0, %v8370_v16, -inf  ;;  %v6568_v59 = vpop.f32.mrf.mxu0  ;;  %v1256_v16 = vadd.f32 %v8192_v61, %v1255_v15 }
 0x109   : > { %v8415_v15 = vmul.f32 %v5993_v32, %v1259_v28 }
 0x10a   : > { %2695 = vmax.xlane.f32.xlu0 %v2694_v8  ;;  %v8373_v43 = vpop.f32.mrf.mxu1  ;;  %v8387_v8 = vmul.f32 %v5996_v56, %v1264_v41  ;;  %v8399_v41 = vmul.f32 %v6125_v13, %v1523_v14  ;;  %v1515_v14 = vadd.f32 %v8192_v61, %v8304_v62  ;;  %v8423_v27 = vmul.f32 %v5992_v2, %v1256_v16 }
 0x10b   : > { %11733 = vst [vmem:[#allocation35_spill] sm:$0xff] %v8415_v15  ;;  %v2709_v32 = vsel %vm980_vm0, %v8415_v15, -inf }
 0x10c   : > { %v8381_v21 = vpop.f32.mrf.mxu1  ;;  %2890 = vmax.xlane.f32.xlu1 %v2889_v49  ;;  %11730 = vst [vmem:[#allocation32_spill] sm:$0xff] %v8387_v8  ;;  %v2715_v49 = vsel %vm980_vm0, %v8379_v46, -inf  ;;  %11731 = vst [vmem:[#allocation33_spill] sm:$0xff] %v8399_v41  ;;  %v2712_v12 = vsel %vm980_vm0, %v8387_v8, -inf  ;;  %v1271_v46 = vpop.f32.mrf.mxu0  ;;  %v2907_v13 = vsel %vm980_vm0, %v8399_v41, -inf  ;;  %v6293_v8 = vld [vmem:[%s8181_s10 + $0x48] sm:$0xff]   ;;  %6739 = vmatmul.mubr.msk.bf16.gmra.mxu1 %vm980_vm0, %v8102_v54 }
 0x10d   : > { %11734 = vst [vmem:[#allocation36_spill] sm:$0xff] %v8423_v27  ;;  %6742 = vmatprep.mubr.msk.bf16.mxu1 %vm980_vm0, %v8104_v63  ;;  %v2706_v54 = vsel %vm980_vm0, %v8423_v27, -inf  ;;  %v6004_v63 = vunpack.c.l.bf16 %v6293_v8 }
 0x10e   : > { %2887 = vmax.xlane.f32.xlu0 %v2886_v35  ;;  %v8392_v53 = vpop.f32.mrf.mxu1  ;;  %v8406_v35 = vmul.f32 %v6124_v45, %v1520_v4  ;;  %v1512_v45 = vadd.f32 %v8192_v61, %v8287_v29  ;;  %v6569_v28 = vpop.f32.mrf.mxu0 }
 0x10f   : > { %v1283_v29 = vadd.f32 %v6569_v28, %v8192_v61 }
 0x110   : > { %v8401_v56 = vpop.f32.mrf.mxu1  ;;  %2716 = vmax.xlane.f32.xlu1 %v2715_v49  ;;  %11732 = vst [vmem:[#allocation34_spill] sm:$0xff] %v8406_v35  ;;  %v6121_v49 = vunpack.c.h.bf16 %v6322_v38  ;;  %v2904_v4 = vsel %vm980_vm0, %v8406_v35, -inf  ;;  %v6325_v35 = vld [vmem:[%s8181_s10 + $0x148] sm:$0xff]  }
 0x111   : > { %v6132_v27 = vunpack.c.l.bf16 %v6325_v35 }
 0x112   : > { %2713 = vmax.xlane.f32.xlu0 %v2712_v12  ;;  %v8409_v47 = vpop.f32.mrf.mxu1  ;;  %v6120_v12 = vunpack.c.l.bf16 %v6322_v38  ;;  %v8435_v16 = vmul.f32 %v6121_v49, %v1515_v14  ;;  %v6005_v38 = vunpack.c.h.bf16 %v6293_v8  ;;  %v1539_v14 = vadd.f32 %v8330_v0, %v8192_v61  ;;  %v6292_v0 = vld [vmem:[%s8181_s10 + $0x40] sm:$0xff]  }
 0x114   : > { %v8417_v39 = vpop.f32.mrf.mxu1  ;;  %2908 = vmax.xlane.f32.xlu1 %v2907_v13  ;;  %11735 = vst [vmem:[#allocation37_spill] sm:$0xff] %v8435_v16  ;;  %v1280_v13 = vadd.f32 %v6568_v59, %v8192_v61  ;;  %v2901_v49 = vsel %vm980_vm0, %v8435_v16, -inf  ;;  %v8451_v41 = vmul.f32 %v6005_v38, %v1283_v29  ;;  %v6133_v59 = vunpack.c.h.bf16 %v6325_v35  ;;  %6743 = vmatmul.mubr.msk.bf16.gmra.mxu1 %vm980_vm0, %v8114_v24  ;;  %v6324_v16 = vld [vmem:[%s8181_s10 + $0x140] sm:$0xff]  }
 0x115   : > { %6746 = vmatprep.mubr.msk.bf16.mxu1 %vm980_vm0, %v7714_v34  ;;  %v6001_v35 = vunpack.c.h.bf16 %v6292_v0  ;;  %v6000_v34 = vunpack.c.l.bf16 %v6292_v0 }
 0x116   : > { %2905 = vmax.xlane.f32.xlu0 %v2904_v4  ;;  %v8428_v62 = vpop.f32.mrf.mxu1  ;;  %v8442_v4 = vmul.f32 %v6120_v12, %v1512_v45  ;;  %11737 = vst [vmem:[#allocation39_spill] sm:$0xff] %v8451_v41  ;;  %v1536_v45 = vadd.f32 %v8311_v25, %v8192_v61  ;;  %v1274_v12 = vpop.f32.mrf.mxu0 }
 0x117   : > { %v1275_v38 = vadd.f32 %v8192_v61, %v1274_v12 }
 0x118   : > { %v8437_v2 = vpop.f32.mrf.mxu1  ;;  %2710 = vmax.xlane.f32.xlu1 %v2709_v32  ;;  %11736 = vst [vmem:[#allocation38_spill] sm:$0xff] %v8442_v4  ;;  %v2898_v8 = vsel %vm980_vm0, %v8442_v4, -inf  ;;  %v6572_v25 = vpop.f32.mrf.mxu0  ;;  %v1272_v4 = vadd.f32 %v8192_v61, %v1271_v46 }
 0x119   : > { %v8487_v46 = vmul.f32 %v6001_v35, %v1275_v38 }
 0x11a   : > { %2707 = vmax.xlane.f32.xlu0 %v2706_v54  ;;  %v8445_v28 = vpop.f32.mrf.mxu1  ;;  %v8459_v54 = vmul.f32 %v6004_v63, %v1280_v13  ;;  %v8471_v13 = vmul.f32 %v6133_v59, %v1539_v14  ;;  %v1531_v14 = vadd.f32 %v8192_v61, %v8338_v33  ;;  %v8495_v0 = vmul.f32 %v6000_v34, %v1272_v4 }
 0x11b   : > { %11741 = vst [vmem:[#allocation43_spill] sm:$0xff] %v8487_v46  ;;  %v2721_v35 = vsel %vm980_vm0, %v8487_v46, -inf }
 0x11c   : > { %v8453_v32 = vpop.f32.mrf.mxu1  ;;  %2902 = vmax.xlane.f32.xlu1 %v2901_v49  ;;  %11738 = vst [vmem:[#allocation40_spill] sm:$0xff] %v8459_v54  ;;  %v2727_v49 = vsel %vm980_vm0, %v8451_v41, -inf  ;;  %11739 = vst [vmem:[#allocation41_spill] sm:$0xff] %v8471_v13  ;;  %v2724_v24 = vsel %vm980_vm0, %v8459_v54, -inf  ;;  %v1287_v41 = vpop.f32.mrf.mxu0  ;;  %v2919_v59 = vsel %vm980_vm0, %v8471_v13, -inf  ;;  %v6295_v54 = vld [vmem:[%s8181_s10 + $0x58] sm:$0xff]   ;;  %6747 = vmatmul.mubr.msk.bf16.gmra.mxu1 %vm980_vm0, %v7728_v48 }
 0x11d   : > { %11742 = vst [vmem:[#allocation44_spill] sm:$0xff] %v8495_v0  ;;  %6750 = vmatprep.mubr.msk.bf16.mxu1 %vm980_vm0, %v7746_v7  ;;  %v2718_v48 = vsel %vm980_vm0, %v8495_v0, -inf  ;;  %v6012_v7 = vunpack.c.l.bf16 %v6295_v54 }
 0x11e   : > { %2899 = vmax.xlane.f32.xlu0 %v2898_v8  ;;  %v8464_v29 = vpop.f32.mrf.mxu1  ;;  %v8478_v8 = vmul.f32 %v6132_v27, %v1536_v45  ;;  %v1528_v27 = vadd.f32 %v8192_v61, %v8321_v40  ;;  %v6573_v38 = vpop.f32.mrf.mxu0 }
 0x11f   : > { %v1299_v40 = vadd.f32 %v6573_v38, %v8192_v61 }
 0x120   : > { %v8473_v63 = vpop.f32.mrf.mxu1  ;;  %2728 = vmax.xlane.f32.xlu1 %v2727_v49  ;;  %11740 = vst [vmem:[#allocation42_spill] sm:$0xff] %v8478_v8  ;;  %v6129_v49 = vunpack.c.h.bf16 %v6324_v16  ;;  %v2916_v45 = vsel %vm980_vm0, %v8478_v8, -inf  ;;  %v6327_v8 = vld [vmem:[%s8181_s10 + $0x158] sm:$0xff]  }
 0x121   : > { %v6140_v0 = vunpack.c.l.bf16 %v6327_v8 }
 0x122   : > { %2725 = vmax.xlane.f32.xlu0 %v2724_v24  ;;  %v8481_v12 = vpop.f32.mrf.mxu1  ;;  %v6128_v24 = vunpack.c.l.bf16 %v6324_v16  ;;  %v8507_v4 = vmul.f32 %v6129_v49, %v1531_v14  ;;  %v6013_v16 = vunpack.c.h.bf16 %v6295_v54  ;;  %v1555_v14 = vadd.f32 %v8365_v10, %v8192_v61  ;;  %v6294_v10 = vld [vmem:[%s8181_s10 + $0x50] sm:$0xff]  }
 0x124   : > { %v8489_v15 = vpop.f32.mrf.mxu1  ;;  %2920 = vmax.xlane.f32.xlu1 %v2919_v59  ;;  %11743 = vst [vmem:[#allocation45_spill] sm:$0xff] %v8507_v4  ;;  %v1296_v59 = vadd.f32 %v6572_v25, %v8192_v61  ;;  %v2913_v49 = vsel %vm980_vm0, %v8507_v4, -inf  ;;  %v8523_v13 = vmul.f32 %v6013_v16, %v1299_v40  ;;  %v6141_v25 = vunpack.c.h.bf16 %v6327_v8  ;;  %6751 = vmatmul.mubr.msk.bf16.gmra.mxu1 %vm980_vm0, %v7757_v20  ;;  %v6326_v4 = vld [vmem:[%s8181_s10 + $0x150] sm:$0xff]  }
 0x125   : > { %6754 = vmatprep.mubr.msk.bf16.mxu1 %vm980_vm0, %v7768_v37  ;;  %v6009_v8 = vunpack.c.h.bf16 %v6294_v10  ;;  %v6008_v37 = vunpack.c.l.bf16 %v6294_v10 }
 0x126   : > { %2917 = vmax.xlane.f32.xlu0 %v2916_v45  ;;  %v8500_v33 = vpop.f32.mrf.mxu1  ;;  %v8514_v45 = vmul.f32 %v6128_v24, %v1528_v27  ;;  %11745 = vst [vmem:[#allocation47_spill] sm:$0xff] %v8523_v13  ;;  %v1552_v27 = vadd.f32 %v8345_v57, %v8192_v61  ;;  %v1290_v24 = vpop.f32.mrf.mxu0 }
 0x127   : > { %v1291_v16 = vadd.f32 %v8192_v61, %v1290_v24 }
 0x128   : > { %v8509_v34 = vpop.f32.mrf.mxu1  ;;  %2722 = vmax.xlane.f32.xlu1 %v2721_v35  ;;  %11744 = vst [vmem:[#allocation46_spill] sm:$0xff] %v8514_v45  ;;  %v2910_v54 = vsel %vm980_vm0, %v8514_v45, -inf  ;;  %v6576_v57 = vpop.f32.mrf.mxu0  ;;  %v1288_v45 = vadd.f32 %v8192_v61, %v1287_v41 }
 0x129   : > { %v8559_v41 = vmul.f32 %v6009_v8, %v1291_v16 }
 0x12a   : > { %2719 = vmax.xlane.f32.xlu0 %v2718_v48  ;;  %v8517_v38 = vpop.f32.mrf.mxu1  ;;  %v8531_v48 = vmul.f32 %v6012_v7, %v1296_v59  ;;  %v8543_v59 = vmul.f32 %v6141_v25, %v1555_v14  ;;  %v1547_v14 = vadd.f32 %v8192_v61, %v8373_v43  ;;  %v8567_v10 = vmul.f32 %v6008_v37, %v1288_v45 }
 0x12b   : > { %v2733_v8 = vsel %vm980_vm0, %v8559_v41, -inf }
 0x12c   : > { %v8525_v35 = vpop.f32.mrf.mxu1  ;;  %2914 = vmax.xlane.f32.xlu1 %v2913_v49  ;;  %11746 = vst [vmem:[#allocation48_spill] sm:$0xff] %v8531_v48  ;;  %v2739_v49 = vsel %vm980_vm0, %v8523_v13, -inf  ;;  %11747 = vst [vmem:[#allocation49_spill] sm:$0xff] %v8543_v59  ;;  %v2736_v20 = vsel %vm980_vm0, %v8531_v48, -inf  ;;  %v1303_v13 = vpop.f32.mrf.mxu0  ;;  %v2931_v25 = vsel %vm980_vm0, %v8543_v59, -inf  ;;  %v6297_v48 = vld [vmem:[%s8181_s10 + $0x68] sm:$0xff]   ;;  %6755 = vmatmul.mubr.msk.bf16.gmra.mxu1 %vm980_vm0, %v7784_v55 }
 0x12d   : > { %11749 = vst [vmem:[#allocation51_spill] sm:$0xff] %v8567_v10  ;;  %6758 = vmatprep.mubr.msk.bf16.mxu1 %vm980_vm0, %v7791_v3  ;;  %v2730_v55 = vsel %vm980_vm0, %v8567_v10, -inf  ;;  %v6020_v3 = vunpack.c.l.bf16 %v6297_v48 }
 0x12e   : > { %2911 = vmax.xlane.f32.xlu0 %v2910_v54  ;;  %v8536_v40 = vpop.f32.mrf.mxu1  ;;  %v8550_v54 = vmul.f32 %v6140_v0, %v1552_v27  ;;  %v1544_v0 = vadd.f32 %v8192_v61, %v8356_v31  ;;  %v6577_v16 = vpop.f32.mrf.mxu0 }
 0x12f   : > { %v1315_v31 = vadd.f32 %v6577_v16, %v8192_v61 }
 0x130   : > { %v8545_v7 = vpop.f32.mrf.mxu1  ;;  %2740 = vmax.xlane.f32.xlu1 %v2739_v49  ;;  %11748 = vst [vmem:[#allocation50_spill] sm:$0xff] %v8550_v54  ;;  %v6137_v49 = vunpack.c.h.bf16 %v6326_v4  ;;  %v2928_v27 = vsel %vm980_vm0, %v8550_v54, -inf  ;;  %v6329_v54 = vld [vmem:[%s8181_s10 + $0x168] sm:$0xff]  }
 0x131   : > { %v6148_v10 = vunpack.c.l.bf16 %v6329_v54 }
 0x132   : > { %2737 = vmax.xlane.f32.xlu0 %v2736_v20  ;;  %v8553_v24 = vpop.f32.mrf.mxu1  ;;  %v6136_v20 = vunpack.c.l.bf16 %v6326_v4  ;;  %v8579_v45 = vmul.f32 %v6137_v49, %v1547_v14  ;;  %v6021_v4 = vunpack.c.h.bf16 %v6297_v48  ;;  %v1571_v14 = vadd.f32 %v8401_v56, %v8192_v61  ;;  %v6296_v56 = vld [vmem:[%s8181_s10 + $0x60] sm:$0xff]  }
 0x134   : > { %v8561_v46 = vpop.f32.mrf.mxu1  ;;  %2932 = vmax.xlane.f32.xlu1 %v2931_v25  ;;  %11750 = vst [vmem:[#allocation52_spill] sm:$0xff] %v8579_v45  ;;  %v1312_v25 = vadd.f32 %v6576_v57, %v8192_v61  ;;  %v2925_v49 = vsel %vm980_vm0, %v8579_v45, -inf  ;;  %v8595_v59 = vmul.f32 %v6021_v4, %v1315_v31  ;;  %v6149_v57 = vunpack.c.h.bf16 %v6329_v54  ;;  %6759 = vmatmul.mubr.msk.bf16.gmra.mxu1 %vm980_vm0, %v7814_v36 }
 0x135   : > { %6762 = vmatprep.mubr.msk.bf16.mxu1 %vm980_vm0, %v7820_v44  ;;  %v6017_v54 = vunpack.c.h.bf16 %v6296_v56  ;;  %v6328_v44 = vld [vmem:[%s8181_s10 + $0x160] sm:$0xff]  }
 0x136   : > { %2929 = vmax.xlane.f32.xlu0 %v2928_v27  ;;  %v8572_v43 = vpop.f32.mrf.mxu1  ;;  %v8586_v27 = vmul.f32 %v6136_v20, %v1544_v0  ;;  %11752 = vst [vmem:[#allocation54_spill] sm:$0xff] %v8595_v59  ;;  %v1568_v0 = vadd.f32 %v8381_v21, %v8192_v61  ;;  %v1306_v20 = vpop.f32.mrf.mxu0 }
 0x137   : > { %v1307_v4 = vadd.f32 %v8192_v61, %v1306_v20 }
 0x138   : > { %v8581_v37 = vpop.f32.mrf.mxu1  ;;  %2734 = vmax.xlane.f32.xlu1 %v2733_v8  ;;  %11751 = vst [vmem:[#allocation53_spill] sm:$0xff] %v8586_v27  ;;  %v2922_v48 = vsel %vm980_vm0, %v8586_v27, -inf  ;;  %v6580_v21 = vpop.f32.mrf.mxu0  ;;  %v6016_v27 = vunpack.c.l.bf16 %v6296_v56  ;;  %v6144_v56 = vunpack.c.l.bf16 %v6328_v44 }
 0x13a   : > { %2731 = vmax.xlane.f32.xlu0 %v2730_v55  ;;  %v8589_v16 = vpop.f32.mrf.mxu1  ;;  %v8603_v55 = vmul.f32 %v6020_v3, %v1312_v25  ;;  %v8615_v25 = vmul.f32 %v6149_v57, %v1571_v14  ;;  %v1304_v3 = vadd.f32 %v8192_v61, %v1303_v13  ;;  %v1319_v20 = vpop.f32.mrf.mxu0  ;;  %v1563_v14 = vadd.f32 %v8192_v61, %v8409_v47 }
 0x13b   : > { %v8629_v13 = vmul.f32 %v6017_v54, %v1307_v4 }
 0x13c   : > { %v8597_v8 = vpop.f32.mrf.mxu1  ;;  %2926 = vmax.xlane.f32.xlu1 %v2925_v49  ;;  %11753 = vst [vmem:[#allocation55_spill] sm:$0xff] %v8603_v55  ;;  %v2751_v49 = vsel %vm980_vm0, %v8595_v59, -inf  ;;  %11754 = vst [vmem:[#allocation56_spill] sm:$0xff] %v8615_v25  ;;  %v2748_v36 = vsel %vm980_vm0, %v8603_v55, -inf  ;;  %v2943_v57 = vsel %vm980_vm0, %v8615_v25, -inf  ;;  %v1560_v55 = vadd.f32 %v8192_v61, %v8392_v53  ;;  %6763 = vmatmul.mubr.msk.bf16.gmra.mxu1 %vm980_vm0, %v7840_v6  ;;  %v6581_v47 = vpop.f32.mrf.mxu0 }
 0x13d   : > { %11756 = vst [vmem:[#allocation58_spill] sm:$0xff] %v8629_v13  ;;  %6766 = vmatprep.mubr.msk.bf16.mxu1 %vm980_vm0, %v7847_v19  ;;  %v1331_v4 = vadd.f32 %v6581_v47, %v8192_v61 }
 0x13e   : > { %2923 = vmax.xlane.f32.xlu0 %v2922_v48  ;;  %v8608_v31 = vpop.f32.mrf.mxu1  ;;  %v8620_v48 = vmul.f32 %v6148_v10, %v1568_v0  ;;  %v8635_v0 = vmul.f32 %v6016_v27, %v1304_v3  ;;  %v2745_v27 = vsel %vm980_vm0, %v8629_v13, -inf }
 0x140   : > { %2752 = vmax.xlane.f32.xlu1 %v2751_v49  ;;  %11755 = vst [vmem:[#allocation57_spill] sm:$0xff] %v8620_v48  ;;  %v8623_v45 = vpop.f32.mrf.mxu1  ;;  %v6145_v49 = vunpack.c.h.bf16 %v6328_v44  ;;  %v2940_v10 = vsel %vm980_vm0, %v8620_v48, -inf  ;;  %11757 = vst [vmem:[#allocation59_spill] sm:$0xff] %v8635_v0  ;;  %v1328_v44 = vadd.f32 %v6580_v21, %v8192_v61  ;;  %v2742_v6 = vsel %vm980_vm0, %v8635_v0, -inf  ;;  %v1322_v48 = vpop.f32.mrf.mxu0  ;;  %v6306_v0 = vld [vmem:[%s8181_s10 + $0xb0] sm:$0xff]  }
 0x142   : > { %2749 = vmax.xlane.f32.xlu0 %v2748_v36  ;;  %v6299_v36 = vld [vmem:[%s8181_s10 + $0x78] sm:$0xff]   ;;  %v8638_v59 = vpop.f32.mrf.mxu1  ;;  %v8649_v54 = vmul.f32 %v6145_v49, %v1563_v14  ;;  %v1587_v14 = vadd.f32 %v8437_v2, %v8192_v61  ;;  %v11763_v2 = vld [vmem:[#allocation2_spill] sm:$0xff] }
 0x143   : > { %v6029_v3 = vunpack.c.h.bf16 %v6299_v36  ;;  %v6028_v19 = vunpack.c.l.bf16 %v6299_v36  ;;  %v6584_v36 = vpop.f32.mrf.mxu0 }
 0x144   : > { %2944 = vmax.xlane.f32.xlu1 %v2943_v57  ;;  %v8644_v53 = vpop.f32.mrf.mxu1  ;;  %11759 = vst [vmem:[#allocation61_spill] sm:$0xff] %v8649_v54  ;;  %v8654_v57 = vmul.f32 %v6144_v56, %v1560_v55  ;;  %v2937_v49 = vsel %vm980_vm0, %v8649_v54, -inf  ;;  %v1584_v55 = vadd.f32 %v8417_v39, %v8192_v61  ;;  %6767 = vmatmul.mubr.msk.bf16.gmra.mxu1 %vm980_vm0, %v7870_v60 }
 0x145   : > { %11758 = vst [vmem:[#allocation60_spill] sm:$0xff] %v8644_v53  ;;  %v8663_v21 = vmul.f32 %v6029_v3, %v1331_v4  ;;  %v6298_v53 = vld [vmem:[%s8181_s10 + $0x70] sm:$0xff]   ;;  %6770 = vmatprep.mubr.msk.bf16.mxu1 %vm980_vm0, %v11763_v2  ;;  %v1323_v39 = vadd.f32 %v8192_v61, %v1322_v48  ;;  %v1576_v54 = vadd.f32 %v8192_v61, %v8428_v62 }
 0x146   : > { %2941 = vmax.xlane.f32.xlu0 %v2940_v10  ;;  %11760 = vst [vmem:[#allocation62_spill] sm:$0xff] %v8654_v57  ;;  %v6331_v10 = vld [vmem:[%s8181_s10 + $0x178] sm:$0xff]   ;;  %v8657_v47 = vpop.f32.mrf.mxu1  ;;  %v2934_v56 = vsel %vm980_vm0, %v8654_v57, -inf  ;;  %v6024_v2 = vunpack.c.l.bf16 %v6298_v53  ;;  %v6330_v57 = vld [vmem:[%s8181_s10 + $0x170] sm:$0xff]  }
 0x147   : > { %11761 = vst [vmem:[#allocation63_spill] sm:$0xff] %v8663_v21  ;;  %v6156_v25 = vunpack.c.l.bf16 %v6331_v10  ;;  %v2763_v3 = vsel %vm980_vm0, %v8663_v21, -inf }
 0x148   : > { %2746 = vmax.xlane.f32.xlu1 %v2745_v27  ;;  %v6157_v27 = vunpack.c.h.bf16 %v6331_v10  ;;  %v8676_v4 = vpop.f32.mrf.mxu1  ;;  %v1335_v10 = vpop.f32.mrf.mxu0 }
 0x149   : > { %11764 = vst [vmem:[#allocation2_spill] sm:$0xff] %v8676_v4 }
 0x14a   : > { %2743 = vmax.xlane.f32.xlu0 %v2742_v6  ;;  %v8669_v6 = vmul.f32 %v6028_v19, %v1328_v44  ;;  %v6025_v44 = vunpack.c.h.bf16 %v6298_v53  ;;  %v1320_v19 = vadd.f32 %v8192_v61, %v1319_v20  ;;  %v8689_v48 = vpop.f32.mrf.mxu1  ;;  %v6585_v4 = vpop.f32.mrf.mxu0 }
 0x14c   : > { %2938 = vmax.xlane.f32.xlu1 %v2937_v49  ;;  %11762 = vst [vmem:[#allocation64_spill] sm:$0xff] %v8669_v6  ;;  %v8681_v49 = vmul.f32 %v6157_v27, %v1587_v14  ;;  %v2760_v60 = vsel %vm980_vm0, %v8669_v6, -inf  ;;  %v1579_v14 = vadd.f32 %v8192_v61, %v8445_v28  ;;  %v8695_v20 = vmul.f32 %v6025_v44, %v1323_v39  ;;  %v8704_v28 = vpop.f32.mrf.mxu1  ;;  %v11770_v6 = vld [vmem:[#allocation3_spill] sm:$0xff]  ;;  %v11771_v39 = vld [vmem:[#allocation4_spill] sm:$0xff] }
 0x14d   : > { %v8701_v53 = vmul.f32 %v6024_v2, %v1320_v19  ;;  %11769 = vst [vmem:[#allocation69_spill] sm:$0xff] %v8704_v28  ;;  %6771 = vmatmul.mubr.msk.bf16.gmra.mxu1 %vm980_vm0, %v11770_v6  ;;  %v1347_v44 = vadd.f32 %v6585_v4, %v8192_v61 }
 0x14e   : > { %2935 = vmax.xlane.f32.xlu0 %v2934_v56  ;;  %11765 = vst [vmem:[#allocation65_spill] sm:$0xff] %v8681_v49  ;;  %v8686_v56 = vmul.f32 %v6156_v25, %v1584_v55  ;;  %v2955_v27 = vsel %vm980_vm0, %v8681_v49, -inf  ;;  %11767 = vst [vmem:[#allocation67_spill] sm:$0xff] %v8695_v20  ;;  %v6152_v55 = vunpack.c.l.bf16 %v6330_v57  ;;  %6774 = vmatprep.mubr.msk.bf16.mxu1 %vm980_vm0, %v11771_v39  ;;  %v8710_v62 = vpop.f32.mrf.mxu1  ;;  %v2757_v19 = vsel %vm980_vm0, %v8695_v20, -inf  ;;  %v6333_v49 = vld [vmem:[%s8181_s10 + $0x188] sm:$0xff]  }
 0x14f   : > { %11768 = vst [vmem:[#allocation68_spill] sm:$0xff] %v8701_v53  ;;  %11772 = vst [vmem:[#allocation3_spill] sm:$0xff] %v8710_v62  ;;  %v2754_v6 = vsel %vm980_vm0, %v8701_v53, -inf }
 0x150   : > { %2764 = vmax.xlane.f32.xlu1 %v2763_v3  ;;  %11766 = vst [vmem:[#allocation66_spill] sm:$0xff] %v8686_v56  ;;  %v6153_v3 = vunpack.c.h.bf16 %v6330_v57  ;;  %v2952_v25 = vsel %vm980_vm0, %v8686_v56, -inf  ;;  %v1338_v56 = vpop.f32.mrf.mxu0  ;;  %v8723_v28 = vpop.f32.mrf.mxu1 }
 0x151   : > { %11775 = vst [vmem:[#allocation71_spill] sm:$0xff] %v8723_v28  ;;  %v6300_v28 = vld [vmem:[%s8181_s10 + $0x80] sm:$0xff]  }
 0x152   : > { %2761 = vmax.xlane.f32.xlu0 %v2760_v60  ;;  %v6301_v60 = vld [vmem:[%s8181_s10 + $0x88] sm:$0xff]   ;;  %v8715_v2 = vmul.f32 %v6153_v3, %v1579_v14  ;;  %v6588_v4 = vpop.f32.mrf.mxu0  ;;  %v8725_v62 = vpop.f32.mrf.mxu1  ;;  %v1603_v14 = vadd.f32 %v8473_v63, %v8192_v61  ;;  %v11780_v63 = vld [vmem:[#allocation5_spill] sm:$0xff] }
 0x153   : > { %v6037_v57 = vunpack.c.h.bf16 %v6301_v60  ;;  %v6036_v39 = vunpack.c.l.bf16 %v6301_v60  ;;  %11776 = vst [vmem:[#allocation72_spill] sm:$0xff] %v8725_v62 }
 0x154   : > { %2956 = vmax.xlane.f32.xlu1 %v2955_v27  ;;  %11773 = vst [vmem:[#allocation4_spill] sm:$0xff] %v8715_v2  ;;  %v1344_v27 = vadd.f32 %v6584_v36, %v8192_v61  ;;  %v2949_v36 = vsel %vm980_vm0, %v8715_v2, -inf  ;;  %v8740_v62 = vpop.f32.mrf.mxu1  ;;  %v6332_v2 = vld [vmem:[%s8181_s10 + $0x180] sm:$0xff]  }
 0x155   : > { %v8731_v3 = vmul.f32 %v6037_v57, %v1347_v44  ;;  %11779 = vst [vmem:[#allocation75_spill] sm:$0xff] %v8740_v62  ;;  %6775 = vmatmul.mubr.msk.bf16.gmra.mxu1 %vm980_vm0, %v11780_v63  ;;  %v11781_v44 = vld [vmem:[#allocation6_spill] sm:$0xff]  ;;  %v8746_v57 = vpop.f32.mrf.mxu0 }
 0x156   : > { %2953 = vmax.xlane.f32.xlu0 %v2952_v25  ;;  %v8720_v25 = vmul.f32 %v6152_v55, %v1576_v54  ;;  %v1600_v54 = vadd.f32 %v8453_v32, %v8192_v61  ;;  %v8737_v60 = vmul.f32 %v6036_v39, %v1344_v27  ;;  %6778 = vmatprep.mubr.msk.bf16.mxu1 %vm980_vm0, %v11781_v44  ;;  %v8748_v32 = vpop.f32.mrf.mxu1  ;;  %v6033_v39 = vunpack.c.h.bf16 %v6300_v28 }
 0x157   : > { %11777 = vst [vmem:[#allocation73_spill] sm:$0xff] %v8731_v3  ;;  %11782 = vst [vmem:[#allocation5_spill] sm:$0xff] %v8748_v32  ;;  %v6032_v44 = vunpack.c.l.bf16 %v6300_v28 }
 0x158   : > { %2758 = vmax.xlane.f32.xlu1 %v2757_v19  ;;  %11774 = vst [vmem:[#allocation70_spill] sm:$0xff] %v8720_v25  ;;  %v6165_v19 = vunpack.c.h.bf16 %v6333_v49  ;;  %v2946_v55 = vsel %vm980_vm0, %v8720_v25, -inf  ;;  %11778 = vst [vmem:[#allocation74_spill] sm:$0xff] %v8737_v60  ;;  %v1336_v25 = vadd.f32 %v8192_v61, %v1335_v10  ;;  %v8761_v32 = vpop.f32.mrf.mxu1 }
 0x159   : > { %11785 = vst [vmem:[#allocation77_spill] sm:$0xff] %v8761_v32  ;;  %v6303_v32 = vld [vmem:[%s8181_s10 + $0x98] sm:$0xff]  }
 0x15a   : > { %2755 = vmax.xlane.f32.xlu0 %v2754_v6  ;;  %v6164_v6 = vunpack.c.l.bf16 %v6333_v49  ;;  %v2775_v49 = vsel %vm980_vm0, %v8731_v3, -inf  ;;  %v8753_v27 = vmul.f32 %v6165_v19, %v1603_v14  ;;  %v8763_v62 = vpop.f32.mrf.mxu1  ;;  %v8768_v14 = vld [vmem:[%s11478_s4] ss:$0 sm:$0xff]  ;;  %v6161_v19 = vunpack.c.h.bf16 %v6332_v2  ;;  %v6305_v3 = vld [vmem:[%s8181_s10 + $0xa8] sm:$0xff]  }
 0x15b   : > { %11786 = vst [vmem:[#allocation78_spill] sm:$0xff] %v8763_v62 }
 0x15c   : > { %2950 = vmax.xlane.f32.xlu1 %v2949_v36  ;;  %v1339_v36 = vadd.f32 %v8192_v61, %v1338_v56  ;;  %11783 = vst [vmem:[#allocation6_spill] sm:$0xff] %v8753_v27  ;;  %v8758_v63 = vmul.f32 %v6164_v6, %v1600_v54  ;;  %v6589_v56 = vpop.f32.mrf.mxu0  ;;  %v1595_v61 = vadd.f32 %v8768_v14, %v8481_v12  ;;  %v2967_v10 = vsel %vm980_vm0, %v8753_v27, -inf  ;;  %v8783_v62 = vpop.f32.mrf.mxu1  ;;  %v11790_v12 = vld [vmem:[#allocation7_spill] sm:$0xff] }
 0x15d   : > { %v1592_v54 = vadd.f32 %v8768_v14, %v8464_v29  ;;  %11789 = vst [vmem:[#allocation81_spill] sm:$0xff] %v8783_v62  ;;  %6779 = vmatmul.mubr.msk.bf16.gmra.mxu1 %vm980_vm0, %v11790_v12  ;;  %v6044_v27 = vunpack.c.l.bf16 %v6303_v32 }
 0x15e   : > { %2947 = vmax.xlane.f32.xlu0 %v2946_v55  ;;  %v2772_v55 = vsel %vm980_vm0, %v8737_v60, -inf  ;;  %11784 = vst [vmem:[#allocation76_spill] sm:$0xff] %v8758_v63  ;;  %v8774_v28 = vmul.f32 %v6033_v39, %v1339_v36  ;;  %v2964_v6 = vsel %vm980_vm0, %v8758_v63, -inf  ;;  %v11791_v36 = vld [vmem:[#allocation8_spill] sm:$0xff]  ;;  %v1354_v39 = vpop.f32.mrf.mxu0  ;;  %v8789_v29 = vpop.f32.mrf.mxu1  ;;  %v1360_v63 = vadd.f32 %v8768_v14, %v6588_v4  ;;  %v11799_v60 = vld [vmem:[#allocation9_spill] sm:$0xff] }
 0x15f   : > { %6782 = vmatprep.mubr.msk.bf16.mxu1 %vm980_vm0, %v11791_v36  ;;  %11792 = vst [vmem:[#allocation7_spill] sm:$0xff] %v8789_v29  ;;  %v6335_v29 = vld [vmem:[%s8181_s10 + $0x198] sm:$0xff]   ;;  %v1619_v4 = vadd.f32 %v8768_v14, %v8509_v34 }
 0x160   : > { %2776 = vmax.xlane.f32.xlu1 %v2775_v49  ;;  %11787 = vst [vmem:[#allocation79_spill] sm:$0xff] %v8774_v28  ;;  %v8780_v49 = vmul.f32 %v6032_v44, %v1336_v25  ;;  %v2769_v25 = vsel %vm980_vm0, %v8774_v28, -inf  ;;  %v6045_v44 = vunpack.c.h.bf16 %v6303_v32  ;;  %v6592_v36 = vpop.f32.mrf.mxu0  ;;  %v8802_v62 = vpop.f32.mrf.mxu1  ;;  %v1616_v32 = vadd.f32 %v8768_v14, %v8489_v15  ;;  %v6302_v28 = vld [vmem:[%s8181_s10 + $0x90] sm:$0xff]   ;;  %v11800_v15 = vld [vmem:[#allocation10_spill] sm:$0xff] }
 0x161   : > { %11795 = vst [vmem:[#allocation83_spill] sm:$0xff] %v8802_v62 }
 0x162   : > { %2773 = vmax.xlane.f32.xlu0 %v2772_v55  ;;  %11788 = vst [vmem:[#allocation80_spill] sm:$0xff] %v8780_v49  ;;  %v6160_v55 = vunpack.c.l.bf16 %v6332_v2  ;;  %v8794_v2 = vmul.f32 %v6161_v19, %v1595_v61  ;;  %v8820_v62 = vpop.f32.mrf.mxu0  ;;  %v8823_v34 = vpop.f32.mrf.mxu1 }
 0x163   : > { %11798 = vst [vmem:[#allocation86_spill] sm:$0xff] %v8823_v34  ;;  %v6334_v34 = vld [vmem:[%s8181_s10 + $0x190] sm:$0xff]  }
 0x164   : > { %2968 = vmax.xlane.f32.xlu1 %v2967_v10  ;;  %v1363_v10 = vadd.f32 %v8768_v14, %v6589_v56  ;;  %11793 = vst [vmem:[#allocation8_spill] sm:$0xff] %v8794_v2  ;;  %v8799_v12 = vmul.f32 %v6160_v55, %v1592_v54  ;;  %v2961_v19 = vsel %vm980_vm0, %v8794_v2, -inf  ;;  %v6173_v54 = vunpack.c.h.bf16 %v6335_v29 }
 0x165   : > { %6783 = vmatmul.mubr.msk.bf16.gmra.mxu1 %vm980_vm0, %v11799_v60 }
 0x166   : > { %2965 = vmax.xlane.f32.xlu0 %v2964_v6  ;;  %v2766_v6 = vsel %vm980_vm0, %v8780_v49, -inf  ;;  %11794 = vst [vmem:[#allocation82_spill] sm:$0xff] %v8799_v12  ;;  %v2958_v55 = vsel %vm980_vm0, %v8799_v12, -inf  ;;  %v6172_v49 = vunpack.c.l.bf16 %v6335_v29  ;;  %6786 = vmatprep.mubr.msk.bf16.mxu1 %vm980_vm0, %v11800_v15  ;;  %v8836_v29 = vmul.f32 %v6173_v54, %v1619_v4 }
 0x167   : > { %v1352_v12 = vadd.f32 %v8768_v14, %v8746_v57  ;;  %v6040_v15 = vunpack.c.l.bf16 %v6302_v28  ;;  %v1611_v57 = vadd.f32 %v8768_v14, %v8517_v38  ;;  %v11807_v38 = vld [vmem:[#allocation11_spill] sm:$0xff] }
 0x168   : > { %2770 = vmax.xlane.f32.xlu1 %v2769_v25  ;;  %v8812_v25 = vmul.f32 %v6045_v44, %v1363_v10  ;;  %11801 = vst [vmem:[#allocation9_spill] sm:$0xff] %v8836_v29  ;;  %v8842_v2 = vmul.f32 %v6172_v49, %v1616_v32  ;;  %v2979_v54 = vsel %vm980_vm0, %v8836_v29, -inf  ;;  %v6169_v49 = vunpack.c.h.bf16 %v6334_v34 }
 0x169   : > { %v8804_v56 = vpop.xlane.xlu1 %2677 }
 0x16a   : > { %2767 = vmax.xlane.f32.xlu0 %v2766_v6  ;;  %11796 = vst [vmem:[#allocation84_spill] sm:$0xff] %v8812_v25  ;;  %v8818_v6 = vmul.f32 %v6044_v27, %v1360_v63  ;;  %v1355_v27 = vadd.f32 %v8768_v14, %v1354_v39  ;;  %v2787_v63 = vsel %vm980_vm0, %v8812_v25, -inf  ;;  %11802 = vst [vmem:[#allocation10_spill] sm:$0xff] %v8842_v2  ;;  %v8845_v39 = vpop.f32.mrf.mxu1  ;;  %v2976_v32 = vsel %vm980_vm0, %v8842_v2, -inf }
 0x16b   : > { %v8806_v61 = vpop.xlane.xlu0 %2869  ;;  %11803 = vst [vmem:[#allocation87_spill] sm:$0xff] %v8845_v39  ;;  %v8861_v39 = vmul.f32 %v6040_v15, %v1352_v12  ;;  %v8879_v15 = vmul.f32 %v6169_v49, %v1611_v57  ;;  %v6053_v2 = vunpack.c.h.bf16 %v6305_v3 }
 0x16c   : > { %2962 = vmax.xlane.f32.xlu1 %v2961_v19  ;;  %11797 = vst [vmem:[#allocation85_spill] sm:$0xff] %v8818_v6  ;;  %v6041_v19 = vunpack.c.h.bf16 %v6302_v28  ;;  %v2784_v60 = vsel %vm980_vm0, %v8818_v6, -inf  ;;  %v1608_v28 = vadd.f32 %v8768_v14, %v8500_v33  ;;  %v6168_v6 = vunpack.c.l.bf16 %v6334_v34  ;;  %v8864_v53 = vpop.f32.mrf.mxu1 }
 0x16d   : > { %v8827_v10 = vpop.xlane.xlu1 %2680  ;;  %11805 = vst [vmem:[#allocation89_spill] sm:$0xff] %v8861_v39  ;;  %11806 = vst [vmem:[#allocation90_spill] sm:$0xff] %v8864_v53  ;;  %6787 = vmatmul.mubr.msk.bf16.gmra.mxu1 %vm980_vm0, %v11807_v38  ;;  %v1376_v38 = vadd.f32 %v8768_v14, %v6592_v36  ;;  %v6337_v53 = vld [vmem:[%s8181_s10 + $0x1a8] sm:$0xff]   ;;  %v1635_v36 = vadd.f32 %v8768_v14, %v8545_v7  ;;  %v2973_v49 = vsel %vm980_vm0, %v8879_v15, -inf }
 0x16e   : > { %2959 = vmax.xlane.f32.xlu0 %v2958_v55  ;;  %v6593_v55 = vpop.f32.mrf.mxu0  ;;  %11809 = vst [vmem:[#allocation11_spill] sm:$0xff] %v8879_v15  ;;  %v8884_v29 = vmul.f32 %v6168_v6, %v1608_v28  ;;  %v8887_v20 = vpop.f32.mrf.mxu1  ;;  %v1632_v28 = vadd.f32 %v8768_v14, %v8525_v35 }
 0x16f   : > { %v8831_v44 = vpop.xlane.xlu0 %2671  ;;  %v1379_v12 = vadd.f32 %v8768_v14, %v6593_v55  ;;  %11811 = vst [vmem:[#allocation91_spill] sm:$0xff] %v8887_v20  ;;  %v6180_v20 = vunpack.c.l.bf16 %v6337_v53 }
 0x170   : > { %2788 = vmax.xlane.f32.xlu1 %v2787_v63  ;;  %v8855_v63 = vmul.f32 %v6041_v19, %v1355_v27  ;;  %v11808_v19 = vld [vmem:[#allocation12_spill] sm:$0xff]  ;;  %v8908_v21 = vpop.f32.mrf.mxu1 }
 0x171   : > { %v8847_v25 = vpop.xlane.xlu1 %2872  ;;  %6790 = vmatprep.mubr.msk.bf16.mxu1 %vm980_vm0, %v11808_v19  ;;  %11810 = vst [vmem:[#allocation12_spill] sm:$0xff] %v8884_v29  ;;  %v6052_v19 = vunpack.c.l.bf16 %v6305_v3  ;;  %v8899_v6 = vmul.f32 %v6053_v2, %v1379_v12  ;;  %v6181_v3 = vunpack.c.h.bf16 %v6337_v53  ;;  %11814 = vst [vmem:[#allocation94_spill] sm:$0xff] %v8908_v21 }
 0x172   : > { %2785 = vmax.xlane.f32.xlu0 %v2784_v60  ;;  %11804 = vst [vmem:[#allocation88_spill] sm:$0xff] %v8855_v63  ;;  %v1370_v60 = vpop.f32.mrf.mxu0  ;;  %v2781_v34 = vsel %vm980_vm0, %v8855_v63, -inf  ;;  %v8930_v15 = vpop.f32.mrf.mxu1 }
 0x173   : > { %v8849_v4 = vpop.xlane.xlu0 %2863  ;;  %11812 = vst [vmem:[#allocation92_spill] sm:$0xff] %v8899_v6  ;;  %v1371_v12 = vadd.f32 %v8768_v14, %v1370_v60  ;;  %v2799_v53 = vsel %vm980_vm0, %v8899_v6, -inf  ;;  %11817 = vst [vmem:[#allocation97_spill] sm:$0xff] %v8930_v15  ;;  %v6307_v6 = vld [vmem:[%s8181_s10 + $0xb8] sm:$0xff]  }
 0x174   : > { %2980 = vmax.xlane.f32.xlu1 %v2979_v54  ;;  %v8874_v54 = vpop.f32.mrf.mxu0 }
 0x175   : > { %v8868_v27 = vpop.xlane.xlu1 %2866  ;;  %6791 = vmatmul.mubr.msk.bf16.gmra.mxu1 %vm980_vm0, %v8038_v23  ;;  %v1368_v23 = vadd.f32 %v8768_v14, %v8820_v62  ;;  %v1627_v62 = vadd.f32 %v8768_v14, %v8553_v24  ;;  %v8951_v24 = vpop.f32.mrf.mxu1 }
 0x176   : > { %2977 = vmax.xlane.f32.xlu0 %v2976_v32  ;;  %v2778_v32 = vsel %vm980_vm0, %v8861_v39, -inf  ;;  %v8893_v57 = vpop.f32.mrf.mxu0  ;;  %v6304_v39 = vld [vmem:[%s8181_s10 + $0xa0] sm:$0xff]   ;;  %6794 = vmatprep.mubr.msk.bf16.mxu1 %vm980_vm0, %v8044_v22  ;;  %11820 = vst [vmem:[#allocation100_spill] sm:$0xff] %v8951_v24 }
 0x177   : > { %v8872_v33 = vpop.xlane.xlu0 %2674  ;;  %v6048_v22 = vunpack.c.l.bf16 %v6304_v39  ;;  %v8975_v24 = vpop.f32.mrf.mxu1 }
 0x178   : > { %2782 = vmax.xlane.f32.xlu1 %v2781_v34  ;;  %v2970_v34 = vsel %vm980_vm0, %v8884_v29, -inf  ;;  %v6597_v2 = vpop.f32.mrf.mxu0  ;;  %v6336_v29 = vld [vmem:[%s8181_s10 + $0x1a0] sm:$0xff]   ;;  %11824 = vst [vmem:[#allocation102_spill] sm:$0xff] %v8975_v24 }
 0x179   : > { %v8889_v55 = vpop.xlane.xlu1 %2692  ;;  %v6176_v15 = vunpack.c.l.bf16 %v6336_v29  ;;  %v8994_v13 = vpop.f32.mrf.mxu1 }
 0x17a   : > { %2779 = vmax.xlane.f32.xlu0 %v2778_v32  ;;  %v8905_v32 = vmul.f32 %v6052_v19, %v1376_v38  ;;  %v8921_v38 = vmul.f32 %v6181_v3, %v1635_v36  ;;  %v6049_v19 = vunpack.c.h.bf16 %v6304_v39  ;;  %v1386_v3 = vpop.f32.mrf.mxu0  ;;  %v1624_v39 = vadd.f32 %v8768_v14, %v8536_v40  ;;  %v11821_v40 = vld [vmem:[#allocation13_spill] sm:$0xff]  ;;  %11827 = vst [vmem:[#allocation105_spill] sm:$0xff] %v8994_v13  ;;  %v6338_v13 = vld [vmem:[%s8181_s10 + $0x1b0] sm:$0xff]  }
 0x17b   : > { %v8891_v63 = vpop.xlane.xlu0 %2689 }
 0x17c   : > { %2974 = vmax.xlane.f32.xlu1 %v2973_v49  ;;  %11813 = vst [vmem:[#allocation93_spill] sm:$0xff] %v8905_v32  ;;  %11815 = vst [vmem:[#allocation95_spill] sm:$0xff] %v8921_v38  ;;  %v2796_v49 = vsel %vm980_vm0, %v8905_v32, -inf  ;;  %v8940_v21 = vmul.f32 %v6049_v19, %v1371_v12  ;;  %v8948_v32 = vpop.f32.mrf.mxu0 }
 0x17d   : > { %v8912_v7 = vpop.xlane.xlu1 %2884  ;;  %6795 = vmatmul.mubr.msk.bf16.gmra.mxu1 %vm980_vm0, %v8063_v52 }
 0x17e   : > { %2971 = vmax.xlane.f32.xlu0 %v2970_v34  ;;  %v8927_v34 = vmul.f32 %v6180_v20, %v1632_v28  ;;  %11818 = vst [vmem:[#allocation98_spill] sm:$0xff] %v8940_v21  ;;  %v6177_v20 = vunpack.c.h.bf16 %v6336_v29  ;;  %6798 = vmatprep.mubr.msk.bf16.mxu1 %vm980_vm0, %v11821_v40  ;;  %v2793_v29 = vsel %vm980_vm0, %v8940_v21, -inf  ;;  %v6060_v40 = vunpack.c.l.bf16 %v6307_v6 }
 0x17f   : > { %v8916_v35 = vpop.xlane.xlu0 %2881 }
 0x180   : > { %2800 = vmax.xlane.f32.xlu1 %v2799_v53  ;;  %11816 = vst [vmem:[#allocation96_spill] sm:$0xff] %v8927_v34  ;;  %v2991_v53 = vsel %vm980_vm0, %v8921_v38, -inf  ;;  %v2988_v28 = vsel %vm980_vm0, %v8927_v34, -inf  ;;  %v1392_v34 = vadd.f32 %v8768_v14, %v8874_v54  ;;  %v8972_v38 = vpop.f32.mrf.mxu0  ;;  %v1651_v54 = vadd.f32 %v8768_v14, %v8581_v37  ;;  %v11828_v37 = vld [vmem:[#allocation14_spill] sm:$0xff] }
 0x181   : > { %v8932_v60 = vpop.xlane.xlu1 %2686 }
 0x182   : > { %2797 = vmax.xlane.f32.xlu0 %v2796_v49  ;;  %v8946_v49 = vmul.f32 %v6048_v22, %v1368_v23  ;;  %v1395_v23 = vadd.f32 %v8768_v14, %v6597_v2  ;;  %v8964_v22 = vmul.f32 %v6177_v20, %v1627_v62  ;;  %v6339_v2 = vld [vmem:[%s8181_s10 + $0x1b8] sm:$0xff]   ;;  %v8991_v24 = vmul.f32 %v6060_v40, %v1392_v34 }
 0x183   : > { %v8934_v36 = vpop.xlane.xlu0 %2683  ;;  %v6188_v21 = vunpack.c.l.bf16 %v6339_v2  ;;  %v1387_v34 = vadd.f32 %v8768_v14, %v1386_v3  ;;  %v9016_v3 = vpop.f32.mrf.mxu1 }
 0x184   : > { %2992 = vmax.xlane.f32.xlu1 %v2991_v53  ;;  %11819 = vst [vmem:[#allocation99_spill] sm:$0xff] %v8946_v49  ;;  %11822 = vst [vmem:[#allocation13_spill] sm:$0xff] %v8964_v22  ;;  %v6061_v53 = vunpack.c.h.bf16 %v6307_v6  ;;  %v2790_v52 = vsel %vm980_vm0, %v8946_v49, -inf  ;;  %v6189_v6 = vunpack.c.h.bf16 %v6339_v2  ;;  %v6601_v49 = vpop.f32.mrf.mxu0 }
 0x185   : > { %v8955_v12 = vpop.xlane.xlu1 %2878  ;;  %11826 = vst [vmem:[#allocation104_spill] sm:$0xff] %v8991_v24  ;;  %6799 = vmatmul.mubr.msk.bf16.gmra.mxu1 %vm980_vm0, %v11828_v37  ;;  %11834 = vst [vmem:[#allocation108_spill] sm:$0xff] %v9016_v3 }
 0x186   : > { %2989 = vmax.xlane.f32.xlu0 %v2988_v28  ;;  %v8970_v28 = vmul.f32 %v6176_v15, %v1624_v39  ;;  %v8985_v15 = vmul.f32 %v6061_v53, %v1395_v23  ;;  %v1648_v39 = vadd.f32 %v8768_v14, %v8561_v46  ;;  %v11830_v53 = vld [vmem:[#allocation15_spill] sm:$0xff]  ;;  %v9007_v2 = vmul.f32 %v6189_v6, %v1651_v54 }
 0x187   : > { %v8959_v19 = vpop.xlane.xlu0 %2875  ;;  %6802 = vmatprep.mubr.msk.bf16.mxu1 %vm980_vm0, %v11830_v53  ;;  %v1402_v53 = vpop.f32.mrf.mxu0 }
 0x188   : > { %2794 = vmax.xlane.f32.xlu1 %v2793_v29  ;;  %11823 = vst [vmem:[#allocation101_spill] sm:$0xff] %v8970_v28  ;;  %v2985_v29 = vsel %vm980_vm0, %v8964_v22, -inf  ;;  %11825 = vst [vmem:[#allocation103_spill] sm:$0xff] %v8985_v15  ;;  %v2811_v40 = vsel %vm980_vm0, %v8985_v15, -inf  ;;  %v9013_v37 = vmul.f32 %v6188_v21, %v1648_v39  ;;  %v6056_v22 = vunpack.c.l.bf16 %v6306_v0  ;;  %v9037_v15 = vpop.f32.mrf.mxu1 }
 0x189   : > { %v8977_v62 = vpop.xlane.xlu1 %2704  ;;  %11832 = vst [vmem:[#allocation106_spill] sm:$0xff] %v9007_v2  ;;  %v9022_v6 = vpop.f32.mrf.mxu0  ;;  %v3003_v21 = vsel %vm980_vm0, %v9007_v2, -inf  ;;  %11836 = vst [vmem:[#allocation110_spill] sm:$0xff] %v9037_v15 }
 0x18a   : > { %2791 = vmax.xlane.f32.xlu0 %v2790_v52  ;;  %v2982_v52 = vsel %vm980_vm0, %v8970_v28, -inf  ;;  %v1384_v28 = vadd.f32 %v8768_v14, %v8893_v57  ;;  %11833 = vst [vmem:[#allocation107_spill] sm:$0xff] %v9013_v37  ;;  %v1643_v57 = vadd.f32 %v8768_v14, %v8589_v16  ;;  %v11837_v16 = vld [vmem:[#allocation16_spill] sm:$0xff]  ;;  %v9061_v15 = vpop.f32.mrf.mxu1 }
 0x18b   : > { %v8979_v20 = vpop.xlane.xlu0 %2701  ;;  %11842 = vst [vmem:[#allocation114_spill] sm:$0xff] %v9061_v15 }
 0x18c   : > { %2986 = vmax.xlane.f32.xlu1 %v2985_v29  ;;  %v6057_v29 = vunpack.c.h.bf16 %v6306_v0  ;;  %v6185_v0 = vunpack.c.h.bf16 %v6338_v13  ;;  %v9034_v3 = vmul.f32 %v6056_v22, %v1384_v28  ;;  %v1411_v22 = vadd.f32 %v8768_v14, %v6601_v49 }
 0x18d   : > { %v8998_v23 = vpop.xlane.xlu1 %2896  ;;  %6803 = vmatmul.mubr.msk.bf16.gmra.mxu1 %vm980_vm0, %v11837_v16  ;;  %v6341_v16 = vld [vmem:[%s8181_s10 + $0x1c8] sm:$0xff]  }
 0x18e   : > { %2983 = vmax.xlane.f32.xlu0 %v2982_v52  ;;  %11829 = vst [vmem:[#allocation14_spill] sm:$0xff] %v8998_v23  ;;  %v2808_v52 = vsel %vm980_vm0, %v8991_v24, -inf  ;;  %v9028_v39 = vmul.f32 %v6057_v29, %v1387_v34  ;;  %11835 = vst [vmem:[#allocation109_spill] sm:$0xff] %v9034_v3  ;;  %v6184_v23 = vunpack.c.l.bf16 %v6338_v13  ;;  %v6309_v24 = vld [vmem:[%s8181_s10 + $0xc8] sm:$0xff]   ;;  %6806 = vmatprep.mubr.msk.bf16.mxu1 %vm980_vm0, %v8136_v9  ;;  %v9047_v29 = vpop.f32.mrf.mxu0  ;;  %v2802_v9 = vsel %vm980_vm0, %v9034_v3, -inf  ;;  %v9080_v3 = vpop.f32.mrf.mxu1 }
 0x18f   : > { %v9002_v46 = vpop.xlane.xlu0 %2893  ;;  %v9052_v28 = vmul.f32 %v6185_v0, %v1643_v57  ;;  %v6068_v2 = vunpack.c.l.bf16 %v6309_v24  ;;  %11845 = vst [vmem:[#allocation117_spill] sm:$0xff] %v9080_v3 }
 0x190   : > { %11831 = vst [vmem:[#allocation15_spill] sm:$0xff] %v9002_v46  ;;  %2812 = vmax.xlane.f32.xlu1 %v2811_v40  ;;  %v1640_v40 = vadd.f32 %v8768_v14, %v8572_v43  ;;  %v2805_v13 = vsel %vm980_vm0, %v9028_v39, -inf  ;;  %v6605_v0 = vpop.f32.mrf.mxu0 }
 0x191   : > { %v9018_v46 = vpop.xlane.xlu1 %2698  ;;  %11840 = vst [vmem:[#allocation112_spill] sm:$0xff] %v9052_v28 }
 0x192   : > { %2809 = vmax.xlane.f32.xlu0 %v2808_v52  ;;  %v3000_v52 = vsel %vm980_vm0, %v9013_v37, -inf  ;;  %v9059_v37 = vmul.f32 %v6184_v23, %v1640_v40  ;;  %v6308_v23 = vld [vmem:[%s8181_s10 + $0xc0] sm:$0xff]   ;;  %v6196_v40 = vunpack.c.l.bf16 %v6341_v16 }
 0x193   : > { %v9020_v54 = vpop.xlane.xlu0 %2695 }
 0x194   : > { %3004 = vmax.xlane.f32.xlu1 %v3003_v21  ;;  %v6069_v21 = vunpack.c.h.bf16 %v6309_v24  ;;  %11841 = vst [vmem:[#allocation113_spill] sm:$0xff] %v9059_v37  ;;  %v1664_v24 = vadd.f32 %v8768_v14, %v8597_v8  ;;  %v1403_v8 = vadd.f32 %v8768_v14, %v1402_v53 }
 0x195   : > { %v9041_v34 = vpop.xlane.xlu1 %2890  ;;  %6807 = vmatmul.mubr.msk.bf16.gmra.mxu1 %vm980_vm0, %v8141_v50 }
 0x196   : > { %3001 = vmax.xlane.f32.xlu0 %v3000_v52  ;;  %11838 = vst [vmem:[#allocation16_spill] sm:$0xff] %v9041_v34  ;;  %v1408_v52 = vadd.f32 %v8768_v14, %v8948_v32  ;;  %v6197_v32 = vunpack.c.h.bf16 %v6341_v16  ;;  %v9071_v34 = vmul.f32 %v6069_v21, %v1411_v22  ;;  %v1418_v21 = vpop.f32.mrf.mxu0  ;;  %v9095_v50 = vmul.f32 %v6196_v40, %v1664_v24 }
 0x197   : > { %v9045_v43 = vpop.xlane.xlu0 %2887 }
 0x198   : > { %11839 = vst [vmem:[#allocation111_spill] sm:$0xff] %v9045_v43  ;;  %2806 = vmax.xlane.f32.xlu1 %v2805_v13  ;;  %v1667_v43 = vadd.f32 %v8768_v14, %v8623_v45  ;;  %v2997_v13 = vsel %vm980_vm0, %v9052_v28, -inf  ;;  %11843 = vst [vmem:[#allocation115_spill] sm:$0xff] %v9071_v34  ;;  %v9078_v15 = vmul.f32 %v6068_v2, %v1408_v52  ;;  %v6065_v2 = vunpack.c.h.bf16 %v6308_v23  ;;  %v6608_v3 = vpop.f32.mrf.mxu0 }
 0x199   : > { %v9063_v49 = vpop.xlane.xlu1 %2716  ;;  %v1400_v52 = vadd.f32 %v8768_v14, %v8972_v38  ;;  %11849 = vst [vmem:[#allocation121_spill] sm:$0xff] %v9095_v50 }
 0x19a   : > { %2803 = vmax.xlane.f32.xlu0 %v2802_v9  ;;  %v2994_v9 = vsel %vm980_vm0, %v9059_v37, -inf  ;;  %11844 = vst [vmem:[#allocation116_spill] sm:$0xff] %v9078_v15  ;;  %v9089_v16 = vmul.f32 %v6197_v32, %v1667_v43  ;;  %v6064_v37 = vunpack.c.l.bf16 %v6308_v23  ;;  %v2820_v28 = vsel %vm980_vm0, %v9078_v15, -inf  ;;  %v9117_v15 = vpop.f32.mrf.mxu0 }
 0x19b   : > { %v9065_v57 = vpop.xlane.xlu0 %2713  ;;  %v1659_v32 = vadd.f32 %v8768_v14, %v8638_v59  ;;  %v9108_v23 = vmul.f32 %v6065_v2, %v1403_v8 }
 0x19c   : > { %2998 = vmax.xlane.f32.xlu1 %v2997_v13  ;;  %11848 = vst [vmem:[#allocation120_spill] sm:$0xff] %v9089_v16  ;;  %v2823_v13 = vsel %vm980_vm0, %v9071_v34, -inf  ;;  %v3015_v38 = vsel %vm980_vm0, %v9089_v16, -inf  ;;  %v9110_v40 = vmul.f32 %v6064_v37, %v1400_v52  ;;  %v1427_v37 = vadd.f32 %v8768_v14, %v6605_v0 }
 0x19d   : > { %v9084_v45 = vpop.xlane.xlu1 %2908  ;;  %11850 = vst [vmem:[#allocation122_spill] sm:$0xff] %v9108_v23 }
 0x19e   : > { %2995 = vmax.xlane.f32.xlu0 %v2994_v9  ;;  %11846 = vst [vmem:[#allocation118_spill] sm:$0xff] %v9084_v45  ;;  %v6340_v9 = vld [vmem:[%s8181_s10 + $0x1c0] sm:$0xff]   ;;  %11851 = vst [vmem:[#allocation123_spill] sm:$0xff] %v9110_v40  ;;  %v3012_v45 = vsel %vm980_vm0, %v9095_v50, -inf  ;;  %v2814_v16 = vsel %vm980_vm0, %v9110_v40, -inf }
 0x19f   : > { %v9086_v22 = vpop.xlane.xlu0 %2905  ;;  %v6193_v24 = vunpack.c.h.bf16 %v6340_v9 }
 0x1a0   : > { %11847 = vst [vmem:[#allocation119_spill] sm:$0xff] %v9086_v22  ;;  %2824 = vmax.xlane.f32.xlu1 %v2823_v13  ;;  %v1656_v13 = vadd.f32 %v8768_v14, %v8608_v31  ;;  %v6311_v22 = vld [vmem:[%s8181_s10 + $0xd8] sm:$0xff]   ;;  %v2817_v31 = vsel %vm980_vm0, %v9108_v23, -inf }
 0x1a1   : > { %v9100_v53 = vpop.xlane.xlu1 %2710  ;;  %v6077_v2 = vunpack.c.h.bf16 %v6311_v22  ;;  %v9126_v52 = vmul.f32 %v6193_v24, %v1659_v32  ;;  %v6076_v50 = vunpack.c.l.bf16 %v6311_v22  ;;  %v1419_v24 = vadd.f32 %v8768_v14, %v1418_v21 }
 0x1a2   : > { %2821 = vmax.xlane.f32.xlu0 %v2820_v28  ;;  %v6192_v28 = vunpack.c.l.bf16 %v6340_v9 }
 0x1a3   : > { %v9102_v43 = vpop.xlane.xlu0 %2707  ;;  %11854 = vst [vmem:[#allocation126_spill] sm:$0xff] %v9126_v52  ;;  %v9139_v32 = vmul.f32 %v6077_v2, %v1427_v37  ;;  %v6313_v2 = vld [vmem:[%s8181_s10 + $0xe8] sm:$0xff]  }
 0x1a4   : > { %3016 = vmax.xlane.f32.xlu1 %v3015_v38  ;;  %v9128_v9 = vmul.f32 %v6192_v28, %v1656_v13  ;;  %v1424_v38 = vadd.f32 %v8768_v14, %v9022_v6  ;;  %v3009_v6 = vsel %vm980_vm0, %v9126_v52, -inf  ;;  %v1416_v28 = vadd.f32 %v8768_v14, %v9047_v29 }
 0x1a5   : > { %v9119_v59 = vpop.xlane.xlu1 %2902  ;;  %11856 = vst [vmem:[#allocation128_spill] sm:$0xff] %v9139_v32  ;;  %v2835_v29 = vsel %vm980_vm0, %v9139_v32, -inf  ;;  %v6084_v32 = vunpack.c.l.bf16 %v6313_v2 }
 0x1a6   : > { %3013 = vmax.xlane.f32.xlu0 %v3012_v45  ;;  %11852 = vst [vmem:[#allocation124_spill] sm:$0xff] %v9119_v59  ;;  %11855 = vst [vmem:[#allocation127_spill] sm:$0xff] %v9128_v9  ;;  %v6310_v45 = vld [vmem:[%s8181_s10 + $0xd0] sm:$0xff]   ;;  %v9144_v13 = vmul.f32 %v6076_v50, %v1424_v38  ;;  %v3006_v40 = vsel %vm980_vm0, %v9128_v9, -inf  ;;  %v1675_v50 = vadd.f32 %v8768_v14, %v8689_v48 }
 0x1a7   : > { %v9121_v8 = vpop.xlane.xlu0 %2899  ;;  %v6073_v22 = vunpack.c.h.bf16 %v6310_v45  ;;  %v1440_v48 = vadd.f32 %v8768_v14, %v6608_v3 }
 0x1a8   : > { %11853 = vst [vmem:[#allocation125_spill] sm:$0xff] %v9121_v8  ;;  %2818 = vmax.xlane.f32.xlu1 %v2817_v31  ;;  %v6609_v8 = vpop.f32.mrf.mxu0  ;;  %11857 = vst [vmem:[#allocation129_spill] sm:$0xff] %v9144_v13  ;;  %v6072_v31 = vunpack.c.l.bf16 %v6310_v45  ;;  %v2832_v52 = vsel %vm980_vm0, %v9144_v13, -inf }
 0x1a9   : > { %v9135_v0 = vpop.xlane.xlu1 %2728  ;;  %v9160_v38 = vmul.f32 %v6073_v22, %v1419_v24  ;;  %v6312_v24 = vld [vmem:[%s8181_s10 + $0xe0] sm:$0xff]   ;;  %v6085_v22 = vunpack.c.h.bf16 %v6313_v2 }
 0x1aa   : > { %2815 = vmax.xlane.f32.xlu0 %v2814_v16  ;;  %v6342_v16 = vld [vmem:[%s8181_s10 + $0x1d0] sm:$0xff]   ;;  %v1434_v23 = vpop.f32.mrf.mxu0  ;;  %v6080_v13 = vunpack.c.l.bf16 %v6312_v24 }
 0x1ab   : > { %v9137_v59 = vpop.xlane.xlu0 %2725  ;;  %v6201_v45 = vunpack.c.h.bf16 %v6342_v16  ;;  %v6200_v9 = vunpack.c.l.bf16 %v6342_v16 }
 0x1ac   : > { %3010 = vmax.xlane.f32.xlu1 %v3009_v6  ;;  %v9162_v6 = vmul.f32 %v6072_v31, %v1416_v28  ;;  %v1443_v28 = vadd.f32 %v8768_v14, %v6609_v8  ;;  %v2829_v31 = vsel %vm980_vm0, %v9160_v38, -inf  ;;  %v1432_v8 = vadd.f32 %v8768_v14, %v9117_v15 }
 0x1ad   : > { %v9151_v37 = vpop.xlane.xlu1 %2920  ;;  %v9179_v16 = vmul.f32 %v6201_v45, %v1675_v50  ;;  %v1435_v50 = vadd.f32 %v8768_v14, %v1434_v23  ;;  %v6315_v45 = vld [vmem:[%s8181_s10 + $0xf8] sm:$0xff]  }
 0x1ae   : > { %3007 = vmax.xlane.f32.xlu0 %v3006_v40  ;;  %11858 = vst [vmem:[#allocation130_spill] sm:$0xff] %v9151_v37  ;;  %v1672_v40 = vadd.f32 %v8768_v14, %v8657_v47  ;;  %v3057_v47 = vsub.f32 %v8216_v1, %v8827_v10  ;;  %v2826_v2 = vsel %vm980_vm0, %v9162_v6, -inf  ;;  %v9189_v10 = vmul.f32 %v6084_v32, %v1440_v48 }
 0x1af   : > { %v9153_v21 = vpop.xlane.xlu0 %2917  ;;  %11860 = vst [vmem:[#allocation132_spill] sm:$0xff] %v9179_v16  ;;  %v3021_v32 = vsel %vm980_vm0, %v9179_v16, -inf  ;;  %v3120_v48 = vsub.f32 %v8205_v18, %v8806_v61 }
 0x1b0   : > { %11859 = vst [vmem:[#allocation131_spill] sm:$0xff] %v9153_v21  ;;  %2836 = vmax.xlane.f32.xlu1 %v2835_v29  ;;  %v6612_v21 = vpop.f32.mrf.mxu0  ;;  %v9183_v3 = vmul.f32 %v6200_v9, %v1672_v40  ;;  %v3188_v9 = vmul.f32 1.442695, %v3057_v47  ;;  %v3121_v40 = vsub.f32 %v8221_v51, %v8847_v25  ;;  %v9209_v51 = vmul.f32 %v6080_v13, %v1432_v8  ;;  %v6314_v25 = vld [vmem:[%s8181_s10 + $0xf0] sm:$0xff]  }
 0x1b1   : > { %v9168_v37 = vpop.xlane.xlu1 %2722  ;;  %v2844_v18 = vsel %vm980_vm0, %v9189_v10, -inf  ;;  %v3314_v13 = vmul.f32 1.442695, %v3120_v48  ;;  %v3054_v8 = vsub.f32 %v8214_v58, %v8831_v44  ;;  %v3119_v44 = vsub.f32 %v8236_v5, %v8868_v27 }
 0x1b2   : > { %2833 = vmax.xlane.f32.xlu0 %v2832_v52  ;;  %v3056_v52 = vsub.f32 %v8201_v17, %v8804_v56  ;;  %11861 = vst [vmem:[#allocation133_spill] sm:$0xff] %v9183_v3  ;;  %v1447_v29 = vpop.f32.mrf.mxu0  ;;  %v6081_v56 = vunpack.c.h.bf16 %v6312_v24  ;;  %v3018_v23 = vsel %vm980_vm0, %v9183_v3, -inf  ;;  %v6093_v24 = vunpack.c.h.bf16 %v6315_v45 }
 0x1b3   : > { %v9172_v34 = vpop.xlane.xlu0 %2719  ;;  %6960 = vpow2.f32 %v3188_v9  ;;  %v6088_v3 = vunpack.c.l.bf16 %v6314_v25  ;;  %v1448_v9 = vadd.f32 %v8768_v14, %v1447_v29  ;;  %v2838_v58 = vsel %vm980_vm0, %v9209_v51, -inf }
 0x1b4   : > { %2830 = vmax.xlane.f32.xlu1 %v2829_v31  ;;  %v9199_v31 = vmul.f32 %v6085_v22, %v1443_v28  ;;  %v3186_v15 = vmul.f32 1.442695, %v3056_v52  ;;  %v9217_v61 = vmul.f32 %v6081_v56, %v1435_v50  ;;  %v3316_v52 = vmul.f32 1.442695, %v3121_v40 }
 0x1b5   : > { %v9187_v1 = vpop.xlane.xlu1 %2914  ;;  %v6089_v56 = vunpack.c.h.bf16 %v6314_v25  ;;  %v3118_v29 = vsub.f32 %v8226_v11, %v8849_v4  ;;  %v3312_v27 = vmul.f32 1.442695, %v3119_v44  ;;  %v3060_v4 = vsub.f32 %v8252_v30, %v8891_v63  ;;  %v11864_v63 = vld [vmem:[#allocation18_spill] sm:$0xff] }
 0x1b6   : > { %2827 = vmax.xlane.f32.xlu0 %v2826_v2  ;;  %v6613_v2 = vpop.f32.mrf.mxu0  ;;  %6962 = vpow2.f32 %v3186_v15  ;;  %v2841_v40 = vsel %vm980_vm0, %v9217_v61, -inf  ;;  %v3182_v15 = vmul.f32 1.442695, %v3054_v8 }
 0x1b7   : > { %v9195_v17 = vpop.xlane.xlu0 %2911  ;;  %v1459_v22 = vadd.f32 %v8768_v14, %v6613_v2  ;;  %v1456_v2 = vadd.f32 %v8768_v14, %v6612_v21  ;;  %6964 = vpow2.f32 %v3316_v52  ;;  %v3310_v11 = vmul.f32 1.442695, %v3118_v29 }
 0x1b8   : > { %11862 = vst [vmem:[#allocation134_spill] sm:$0xff] %v9195_v17  ;;  %3022 = vmax.xlane.f32.xlu1 %v3021_v32  ;;  %v6092_v17 = vunpack.c.l.bf16 %v6315_v45  ;;  %v3055_v45 = vsub.f32 %v8241_v26, %v8872_v33  ;;  %v2847_v32 = vsel %vm980_vm0, %v9199_v31, -inf  ;;  %6966 = vpow2.f32 %v3314_v13 }
 0x1b9   : > { %v9207_v47 = vpop.xlane.xlu1 %2740  ;;  %v9229_v26 = vmul.f32 %v6093_v24, %v1459_v22  ;;  %v9246_v22 = vmul.f32 %v6088_v3, %v1448_v9  ;;  %v3194_v30 = vmul.f32 1.442695, %v3060_v4  ;;  %v11869_v4 = vld [vmem:[#allocation21_spill] sm:$0xff] }
 0x1ba   : > { %3019 = vmax.xlane.f32.xlu0 %v3018_v23  ;;  %v1450_v23 = vpop.f32.mrf.mxu0  ;;  %v3184_v21 = vmul.f32 1.442695, %v3055_v45  ;;  %v9242_v24 = vmul.f32 %v6092_v17, %v1456_v2  ;;  %v3124_v2 = vsub.f32 %v11864_v63, %v8916_v35 }
 0x1bb   : > { %v9213_v28 = vpop.xlane.xlu0 %2737  ;;  %v1451_v48 = vadd.f32 %v8768_v14, %v1450_v23  ;;  %v2859_v5 = vsel %vm980_vm0, %v9229_v26, -inf  ;;  %v3061_v14 = vsub.f32 %v8247_v42, %v8889_v55  ;;  %v11863_v42 = vld [vmem:[#allocation17_spill] sm:$0xff]  ;;  %v2850_v23 = vsel %vm980_vm0, %v9246_v22, -inf }
 0x1bc   : > { %2848 = vmax.xlane.f32.xlu1 %v2847_v32  ;;  %6968 = vpow2.f32 %v3184_v21  ;;  %v2856_v3 = vsel %vm980_vm0, %v9242_v24, -inf  ;;  %v3125_v55 = vsub.f32 %v11863_v42, %v8912_v7 }
 0x1bd   : > { %v9226_v50 = vpop.xlane.xlu1 %2932  ;;  %v9254_v52 = vmul.f32 %v6089_v56, %v1451_v48  ;;  %6970 = vpow2.f32 %v3182_v15  ;;  %v3196_v32 = vmul.f32 1.442695, %v3061_v14  ;;  %v3322_v48 = vmul.f32 1.442695, %v3124_v2  ;;  %v11867_v15 = vld [vmem:[#allocation20_spill] sm:$0xff] }
 0x1be   : > { %2845 = vmax.xlane.f32.xlu0 %v2844_v18  ;;  %6972 = vpow2.f32 %v3312_v27  ;;  %v3058_v29 = vsub.f32 %v11867_v15, %v8934_v36  ;;  %v6958_v36 = vld [vmem:[%s11481_s7 + $0x8] sm:$0xff]   ;;  %v11873_v15 = vld [vmem:[#allocation24_spill] sm:$0xff] }
 0x1bf   : > { %v9231_v33 = vpop.xlane.xlu0 %2929  ;;  %v2853_v13 = vsel %vm980_vm0, %v9254_v52, -inf  ;;  %6974 = vpow2.f32 %v3310_v11  ;;  %6810 = vmatprep.subr.bf16.mxu0 %v6958_v36 }
 0x1c0   : > { %2842 = vmax.xlane.f32.xlu1 %v2841_v40  ;;  %v9268_v8 = vpop.eup %6960  ;;  %6976 = vpow2.f32 %v3196_v32  ;;  %v3324_v40 = vmul.f32 1.442695, %v3125_v55  ;;  %v3190_v55 = vmul.f32 1.442695, %v3058_v29  ;;  %6811 = vmatpush3.bf16.msra.mxu0 %v6958_v36  ;;  %v3064_v29 = vsub.f32 %v11873_v15, %v8979_v20  ;;  %v9335_v20 = vpop.f32.mrf.mxu1 }
 0x1c1   : > { %v9244_v25 = vpop.xlane.xlu1 %2734  ;;  %v3447_v21 = vsel %vm980_vm0, %v9268_v8, 0.0  ;;  %6978 = vpow2.f32 %v3194_v30 }
 0x1c2   : > { %2839 = vmax.xlane.f32.xlu0 %v2838_v58  ;;  %v11865_v58 = vld [vmem:[#allocation19_spill] sm:$0xff]  ;;  %6980 = vpow2.f32 %v3324_v40 }
 0x1c3   : > { %v9248_v18 = vpop.xlane.xlu0 %2731  ;;  %v9274_v56 = vpop.eup %6962  ;;  %v3059_v44 = vsub.f32 %v11865_v58, %v8932_v60  ;;  %6982 = vpow2.f32 %v3322_v48  ;;  %v11871_v58 = vld [vmem:[#allocation23_spill] sm:$0xff] }
 0x1c4   : > { %2860 = vmax.xlane.f32.xlu1 %v2859_v5  ;;  %v9284_v35 = vpop.eup %6964  ;;  %v3444_v5 = vsel %vm980_vm0, %v9274_v56, 0.0 }
 0x1c5   : > { %v9260_v17 = vpop.xlane.xlu1 %2926  ;;  %11866 = vst [vmem:[#allocation17_spill] sm:$0xff] %v9284_v35  ;;  %v9290_v27 = vpop.eup %6966  ;;  %v3192_v11 = vmul.f32 1.442695, %v3059_v44  ;;  %v3639_v32 = vsel %vm980_vm0, %v9284_v35, 0.0  ;;  %v3065_v44 = vsub.f32 %v11871_v58, %v8977_v62 }
 0x1c6   : > { %2857 = vmax.xlane.f32.xlu0 %v2856_v3  ;;  %11868 = vst [vmem:[#allocation18_spill] sm:$0xff] %v9290_v27  ;;  %v3123_v3 = vsub.f32 %v11869_v4, %v8955_v12  ;;  %v3636_v63 = vsel %vm980_vm0, %v9290_v27, 0.0  ;;  %v11882_v27 = vld [vmem:[#allocation35_spill] sm:$0xff] }
 0x1c7   : > { %v9262_v45 = vpop.xlane.xlu0 %2923  ;;  %6984 = vpow2.f32 %v3192_v11 }
 0x1c8   : > { %2854 = vmax.xlane.f32.xlu1 %v2853_v13  ;;  %v11870_v13 = vld [vmem:[#allocation22_spill] sm:$0xff]  ;;  %v3320_v40 = vmul.f32 1.442695, %v3123_v3  ;;  %6986 = vpow2.f32 %v3190_v55  ;;  %v3204_v3 = vmul.f32 1.442695, %v3065_v44 }
 0x1c9   : > { %v9276_v9 = vpop.xlane.xlu1 %2752  ;;  %v9303_v42 = vpop.eup %6968  ;;  %v3122_v30 = vsub.f32 %v11870_v13, %v8959_v19 }
 0x1ca   : > { %2851 = vmax.xlane.f32.xlu0 %v2850_v23  ;;  %v9309_v2 = vpop.eup %6970  ;;  %v3441_v19 = vsel %vm980_vm0, %v9303_v42, 0.0  ;;  %6988 = vpow2.f32 %v3320_v40 }
 0x1cb   : > { %v9278_v7 = vpop.xlane.xlu0 %2749  ;;  %v3318_v48 = vmul.f32 1.442695, %v3122_v30  ;;  %v3202_v30 = vmul.f32 1.442695, %v3064_v29 }
 0x1cc   : > { %3448 = vadd.xlane.f32.xlu1 %v3447_v21  ;;  %v9319_v21 = vpop.eup %6972 }
 0x1cd   : > { %v9292_v14 = vpop.xlane.xlu1 %2944  ;;  %11872 = vst [vmem:[#allocation19_spill] sm:$0xff] %v9319_v21  ;;  %v9325_v4 = vpop.eup %6974  ;;  %v3633_v55 = vsel %vm980_vm0, %v9319_v21, 0.0  ;;  %6990 = vpow2.f32 %v3318_v48 }
 0x1ce   : > { %3445 = vadd.xlane.f32.xlu0 %v3444_v5  ;;  %v3438_v5 = vsel %vm980_vm0, %v9309_v2, 0.0  ;;  %11874 = vst [vmem:[#allocation20_spill] sm:$0xff] %v9325_v4  ;;  %v9337_v13 = vpop.eup %6976  ;;  %v3630_v40 = vsel %vm980_vm0, %v9325_v4, 0.0  ;;  %6992 = vpow2.f32 %v3204_v3  ;;  %v11885_v4 = vld [vmem:[#allocation39_spill] sm:$0xff] }
 0x1cf   : > { %v9294_v60 = vpop.xlane.xlu0 %2941  ;;  %v9343_v44 = vpop.eup %6978  ;;  %v3459_v29 = vsel %vm980_vm0, %v9337_v13, 0.0  ;;  %6994 = vpow2.f32 %v3202_v30  ;;  %v3067_v30 = vsub.f32 %v11882_v27, %v9100_v53 }
 0x1d0   : > { %3640 = vadd.xlane.f32.xlu1 %v3639_v32  ;;  %v11875_v32 = vld [vmem:[#allocation27_spill] sm:$0xff]  ;;  %v3456_v3 = vsel %vm980_vm0, %v9343_v44, 0.0 }
 0x1d1   : > { %v9311_v12 = vpop.xlane.xlu1 %2746  ;;  %v3063_v36 = vsub.f32 %v11875_v32, %v9018_v46  ;;  %v9355_v32 = vpop.eup %6980 }
 0x1d2   : > { %3637 = vadd.xlane.f32.xlu0 %v3636_v63  ;;  %v11876_v63 = vld [vmem:[#allocation28_spill] sm:$0xff]  ;;  %11879 = vst [vmem:[#allocation22_spill] sm:$0xff] %v9355_v32 }
 0x1d3   : > { %v9313_v23 = vpop.xlane.xlu0 %2743  ;;  %v3062_v58 = vsub.f32 %v11876_v63, %v9020_v54  ;;  %v3200_v15 = vmul.f32 1.442695, %v3063_v36  ;;  %v9353_v54 = vpop.f32.mrf.mxu1  ;;  %v11880_v63 = vld [vmem:[#allocation32_spill] sm:$0xff] }
 0x1d4   : > { %3442 = vadd.xlane.f32.xlu1 %v3441_v19  ;;  %11878 = vst [vmem:[#allocation21_spill] sm:$0xff] %v9353_v54  ;;  %v9361_v36 = vpop.eup %6982 }
 0x1d5   : > { %v9327_v11 = vpop.xlane.xlu1 %2938  ;;  %11881 = vst [vmem:[#allocation23_spill] sm:$0xff] %v9361_v36  ;;  %6996 = vpow2.f32 %v3200_v15  ;;  %v3648_v15 = vsel %vm980_vm0, %v9361_v36, 0.0 }
 0x1d6   : > { %3439 = vadd.xlane.f32.xlu0 %v3438_v5  ;;  %v11877_v5 = vld [vmem:[#allocation31_spill] sm:$0xff] }
 0x1d7   : > { %v9329_v62 = vpop.xlane.xlu0 %2935  ;;  %v3069_v48 = vsub.f32 %v11877_v5, %v9063_v49 }
 0x1d8   : > { %3634 = vadd.xlane.f32.xlu1 %v3633_v55  ;;  %v3198_v55 = vmul.f32 1.442695, %v3062_v58  ;;  %v3651_v58 = vsel %vm980_vm0, %v9355_v32, 0.0  ;;  %v3208_v32 = vmul.f32 1.442695, %v3067_v30 }
 0x1d9   : > { %v9345_v46 = vpop.xlane.xlu1 %2764  ;;  %v3212_v35 = vmul.f32 1.442695, %v3069_v48 }
 0x1da   : > { %3631 = vadd.xlane.f32.xlu0 %v3630_v40  ;;  %v3068_v40 = vsub.f32 %v11880_v63, %v9065_v57  ;;  %v9371_v57 = vpop.f32.mrf.mxu1  ;;  %6998 = vpow2.f32 %v3198_v55  ;;  %v3073_v55 = vsub.f32 %v11885_v4, %v9135_v0 }
 0x1db   : > { %v9347_v19 = vpop.xlane.xlu0 %2761  ;;  %11883 = vst [vmem:[#allocation24_spill] sm:$0xff] %v9371_v57  ;;  %7000 = vpow2.f32 %v3212_v35 }
 0x1dc   : > { %3460 = vadd.xlane.f32.xlu1 %v3459_v29  ;;  %v9373_v29 = vpop.eup %6984  ;;  %v3210_v63 = vmul.f32 1.442695, %v3068_v40  ;;  %v3220_v16 = vmul.f32 1.442695, %v3073_v55 }
 0x1dd   : > { %v9363_v49 = vpop.xlane.xlu1 %2956  ;;  %v9379_v48 = vpop.eup %6986  ;;  %v3453_v40 = vsel %vm980_vm0, %v9373_v29, 0.0 }
 0x1de   : > { %3457 = vadd.xlane.f32.xlu0 %v3456_v3  ;;  %v11884_v3 = vld [vmem:[#allocation36_spill] sm:$0xff]  ;;  %7002 = vpow2.f32 %v3210_v63  ;;  %v3450_v35 = vsel %vm980_vm0, %v9379_v48, 0.0 }
 0x1df   : > { %v9365_v5 = vpop.xlane.xlu0 %2953  ;;  %v3066_v21 = vsub.f32 %v11884_v3, %v9102_v43  ;;  %v9389_v43 = vpop.f32.mrf.mxu1  ;;  %7004 = vpow2.f32 %v3208_v32 }
 0x1e0   : > { %3652 = vadd.xlane.f32.xlu1 %v3651_v58  ;;  %11886 = vst [vmem:[#allocation27_spill] sm:$0xff] %v9389_v43  ;;  %v9391_v58 = vpop.eup %6988  ;;  %v11891_v43 = vld [vmem:[#allocation43_spill] sm:$0xff] }
 0x1e1   : > { %v9381_v53 = vpop.xlane.xlu1 %2758  ;;  %11887 = vst [vmem:[#allocation28_spill] sm:$0xff] %v9391_v58  ;;  %v3206_v3 = vmul.f32 1.442695, %v3066_v21  ;;  %v9397_v30 = vpop.eup %6990  ;;  %v3071_v63 = vsub.f32 %v11891_v43, %v9168_v37  ;;  %v3645_v21 = vsel %vm980_vm0, %v9391_v58, 0.0 }
 0x1e2   : > { %3649 = vadd.xlane.f32.xlu0 %v3648_v15  ;;  %v11888_v15 = vld [vmem:[#allocation40_spill] sm:$0xff]  ;;  %11889 = vst [vmem:[#allocation31_spill] sm:$0xff] %v9397_v30  ;;  %v3642_v32 = vsel %vm980_vm0, %v9397_v30, 0.0 }
 0x1e3   : > { %v9383_v27 = vpop.xlane.xlu0 %2755  ;;  %v3072_v36 = vsub.f32 %v11888_v15, %v9137_v59  ;;  %v9407_v59 = vpop.f32.mrf.mxu1  ;;  %7006 = vpow2.f32 %v3206_v3  ;;  %v3216_v58 = vmul.f32 1.442695, %v3071_v63 }
 0x1e4   : > { %3454 = vadd.xlane.f32.xlu1 %v3453_v40  ;;  %11892 = vst [vmem:[#allocation35_spill] sm:$0xff] %v9407_v59  ;;  %v9409_v40 = vpop.eup %6992  ;;  %7008 = vpow2.f32 %v3220_v16  ;;  %v11894_v59 = vld [vmem:[#allocation47_spill] sm:$0xff] }
 0x1e5   : > { %v9399_v0 = vpop.xlane.xlu1 %2950  ;;  %v3218_v15 = vmul.f32 1.442695, %v3072_v36  ;;  %v9415_v55 = vpop.eup %6994  ;;  %v3077_v3 = vsub.f32 %v11894_v59, %v9207_v47  ;;  %v3471_v36 = vsel %vm980_vm0, %v9409_v40, 0.0 }
 0x1e6   : > { %3451 = vadd.xlane.f32.xlu0 %v3450_v35  ;;  %v11893_v35 = vld [vmem:[#allocation44_spill] sm:$0xff]  ;;  %v3468_v16 = vsel %vm980_vm0, %v9415_v55, 0.0 }
 0x1e7   : > { %v9401_v4 = vpop.xlane.xlu0 %2947  ;;  %v3070_v57 = vsub.f32 %v11893_v35, %v9172_v34  ;;  %v9425_v34 = vpop.f32.mrf.mxu1  ;;  %7010 = vpow2.f32 %v3218_v15  ;;  %v3075_v15 = vsub.f32 %v8559_v41, %v9244_v25  ;;  %v6959_v41 = vld [vmem:[%s11481_s7] sm:$0xff]  }
 0x1e8   : > { %11890 = vst [vmem:[#allocation32_spill] sm:$0xff] %v9401_v4  ;;  %3646 = vadd.xlane.f32.xlu1 %v3645_v21  ;;  %11895 = vst [vmem:[#allocation36_spill] sm:$0xff] %v9425_v34  ;;  %v9427_v21 = vpop.eup %6996  ;;  %7012 = vpow2.f32 %v3216_v58  ;;  %v3228_v34 = vmul.f32 1.442695, %v3077_v3  ;;  %6812 = vmatprep.subr.bf16.mxu0 %v6959_v41 }
 0x1e9   : > { %v9417_v37 = vpop.xlane.xlu1 %2776  ;;  %v3214_v35 = vmul.f32 1.442695, %v3070_v57  ;;  %v9433_v63 = vpop.eup %6998  ;;  %v3465_v57 = vsel %vm980_vm0, %v9427_v21, 0.0  ;;  %6813 = vmatpush3.bf16.msra.mxu0 %v6959_v41 }
 0x1ea   : > { %3643 = vadd.xlane.f32.xlu0 %v3642_v32  ;;  %v11896_v32 = vld [vmem:[#allocation48_spill] sm:$0xff]  ;;  %v3462_v58 = vsel %vm980_vm0, %v9433_v63, 0.0 }
 0x1eb   : > { %v9419_v43 = vpop.xlane.xlu0 %2773  ;;  %v3076_v30 = vsub.f32 %v11896_v32, %v9213_v28  ;;  %v9443_v28 = vpop.f32.mrf.mxu1  ;;  %7014 = vpow2.f32 %v3214_v35 }
 0x1ec   : > { %3472 = vadd.xlane.f32.xlu1 %v3471_v36  ;;  %11899 = vst [vmem:[#allocation43_spill] sm:$0xff] %v9443_v28  ;;  %v9445_v36 = vpop.eup %7000  ;;  %7016 = vpow2.f32 %v3228_v34 }
 0x1ed   : > { %v9435_v47 = vpop.xlane.xlu1 %2968  ;;  %v3226_v32 = vmul.f32 1.442695, %v3076_v30  ;;  %v9454_v25 = vpop.eup %7002  ;;  %v3224_v30 = vmul.f32 1.442695, %v3075_v15 }
 0x1ee   : > { %3469 = vadd.xlane.f32.xlu0 %v3468_v16  ;;  %11897 = vst [vmem:[#allocation39_spill] sm:$0xff] %v9435_v47  ;;  %v11900_v16 = vld [vmem:[#allocation51_spill] sm:$0xff]  ;;  %11901 = vst [vmem:[#allocation44_spill] sm:$0xff] %v9454_v25  ;;  %v3480_v34 = vsel %vm980_vm0, %v9454_v25, 0.0 }
 0x1ef   : > { %v9437_v59 = vpop.xlane.xlu0 %2965  ;;  %v3074_v54 = vsub.f32 %v11900_v16, %v9248_v18  ;;  %v11902_v18 = vld [vmem:[#allocation54_spill] sm:$0xff]  ;;  %v9464_v16 = vpop.f32.mrf.mxu1  ;;  %7018 = vpow2.f32 %v3226_v32  ;;  %v11904_v47 = vld [vmem:[#allocation55_spill] sm:$0xff] }
 0x1f0   : > { %11898 = vst [vmem:[#allocation40_spill] sm:$0xff] %v9437_v59  ;;  %3466 = vadd.xlane.f32.xlu1 %v3465_v57  ;;  %v3081_v35 = vsub.f32 %v11902_v18, %v9276_v9  ;;  %v3483_v57 = vsel %vm980_vm0, %v9445_v36, 0.0  ;;  %11903 = vst [vmem:[#allocation47_spill] sm:$0xff] %v9464_v16  ;;  %v9466_v59 = vpop.eup %7004  ;;  %v3080_v4 = vsub.f32 %v11904_v47, %v9278_v7  ;;  %7020 = vpow2.f32 %v3224_v30  ;;  %v11907_v16 = vld [vmem:[#allocation58_spill] sm:$0xff] }
 0x1f1   : > { %v9456_v3 = vpop.xlane.xlu1 %2770  ;;  %v9472_v15 = vpop.eup %7006  ;;  %v3079_v32 = vsub.f32 %v11907_v16, %v9311_v12 }
 0x1f2   : > { %3463 = vadd.xlane.f32.xlu0 %v3462_v58  ;;  %v3222_v58 = vmul.f32 1.442695, %v3074_v54  ;;  %v3236_v41 = vmul.f32 1.442695, %v3081_v35  ;;  %v3477_v54 = vsel %vm980_vm0, %v9466_v59, 0.0  ;;  %v9482_v7 = vpop.f32.mrf.mxu1  ;;  %v9484_v47 = vpop.eup %7008  ;;  %v3474_v30 = vsel %vm980_vm0, %v9472_v15, 0.0 }
 0x1f3   : > { %v9458_v28 = vpop.xlane.xlu0 %2767  ;;  %11908 = vst [vmem:[#allocation54_spill] sm:$0xff] %v9482_v7  ;;  %11909 = vst [vmem:[#allocation55_spill] sm:$0xff] %v9484_v47  ;;  %v3232_v7 = vmul.f32 1.442695, %v3079_v32 }
 0x1f4   : > { %3484 = vadd.xlane.f32.xlu1 %v3483_v57  ;;  %7022 = vpow2.f32 %v3222_v58  ;;  %v3234_v57 = vmul.f32 1.442695, %v3080_v4  ;;  %v9490_v35 = vpop.eup %7010  ;;  %v3495_v4 = vsel %vm980_vm0, %v9484_v47, 0.0  ;;  %v11917_v47 = vld [vmem:[#allocation67_spill] sm:$0xff] }
 0x1f5   : > { %v9474_v9 = vpop.xlane.xlu1 %2962  ;;  %11911 = vst [vmem:[#allocation58_spill] sm:$0xff] %v9490_v35  ;;  %7024 = vpow2.f32 %v3236_v41  ;;  %v3492_v41 = vsel %vm980_vm0, %v9490_v35, 0.0 }
 0x1f6   : > { %3481 = vadd.xlane.f32.xlu0 %v3480_v34  ;;  %11905 = vst [vmem:[#allocation48_spill] sm:$0xff] %v9474_v9  ;;  %v11910_v34 = vld [vmem:[#allocation59_spill] sm:$0xff]  ;;  %7026 = vpow2.f32 %v3234_v57  ;;  %v3083_v57 = vsub.f32 %v11917_v47, %v9381_v53 }
 0x1f7   : > { %v9476_v18 = vpop.xlane.xlu0 %2959  ;;  %v3078_v25 = vsub.f32 %v11910_v34, %v9313_v23  ;;  %v9500_v23 = vpop.f32.mrf.mxu1  ;;  %7028 = vpow2.f32 %v3232_v7 }
 0x1f8   : > { %11906 = vst [vmem:[#allocation51_spill] sm:$0xff] %v9476_v18  ;;  %3478 = vadd.xlane.f32.xlu1 %v3477_v54  ;;  %v11912_v18 = vld [vmem:[#allocation63_spill] sm:$0xff]  ;;  %11913 = vst [vmem:[#allocation59_spill] sm:$0xff] %v9500_v23  ;;  %v9502_v54 = vpop.eup %7012 }
 0x1f9   : > { %v9492_v12 = vpop.xlane.xlu1 %2788  ;;  %v3085_v58 = vsub.f32 %v11912_v18, %v9345_v46  ;;  %v3230_v34 = vmul.f32 1.442695, %v3078_v25  ;;  %v9508_v32 = vpop.eup %7014  ;;  %v3489_v25 = vsel %vm980_vm0, %v9502_v54, 0.0 }
 0x1fa   : > { %3475 = vadd.xlane.f32.xlu0 %v3474_v30  ;;  %v11914_v30 = vld [vmem:[#allocation64_spill] sm:$0xff]  ;;  %11915 = vst [vmem:[#allocation63_spill] sm:$0xff] %v9508_v32  ;;  %v3486_v7 = vsel %vm980_vm0, %v9508_v32, 0.0 }
 0x1fb   : > { %v9494_v16 = vpop.xlane.xlu0 %2785  ;;  %v3084_v9 = vsub.f32 %v11914_v30, %v9347_v19  ;;  %v3244_v23 = vmul.f32 1.442695, %v3085_v58  ;;  %v9518_v19 = vpop.f32.mrf.mxu1  ;;  %7030 = vpow2.f32 %v3230_v34 }
 0x1fc   : > { %3496 = vadd.xlane.f32.xlu1 %v3495_v4  ;;  %11918 = vst [vmem:[#allocation67_spill] sm:$0xff] %v9518_v19  ;;  %v9520_v4 = vpop.eup %7016  ;;  %v3240_v19 = vmul.f32 1.442695, %v3083_v57 }
 0x1fd   : > { %v9510_v46 = vpop.xlane.xlu1 %2980  ;;  %11919 = vst [vmem:[#allocation135_spill] sm:$0xff] %v9520_v4  ;;  %v3242_v30 = vmul.f32 1.442695, %v3084_v9  ;;  %v9526_v58 = vpop.eup %7018  ;;  %7032 = vpow2.f32 %v3244_v23  ;;  %v3507_v9 = vsel %vm980_vm0, %v9520_v4, 0.0  ;;  %v11928_v4 = vld [vmem:[#allocation79_spill] sm:$0xff] }
 0x1fe   : > { %3493 = vadd.xlane.f32.xlu0 %v3492_v41  ;;  %v11920_v41 = vld [vmem:[#allocation68_spill] sm:$0xff]  ;;  %v3504_v23 = vsel %vm980_vm0, %v9526_v58, 0.0 }
 0x1ff   : > { %v9512_v18 = vpop.xlane.xlu0 %2977  ;;  %v3082_v35 = vsub.f32 %v11920_v41, %v9383_v27  ;;  %11921 = vst [vmem:[#allocation68_spill] sm:$0xff] %v9526_v58  ;;  %v9536_v27 = vpop.f32.mrf.mxu1  ;;  %7034 = vpow2.f32 %v3242_v30  ;;  %v3087_v30 = vsub.f32 %v11928_v4, %v9456_v3 }
 0x200   : > { %11916 = vst [vmem:[#allocation64_spill] sm:$0xff] %v9512_v18  ;;  %3490 = vadd.xlane.f32.xlu1 %v3489_v25  ;;  %v11922_v18 = vld [vmem:[#allocation73_spill] sm:$0xff]  ;;  %v9538_v25 = vpop.eup %7020  ;;  %7036 = vpow2.f32 %v3240_v19 }
 0x201   : > { %v9528_v53 = vpop.xlane.xlu1 %2782  ;;  %v3089_v34 = vsub.f32 %v11922_v18, %v9417_v37  ;;  %11923 = vst [vmem:[#allocation73_spill] sm:$0xff] %v9536_v27  ;;  %11924 = vst [vmem:[#allocation136_spill] sm:$0xff] %v9538_v25  ;;  %v3238_v41 = vmul.f32 1.442695, %v3082_v35  ;;  %v9544_v57 = vpop.eup %7022  ;;  %v3501_v35 = vsel %vm980_vm0, %v9538_v25, 0.0 }
 0x202   : > { %3487 = vadd.xlane.f32.xlu0 %v3486_v7  ;;  %v11925_v7 = vld [vmem:[#allocation74_spill] sm:$0xff]  ;;  %v3498_v19 = vsel %vm980_vm0, %v9544_v57, 0.0  ;;  %v3248_v25 = vmul.f32 1.442695, %v3087_v30 }
 0x203   : > { %v9530_v47 = vpop.xlane.xlu0 %2779  ;;  %v3088_v32 = vsub.f32 %v11925_v7, %v9419_v43  ;;  %11926 = vst [vmem:[#allocation74_spill] sm:$0xff] %v9544_v57  ;;  %v3252_v27 = vmul.f32 1.442695, %v3089_v34  ;;  %v9554_v43 = vpop.f32.mrf.mxu1  ;;  %7038 = vpow2.f32 %v3238_v41 }
 0x204   : > { %3508 = vadd.xlane.f32.xlu1 %v3507_v9  ;;  %11929 = vst [vmem:[#allocation79_spill] sm:$0xff] %v9554_v43  ;;  %v9556_v9 = vpop.eup %7024  ;;  %v11933_v43 = vld [vmem:[#allocation84_spill] sm:$0xff] }
 0x205   : > { %v9546_v37 = vpop.xlane.xlu1 %2974  ;;  %11930 = vst [vmem:[#allocation138_spill] sm:$0xff] %v9556_v9  ;;  %v3250_v7 = vmul.f32 1.442695, %v3088_v32  ;;  %v9562_v34 = vpop.eup %7026  ;;  %7040 = vpow2.f32 %v3252_v27  ;;  %v3519_v32 = vsel %vm980_vm0, %v9556_v9, 0.0  ;;  %v11939_v9 = vld [vmem:[#allocation88_spill] sm:$0xff] }
 0x206   : > { %3505 = vadd.xlane.f32.xlu0 %v3504_v23  ;;  %v11931_v23 = vld [vmem:[#allocation80_spill] sm:$0xff]  ;;  %v9568_v41 = vpop.f32.mrf.mxu1  ;;  %v3516_v27 = vsel %vm980_vm0, %v9562_v34, 0.0 }
 0x207   : > { %v9548_v18 = vpop.xlane.xlu0 %2971  ;;  %v3086_v58 = vsub.f32 %v11931_v23, %v9458_v28  ;;  %11932 = vst [vmem:[#allocation80_spill] sm:$0xff] %v9562_v34  ;;  %v9570_v28 = vpop.eup %7028  ;;  %7042 = vpow2.f32 %v3250_v7  ;;  %v11935_v23 = vld [vmem:[#allocation85_spill] sm:$0xff]  ;;  %v3091_v7 = vsub.f32 %v11939_v9, %v9528_v53 }
 0x208   : > { %11927 = vst [vmem:[#allocation137_spill] sm:$0xff] %v9548_v18  ;;  %3502 = vadd.xlane.f32.xlu1 %v3501_v35  ;;  %v3093_v18 = vsub.f32 %v11933_v43, %v9492_v12  ;;  %11934 = vst [vmem:[#allocation84_spill] sm:$0xff] %v9570_v28  ;;  %v3092_v57 = vsub.f32 %v11935_v23, %v9494_v16  ;;  %v9576_v30 = vpop.eup %7030  ;;  %7044 = vpow2.f32 %v3248_v25  ;;  %v9586_v16 = vpop.f32.mrf.mxu1 }
 0x209   : > { %v2801_v3 = vpop.xlane.xlu1 %2800  ;;  %v3246_v35 = vmul.f32 1.442695, %v3086_v58  ;;  %11936 = vst [vmem:[#allocation85_spill] sm:$0xff] %v9576_v30  ;;  %v3513_v58 = vsel %vm980_vm0, %v9570_v28, 0.0  ;;  %11940 = vst [vmem:[#allocation88_spill] sm:$0xff] %v9586_v16  ;;  %v3510_v25 = vsel %vm980_vm0, %v9576_v30, 0.0 }
 0x20a   : > { %3499 = vadd.xlane.f32.xlu0 %v3498_v19  ;;  %v3260_v19 = vmul.f32 1.442695, %v3093_v18  ;;  %v3258_v23 = vmul.f32 1.442695, %v3092_v57  ;;  %v11944_v28 = vld [vmem:[#allocation92_spill] sm:$0xff]  ;;  %v9599_v57 = vpop.f32.mrf.mxu1 }
 0x20b   : > { %v2798_v4 = vpop.xlane.xlu0 %2797  ;;  %7046 = vpow2.f32 %v3246_v35  ;;  %11945 = vst [vmem:[#allocation92_spill] sm:$0xff] %v9599_v57 }
 0x20c   : > { %3520 = vadd.xlane.f32.xlu1 %v3519_v32  ;;  %v9588_v32 = vpop.eup %7032  ;;  %7048 = vpow2.f32 %v3260_v19 }
 0x20d   : > { %v9578_v12 = vpop.xlane.xlu1 %2992  ;;  %11941 = vst [vmem:[#allocation141_spill] sm:$0xff] %v9588_v32  ;;  %v9594_v18 = vpop.eup %7034  ;;  %v3531_v35 = vsel %vm980_vm0, %v9588_v32, 0.0  ;;  %7050 = vpow2.f32 %v3258_v23 }
 0x20e   : > { %3517 = vadd.xlane.f32.xlu0 %v3516_v27  ;;  %11937 = vst [vmem:[#allocation139_spill] sm:$0xff] %v9578_v12  ;;  %v11942_v27 = vld [vmem:[#allocation89_spill] sm:$0xff]  ;;  %v3097_v12 = vsub.f32 %v11944_v28, %v2801_v3  ;;  %v9601_v16 = vpop.eup %7036  ;;  %v9615_v23 = vpop.f32.mrf.mxu1 }
 0x20f   : > { %v9580_v43 = vpop.xlane.xlu0 %2989  ;;  %v3090_v34 = vsub.f32 %v11942_v27, %v9530_v47  ;;  %11943 = vst [vmem:[#allocation89_spill] sm:$0xff] %v9594_v18  ;;  %11946 = vst [vmem:[#allocation142_spill] sm:$0xff] %v9601_v16 }
 0x210   : > { %11938 = vst [vmem:[#allocation140_spill] sm:$0xff] %v9580_v43  ;;  %3514 = vadd.xlane.f32.xlu1 %v3513_v58  ;;  %v3256_v43 = vmul.f32 1.442695, %v3091_v7  ;;  %v11947_v58 = vld [vmem:[#allocation93_spill] sm:$0xff]  ;;  %v9606_v30 = vpop.eup %7038  ;;  %v3268_v28 = vmul.f32 1.442695, %v3097_v12 }
 0x211   : > { %v2795_v53 = vpop.xlane.xlu1 %2794  ;;  %v3254_v47 = vmul.f32 1.442695, %v3090_v34  ;;  %v3096_v27 = vsub.f32 %v11947_v58, %v2798_v4  ;;  %11948 = vst [vmem:[#allocation93_spill] sm:$0xff] %v9606_v30  ;;  %v11949_v7 = vld [vmem:[#allocation98_spill] sm:$0xff]  ;;  %v3525_v34 = vsel %vm980_vm0, %v9601_v16, 0.0  ;;  %v11952_v58 = vld [vmem:[#allocation99_spill] sm:$0xff] }
 0x212   : > { %3511 = vadd.xlane.f32.xlu0 %v3510_v25  ;;  %v3528_v25 = vsel %vm980_vm0, %v9594_v18, 0.0  ;;  %7052 = vpow2.f32 %v3256_v43  ;;  %v3095_v32 = vsub.f32 %v11949_v7, %v2795_v53  ;;  %11950 = vst [vmem:[#allocation98_spill] sm:$0xff] %v9615_v23  ;;  %v9617_v4 = vpop.eup %7040  ;;  %v11954_v7 = vld [vmem:[#allocation103_spill] sm:$0xff] }
 0x213   : > { %v2792_v9 = vpop.xlane.xlu0 %2791  ;;  %11951 = vst [vmem:[#allocation143_spill] sm:$0xff] %v9617_v4  ;;  %7054 = vpow2.f32 %v3254_v47  ;;  %v3543_v23 = vsel %vm980_vm0, %v9617_v4, 0.0  ;;  %v9627_v47 = vpop.f32.mrf.mxu1  ;;  %v11964_v4 = vld [vmem:[#allocation109_spill] sm:$0xff] }
 0x214   : > { %3532 = vadd.xlane.f32.xlu1 %v3531_v35  ;;  %v3266_v35 = vmul.f32 1.442695, %v3096_v27  ;;  %v3094_v18 = vsub.f32 %v11952_v58, %v2792_v9  ;;  %v9622_v57 = vpop.eup %7042  ;;  %7056 = vpow2.f32 %v3268_v28  ;;  %v3264_v53 = vmul.f32 1.442695, %v3095_v32  ;;  %11955 = vst [vmem:[#allocation103_spill] sm:$0xff] %v9627_v47 }
 0x215   : > { %v9608_v19 = vpop.xlane.xlu1 %2986  ;;  %11953 = vst [vmem:[#allocation99_spill] sm:$0xff] %v9622_v57  ;;  %v9629_v27 = vpop.eup %7044 }
 0x216   : > { %3529 = vadd.xlane.f32.xlu0 %v3528_v25  ;;  %v3522_v25 = vsel %vm980_vm0, %v9606_v30, 0.0  ;;  %11956 = vst [vmem:[#allocation144_spill] sm:$0xff] %v9629_v27  ;;  %7058 = vpow2.f32 %v3266_v35  ;;  %v3262_v9 = vmul.f32 1.442695, %v3094_v18  ;;  %v9642_v35 = vpop.f32.mrf.mxu1 }
 0x217   : > { %v9610_v3 = vpop.xlane.xlu0 %2983  ;;  %7060 = vpow2.f32 %v3264_v53  ;;  %11961 = vst [vmem:[#allocation147_spill] sm:$0xff] %v9642_v35 }
 0x218   : > { %3526 = vadd.xlane.f32.xlu1 %v3525_v34  ;;  %v11957_v34 = vld [vmem:[#allocation104_spill] sm:$0xff]  ;;  %v9634_v30 = vpop.eup %7046  ;;  %7062 = vpow2.f32 %v3262_v9 }
 0x219   : > { %v2813_v12 = vpop.xlane.xlu1 %2812  ;;  %11958 = vst [vmem:[#allocation104_spill] sm:$0xff] %v9634_v30  ;;  %v9644_v18 = vpop.eup %7048 }
 0x21a   : > { %3523 = vadd.xlane.f32.xlu0 %v3522_v25  ;;  %v3101_v16 = vsub.f32 %v11954_v7, %v2813_v12  ;;  %v3540_v25 = vsel %vm980_vm0, %v9622_v57, 0.0  ;;  %v3537_v7 = vsel %vm980_vm0, %v9629_v27, 0.0  ;;  %11962 = vst [vmem:[#allocation148_spill] sm:$0xff] %v9644_v18  ;;  %v3555_v57 = vsel %vm980_vm0, %v9644_v18, 0.0 }
 0x21b   : > { %v2810_v43 = vpop.xlane.xlu0 %2809 }
 0x21c   : > { %v3100_v58 = vsub.f32 %v11957_v34, %v2810_v43  ;;  %3544 = vadd.xlane.f32.xlu1 %v3543_v23  ;;  %v3276_v12 = vmul.f32 1.442695, %v3101_v16  ;;  %v3534_v43 = vsel %vm980_vm0, %v9634_v30, 0.0  ;;  %v9648_v34 = vpop.eup %7050 }
 0x21d   : > { %v9636_v32 = vpop.xlane.xlu1 %3004  ;;  %11963 = vst [vmem:[#allocation149_spill] sm:$0xff] %v9648_v34 }
 0x21e   : > { %3541 = vadd.xlane.f32.xlu0 %v3540_v25  ;;  %11959 = vst [vmem:[#allocation145_spill] sm:$0xff] %v9636_v32  ;;  %v3274_v23 = vmul.f32 1.442695, %v3100_v58  ;;  %7064 = vpow2.f32 %v3276_v12 }
 0x21f   : > { %v9638_v28 = vpop.xlane.xlu0 %3001  ;;  %v9656_v9 = vpop.eup %7052 }
 0x220   : > { %11960 = vst [vmem:[#allocation146_spill] sm:$0xff] %v9638_v28  ;;  %3538 = vadd.xlane.f32.xlu1 %v3537_v7  ;;  %v9654_v28 = vpop.f32.mrf.mxu1  ;;  %11966 = vst [vmem:[#allocation150_spill] sm:$0xff] %v9656_v9  ;;  %7066 = vpow2.f32 %v3274_v23  ;;  %v3552_v7 = vsel %vm980_vm0, %v9648_v34, 0.0 }
 0x221   : > { %v2807_v25 = vpop.xlane.xlu1 %2806  ;;  %11965 = vst [vmem:[#allocation109_spill] sm:$0xff] %v9654_v28 }
 0x222   : > { %3535 = vadd.xlane.f32.xlu0 %v3534_v43  ;;  %v3099_v53 = vsub.f32 %v9028_v39, %v2807_v25  ;;  %v9660_v43 = vpop.eup %7054  ;;  %v3549_v25 = vsel %vm980_vm0, %v9656_v9, 0.0 }
 0x223   : > { %v2804_v16 = vpop.xlane.xlu0 %2803  ;;  %11967 = vst [vmem:[#allocation151_spill] sm:$0xff] %v9660_v43  ;;  %v9670_v23 = vpop.eup %7056 }
 0x224   : > { %v3098_v27 = vsub.f32 %v11964_v4, %v2804_v16  ;;  %v3272_v58 = vmul.f32 1.442695, %v3099_v53  ;;  %3556 = vadd.xlane.f32.xlu1 %v3555_v57  ;;  %v9668_v16 = vpop.f32.mrf.mxu1  ;;  %11971 = vst [vmem:[#allocation155_spill] sm:$0xff] %v9670_v23  ;;  %v3546_v57 = vsel %vm980_vm0, %v9660_v43, 0.0  ;;  %v9674_v53 = vpop.eup %7058  ;;  %v3567_v9 = vsel %vm980_vm0, %v9670_v23, 0.0 }
 0x225   : > { %v9662_v12 = vpop.xlane.xlu1 %2998  ;;  %11970 = vst [vmem:[#allocation154_spill] sm:$0xff] %v9668_v16  ;;  %11972 = vst [vmem:[#allocation156_spill] sm:$0xff] %v9674_v53  ;;  %v9682_v32 = vpop.eup %7060 }
 0x226   : > { %v3270_v39 = vmul.f32 1.442695, %v3098_v27  ;;  %3553 = vadd.xlane.f32.xlu0 %v3552_v7  ;;  %11968 = vst [vmem:[#allocation152_spill] sm:$0xff] %v9662_v12  ;;  %7068 = vpow2.f32 %v3272_v58  ;;  %v11973_v7 = vld [vmem:[#allocation115_spill] sm:$0xff]  ;;  %v11974_v58 = vld [vmem:[#allocation116_spill] sm:$0xff]  ;;  %v9680_v16 = vpop.f32.mrf.mxu1  ;;  %v9686_v43 = vpop.eup %7062  ;;  %v12051_v12 = vld [vmem:[#allocation69_spill] sm:$0xff] }
 0x227   : > { %v9664_v4 = vpop.xlane.xlu0 %2995  ;;  %11975 = vst [vmem:[#allocation115_spill] sm:$0xff] %v9680_v16  ;;  %11976 = vst [vmem:[#allocation116_spill] sm:$0xff] %v9682_v32 }
 0x228   : > { %11969 = vst [vmem:[#allocation153_spill] sm:$0xff] %v9664_v4  ;;  %7070 = vpow2.f32 %v3270_v39  ;;  %3550 = vadd.xlane.f32.xlu1 %v3549_v25  ;;  %v3564_v25 = vsel %vm980_vm0, %v9674_v53, 0.0  ;;  %11977 = vst [vmem:[#allocation157_spill] sm:$0xff] %v9686_v43 }
 0x229   : > { %v2825_v27 = vpop.xlane.xlu1 %2824 }
 0x22a   : > { %3547 = vadd.xlane.f32.xlu0 %v3546_v57  ;;  %v3105_v18 = vsub.f32 %v11973_v7, %v2825_v27  ;;  %v9692_v7 = vpop.f32.mrf.mxu1 }
 0x22b   : > { %v2822_v34 = vpop.xlane.xlu0 %2821  ;;  %11980 = vst [vmem:[#allocation160_spill] sm:$0xff] %v9692_v7 }
 0x22c   : > { %v3104_v30 = vsub.f32 %v11974_v58, %v2822_v34  ;;  %v3284_v39 = vmul.f32 1.442695, %v3105_v18  ;;  %3568 = vadd.xlane.f32.xlu1 %v3567_v9  ;;  %v3561_v58 = vsel %vm980_vm0, %v9682_v32, 0.0  ;;  %v9696_v18 = vpop.eup %7064  ;;  %v3558_v9 = vsel %vm980_vm0, %v9686_v43, 0.0  ;;  %v9703_v16 = vpop.f32.mrf.mxu1 }
 0x22d   : > { %v9688_v27 = vpop.xlane.xlu1 %3016  ;;  %11981 = vst [vmem:[#allocation161_spill] sm:$0xff] %v9696_v18  ;;  %v9700_v23 = vpop.eup %7066  ;;  %v3579_v32 = vsel %vm980_vm0, %v9696_v18, 0.0  ;;  %v11991_v18 = vld [vmem:[#allocation128_spill] sm:$0xff] }
 0x22e   : > { %v3282_v57 = vmul.f32 1.442695, %v3104_v30  ;;  %3565 = vadd.xlane.f32.xlu0 %v3564_v25  ;;  %11978 = vst [vmem:[#allocation158_spill] sm:$0xff] %v9688_v27  ;;  %7072 = vpow2.f32 %v3284_v39  ;;  %11982 = vst [vmem:[#allocation162_spill] sm:$0xff] %v9700_v23  ;;  %v11983_v25 = vld [vmem:[#allocation122_spill] sm:$0xff]  ;;  %v3576_v43 = vsel %vm980_vm0, %v9700_v23, 0.0 }
 0x22f   : > { %v9690_v34 = vpop.xlane.xlu0 %3013  ;;  %11984 = vst [vmem:[#allocation122_spill] sm:$0xff] %v9703_v16  ;;  %v11994_v16 = vld [vmem:[#allocation129_spill] sm:$0xff] }
 0x230   : > { %11979 = vst [vmem:[#allocation159_spill] sm:$0xff] %v9690_v34  ;;  %7074 = vpow2.f32 %v3282_v57  ;;  %3562 = vadd.xlane.f32.xlu1 %v3561_v58  ;;  %v11985_v57 = vld [vmem:[#allocation123_spill] sm:$0xff] }
 0x231   : > { %v2819_v30 = vpop.xlane.xlu1 %2818 }
 0x232   : > { %3559 = vadd.xlane.f32.xlu0 %v3558_v9  ;;  %v3103_v39 = vsub.f32 %v11983_v25, %v2819_v30 }
 0x233   : > { %v2816_v53 = vpop.xlane.xlu0 %2815  ;;  %v9708_v27 = vpop.eup %7068 }
 0x234   : > { %v3102_v34 = vsub.f32 %v11985_v57, %v2816_v53  ;;  %11986 = vst [vmem:[#allocation123_spill] sm:$0xff] %v9708_v27  ;;  %v3280_v58 = vmul.f32 1.442695, %v3103_v39  ;;  %3580 = vadd.xlane.f32.xlu1 %v3579_v32  ;;  %v9718_v53 = vpop.f32.mrf.mxu1  ;;  %v3573_v57 = vsel %vm980_vm0, %v9708_v27, 0.0 }
 0x235   : > { %v9712_v7 = vpop.eup %7070  ;;  %v9714_v30 = vpop.xlane.xlu1 %3010  ;;  %11990 = vst [vmem:[#allocation166_spill] sm:$0xff] %v9718_v53 }
 0x236   : > { %11987 = vst [vmem:[#allocation163_spill] sm:$0xff] %v9712_v7  ;;  %v3278_v9 = vmul.f32 1.442695, %v3102_v34  ;;  %3577 = vadd.xlane.f32.xlu0 %v3576_v43  ;;  %11988 = vst [vmem:[#allocation164_spill] sm:$0xff] %v9714_v30  ;;  %7076 = vpow2.f32 %v3280_v58  ;;  %v3570_v32 = vsel %vm980_vm0, %v9712_v7, 0.0  ;;  %v9727_v58 = vpop.f32.mrf.mxu1 }
 0x237   : > { %v9716_v25 = vpop.xlane.xlu0 %3007  ;;  %11993 = vst [vmem:[#allocation167_spill] sm:$0xff] %v9727_v58 }
 0x238   : > { %11989 = vst [vmem:[#allocation165_spill] sm:$0xff] %v9716_v25  ;;  %7078 = vpow2.f32 %v3278_v9  ;;  %3574 = vadd.xlane.f32.xlu1 %v3573_v57  ;;  %v9737_v7 = vpop.f32.mrf.mxu1 }
 0x239   : > { %v2837_v39 = vpop.xlane.xlu1 %2836  ;;  %11996 = vst [vmem:[#allocation168_spill] sm:$0xff] %v9737_v7 }
 0x23a   : > { %3571 = vadd.xlane.f32.xlu0 %v3570_v32  ;;  %v3109_v34 = vsub.f32 %v11991_v18, %v2837_v39 }
 0x23b   : > { %v2834_v43 = vpop.xlane.xlu0 %2833  ;;  %v9725_v23 = vpop.eup %7072 }
 0x23c   : > { %11992 = vst [vmem:[#allocation128_spill] sm:$0xff] %v9725_v23  ;;  %v3108_v9 = vsub.f32 %v11994_v16, %v2834_v43  ;;  %v3292_v53 = vmul.f32 1.442695, %v3109_v34  ;;  %v3591_v57 = vsel %vm980_vm0, %v9725_v23, 0.0 }
 0x23d   : > { %v9730_v25 = vpop.eup %7074  ;;  %v2831_v30 = vpop.xlane.xlu1 %2830  ;;  %3592 = vadd.xlane.f32.xlu1 %v3591_v57 }
 0x23e   : > { %11995 = vst [vmem:[#allocation129_spill] sm:$0xff] %v9730_v25  ;;  %v3290_v27 = vmul.f32 1.442695, %v3108_v9  ;;  %v3588_v32 = vsel %vm980_vm0, %v9730_v25, 0.0  ;;  %7080 = vpow2.f32 %v3292_v53  ;;  %v3107_v18 = vsub.f32 %v9160_v38, %v2831_v30  ;;  %v9746_v25 = vpop.f32.mrf.mxu1 }
 0x23f   : > { %3589 = vadd.xlane.f32.xlu0 %v3588_v32  ;;  %v2828_v39 = vpop.xlane.xlu0 %2827  ;;  %12000 = vst [vmem:[#allocation172_spill] sm:$0xff] %v9746_v25 }
 0x240   : > { %7082 = vpow2.f32 %v3290_v27  ;;  %v3106_v16 = vsub.f32 %v9162_v6, %v2828_v39  ;;  %v3288_v34 = vmul.f32 1.442695, %v3107_v18  ;;  %v9755_v18 = vpop.f32.mrf.mxu1 }
 0x241   : > { %v9740_v58 = vpop.xlane.xlu1 %3022  ;;  %12002 = vst [vmem:[#allocation174_spill] sm:$0xff] %v9755_v18 }
 0x242   : > { %v3286_v43 = vmul.f32 1.442695, %v3106_v16  ;;  %11997 = vst [vmem:[#allocation169_spill] sm:$0xff] %v9740_v58  ;;  %7084 = vpow2.f32 %v3288_v34 }
 0x243   : > { %v9742_v9 = vpop.xlane.xlu0 %3019  ;;  %v9744_v57 = vpop.eup %7076 }
 0x244   : > { %11998 = vst [vmem:[#allocation170_spill] sm:$0xff] %v9742_v9  ;;  %11999 = vst [vmem:[#allocation171_spill] sm:$0xff] %v9744_v57  ;;  %7086 = vpow2.f32 %v3286_v43  ;;  %v3585_v30 = vsel %vm980_vm0, %v9744_v57, 0.0 }
 0x245   : > { %v9748_v38 = vpop.eup %7078  ;;  %v2849_v27 = vpop.xlane.xlu1 %2848  ;;  %3586 = vadd.xlane.f32.xlu1 %v3585_v30 }
 0x246   : > { %12001 = vst [vmem:[#allocation173_spill] sm:$0xff] %v9748_v38  ;;  %v3582_v6 = vsel %vm980_vm0, %v9748_v38, 0.0  ;;  %v3113_v53 = vsub.f32 %v9199_v31, %v2849_v27  ;;  %v9761_v30 = vpop.f32.mrf.mxu1  ;;  %v12014_v38 = vld [vmem:[#allocation111_spill] sm:$0xff] }
 0x247   : > { %3583 = vadd.xlane.f32.xlu0 %v3582_v6  ;;  %v2846_v32 = vpop.xlane.xlu0 %2845  ;;  %12004 = vst [vmem:[#allocation176_spill] sm:$0xff] %v9761_v30  ;;  %v12015_v30 = vld [vmem:[#allocation30_spill] sm:$0xff] }
 0x248   : > { %v3112_v39 = vsub.f32 %v9189_v10, %v2846_v32  ;;  %v3300_v16 = vmul.f32 1.442695, %v3113_v53 }
 0x249   : > { %v2843_v43 = vpop.xlane.xlu1 %2842 }
 0x24a   : > { %v3298_v34 = vmul.f32 1.442695, %v3112_v39  ;;  %7088 = vpow2.f32 %v3300_v16  ;;  %v3111_v23 = vsub.f32 %v9217_v61, %v2843_v43 }
 0x24b   : > { %v2840_v57 = vpop.xlane.xlu0 %2839  ;;  %v9759_v25 = vpop.eup %7080 }
 0x24c   : > { %12003 = vst [vmem:[#allocation175_spill] sm:$0xff] %v9759_v25  ;;  %7090 = vpow2.f32 %v3298_v34  ;;  %v3110_v31 = vsub.f32 %v9209_v51, %v2840_v57  ;;  %v3296_v6 = vmul.f32 1.442695, %v3111_v23  ;;  %v3603_v10 = vsel %vm980_vm0, %v9759_v25, 0.0  ;;  %v9773_v51 = vpop.f32.mrf.mxu1 }
 0x24d   : > { %v9764_v27 = vpop.eup %7082  ;;  %v2861_v32 = vpop.xlane.xlu1 %2860  ;;  %3604 = vadd.xlane.f32.xlu1 %v3603_v10  ;;  %12007 = vst [vmem:[#allocation179_spill] sm:$0xff] %v9773_v51 }
 0x24e   : > { %12005 = vst [vmem:[#allocation177_spill] sm:$0xff] %v9764_v27  ;;  %v3294_v53 = vmul.f32 1.442695, %v3110_v31  ;;  %v3600_v61 = vsel %vm980_vm0, %v9764_v27, 0.0  ;;  %7092 = vpow2.f32 %v3296_v6  ;;  %v3117_v39 = vsub.f32 %v9229_v26, %v2861_v32 }
 0x24f   : > { %3601 = vadd.xlane.f32.xlu0 %v3600_v61  ;;  %v2858_v16 = vpop.xlane.xlu0 %2857  ;;  %v9771_v34 = vpop.eup %7084  ;;  %v12010_v61 = vld [vmem:[#allocation25_spill] sm:$0xff] }
 0x250   : > { %12006 = vst [vmem:[#allocation178_spill] sm:$0xff] %v9771_v34  ;;  %7094 = vpow2.f32 %v3294_v53  ;;  %v3116_v23 = vsub.f32 %v9242_v24, %v2858_v16  ;;  %v3308_v43 = vmul.f32 1.442695, %v3117_v39  ;;  %v3597_v31 = vsel %vm980_vm0, %v9771_v34, 0.0  ;;  %v12009_v53 = vld [vmem:[#allocation14_spill] sm:$0xff]  ;;  %v9785_v16 = vpop.f32.mrf.mxu1  ;;  %v12012_v34 = vld [vmem:[#allocation16_spill] sm:$0xff] }
 0x251   : > { %v9776_v57 = vpop.eup %7086  ;;  %v2855_v27 = vpop.xlane.xlu1 %2854  ;;  %3598 = vadd.xlane.f32.xlu1 %v3597_v31  ;;  %v3129_v24 = vsub.f32 %v12010_v61, %v12009_v53  ;;  %12011 = vst [vmem:[#allocation14_spill] sm:$0xff] %v9785_v16 }
 0x252   : > { %12008 = vst [vmem:[#allocation180_spill] sm:$0xff] %v9776_v57  ;;  %v3306_v10 = vmul.f32 1.442695, %v3116_v23  ;;  %v3594_v26 = vsel %vm980_vm0, %v9776_v57, 0.0  ;;  %7096 = vpow2.f32 %v3308_v43  ;;  %v3115_v6 = vsub.f32 %v9254_v52, %v2855_v27  ;;  %v12013_v23 = vld [vmem:[#allocation29_spill] sm:$0xff]  ;;  %v9794_v53 = vpop.f32.mrf.mxu1 }
 0x253   : > { %3595 = vadd.xlane.f32.xlu0 %v3594_v26  ;;  %v2852_v32 = vpop.xlane.xlu0 %2851  ;;  %v3127_v25 = vsub.f32 %v12013_v23, %v12012_v34  ;;  %v3126_v57 = vsub.f32 %v12015_v30, %v12014_v38  ;;  %v3332_v26 = vmul.f32 1.442695, %v3129_v24  ;;  %12017 = vst [vmem:[#allocation16_spill] sm:$0xff] %v9794_v53 }
 0x254   : > { %7098 = vpow2.f32 %v3306_v10  ;;  %v3114_v39 = vsub.f32 %v9246_v22, %v2852_v32  ;;  %v3304_v31 = vmul.f32 1.442695, %v3115_v6  ;;  %v12019_v22 = vld [vmem:[#allocation15_spill] sm:$0xff]  ;;  %v12020_v32 = vld [vmem:[#allocation26_spill] sm:$0xff] }
 0x255   : > { %v3449_v51 = vpop.xlane.xlu1 %3448  ;;  %v3128_v61 = vsub.f32 %v12020_v32, %v12019_v22  ;;  %v3328_v34 = vmul.f32 1.442695, %v3127_v25  ;;  %v3326_v30 = vmul.f32 1.442695, %v3126_v57  ;;  %v9810_v25 = vpop.f32.mrf.mxu1  ;;  %v6343_v57 = vld [vmem:[%s8181_s10 + $0x1d8] sm:$0xff]  }
 0x256   : > { %v3302_v43 = vmul.f32 1.442695, %v3114_v39  ;;  %7100 = vpow2.f32 %v3304_v31  ;;  %12024 = vst [vmem:[#allocation26_spill] sm:$0xff] %v9810_v25  ;;  %v12037_v25 = vld [vmem:[#allocation38_spill] sm:$0xff] }
 0x257   : > { %v3446_v52 = vpop.xlane.xlu0 %3445  ;;  %v9792_v27 = vpop.eup %7088  ;;  %v3330_v31 = vmul.f32 1.442695, %v3128_v61  ;;  %v9824_v61 = vld [vmem:[%s11478_s4] ss:$0 sm:$0xff] }
 0x258   : > { %12016 = vst [vmem:[#allocation25_spill] sm:$0xff] %v9792_v27  ;;  %7102 = vpow2.f32 %v3302_v43  ;;  %v3615_v38 = vsel %vm980_vm0, %v9792_v27, 0.0  ;;  %v12032_v27 = vld [vmem:[#allocation124_spill] sm:$0xff] }
 0x259   : > { %v9796_v10 = vpop.eup %7090  ;;  %7104 = vrcp.f32 %v3449_v51  ;;  %v9802_v6 = vpop.xlane.xlu1 %3640  ;;  %3616 = vadd.xlane.f32.xlu1 %v3615_v38 }
 0x25a   : > { %12018 = vst [vmem:[#allocation29_spill] sm:$0xff] %v9796_v10  ;;  %7106 = vrcp.f32 %v3446_v52  ;;  %12021 = vst [vmem:[#allocation111_spill] sm:$0xff] %v9802_v6  ;;  %v3612_v24 = vsel %vm980_vm0, %v9796_v10, 0.0  ;;  %v9839_v10 = vld [vmem:[%s11480_s6] ss:$0 sm:$0xff] }
 0x25b   : > { %3613 = vadd.xlane.f32.xlu0 %v3612_v24  ;;  %v9806_v39 = vpop.xlane.xlu0 %3637  ;;  %v9808_v23 = vpop.eup %7092  ;;  %7108 = vpow2.f32 %v3332_v26  ;;  %v9848_v6 = vld [vmem:[%s8181_s10 + $0x1e0] sm:$0xff]  }
 0x25c   : > { %12022 = vst [vmem:[#allocation30_spill] sm:$0xff] %v9806_v39  ;;  %12023 = vst [vmem:[#allocation15_spill] sm:$0xff] %v9808_v23  ;;  %7110 = vpow2.f32 %v3328_v34  ;;  %v3609_v43 = vsel %vm980_vm0, %v9808_v23, 0.0  ;;  %v12027_v34 = vld [vmem:[#allocation60_spill] sm:$0xff]  ;;  %v9828_v24 = vpop.f32.mrf.mxu1 }
 0x25d   : > { %v9812_v51 = vpop.eup %7094  ;;  %7112 = vpow2.f32 %v3326_v30  ;;  %3610 = vadd.xlane.f32.xlu1 %v3609_v43  ;;  %v3443_v52 = vpop.xlane.xlu1 %3442  ;;  %v1680_v38 = vadd.f32 %v9824_v61, %v12027_v34  ;;  %v6204_v30 = vunpack.c.l.bf16 %v6343_v57  ;;  %12028 = vst [vmem:[#allocation60_spill] sm:$0xff] %v9828_v24 }
 0x25e   : > { %12025 = vst [vmem:[#allocation181_spill] sm:$0xff] %v9812_v51  ;;  %v3606_v22 = vsel %vm980_vm0, %v9812_v51, 0.0  ;;  %7114 = vrcp.f32 %v3443_v52  ;;  %v12030_v52 = vld [vmem:[#allocation2_spill] sm:$0xff]  ;;  %v6205_v51 = vunpack.c.h.bf16 %v6343_v57 }
 0x25f   : > { %3607 = vadd.xlane.f32.xlu0 %v3606_v22  ;;  %v3440_v32 = vpop.xlane.xlu0 %3439  ;;  %v9819_v26 = vpop.eup %7096  ;;  %v1683_v22 = vadd.f32 %v9824_v61, %v12030_v52  ;;  %v9856_v53 = vmul.f32 %v6204_v30, %v1680_v38  ;;  %v6208_v30 = vunpack.c.l.bf16 %v9848_v6 }
 0x260   : > { %12026 = vst [vmem:[#allocation182_spill] sm:$0xff] %v9819_v26  ;;  %7116 = vrcp.f32 %v3440_v32  ;;  %v3627_v23 = vsel %vm980_vm0, %v9819_v26, 0.0  ;;  %v12036_v26 = vld [vmem:[#allocation125_spill] sm:$0xff] }
 0x261   : > { %v9830_v43 = vpop.eup %7098  ;;  %7118 = vpow2.f32 %v3330_v31  ;;  %3628 = vadd.xlane.f32.xlu1 %v3627_v23  ;;  %v9841_v34 = vpop.xlane.xlu1 %3634  ;;  %v12033_v31 = vld [vmem:[#allocation37_spill] sm:$0xff]  ;;  %v3130_v24 = vsub.f32 %v12037_v25, %v12036_v26  ;;  %12038 = vst [vmem:[#allocation125_spill] sm:$0xff] %v9856_v53  ;;  %v12044_v25 = vld [vmem:[#allocation118_spill] sm:$0xff] }
 0x262   : > { %12029 = vst [vmem:[#allocation183_spill] sm:$0xff] %v9830_v43  ;;  %12031 = vst [vmem:[#allocation2_spill] sm:$0xff] %v9841_v34  ;;  %v3624_v32 = vsel %vm980_vm0, %v9830_v43, 0.0  ;;  %v3131_v39 = vsub.f32 %v12033_v31, %v12032_v27  ;;  %v9858_v23 = vpop.f32.mrf.mxu1  ;;  %v9862_v43 = vmul.f32 %v6205_v51, %v1683_v22  ;;  %v12042_v27 = vld [vmem:[#allocation3_spill] sm:$0xff]  ;;  %v12045_v26 = vld [vmem:[#allocation33_spill] sm:$0xff] }
 0x263   : > { %3625 = vadd.xlane.f32.xlu0 %v3624_v32  ;;  %v9850_v57 = vpop.xlane.xlu0 %3631  ;;  %v9852_v52 = vpop.eup %7100  ;;  %12039 = vst [vmem:[#allocation38_spill] sm:$0xff] %v9858_v23  ;;  %v1688_v31 = vadd.f32 %v9824_v61, %v12042_v27  ;;  %v12043_v32 = vld [vmem:[#allocation83_spill] sm:$0xff]  ;;  %v3133_v38 = vsub.f32 %v12045_v26, %v12044_v25  ;;  %v12046_v23 = vld [vmem:[#allocation81_spill] sm:$0xff]  ;;  %v3334_v25 = vmul.f32 1.442695, %v3130_v24 }
 0x264   : > { %12034 = vst [vmem:[#allocation124_spill] sm:$0xff] %v9850_v57  ;;  %12035 = vst [vmem:[#allocation37_spill] sm:$0xff] %v9852_v52  ;;  %v1787_v57 = vadd.f32 %v12043_v32, %v9839_v10  ;;  %v3621_v16 = vsel %vm980_vm0, %v9852_v52, 0.0  ;;  %v1784_v7 = vadd.f32 %v12046_v23, %v9839_v10  ;;  %v3336_v9 = vmul.f32 1.442695, %v3131_v39  ;;  %v9878_v32 = vld [vmem:[%s8181_s10 + $0x1e8] sm:$0xff]   ;;  %v9881_v26 = vpop.f32.mrf.mxu1 }
 0x265   : > { %v9860_v34 = vpop.eup %7102  ;;  %12041 = vst [vmem:[#allocation185_spill] sm:$0xff] %v9862_v43  ;;  %3622 = vadd.xlane.f32.xlu1 %v3621_v16  ;;  %v3461_v51 = vpop.xlane.xlu1 %3460  ;;  %12047 = vst [vmem:[#allocation3_spill] sm:$0xff] %v9881_v26  ;;  %v3024_v16 = vsel %vm980_vm0, %v9856_v53, -inf  ;;  %v12050_v39 = vld [vmem:[#allocation34_spill] sm:$0xff]  ;;  %v3027_v24 = vsel %vm980_vm0, %v9862_v43, -inf }
 0x266   : > { %12040 = vst [vmem:[#allocation184_spill] sm:$0xff] %v9860_v34  ;;  %v7105_v18 = vpop.eup %7104  ;;  %v3618_v22 = vsel %vm980_vm0, %v9860_v34, 0.0  ;;  %7120 = vrcp.f32 %v3461_v51  ;;  %v12049_v34 = vld [vmem:[#allocation119_spill] sm:$0xff]  ;;  %v12058_v26 = vld [vmem:[#allocation86_spill] sm:$0xff]  ;;  %v9919_v35 = vpop.f32.mrf.mxu1 }
 0x267   : > { %v7107_v27 = vpop.eup %7106  ;;  %v3953_v52 = vmul.f32 %v7105_v18, %v9268_v8  ;;  %3619 = vadd.xlane.f32.xlu0 %v3618_v22  ;;  %v3458_v58 = vpop.xlane.xlu0 %3457  ;;  %v3132_v4 = vsub.f32 %v12050_v39, %v12049_v34  ;;  %v1696_v8 = vadd.f32 %v9824_v61, %v12051_v12  ;;  %v9899_v22 = vmul.f32 %v6208_v30, %v1688_v31  ;;  %v12055_v12 = vld [vmem:[#allocation130_spill] sm:$0xff]  ;;  %v12057_v39 = vld [vmem:[#allocation72_spill] sm:$0xff] }
 0x268   : > { %v3952_v28 = vmul.f32 %v7107_v27, %v9274_v56  ;;  %7122 = vrcp.f32 %v3458_v58  ;;  %v9886_v23 = vpop.eup %7108  ;;  %v3340_v56 = vmul.f32 1.442695, %v3133_v38  ;;  %v6212_v58 = vunpack.c.l.bf16 %v9878_v32  ;;  %v12061_v30 = vld [vmem:[#allocation42_spill] sm:$0xff]  ;;  %12063 = vst [vmem:[#allocation34_spill] sm:$0xff] %v9919_v35  ;;  %v12066_v35 = vld [vmem:[#allocation71_spill] sm:$0xff]  ;;  %v9937_v47 = vpop.f32.mrf.mxu1 }
 0x269   : > { %12048 = vst [vmem:[#allocation83_spill] sm:$0xff] %v9886_v23  ;;  %v9892_v18 = vmul.f32 %v3953_v52, %v1787_v57  ;;  %v9896_v51 = vpop.eup %7110  ;;  %3028 = vmax.xlane.f32.xlu1 %v3027_v24  ;;  %v9903_v53 = vpop.xlane.xlu1 %3652  ;;  %7124 = vpow2.f32 %v3336_v9  ;;  %v12056_v57 = vld [vmem:[#allocation41_spill] sm:$0xff]  ;;  %v1691_v43 = vadd.f32 %v9824_v61, %v12057_v39  ;;  %v1779_v38 = vadd.f32 %v9839_v10, %v12058_v26 }
 0x26a   : > { %12052 = vst [vmem:[#allocation118_spill] sm:$0xff] %v9896_v51  ;;  %v9901_v27 = vmul.f32 %v3952_v28, %v1784_v7  ;;  %12053 = vst [vmem:[#allocation33_spill] sm:$0xff] %v9903_v53  ;;  %v9905_v34 = vpop.eup %7112  ;;  %v3137_v52 = vsub.f32 %v12056_v57, %v12055_v12  ;;  %7126 = vpow2.f32 %v3334_v25  ;;  %v12060_v7 = vld [vmem:[#allocation131_spill] sm:$0xff]  ;;  %v3338_v39 = vmul.f32 1.442695, %v3132_v4 }
 0x26b   : > { %12054 = vst [vmem:[#allocation81_spill] sm:$0xff] %v9905_v34  ;;  %3025 = vmax.xlane.f32.xlu0 %v3024_v16  ;;  %v9913_v31 = vpop.xlane.xlu0 %3649  ;;  %v7115_v28 = vpop.eup %7114  ;;  %v3136_v24 = vsub.f32 %v12061_v30, %v12060_v7  ;;  %v12062_v53 = vld [vmem:[#allocation7_spill] sm:$0xff]  ;;  %v3657_v26 = vsel %vm980_vm0, %v9896_v51, 0.0  ;;  %v6209_v25 = vunpack.c.h.bf16 %v9848_v6  ;;  %7128 = vpow2.f32 %v3340_v56  ;;  %v12065_v7 = vld [vmem:[#allocation45_spill] sm:$0xff] }
 0x26c   : > { %12059 = vst [vmem:[#allocation119_spill] sm:$0xff] %v9913_v31  ;;  %v1776_v9 = vadd.f32 %v9839_v10, %v12062_v53  ;;  %v4207_v12 = vpack.c.bf16 %v9892_v18, %v9901_v27  ;;  %v3951_v16 = vmul.f32 %v7115_v28, %v9303_v42  ;;  %v3135_v53 = vsub.f32 %v12065_v7, %v9187_v1  ;;  %v12068_v7 = vld [vmem:[#allocation46_spill] sm:$0xff] }
 0x26d   : > { %v7117_v57 = vpop.eup %7116  ;;  %3658 = vadd.xlane.f32.xlu1 %v3657_v26  ;;  %v3455_v30 = vpop.xlane.xlu1 %3454  ;;  %v3654_v18 = vsel %vm980_vm0, %v9905_v34, 0.0  ;;  %v3348_v27 = vmul.f32 1.442695, %v3137_v52  ;;  %v1699_v51 = vadd.f32 %v9824_v61, %v12066_v35  ;;  %v3346_v28 = vmul.f32 1.442695, %v3136_v24  ;;  %v12067_v26 = vld [vmem:[#allocation134_spill] sm:$0xff] }
 0x26e   : > { %v9927_v31 = vpop.eup %7118  ;;  %v3950_v4 = vmul.f32 %v7117_v57, %v9309_v2  ;;  %7130 = vrcp.f32 %v3455_v30  ;;  %v4079_v6 = vmul.f32 %v3951_v16, %v1779_v38  ;;  %v6213_v56 = vunpack.c.h.bf16 %v9878_v32  ;;  %v12069_v32 = vld [vmem:[#allocation49_spill] sm:$0xff]  ;;  %v12070_v16 = vld [vmem:[#allocation91_spill] sm:$0xff] }
 0x26f   : > { %12064 = vst [vmem:[#allocation69_spill] sm:$0xff] %v9927_v31  ;;  %3655 = vadd.xlane.f32.xlu0 %v3654_v18  ;;  %v3452_v42 = vpop.xlane.xlu0 %3451  ;;  %v3134_v34 = vsub.f32 %v12068_v7, %v12067_v26  ;;  %v3663_v2 = vsel %vm980_vm0, %v9886_v23, 0.0  ;;  %v3660_v35 = vsel %vm980_vm0, %v9927_v31, 0.0  ;;  %v9945_v52 = vmul.f32 %v6209_v25, %v1691_v43  ;;  %v9960_v25 = vld [vmem:[%s8181_s10 + $0x1f8] sm:$0xff]   ;;  %v9970_v7 = vld [vmem:[%s8181_s10 + $0x1f0] sm:$0xff]  }
 0x270   : > { %7132 = vrcp.f32 %v3452_v42  ;;  %v4078_v1 = vmul.f32 %v3950_v4, %v1776_v9  ;;  %v3344_v38 = vmul.f32 1.442695, %v3135_v53  ;;  %v3141_v24 = vsub.f32 %v12069_v32, %v9226_v50  ;;  %v12072_v50 = vld [vmem:[#allocation87_spill] sm:$0xff]  ;;  %v9964_v42 = vpop.f32.mrf.mxu1  ;;  %v12085_v23 = vld [vmem:[#allocation57_spill] sm:$0xff] }
 0x271   : > { %7134 = vpow2.f32 %v3338_v39  ;;  %3664 = vadd.xlane.f32.xlu1 %v3663_v2  ;;  %v9949_v57 = vpop.xlane.xlu1 %3646  ;;  %v1803_v30 = vadd.f32 %v12070_v16, %v9839_v10  ;;  %v9955_v43 = vmul.f32 %v6212_v58, %v1696_v8  ;;  %v9957_v39 = vmul.f32 %v6213_v56, %v1699_v51  ;;  %v12074_v2 = vld [vmem:[#allocation75_spill] sm:$0xff] }
 0x272   : > { %v4206_v9 = vpack.c.bf16 %v4079_v6, %v4078_v1  ;;  %7136 = vpow2.f32 %v3348_v27  ;;  %v1800_v53 = vadd.f32 %v12072_v50, %v9839_v10  ;;  %v3342_v6 = vmul.f32 1.442695, %v3134_v34  ;;  %v12073_v1 = vld [vmem:[#allocation50_spill] sm:$0xff]  ;;  %v9989_v16 = vpop.f32.mrf.mxu1 }
 0x273   : > { %3661 = vadd.xlane.f32.xlu0 %v3660_v35  ;;  %v9953_v18 = vpop.xlane.xlu0 %3643  ;;  %v7121_v4 = vpop.eup %7120  ;;  %7138 = vpow2.f32 %v3346_v28  ;;  %12071 = vst [vmem:[#allocation130_spill] sm:$0xff] %v9955_v43  ;;  %v3140_v26 = vsub.f32 %v12073_v1, %v9231_v33  ;;  %v3033_v8 = vsel %vm980_vm0, %v9945_v52, -inf  ;;  %v3356_v58 = vmul.f32 1.442695, %v3141_v24 }
 0x274   : > { %6814 = vmatprep.mubr.msk.bf16.mxu0 %vm980_vm0, %v4206_v9  ;;  %v3957_v51 = vmul.f32 %v7121_v4, %v9337_v13  ;;  %7140 = vpow2.f32 %v3344_v38  ;;  %v3030_v56 = vsel %vm980_vm0, %v9899_v22, -inf  ;;  %v1712_v33 = vadd.f32 %v9824_v61, %v12074_v2  ;;  %v12076_v38 = vld [vmem:[#allocation5_spill] sm:$0xff]  ;;  %v12082_v2 = vld [vmem:[#allocation94_spill] sm:$0xff] }
 0x275   : > { %v7123_v27 = vpop.eup %7122  ;;  %6815 = vmatmul.mubr.msk.bf16.vlgmr.msra.gmra.mxu0 %vm980_vm0, %v4207_v12  ;;  %3034 = vmax.xlane.f32.xlu1 %v3033_v8  ;;  %v3473_v28 = vpop.xlane.xlu1 %3472  ;;  %v6220_v35 = vunpack.c.l.bf16 %v9960_v25  ;;  %v1704_v24 = vadd.f32 %v9824_v61, %v12076_v38  ;;  %v6216_v9 = vunpack.c.l.bf16 %v9970_v7  ;;  %v3354_v50 = vmul.f32 1.442695, %v3140_v26  ;;  %v12079_v8 = vld [vmem:[#allocation53_spill] sm:$0xff]  ;;  %v12083_v38 = vld [vmem:[#allocation90_spill] sm:$0xff] }
 0x276   : > { %v3956_v34 = vmul.f32 %v7123_v27, %v9343_v44  ;;  %7142 = vrcp.f32 %v3473_v28  ;;  %v9982_v32 = vmul.f32 %v3957_v51, %v1803_v30  ;;  %v9984_v13 = vpop.eup %7124  ;;  %v12078_v27 = vld [vmem:[#allocation52_spill] sm:$0xff]  ;;  %v3039_v1 = vsel %vm980_vm0, %v9957_v39, -inf }
 0x277   : > { %3031 = vmax.xlane.f32.xlu0 %v3030_v56  ;;  %v3470_v12 = vpop.xlane.xlu0 %3469  ;;  %12075 = vst [vmem:[#allocation41_spill] sm:$0xff] %v9984_v13  ;;  %v9993_v4 = vpop.eup %7126  ;;  %v3139_v30 = vsub.f32 %v12078_v27, %v9260_v17  ;;  %v3138_v51 = vsub.f32 %v12079_v8, %v9262_v45  ;;  %v10007_v26 = vmul.f32 %v6220_v35, %v1712_v33  ;;  %v12081_v17 = vld [vmem:[#allocation78_spill] sm:$0xff]  ;;  %v3669_v33 = vsel %vm980_vm0, %v9984_v13, 0.0 }
 0x278   : > { %7144 = vrcp.f32 %v3470_v12  ;;  %v9991_v44 = vmul.f32 %v3956_v34, %v1800_v53  ;;  %12077 = vst [vmem:[#allocation72_spill] sm:$0xff] %v9993_v4  ;;  %v3036_v53 = vsel %vm980_vm0, %v9955_v43, -inf  ;;  %v1707_v34 = vadd.f32 %v9824_v61, %v12081_v17 }
 0x279   : > { %7146 = vpow2.f32 %v3342_v6  ;;  %3040 = vmax.xlane.f32.xlu1 %v3039_v1  ;;  %v3467_v28 = vpop.xlane.xlu1 %3466  ;;  %v10005_v6 = vpop.eup %7128  ;;  %v1792_v27 = vadd.f32 %v9839_v10, %v12083_v38  ;;  %v3666_v35 = vsel %vm980_vm0, %v9993_v4, 0.0  ;;  %v3352_v17 = vmul.f32 1.442695, %v3139_v30  ;;  %v12087_v4 = vld [vmem:[#allocation77_spill] sm:$0xff] }
 0x27a   : > { %7148 = vpow2.f32 %v3356_v58  ;;  %12080 = vst [vmem:[#allocation86_spill] sm:$0xff] %v10005_v6  ;;  %v1795_v58 = vadd.f32 %v9839_v10, %v12082_v2  ;;  %v10015_v1 = vpop.f32.mrf.mxu1  ;;  %v12084_v2 = vld [vmem:[#allocation56_spill] sm:$0xff]  ;;  %v6217_v56 = vunpack.c.h.bf16 %v9970_v7  ;;  %v3350_v38 = vmul.f32 1.442695, %v3138_v51 }
 0x27b   : > { %7150 = vrcp.f32 %v3467_v28  ;;  %3037 = vmax.xlane.f32.xlu0 %v3036_v53  ;;  %v3464_v45 = vpop.xlane.xlu0 %3463  ;;  %v7131_v12 = vpop.eup %7130  ;;  %v3145_v28 = vsub.f32 %v12084_v2, %v9292_v14  ;;  %v1715_v30 = vadd.f32 %v9824_v61, %v12087_v4  ;;  %v6221_v14 = vunpack.c.h.bf16 %v9960_v25  ;;  %v12094_v2 = vld [vmem:[#allocation62_spill] sm:$0xff] }
 0x27c   : > { %7152 = vrcp.f32 %v3464_v45  ;;  %v3955_v53 = vmul.f32 %v7131_v12, %v9373_v29  ;;  %v3144_v45 = vsub.f32 %v12085_v23, %v9294_v60  ;;  %v10035_v51 = vmul.f32 %v6216_v9, %v1704_v24  ;;  %v10037_v60 = vpop.f32.mrf.mxu1 }
 0x27d   : > { %v7133_v8 = vpop.eup %7132  ;;  %7154 = vpow2.f32 %v3354_v50  ;;  %3670 = vadd.xlane.f32.xlu1 %v3669_v33  ;;  %v3485_v31 = vpop.xlane.xlu1 %3484  ;;  %v3364_v61 = vmul.f32 1.442695, %v3145_v28  ;;  %v10045_v4 = vmul.f32 %v6217_v56, %v1707_v34  ;;  %v3142_v28 = vsub.f32 %v12094_v2, %v9329_v62  ;;  %v12103_v2 = vld [vmem:[#allocation114_spill] sm:$0xff] }
 0x27e   : > { %v3954_v13 = vmul.f32 %v7133_v8, %v9379_v48  ;;  %v10028_v43 = vpop.eup %7134  ;;  %7156 = vrcp.f32 %v3485_v31  ;;  %v4083_v7 = vmul.f32 %v3955_v53, %v1795_v58  ;;  %v3675_v48 = vsel %vm980_vm0, %v10005_v6, 0.0  ;;  %v12090_v31 = vld [vmem:[#allocation61_spill] sm:$0xff]  ;;  %v12095_v53 = vld [vmem:[#allocation100_spill] sm:$0xff] }
 0x27f   : > { %12086 = vst [vmem:[#allocation131_spill] sm:$0xff] %v10028_v43  ;;  %3667 = vadd.xlane.f32.xlu0 %v3666_v35  ;;  %v3482_v29 = vpop.xlane.xlu0 %3481  ;;  %v10033_v50 = vpop.eup %7136  ;;  %v3143_v25 = vsub.f32 %v12090_v31, %v9327_v11  ;;  %v3362_v58 = vmul.f32 1.442695, %v3144_v45  ;;  %v3672_v9 = vsel %vm980_vm0, %v10028_v43, 0.0  ;;  %v12096_v45 = vld [vmem:[#allocation105_spill] sm:$0xff]  ;;  %v3045_v62 = vsel %vm980_vm0, %v10045_v4, -inf }
 0x280   : > { %12088 = vst [vmem:[#allocation42_spill] sm:$0xff] %v10033_v50  ;;  %7158 = vrcp.f32 %v3482_v29  ;;  %v4082_v23 = vmul.f32 %v3954_v13, %v1792_v27  ;;  %v10041_v12 = vpop.eup %7138  ;;  %v10051_v13 = vmul.f32 %v6221_v14, %v1715_v30  ;;  %v12092_v27 = vld [vmem:[#allocation97_spill] sm:$0xff]  ;;  %v1811_v30 = vadd.f32 %v9839_v10, %v12096_v45  ;;  %v10063_v14 = vpop.f32.mrf.mxu1 }
 0x281   : > { %12089 = vst [vmem:[#allocation7_spill] sm:$0xff] %v10041_v12  ;;  %7160 = vpow2.f32 %v3352_v17  ;;  %3676 = vadd.xlane.f32.xlu1 %v3675_v48  ;;  %v3479_v24 = vpop.xlane.xlu1 %3478  ;;  %v10049_v35 = vpop.eup %7140  ;;  %v1816_v8 = vadd.f32 %v12092_v27, %v9839_v10  ;;  %v12093_v17 = vld [vmem:[#allocation102_spill] sm:$0xff]  ;;  %v12097_v48 = vpack.c.bf16 %v9982_v32, %v9991_v44 }
 0x282   : > { %7162 = vpow2.f32 %v3350_v38  ;;  %v4208_v33 = vpack.c.bf16 %v4083_v7, %v4082_v23  ;;  %12091 = vst [vmem:[#allocation45_spill] sm:$0xff] %v10049_v35  ;;  %v1819_v11 = vadd.f32 %v12093_v17, %v9839_v10  ;;  %v1808_v38 = vadd.f32 %v9839_v10, %v12095_v53  ;;  %v12102_v17 = vld [vmem:[#allocation110_spill] sm:$0xff]  ;;  %v10090_v45 = vpop.f32.mrf.mxu1 }
 0x283   : > { %7164 = vrcp.f32 %v3479_v24  ;;  %3673 = vadd.xlane.f32.xlu0 %v3672_v9  ;;  %v3476_v56 = vpop.xlane.xlu0 %3475  ;;  %v7143_v34 = vpop.eup %7142  ;;  %v3360_v7 = vmul.f32 1.442695, %v3143_v25  ;;  %v12099_v24 = vld [vmem:[#allocation65_spill] sm:$0xff]  ;;  %v12101_v25 = vld [vmem:[#allocation108_spill] sm:$0xff]  ;;  %v1835_v53 = vadd.f32 %v12103_v2, %v9839_v10 }
 0x284   : > { %7166 = vrcp.f32 %v3476_v56  ;;  %6818 = vmatprep.mubr.msk.bf16.mxu0 %vm980_vm0, %v4208_v33  ;;  %v3961_v23 = vmul.f32 %v7143_v34, %v9409_v40  ;;  %v3149_v9 = vsub.f32 %v12099_v24, %v9363_v49  ;;  %v1832_v27 = vadd.f32 %v12101_v25, %v9839_v10 }
 0x285   : > { %v7145_v29 = vpop.eup %7144  ;;  %7168 = vpow2.f32 %v3364_v61  ;;  %6819 = vmatmul.mubr.msk.bf16.gmra.mxu0 %vm980_vm0, %v12097_v48  ;;  %3046 = vmax.xlane.f32.xlu1 %v3045_v62  ;;  %v3497_v33 = vpop.xlane.xlu1 %3496  ;;  %v3042_v61 = vsel %vm980_vm0, %v10035_v51, -inf  ;;  %v10086_v40 = vadd.f32 %v9839_v10, %v12102_v17  ;;  %v3358_v34 = vmul.f32 1.442695, %v3142_v28  ;;  %v12104_v48 = vld [vmem:[#allocation66_spill] sm:$0xff] }
 0x286   : > { %v10073_v31 = vpop.eup %7146  ;;  %7170 = vpow2.f32 %v3362_v58  ;;  %v3960_v32 = vmul.f32 %v7145_v29, %v9415_v55  ;;  %v4089_v49 = vmul.f32 %v3961_v23, %v1819_v11  ;;  %v3148_v62 = vsub.f32 %v12104_v48, %v9365_v5 }
 0x287   : > { %12098 = vst [vmem:[#allocation71_spill] sm:$0xff] %v10073_v31  ;;  %v10080_v44 = vpop.eup %7148  ;;  %7172 = vrcp.f32 %v3497_v33  ;;  %3043 = vmax.xlane.f32.xlu0 %v3042_v61  ;;  %v3494_v58 = vpop.xlane.xlu0 %3493  ;;  %v3051_v24 = vsel %vm980_vm0, %v10051_v13, -inf  ;;  %v3372_v11 = vmul.f32 1.442695, %v3149_v9  ;;  %v3048_v23 = vsel %vm980_vm0, %v10007_v26, -inf }
 0x288   : > { %12100 = vst [vmem:[#allocation134_spill] sm:$0xff] %v10080_v44  ;;  %v7151_v56 = vpop.eup %7150  ;;  %7174 = vrcp.f32 %v3494_v58  ;;  %v4088_v55 = vmul.f32 %v3960_v32, %v1816_v8  ;;  %v10106_v5 = vadd.f32 %v9335_v20, %v9839_v10  ;;  %v10108_v58 = vpop.f32.mrf.mxu1  ;;  %v12107_v20 = vld [vmem:[#allocation4_spill] sm:$0xff] }
 0x289   : > { %v7153_v29 = vpop.eup %7152  ;;  %7176 = vpow2.f32 %v3360_v7  ;;  %v3959_v33 = vmul.f32 %v7151_v56, %v9427_v21  ;;  %3052 = vmax.xlane.f32.xlu1 %v3051_v24  ;;  %v3491_v28 = vpop.xlane.xlu1 %3490  ;;  %v12106_v7 = vld [vmem:[#allocation117_spill] sm:$0xff]  ;;  %v12109_v24 = vld [vmem:[#allocation32_spill] sm:$0xff] }
 0x28a   : > { %v3958_v61 = vmul.f32 %v7153_v29, %v9433_v63  ;;  %v4211_v25 = vpack.c.bf16 %v4089_v49, %v4088_v55  ;;  %v10100_v8 = vpop.eup %7154  ;;  %v1827_v32 = vadd.f32 %v9839_v10, %v12106_v7  ;;  %7178 = vrcp.f32 %v3491_v28 }
 0x28b   : > { %12105 = vst [vmem:[#allocation46_spill] sm:$0xff] %v10100_v8  ;;  %3049 = vmax.xlane.f32.xlu0 %v3048_v23  ;;  %v3488_v21 = vpop.xlane.xlu0 %3487  ;;  %v4087_v9 = vmul.f32 %v3959_v33, %v1811_v30  ;;  %v7157_v17 = vpop.eup %7156  ;;  %v3681_v63 = vsel %vm980_vm0, %v10049_v35, 0.0  ;;  %v3678_v49 = vsel %vm980_vm0, %v10073_v31, 0.0  ;;  %v3370_v55 = vmul.f32 1.442695, %v3148_v62  ;;  %v12110_v33 = vld [vmem:[#allocation70_spill] sm:$0xff] }
 0x28c   : > { %7180 = vrcp.f32 %v3488_v21  ;;  %v4086_v56 = vmul.f32 %v3958_v61, %v1808_v38  ;;  %v3147_v29 = vsub.f32 %v12107_v20, %v9399_v0  ;;  %v3965_v48 = vmul.f32 %v7157_v17, %v9445_v36  ;;  %v12111_v21 = vld [vmem:[#allocation44_spill] sm:$0xff] }
 0x28d   : > { %v7159_v2 = vpop.eup %7158  ;;  %7182 = vpow2.f32 %v3358_v34  ;;  %v3146_v28 = vsub.f32 %v12110_v33, %v12109_v24  ;;  %3682 = vadd.xlane.f32.xlu1 %v3681_v63  ;;  %v3509_v23 = vpop.xlane.xlu1 %3508  ;;  %v12113_v34 = vld [vmem:[#allocation21_spill] sm:$0xff]  ;;  %v12114_v0 = vld [vmem:[#allocation24_spill] sm:$0xff]  ;;  %v12116_v33 = vld [vmem:[#allocation6_spill] sm:$0xff] }
 0x28e   : > { %v10117_v30 = vpop.eup %7160  ;;  %7184 = vpow2.f32 %v3372_v11  ;;  %v4210_v7 = vpack.c.bf16 %v4087_v9, %v4086_v56  ;;  %v3964_v31 = vmul.f32 %v7159_v2, %v12111_v21  ;;  %v10126_v62 = vadd.f32 %v9839_v10, %v12113_v34  ;;  %v10134_v63 = vpop.f32.mrf.mxu1  ;;  %v12118_v21 = vld [vmem:[#allocation40_spill] sm:$0xff] }
 0x28f   : > { %12108 = vst [vmem:[#allocation49_spill] sm:$0xff] %v10117_v30  ;;  %v10122_v38 = vpop.eup %7162  ;;  %v10130_v36 = vadd.f32 %v12114_v0, %v9839_v10  ;;  %7186 = vrcp.f32 %v3509_v23  ;;  %3679 = vadd.xlane.f32.xlu0 %v3678_v49  ;;  %v3506_v11 = vpop.xlane.xlu0 %3505  ;;  %v10132_v61 = vmul.f32 %v3965_v48, %v1835_v53  ;;  %v3687_v9 = vsel %vm980_vm0, %v10033_v50, 0.0  ;;  %v12115_v49 = vld [vmem:[#allocation39_spill] sm:$0xff]  ;;  %v12119_v34 = vld [vmem:[#allocation76_spill] sm:$0xff] }
 0x290   : > { %12112 = vst [vmem:[#allocation91_spill] sm:$0xff] %v10122_v38  ;;  %v7165_v17 = vpop.eup %7164  ;;  %7188 = vrcp.f32 %v3506_v11  ;;  %6822 = vmatprep.mubr.msk.bf16.mxu0 %vm980_vm0, %v4210_v7  ;;  %v3684_v56 = vsel %vm980_vm0, %v10041_v12, 0.0  ;;  %v4092_v2 = vmul.f32 %v3964_v31, %v1832_v27  ;;  %v3368_v24 = vmul.f32 1.442695, %v3147_v29  ;;  %v12121_v29 = vld [vmem:[#allocation27_spill] sm:$0xff] }
 0x291   : > { %v7167_v20 = vpop.eup %7166  ;;  %7190 = vpow2.f32 %v3370_v55  ;;  %v3153_v53 = vsub.f32 %v12116_v33, %v12115_v49  ;;  %6823 = vmatmul.mubr.msk.bf16.gmra.mxu0 %vm980_vm0, %v4211_v25  ;;  %v3963_v48 = vmul.f32 %v7165_v17, %v9466_v59  ;;  %v3366_v7 = vmul.f32 1.442695, %v3146_v28  ;;  %3688 = vadd.xlane.f32.xlu1 %v3687_v9  ;;  %v3503_v11 = vpop.xlane.xlu1 %3502  ;;  %v12122_v25 = vld [vmem:[#allocation35_spill] sm:$0xff]  ;;  %v12123_v9 = vld [vmem:[#allocation36_spill] sm:$0xff] }
 0x292   : > { %v10145_v23 = vpop.eup %7168  ;;  %v3152_v0 = vsub.f32 %v12119_v34, %v12118_v21  ;;  %v3962_v31 = vmul.f32 %v7167_v20, %v9472_v15  ;;  %v4213_v27 = vpack.c.bf16 %v10132_v61, %v4092_v2  ;;  %v1843_v49 = vadd.f32 %v9839_v10, %v12121_v29  ;;  %v10163_v15 = vpop.f32.mrf.mxu1 }
 0x293   : > { %12117 = vst [vmem:[#allocation87_spill] sm:$0xff] %v10145_v23  ;;  %v10151_v55 = vpop.eup %7170  ;;  %v10157_v59 = vadd.f32 %v12122_v25, %v9839_v10  ;;  %7192 = vrcp.f32 %v3503_v11  ;;  %3685 = vadd.xlane.f32.xlu0 %v3684_v56  ;;  %v3500_v28 = vpop.xlane.xlu0 %3499  ;;  %v4091_v17 = vmul.f32 %v3963_v48, %v1827_v32  ;;  %v10161_v21 = vadd.f32 %v9839_v10, %v12123_v9  ;;  %v12124_v11 = vld [vmem:[#allocation48_spill] sm:$0xff]  ;;  %v12127_v9 = vld [vmem:[#allocation51_spill] sm:$0xff] }
 0x294   : > { %12120 = vst [vmem:[#allocation50_spill] sm:$0xff] %v10151_v55  ;;  %v7173_v33 = vpop.eup %7172  ;;  %7194 = vrcp.f32 %v3500_v28  ;;  %v3693_v61 = vsel %vm980_vm0, %v10117_v30, 0.0  ;;  %v4090_v2 = vmul.f32 %v3962_v31, %v10086_v40  ;;  %v3380_v34 = vmul.f32 1.442695, %v3153_v53  ;;  %v12125_v56 = vld [vmem:[#allocation8_spill] sm:$0xff]  ;;  %v12128_v28 = vld [vmem:[#allocation82_spill] sm:$0xff] }
 0x295   : > { %v7175_v20 = vpop.eup %7174  ;;  %7196 = vpow2.f32 %v3368_v24  ;;  %v3151_v29 = vsub.f32 %v12125_v56, %v12124_v11  ;;  %v3690_v32 = vsel %vm980_vm0, %v10122_v38, 0.0  ;;  %v3378_v25 = vmul.f32 1.442695, %v3152_v0  ;;  %3694 = vadd.xlane.f32.xlu1 %v3693_v61  ;;  %v3521_v30 = vpop.xlane.xlu1 %3520  ;;  %v12129_v40 = vld [vmem:[#allocation43_spill] sm:$0xff]  ;;  %v12130_v31 = vld [vmem:[#allocation58_spill] sm:$0xff] }
 0x296   : > { %v10172_v48 = vpop.eup %7176  ;;  %7198 = vpow2.f32 %v3366_v7  ;;  %v3150_v12 = vsub.f32 %v12128_v28, %v12127_v9  ;;  %v4212_v50 = vpack.c.bf16 %v4091_v17, %v4090_v2  ;;  %v10178_v24 = vadd.f32 %v12129_v40, %v9839_v10  ;;  %v12131_v56 = vld [vmem:[#allocation55_spill] sm:$0xff]  ;;  %v10186_v9 = vpop.f32.mrf.mxu1 }
 0x297   : > { %12126 = vst [vmem:[#allocation75_spill] sm:$0xff] %v10172_v48  ;;  %7200 = vrcp.f32 %v3521_v30  ;;  %3691 = vadd.xlane.f32.xlu0 %v3690_v32  ;;  %v3518_v53 = vpop.xlane.xlu0 %3517  ;;  %v3968_v11 = vmul.f32 %v7175_v20, %v12130_v31  ;;  %v3969_v38 = vmul.f32 %v7173_v33, %v12131_v56  ;;  %v7179_v35 = vpop.eup %7178  ;;  %v12132_v7 = vld [vmem:[#allocation47_spill] sm:$0xff]  ;;  %v3699_v17 = vsel %vm980_vm0, %v10080_v44, 0.0  ;;  %v12133_v33 = vld [vmem:[#allocation9_spill] sm:$0xff] }
 0x298   : > { %v10184_v0 = vadd.f32 %v9839_v10, %v12132_v7  ;;  %7202 = vrcp.f32 %v3518_v53  ;;  %6826 = vmatprep.mubr.msk.bf16.mxu0 %vm980_vm0, %v4212_v50  ;;  %v3696_v30 = vsel %vm980_vm0, %v10100_v8, 0.0  ;;  %v3376_v2 = vmul.f32 1.442695, %v3151_v29  ;;  %v12135_v40 = vld [vmem:[#allocation11_spill] sm:$0xff] }
 0x299   : > { %v7181_v61 = vpop.eup %7180  ;;  %7204 = vpow2.f32 %v3380_v34  ;;  %v3157_v20 = vsub.f32 %v12133_v33, %v9510_v46  ;;  %6827 = vmatmul.mubr.msk.bf16.gmra.mxu0 %vm980_vm0, %v4213_v27  ;;  %v3967_v32 = vmul.f32 %v7179_v35, %v9502_v54  ;;  %v3374_v50 = vmul.f32 1.442695, %v3150_v12  ;;  %3700 = vadd.xlane.f32.xlu1 %v3699_v17  ;;  %v3515_v31 = vpop.xlane.xlu1 %3514  ;;  %v12136_v56 = vld [vmem:[#allocation63_spill] sm:$0xff]  ;;  %v12138_v12 = vld [vmem:[#allocation54_spill] sm:$0xff]  ;;  %v12139_v33 = vld [vmem:[#allocation137_spill] sm:$0xff] }
 0x29a   : > { %v10197_v28 = vpop.eup %7182  ;;  %7206 = vpow2.f32 %v3378_v25  ;;  %v3155_v53 = vsub.f32 %v12135_v40, %v9546_v37  ;;  %v3966_v7 = vmul.f32 %v7181_v61, %v12136_v56  ;;  %v4096_v27 = vmul.f32 %v3968_v11, %v10106_v5  ;;  %v10210_v37 = vpop.f32.mrf.mxu1  ;;  %v12140_v5 = vld [vmem:[#allocation12_spill] sm:$0xff]  ;;  %v12143_v40 = vld [vmem:[#allocation10_spill] sm:$0xff] }
 0x29b   : > { %12134 = vst [vmem:[#allocation5_spill] sm:$0xff] %v10197_v28  ;;  %v10202_v34 = vpop.eup %7184  ;;  %7208 = vrcp.f32 %v3515_v31  ;;  %3697 = vadd.xlane.f32.xlu0 %v3696_v30  ;;  %v3512_v46 = vpop.xlane.xlu0 %3511  ;;  %v4095_v29 = vmul.f32 %v3967_v32, %v1843_v49  ;;  %v4097_v54 = vmul.f32 %v3969_v38, %v10130_v36  ;;  %v10208_v25 = vadd.f32 %v12138_v12, %v9839_v10  ;;  %v12142_v32 = vld [vmem:[#allocation64_spill] sm:$0xff] }
 0x29c   : > { %12137 = vst [vmem:[#allocation52_spill] sm:$0xff] %v10202_v34  ;;  %v7187_v35 = vpop.eup %7186  ;;  %7210 = vrcp.f32 %v3512_v46  ;;  %v3705_v17 = vsel %vm980_vm0, %v10172_v48, 0.0  ;;  %v4094_v61 = vmul.f32 %v3966_v7, %v10126_v62  ;;  %v3388_v49 = vmul.f32 1.442695, %v3157_v20  ;;  %v12144_v20 = vld [vmem:[#allocation68_spill] sm:$0xff] }
 0x29d   : > { %v7189_v30 = vpop.eup %7188  ;;  %7212 = vpow2.f32 %v3376_v2  ;;  %v3154_v11 = vsub.f32 %v12140_v5, %v12139_v33  ;;  %v3702_v38 = vsel %vm980_vm0, %v10197_v28, 0.0  ;;  %v3156_v31 = vsub.f32 %v12143_v40, %v12142_v32  ;;  %3706 = vadd.xlane.f32.xlu1 %v3705_v17  ;;  %v3533_v46 = vpop.xlane.xlu1 %3532  ;;  %v12145_v33 = vld [vmem:[#allocation135_spill] sm:$0xff] }
 0x29e   : > { %v10219_v36 = vpop.eup %7190  ;;  %7214 = vpow2.f32 %v3374_v50  ;;  %v3384_v56 = vmul.f32 1.442695, %v3155_v53  ;;  %v4214_v12 = vpack.c.bf16 %v4095_v29, %v4094_v61  ;;  %v4215_v2 = vpack.c.bf16 %v4097_v54, %v4096_v27  ;;  %v12146_v28 = vld [vmem:[#allocation59_spill] sm:$0xff]  ;;  %v10233_v53 = vpop.f32.mrf.mxu1 }
 0x29f   : > { %12141 = vst [vmem:[#allocation53_spill] sm:$0xff] %v10219_v36  ;;  %7216 = vrcp.f32 %v3533_v46  ;;  %3703 = vadd.xlane.f32.xlu0 %v3702_v38  ;;  %v3530_v62 = vpop.xlane.xlu0 %3529  ;;  %v3972_v7 = vmul.f32 %v7189_v30, %v12144_v20  ;;  %v3973_v5 = vmul.f32 %v7187_v35, %v12145_v33  ;;  %v10227_v8 = vadd.f32 %v9839_v10, %v12146_v28  ;;  %v12147_v50 = vld [vmem:[#allocation67_spill] sm:$0xff]  ;;  %v12148_v35 = vld [vmem:[#allocation136_spill] sm:$0xff]  ;;  %v12150_v38 = vld [vmem:[#allocation13_spill] sm:$0xff] }
 0x2a0   : > { %v7193_v48 = vpop.eup %7192  ;;  %v10231_v32 = vadd.f32 %v12147_v50, %v9839_v10  ;;  %7218 = vrcp.f32 %v3530_v62  ;;  %6830 = vmatprep.mubr.msk.bf16.mxu0 %vm980_vm0, %v4214_v12  ;;  %v3711_v29 = vsel %vm980_vm0, %v10145_v23, 0.0  ;;  %v3382_v54 = vmul.f32 1.442695, %v3154_v11  ;;  %v10246_v46 = vpop.f32.mrf.mxu1  ;;  %v12153_v33 = vld [vmem:[#allocation73_spill] sm:$0xff]  ;;  %v12154_v50 = vld [vmem:[#allocation79_spill] sm:$0xff] }
 0x2a1   : > { %v7195_v27 = vpop.eup %7194  ;;  %7220 = vpow2.f32 %v3388_v49  ;;  %6831 = vmatmul.mubr.msk.bf16.gmra.mxu0 %vm980_vm0, %v4215_v2  ;;  %v3708_v28 = vsel %vm980_vm0, %v10151_v55, 0.0  ;;  %v3971_v17 = vmul.f32 %v7193_v48, %v12148_v35  ;;  %v3386_v30 = vmul.f32 1.442695, %v3156_v31  ;;  %3712 = vadd.xlane.f32.xlu1 %v3711_v29  ;;  %v3527_v12 = vpop.xlane.xlu1 %3526  ;;  %v12151_v49 = vld [vmem:[#allocation74_spill] sm:$0xff] }
 0x2a2   : > { %v10242_v61 = vpop.eup %7196  ;;  %7222 = vpow2.f32 %v3384_v56  ;;  %v3159_v40 = vsub.f32 %v12150_v38, %v9608_v19  ;;  %v3970_v11 = vmul.f32 %v7195_v27, %v12151_v49  ;;  %v4100_v20 = vmul.f32 %v3972_v7, %v10157_v59  ;;  %v10260_v27 = vpop.f32.mrf.mxu1  ;;  %v12158_v49 = vld [vmem:[#allocation80_spill] sm:$0xff] }
 0x2a3   : > { %12149 = vst [vmem:[#allocation78_spill] sm:$0xff] %v10242_v61  ;;  %v10249_v62 = vpop.eup %7198  ;;  %7224 = vrcp.f32 %v3527_v12  ;;  %3709 = vadd.xlane.f32.xlu0 %v3708_v28  ;;  %v3524_v2 = vpop.xlane.xlu0 %3523  ;;  %v4099_v48 = vmul.f32 %v3971_v17, %v10184_v0  ;;  %v4101_v31 = vmul.f32 %v3973_v5, %v10178_v24  ;;  %v1875_v19 = vadd.f32 %v9839_v10, %v12153_v33  ;;  %v12155_v0 = vld [vmem:[#allocation101_spill] sm:$0xff] }
 0x2a4   : > { %12152 = vst [vmem:[#allocation94_spill] sm:$0xff] %v10249_v62  ;;  %v7201_v56 = vpop.eup %7200  ;;  %v10258_v29 = vadd.f32 %v12154_v50, %v9839_v10  ;;  %7226 = vrcp.f32 %v3524_v2  ;;  %v4098_v28 = vmul.f32 %v3970_v11, %v10161_v21  ;;  %v3158_v59 = vsub.f32 %v12155_v0, %v9610_v3  ;;  %v12159_v2 = vld [vmem:[#allocation138_spill] sm:$0xff]  ;;  %v12161_v0 = vld [vmem:[#allocation92_spill] sm:$0xff] }
 0x2a5   : > { %v7203_v35 = vpop.eup %7202  ;;  %7228 = vpow2.f32 %v3382_v54  ;;  %v10267_v24 = vadd.f32 %v9839_v10, %v9568_v41  ;;  %v3717_v7 = vsel %vm980_vm0, %v10242_v61, 0.0  ;;  %v3392_v17 = vmul.f32 1.442695, %v3159_v40  ;;  %v3545_v38 = vpop.xlane.xlu1 %3544 }
 0x2a6   : > { %v10271_v5 = vpop.eup %7204  ;;  %7230 = vpow2.f32 %v3386_v30  ;;  %3718 = vadd.xlane.f32.xlu1 %v3717_v7  ;;  %v3714_v21 = vsel %vm980_vm0, %v10249_v62, 0.0  ;;  %v4216_v54 = vpack.c.bf16 %v4099_v48, %v4098_v28  ;;  %v4217_v41 = vpack.c.bf16 %v4101_v31, %v4100_v20  ;;  %v12160_v30 = vld [vmem:[#allocation88_spill] sm:$0xff]  ;;  %v12162_v48 = vld [vmem:[#allocation98_spill] sm:$0xff]  ;;  %v12163_v31 = vld [vmem:[#allocation139_spill] sm:$0xff] }
 0x2a7   : > { %12156 = vst [vmem:[#allocation90_spill] sm:$0xff] %v10271_v5  ;;  %v10275_v12 = vpop.eup %7206  ;;  %7232 = vrcp.f32 %v3545_v38  ;;  %3715 = vadd.xlane.f32.xlu0 %v3714_v21  ;;  %v3542_v3 = vpop.xlane.xlu0 %3541  ;;  %v3976_v11 = vmul.f32 %v7203_v35, %v12158_v49  ;;  %v3977_v33 = vmul.f32 %v7201_v56, %v12159_v2  ;;  %v10281_v40 = vadd.f32 %v12160_v30, %v9839_v10  ;;  %v12164_v56 = vld [vmem:[#allocation95_spill] sm:$0xff]  ;;  %v12165_v2 = vld [vmem:[#allocation84_spill] sm:$0xff] }
 0x2a8   : > { %12157 = vst [vmem:[#allocation56_spill] sm:$0xff] %v10275_v12  ;;  %v7209_v50 = vpop.eup %7208  ;;  %v10285_v7 = vadd.f32 %v9839_v10, %v12161_v0  ;;  %v10289_v28 = vadd.f32 %v12162_v48, %v9839_v10  ;;  %v10291_v38 = vpop.f32.mrf.mxu1  ;;  %7234 = vrcp.f32 %v3542_v3  ;;  %6834 = vmatprep.mubr.msk.bf16.mxu0 %vm980_vm0, %v4216_v54  ;;  %v3161_v35 = vsub.f32 %v12164_v56, %v12163_v31  ;;  %v12167_v48 = vld [vmem:[#allocation140_spill] sm:$0xff]  ;;  %v12169_v31 = vld [vmem:[#allocation85_spill] sm:$0xff] }
 0x2a9   : > { %v7211_v20 = vpop.eup %7210  ;;  %v3390_v21 = vmul.f32 1.442695, %v3158_v59  ;;  %6835 = vmatmul.mubr.msk.bf16.gmra.mxu0 %vm980_vm0, %v4217_v41  ;;  %v3723_v49 = vsel %vm980_vm0, %v10202_v34, 0.0  ;;  %v3975_v30 = vmul.f32 %v7209_v50, %v12165_v2  ;;  %v12168_v62 = vld [vmem:[#allocation96_spill] sm:$0xff]  ;;  %7236 = vpow2.f32 %v3392_v17  ;;  %v3539_v54 = vpop.xlane.xlu1 %3538 }
 0x2aa   : > { %v10300_v0 = vpop.eup %7212  ;;  %v3160_v61 = vsub.f32 %v12168_v62, %v12167_v48  ;;  %3724 = vadd.xlane.f32.xlu1 %v3723_v49  ;;  %v3720_v3 = vsel %vm980_vm0, %v10219_v36, 0.0  ;;  %v3974_v59 = vmul.f32 %v7211_v20, %v12169_v31  ;;  %7238 = vrcp.f32 %v3539_v54  ;;  %v12171_v62 = vld [vmem:[#allocation103_spill] sm:$0xff]  ;;  %v10319_v20 = vpop.f32.mrf.mxu1 }
 0x2ab   : > { %12166 = vst [vmem:[#allocation57_spill] sm:$0xff] %v10300_v0  ;;  %v10307_v56 = vpop.eup %7214  ;;  %3721 = vadd.xlane.f32.xlu0 %v3720_v3  ;;  %v3536_v41 = vpop.xlane.xlu0 %3535  ;;  %v4103_v34 = vmul.f32 %v3975_v30, %v1875_v19  ;;  %v4104_v50 = vmul.f32 %v3976_v11, %v10208_v25  ;;  %v4105_v2 = vmul.f32 %v3977_v33, %v10231_v32  ;;  %v12172_v49 = vld [vmem:[#allocation147_spill] sm:$0xff]  ;;  %v3396_v19 = vmul.f32 1.442695, %v3161_v35  ;;  %v12173_v25 = vld [vmem:[#allocation152_spill] sm:$0xff] }
 0x2ac   : > { %12170 = vst [vmem:[#allocation77_spill] sm:$0xff] %v10307_v56  ;;  %v7217_v55 = vpop.eup %7216  ;;  %v10313_v17 = vadd.f32 %v9839_v10, %v12171_v62  ;;  %v10317_v48 = vadd.f32 %v12172_v49, %v9839_v10  ;;  %7240 = vrcp.f32 %v3536_v41  ;;  %v4102_v54 = vmul.f32 %v3974_v59, %v10227_v8  ;;  %v12174_v11 = vld [vmem:[#allocation112_spill] sm:$0xff]  ;;  %v12176_v62 = vld [vmem:[#allocation153_spill] sm:$0xff]  ;;  %v10330_v23 = vpop.f32.mrf.mxu1 }
 0x2ad   : > { %v7219_v3 = vpop.eup %7218  ;;  %7242 = vpow2.f32 %v3390_v21  ;;  %v3163_v32 = vsub.f32 %v12174_v11, %v12173_v25  ;;  %v3729_v33 = vsel %vm980_vm0, %v10300_v0, 0.0  ;;  %v3394_v31 = vmul.f32 1.442695, %v3160_v61  ;;  %v12177_v49 = vld [vmem:[#allocation113_spill] sm:$0xff]  ;;  %v3557_v41 = vpop.xlane.xlu1 %3556 }
 0x2ae   : > { %v10326_v30 = vpop.eup %7220  ;;  %v3162_v36 = vsub.f32 %v12177_v49, %v12176_v62  ;;  %3730 = vadd.xlane.f32.xlu1 %v3729_v33  ;;  %v3726_v8 = vsel %vm980_vm0, %v10307_v56, 0.0  ;;  %v4218_v35 = vpack.c.bf16 %v4103_v34, %v4102_v54  ;;  %7244 = vrcp.f32 %v3557_v41  ;;  %v12179_v11 = vld [vmem:[#allocation89_spill] sm:$0xff]  ;;  %v10347_v33 = vpop.f32.mrf.mxu1 }
 0x2af   : > { %12175 = vst [vmem:[#allocation61_spill] sm:$0xff] %v10326_v30  ;;  %v10334_v21 = vpop.eup %7222  ;;  %3727 = vadd.xlane.f32.xlu0 %v3726_v8  ;;  %v3554_v59 = vpop.xlane.xlu0 %3553  ;;  %v4219_v25 = vpack.c.bf16 %v4105_v2, %v4104_v50  ;;  %v3980_v0 = vmul.f32 %v7219_v3, %v12179_v11  ;;  %v12180_v61 = vld [vmem:[#allocation141_spill] sm:$0xff]  ;;  %v3735_v34 = vsel %vm980_vm0, %v10271_v5, 0.0  ;;  %v3732_v54 = vsel %vm980_vm0, %v10275_v12, 0.0  ;;  %v12184_v8 = vld [vmem:[#allocation142_spill] sm:$0xff] }
 0x2b0   : > { %12178 = vst [vmem:[#allocation97_spill] sm:$0xff] %v10334_v21  ;;  %v3981_v44 = vmul.f32 %v7217_v55, %v12180_v61  ;;  %v7225_v6 = vpop.eup %7224  ;;  %v12181_v62 = vld [vmem:[#allocation109_spill] sm:$0xff]  ;;  %7246 = vrcp.f32 %v3554_v59  ;;  %6838 = vmatprep.mubr.msk.bf16.mxu0 %vm980_vm0, %v4218_v35  ;;  %v12183_v55 = vld [vmem:[#allocation106_spill] sm:$0xff]  ;;  %v3400_v41 = vmul.f32 1.442695, %v3163_v32  ;;  %v12187_v61 = vld [vmem:[#allocation107_spill] sm:$0xff] }
 0x2b1   : > { %v10340_v49 = vadd.f32 %v9839_v10, %v12181_v62  ;;  %v7227_v50 = vpop.eup %7226  ;;  %7248 = vpow2.f32 %v3396_v19  ;;  %v12182_v2 = vld [vmem:[#allocation145_spill] sm:$0xff]  ;;  %6839 = vmatmul.mubr.msk.bf16.gmra.mxu0 %vm980_vm0, %v4219_v25  ;;  %v3979_v59 = vmul.f32 %v7225_v6, %v12184_v8  ;;  %v12186_v35 = vld [vmem:[#allocation146_spill] sm:$0xff]  ;;  %v3398_v5 = vmul.f32 1.442695, %v3162_v36  ;;  %v3551_v12 = vpop.xlane.xlu1 %3550 }
 0x2b2   : > { %v3165_v3 = vsub.f32 %v12183_v55, %v12182_v2  ;;  %v10353_v11 = vpop.eup %7228  ;;  %7250 = vpow2.f32 %v3394_v31  ;;  %v3164_v62 = vsub.f32 %v12187_v61, %v12186_v35  ;;  %3736 = vadd.xlane.f32.xlu1 %v3735_v34  ;;  %v12188_v56 = vld [vmem:[#allocation93_spill] sm:$0xff]  ;;  %v4108_v6 = vmul.f32 %v3980_v0, %v10258_v29  ;;  %v12190_v55 = vld [vmem:[#allocation154_spill] sm:$0xff] }
 0x2b3   : > { %12185 = vst [vmem:[#allocation102_spill] sm:$0xff] %v10353_v11  ;;  %v3978_v43 = vmul.f32 %v7227_v50, %v12188_v56  ;;  %v10358_v19 = vpop.eup %7230  ;;  %7252 = vrcp.f32 %v3551_v12  ;;  %3733 = vadd.xlane.f32.xlu0 %v3732_v54  ;;  %v3548_v32 = vpop.xlane.xlu0 %3547  ;;  %v4107_v25 = vmul.f32 %v3979_v59, %v10285_v7  ;;  %v4109_v2 = vmul.f32 %v3981_v44, %v10281_v40  ;;  %v12191_v7 = vld [vmem:[#allocation164_spill] sm:$0xff]  ;;  %v12192_v29 = vld [vmem:[#allocation126_spill] sm:$0xff]  ;;  %v12194_v50 = vld [vmem:[#allocation127_spill] sm:$0xff] }
 0x2b4   : > { %12189 = vst [vmem:[#allocation62_spill] sm:$0xff] %v10358_v19  ;;  %v7233_v31 = vpop.eup %7232  ;;  %v10365_v8 = vadd.f32 %v12190_v55, %v9839_v10  ;;  %7254 = vrcp.f32 %v3548_v32  ;;  %v3741_v36 = vsel %vm980_vm0, %v10334_v21, 0.0  ;;  %v10370_v12 = vpop.f32.mrf.mxu1  ;;  %v3404_v54 = vmul.f32 1.442695, %v3165_v3  ;;  %v12193_v10 = vld [vmem:[#allocation165_spill] sm:$0xff]  ;;  %v12197_v55 = vld [vmem:[#allocation143_spill] sm:$0xff] }
 0x2b5   : > { %v4106_v56 = vmul.f32 %v3978_v43, %v10267_v24  ;;  %v7235_v34 = vpop.eup %7234  ;;  %7256 = vpow2.f32 %v3400_v41  ;;  %v3167_v0 = vsub.f32 %v12192_v29, %v12191_v7  ;;  %v3738_v44 = vsel %vm980_vm0, %v10353_v11, 0.0  ;;  %v3569_v35 = vpop.xlane.xlu1 %3568  ;;  %v12196_v41 = vld [vmem:[#allocation99_spill] sm:$0xff] }
 0x2b6   : > { %v3402_v40 = vmul.f32 1.442695, %v3164_v62  ;;  %7258 = vpow2.f32 %v3398_v5  ;;  %v3166_v59 = vsub.f32 %v12194_v50, %v12193_v10  ;;  %3742 = vadd.xlane.f32.xlu1 %v3741_v36  ;;  %v10378_v43 = vpop.eup %7236  ;;  %v4221_v3 = vpack.c.bf16 %v4109_v2, %v4108_v6  ;;  %v10385_v5 = vld [vmem:[%s11480_s6] ss:$0 sm:$0xff]  ;;  %v12198_v62 = vld [vmem:[#allocation160_spill] sm:$0xff]  ;;  %v10396_v2 = vpop.f32.mrf.mxu1 }
 0x2b7   : > { %v4220_v61 = vpack.c.bf16 %v4107_v25, %v4106_v56  ;;  %12195 = vst [vmem:[#allocation100_spill] sm:$0xff] %v10378_v43  ;;  %7260 = vrcp.f32 %v3569_v35  ;;  %3739 = vadd.xlane.f32.xlu0 %v3738_v44  ;;  %v3566_v24 = vpop.xlane.xlu0 %3565  ;;  %v3984_v32 = vmul.f32 %v7235_v34, %v12196_v41  ;;  %v3985_v7 = vmul.f32 %v7233_v31, %v12197_v55  ;;  %v7239_v29 = vpop.eup %7238  ;;  %v12199_v56 = vld [vmem:[#allocation158_spill] sm:$0xff]  ;;  %v12200_v34 = vld [vmem:[#allocation120_spill] sm:$0xff]  ;;  %v12204_v41 = vld [vmem:[#allocation121_spill] sm:$0xff] }
 0x2b8   : > { %v10389_v36 = vadd.f32 %v10385_v5, %v12198_v62  ;;  %7262 = vrcp.f32 %v3566_v24  ;;  %v3747_v25 = vsel %vm980_vm0, %v10326_v30, 0.0  ;;  %v3744_v6 = vsel %vm980_vm0, %v10358_v19, 0.0  ;;  %v12201_v50 = vld [vmem:[#allocation144_spill] sm:$0xff] }
 0x2b9   : > { %6842 = vmatprep.mubr.msk.bf16.mxu0 %vm980_vm0, %v4220_v61  ;;  %v7241_v31 = vpop.eup %7240  ;;  %7264 = vpow2.f32 %v3404_v54  ;;  %v3169_v44 = vsub.f32 %v12200_v34, %v12199_v56  ;;  %v3408_v10 = vmul.f32 1.442695, %v3167_v0  ;;  %v3983_v35 = vmul.f32 %v7239_v29, %v12201_v50  ;;  %v12203_v61 = vld [vmem:[#allocation159_spill] sm:$0xff]  ;;  %v3563_v19 = vpop.xlane.xlu1 %3562  ;;  %v12205_v30 = vld [vmem:[#allocation104_spill] sm:$0xff]  ;;  %v12206_v34 = vld [vmem:[#allocation122_spill] sm:$0xff] }
 0x2ba   : > { %6843 = vmatmul.mubr.msk.bf16.gmra.mxu0 %vm980_vm0, %v4221_v3  ;;  %v10402_v24 = vpop.eup %7242  ;;  %7266 = vpow2.f32 %v3402_v40  ;;  %v3168_v55 = vsub.f32 %v12204_v41, %v12203_v61  ;;  %v3406_v62 = vmul.f32 1.442695, %v3166_v59  ;;  %3748 = vadd.xlane.f32.xlu1 %v3747_v25  ;;  %v3982_v21 = vmul.f32 %v7241_v31, %v12205_v30  ;;  %v10415_v30 = vpop.f32.mrf.mxu1  ;;  %v12208_v31 = vld [vmem:[#allocation132_spill] sm:$0xff]  ;;  %v12210_v50 = vld [vmem:[#allocation170_spill] sm:$0xff] }
 0x2bb   : > { %12202 = vst [vmem:[#allocation105_spill] sm:$0xff] %v10402_v24  ;;  %7268 = vrcp.f32 %v3563_v19  ;;  %3745 = vadd.xlane.f32.xlu0 %v3744_v6  ;;  %v3560_v54 = vpop.xlane.xlu0 %3559  ;;  %v4111_v0 = vmul.f32 %v3983_v35, %v10340_v49  ;;  %v4112_v3 = vmul.f32 %v3984_v32, %v10289_v28  ;;  %v4113_v29 = vmul.f32 %v3985_v7, %v10317_v48  ;;  %v7245_v56 = vpop.eup %7244  ;;  %v12207_v49 = vld [vmem:[#allocation169_spill] sm:$0xff] }
 0x2bc   : > { %v1923_v40 = vadd.f32 %v10385_v5, %v12206_v34  ;;  %7270 = vrcp.f32 %v3560_v54  ;;  %v3753_v59 = vsel %vm980_vm0, %v10378_v43, 0.0  ;;  %v4110_v25 = vmul.f32 %v3982_v21, %v10313_v17  ;;  %v12211_v35 = vld [vmem:[#allocation133_spill] sm:$0xff]  ;;  %v10425_v41 = vpop.f32.mrf.mxu1 }
 0x2bd   : > { %v7247_v19 = vpop.eup %7246  ;;  %v3412_v6 = vmul.f32 1.442695, %v3169_v44  ;;  %7272 = vpow2.f32 %v3408_v10  ;;  %v3171_v28 = vsub.f32 %v12208_v31, %v12207_v49  ;;  %v3750_v48 = vsel %vm980_vm0, %v10402_v24, 0.0  ;;  %v3581_v17 = vpop.xlane.xlu1 %3580  ;;  %v12213_v34 = vld [vmem:[#allocation149_spill] sm:$0xff]  ;;  %v12214_v31 = vld [vmem:[#allocation148_spill] sm:$0xff] }
 0x2be   : > { %v10421_v32 = vpop.eup %7248  ;;  %v3410_v7 = vmul.f32 1.442695, %v3168_v55  ;;  %7274 = vpow2.f32 %v3406_v62  ;;  %v3170_v61 = vsub.f32 %v12211_v35, %v12210_v50  ;;  %3754 = vadd.xlane.f32.xlu1 %v3753_v59  ;;  %v4222_v21 = vpack.c.bf16 %v4111_v0, %v4110_v25  ;;  %v12215_v62 = vld [vmem:[#allocation115_spill] sm:$0xff] }
 0x2bf   : > { %12209 = vst [vmem:[#allocation65_spill] sm:$0xff] %v10421_v32  ;;  %v10427_v44 = vpop.eup %7250  ;;  %7276 = vrcp.f32 %v3581_v17  ;;  %3751 = vadd.xlane.f32.xlu0 %v3750_v48  ;;  %v3578_v10 = vpop.xlane.xlu0 %3577  ;;  %v4223_v54 = vpack.c.bf16 %v4113_v29, %v4112_v3  ;;  %v3988_v49 = vmul.f32 %v7247_v19, %v12213_v34  ;;  %v3989_v24 = vmul.f32 %v7245_v56, %v12214_v31  ;;  %v12216_v3 = vld [vmem:[#allocation150_spill] sm:$0xff]  ;;  %v12218_v35 = vld [vmem:[#allocation151_spill] sm:$0xff] }
 0x2c0   : > { %12212 = vst [vmem:[#allocation108_spill] sm:$0xff] %v10427_v44  ;;  %v7253_v55 = vpop.eup %7252  ;;  %v1920_v43 = vadd.f32 %v10385_v5, %v12215_v62  ;;  %7278 = vrcp.f32 %v3578_v10  ;;  %6846 = vmatprep.mubr.msk.bf16.mxu0 %vm980_vm0, %v4222_v21  ;;  %v3416_v59 = vmul.f32 1.442695, %v3171_v28  ;;  %v3759_v25 = vsel %vm980_vm0, %v10421_v32, 0.0 }
 0x2c1   : > { %v7255_v0 = vpop.eup %7254  ;;  %7280 = vpow2.f32 %v3412_v6  ;;  %v3987_v29 = vmul.f32 %v7253_v55, %v12216_v3  ;;  %v3414_v56 = vmul.f32 1.442695, %v3170_v61  ;;  %v3575_v48 = vpop.xlane.xlu1 %3574  ;;  %v3756_v50 = vsel %vm980_vm0, %v10427_v44, 0.0  ;;  %v12220_v55 = vld [vmem:[#allocation166_spill] sm:$0xff]  ;;  %v12222_v3 = vld [vmem:[#allocation168_spill] sm:$0xff] }
 0x2c2   : > { %6847 = vmatmul.mubr.msk.bf16.gmra.mxu0 %vm980_vm0, %v4223_v54  ;;  %v10438_v19 = vpop.eup %7256  ;;  %7282 = vpow2.f32 %v3410_v7  ;;  %3760 = vadd.xlane.f32.xlu1 %v3759_v25  ;;  %v3986_v17 = vmul.f32 %v7255_v0, %v12218_v35  ;;  %v10443_v6 = vpop.f32.mrf.mxu1  ;;  %v4116_v54 = vmul.f32 %v3988_v49, %v10365_v8  ;;  %v4117_v7 = vmul.f32 %v3989_v24, %v10389_v36  ;;  %v12224_v49 = vld [vmem:[#allocation172_spill] sm:$0xff]  ;;  %v12226_v35 = vld [vmem:[#allocation155_spill] sm:$0xff] }
 0x2c3   : > { %12217 = vst [vmem:[#allocation110_spill] sm:$0xff] %v10438_v19  ;;  %v10445_v28 = vpop.eup %7258  ;;  %7284 = vrcp.f32 %v3575_v48  ;;  %3757 = vadd.xlane.f32.xlu0 %v3756_v50  ;;  %v3572_v21 = vpop.xlane.xlu0 %3571  ;;  %v4115_v10 = vmul.f32 %v3987_v29, %v1923_v40  ;;  %v1944_v62 = vadd.f32 %v10385_v5, %v12220_v55  ;;  %v3765_v0 = vsel %vm980_vm0, %v10438_v19, 0.0  ;;  %v12225_v48 = vld [vmem:[#allocation156_spill] sm:$0xff] }
 0x2c4   : > { %12219 = vst [vmem:[#allocation114_spill] sm:$0xff] %v10445_v28  ;;  %v7261_v61 = vpop.eup %7260  ;;  %7286 = vrcp.f32 %v3572_v21  ;;  %v4114_v34 = vmul.f32 %v3986_v17, %v1920_v43  ;;  %v1947_v40 = vadd.f32 %v10385_v5, %v12222_v3  ;;  %v3762_v8 = vsel %vm980_vm0, %v10445_v28, 0.0  ;;  %v10459_v43 = vpop.f32.mrf.mxu1  ;;  %v12234_v28 = vld [vmem:[#allocation179_spill] sm:$0xff]  ;;  %v12239_v44 = vld [vmem:[#allocation176_spill] sm:$0xff] }
 0x2c5   : > { %v7263_v31 = vpop.eup %7262  ;;  %7288 = vpow2.f32 %v3416_v59  ;;  %v1939_v59 = vadd.f32 %v10385_v5, %v12224_v49  ;;  %v4225_v29 = vpack.c.bf16 %v4117_v7, %v4116_v54  ;;  %v3993_v17 = vmul.f32 %v7261_v61, %v12226_v35 }
 0x2c6   : > { %v10453_v25 = vpop.eup %7264  ;;  %7290 = vpow2.f32 %v3414_v56  ;;  %3766 = vadd.xlane.f32.xlu1 %v3765_v0  ;;  %v4224_v36 = vpack.c.bf16 %v4115_v10, %v4114_v34  ;;  %v3992_v50 = vmul.f32 %v7263_v31, %v12225_v48  ;;  %v12227_v56 = vld [vmem:[#allocation167_spill] sm:$0xff]  ;;  %v3593_v0 = vpop.xlane.xlu1 %3592  ;;  %v12230_v31 = vld [vmem:[#allocation157_spill] sm:$0xff] }
 0x2c7   : > { %12221 = vst [vmem:[#allocation66_spill] sm:$0xff] %v10453_v25  ;;  %v10461_v24 = vpop.eup %7266  ;;  %3763 = vadd.xlane.f32.xlu0 %v3762_v8  ;;  %v1936_v55 = vadd.f32 %v10385_v5, %v12227_v56  ;;  %v3771_v3 = vsel %vm980_vm0, %v10453_v25, 0.0  ;;  %v12228_v8 = vld [vmem:[#allocation116_spill] sm:$0xff]  ;;  %v10479_v48 = vpop.f32.mrf.mxu1  ;;  %7292 = vrcp.f32 %v3593_v0  ;;  %v4121_v56 = vmul.f32 %v3993_v17, %v1947_v40 }
 0x2c8   : > { %12223 = vst [vmem:[#allocation117_spill] sm:$0xff] %v10461_v24  ;;  %v7269_v21 = vpop.eup %7268  ;;  %6850 = vmatprep.mubr.msk.bf16.mxu0 %vm980_vm0, %v4224_v36  ;;  %v3590_v34 = vpop.xlane.xlu0 %3589  ;;  %v3768_v61 = vsel %vm980_vm0, %v10461_v24, 0.0  ;;  %v4120_v35 = vmul.f32 %v3992_v50, %v1944_v62  ;;  %v1963_v0 = vadd.f32 %v10385_v5, %v12234_v28  ;;  %v12236_v50 = vld [vmem:[#allocation14_spill] sm:$0xff]  ;;  %v1952_v28 = vadd.f32 %v10385_v5, %v12239_v44 }
 0x2c9   : > { %v7271_v10 = vpop.eup %7270  ;;  %v3991_v54 = vmul.f32 %v7269_v21, %v12228_v8  ;;  %7294 = vrcp.f32 %v3590_v34  ;;  %v10483_v8 = vpop.f32.mrf.mxu1  ;;  %v1955_v17 = vadd.f32 %v10385_v5, %v12236_v50 }
 0x2ca   : > { %6851 = vmatmul.mubr.msk.bf16.gmra.mxu0 %vm980_vm0, %v4225_v29  ;;  %v10474_v7 = vpop.eup %7272  ;;  %3772 = vadd.xlane.f32.xlu1 %v3771_v3  ;;  %v3990_v49 = vmul.f32 %v7271_v10, %v12230_v31  ;;  %v12233_v10 = vld [vmem:[#allocation174_spill] sm:$0xff]  ;;  %v4227_v34 = vpack.c.bf16 %v4121_v56, %v4120_v35  ;;  %v12240_v56 = vld [vmem:[#allocation123_spill] sm:$0xff] }
 0x2cb   : > { %12229 = vst [vmem:[#allocation4_spill] sm:$0xff] %v10474_v7  ;;  %v10481_v36 = vpop.eup %7274  ;;  %3769 = vadd.xlane.f32.xlu0 %v3768_v61  ;;  %v4119_v29 = vmul.f32 %v3991_v54, %v1939_v59  ;;  %v3777_v24 = vsel %vm980_vm0, %v10474_v7, 0.0  ;;  %v1960_v31 = vadd.f32 %v10385_v5, %v12233_v10  ;;  %v12237_v54 = vld [vmem:[#allocation162_spill] sm:$0xff] }
 0x2cc   : > { %12231 = vst [vmem:[#allocation32_spill] sm:$0xff] %v10481_v36  ;;  %v7277_v25 = vpop.eup %7276  ;;  %v4118_v21 = vmul.f32 %v3990_v49, %v1936_v55  ;;  %v3774_v62 = vsel %vm980_vm0, %v10481_v36, 0.0  ;;  %v12238_v49 = vld [vmem:[#allocation161_spill] sm:$0xff] }
 0x2cd   : > { %v7279_v3 = vpop.eup %7278  ;;  %v3997_v10 = vmul.f32 %v7277_v25, %v12238_v49 }
 0x2ce   : > { %v10487_v19 = vpop.eup %7280  ;;  %3778 = vadd.xlane.f32.xlu1 %v3777_v24  ;;  %v4226_v40 = vpack.c.bf16 %v4119_v29, %v4118_v21  ;;  %v3587_v55 = vpop.xlane.xlu1 %3586  ;;  %v3996_v61 = vmul.f32 %v7279_v3, %v12237_v54 }
 0x2cf   : > { %12232 = vst [vmem:[#allocation70_spill] sm:$0xff] %v10487_v19  ;;  %v10495_v59 = vpop.eup %7282  ;;  %3775 = vadd.xlane.f32.xlu0 %v3774_v62  ;;  %7296 = vrcp.f32 %v3587_v55  ;;  %v10504_v29 = vpop.f32.mrf.mxu1  ;;  %v3783_v35 = vsel %vm980_vm0, %v10487_v19, 0.0  ;;  %v12242_v62 = vld [vmem:[#allocation163_spill] sm:$0xff]  ;;  %v4125_v49 = vmul.f32 %v3997_v10, %v1963_v0 }
 0x2d0   : > { %12235 = vst [vmem:[#allocation44_spill] sm:$0xff] %v10495_v59  ;;  %v7285_v7 = vpop.eup %7284  ;;  %6854 = vmatprep.mubr.msk.bf16.mxu0 %vm980_vm0, %v4226_v40  ;;  %v3584_v24 = vpop.xlane.xlu0 %3583  ;;  %v3780_v44 = vsel %vm980_vm0, %v10495_v59, 0.0  ;;  %v4124_v54 = vmul.f32 %v3996_v61, %v1960_v31  ;;  %v12244_v61 = vld [vmem:[#allocation16_spill] sm:$0xff] }
 0x2d1   : > { %v7287_v21 = vpop.eup %7286  ;;  %7298 = vrcp.f32 %v3584_v24  ;;  %v3995_v3 = vmul.f32 %v7285_v7, %v12240_v56  ;;  %v10517_v24 = vpop.f32.mrf.mxu1  ;;  %v1976_v10 = vadd.f32 %v10385_v5, %v12244_v61 }
 0x2d2   : > { %6855 = vmatmul.mubr.msk.bf16.gmra.mxu0 %vm980_vm0, %v4227_v34  ;;  %v10510_v25 = vpop.eup %7288  ;;  %3784 = vadd.xlane.f32.xlu1 %v3783_v35  ;;  %v3994_v40 = vmul.f32 %v7287_v21, %v12242_v62  ;;  %v4229_v21 = vpack.c.bf16 %v4125_v49, %v4124_v54  ;;  %v12248_v49 = vld [vmem:[#allocation129_spill] sm:$0xff] }
 0x2d3   : > { %12241 = vst [vmem:[#allocation21_spill] sm:$0xff] %v10510_v25  ;;  %v10515_v50 = vpop.eup %7290  ;;  %3781 = vadd.xlane.f32.xlu0 %v3780_v44  ;;  %v4123_v55 = vmul.f32 %v3995_v3, %v1955_v17  ;;  %v3789_v7 = vsel %vm980_vm0, %v10510_v25, 0.0  ;;  %v10524_v0 = vpop.f32.mrf.mxu1  ;;  %v12252_v25 = vld [vmem:[#allocation173_spill] sm:$0xff] }
 0x2d4   : > { %12243 = vst [vmem:[#allocation24_spill] sm:$0xff] %v10515_v50  ;;  %v4122_v34 = vmul.f32 %v3994_v40, %v1952_v28  ;;  %v3786_v35 = vsel %vm980_vm0, %v10515_v50, 0.0  ;;  %v7293_v62 = vpop.eup %7292  ;;  %v12245_v28 = vld [vmem:[#allocation60_spill] sm:$0xff]  ;;  %v12246_v40 = vld [vmem:[#allocation38_spill] sm:$0xff]  ;;  %v12251_v50 = vld [vmem:[#allocation171_spill] sm:$0xff] }
 0x2d5   : > { %v1979_v3 = vadd.f32 %v10385_v5, %v12245_v28 }
 0x2d6   : > { %3790 = vadd.xlane.f32.xlu1 %v3789_v7  ;;  %v4228_v56 = vpack.c.bf16 %v4123_v55, %v4122_v34  ;;  %v3605_v59 = vpop.xlane.xlu1 %3604  ;;  %v7295_v17 = vpop.eup %7294  ;;  %v1971_v55 = vadd.f32 %v10385_v5, %v12246_v40 }
 0x2d7   : > { %3787 = vadd.xlane.f32.xlu0 %v3786_v35  ;;  %7300 = vrcp.f32 %v3605_v59  ;;  %v12247_v59 = vld [vmem:[#allocation128_spill] sm:$0xff]  ;;  %v4000_v34 = vmul.f32 %v7295_v17, %v12248_v49  ;;  %v10535_v35 = vpop.f32.mrf.mxu1 }
 0x2d8   : > { %6858 = vmatprep.mubr.msk.bf16.mxu0 %vm980_vm0, %v4228_v56  ;;  %v3602_v31 = vpop.xlane.xlu0 %3601  ;;  %v4001_v54 = vmul.f32 %v7293_v62, %v12247_v59  ;;  %12249 = vst [vmem:[#allocation39_spill] sm:$0xff] %v10535_v35 }
 0x2d9   : > { %7302 = vrcp.f32 %v3602_v31  ;;  %v4128_v40 = vmul.f32 %v4000_v34, %v1976_v10  ;;  %v10541_v62 = vpop.f32.mrf.mxu1 }
 0x2da   : > { %6859 = vmatmul.mubr.msk.bf16.gmra.mxu0 %vm980_vm0, %v4229_v21  ;;  %v3599_v44 = vpop.xlane.xlu1 %3598  ;;  %v12250_v21 = vld [vmem:[#allocation26_spill] sm:$0xff]  ;;  %v4129_v32 = vmul.f32 %v4001_v54, %v1979_v3  ;;  %v12256_v54 = vld [vmem:[#allocation177_spill] sm:$0xff] }
 0x2db   : > { %7304 = vrcp.f32 %v3599_v44  ;;  %v1968_v31 = vadd.f32 %v10385_v5, %v12250_v21  ;;  %v10543_v35 = vpop.f32.mrf.mxu1 }
 0x2dc   : > { %v3596_v7 = vpop.xlane.xlu0 %3595  ;;  %v7297_v56 = vpop.eup %7296  ;;  %v4231_v11 = vpack.c.bf16 %v4129_v32, %v4128_v40  ;;  %12253 = vst [vmem:[#allocation6_spill] sm:$0xff] %v10543_v35  ;;  %v12255_v32 = vld [vmem:[#allocation175_spill] sm:$0xff]  ;;  %v12258_v40 = vld [vmem:[#allocation2_spill] sm:$0xff] }
 0x2dd   : > { %7306 = vrcp.f32 %v3596_v7  ;;  %v3999_v28 = vmul.f32 %v7297_v56, %v12251_v50  ;;  %v10555_v56 = vpop.f32.mrf.mxu1 }
 0x2de   : > { %v7299_v61 = vpop.eup %7298 }
 0x2df   : > { %v3998_v19 = vmul.f32 %v7299_v61, %v12252_v25  ;;  %v4127_v36 = vmul.f32 %v3999_v28, %v1971_v55  ;;  %v12254_v25 = vld [vmem:[#allocation3_spill] sm:$0xff] }
 0x2e0   : > { %v1992_v10 = vadd.f32 %v10385_v5, %v12254_v25 }
 0x2e1   : > { %v4126_v17 = vmul.f32 %v3998_v19, %v1968_v31  ;;  %v1995_v19 = vadd.f32 %v10385_v5, %v9937_v47  ;;  %v12259_v47 = vld [vmem:[#allocation178_spill] sm:$0xff] }
 0x2e2   : > { %v3617_v44 = vpop.xlane.xlu1 %3616 }
 0x2e3   : > { %v4230_v59 = vpack.c.bf16 %v4127_v36, %v4126_v17  ;;  %7308 = vrcp.f32 %v3617_v44  ;;  %v1987_v36 = vadd.f32 %v10385_v5, %v9964_v42  ;;  %v12260_v44 = vld [vmem:[#allocation124_spill] sm:$0xff] }
 0x2e4   : > { %v3614_v49 = vpop.xlane.xlu0 %3613  ;;  %v7301_v21 = vpop.eup %7300 }
 0x2e5   : > { %7310 = vrcp.f32 %v3614_v49  ;;  %6862 = vmatprep.mubr.msk.bf16.mxu0 %vm980_vm0, %v4230_v59  ;;  %v4005_v55 = vmul.f32 %v7301_v21, %v12255_v32  ;;  %v12261_v59 = vld [vmem:[#allocation180_spill] sm:$0xff]  ;;  %v10563_v32 = vpop.f32.mrf.mxu1 }
 0x2e6   : > { %v7303_v50 = vpop.eup %7302  ;;  %6863 = vmatmul.mubr.msk.bf16.gmra.mxu0 %vm980_vm0, %v4231_v11  ;;  %v3611_v3 = vpop.xlane.xlu1 %3610  ;;  %v12257_v11 = vld [vmem:[#allocation34_spill] sm:$0xff]  ;;  %12262 = vst [vmem:[#allocation40_spill] sm:$0xff] %v10563_v32 }
 0x2e7   : > { %v4004_v34 = vmul.f32 %v7303_v50, %v12256_v54  ;;  %7312 = vrcp.f32 %v3611_v3  ;;  %v1984_v61 = vadd.f32 %v10385_v5, %v12257_v11  ;;  %v4133_v3 = vmul.f32 %v4005_v55, %v1995_v19  ;;  %v12282_v32 = vld [vmem:[#allocation18_spill] sm:$0xff] }
 0x2e8   : > { %v3608_v7 = vpop.xlane.xlu0 %3607  ;;  %v7305_v31 = vpop.eup %7304  ;;  %v2008_v19 = vadd.f32 %v10385_v5, %v9989_v16  ;;  %v2011_v55 = vadd.f32 %v10385_v5, %v10037_v60  ;;  %v2000_v60 = vadd.f32 %v10385_v5, %v10015_v1 }
 0x2e9   : > { %7314 = vrcp.f32 %v3608_v7  ;;  %v4003_v17 = vmul.f32 %v7305_v31, %v12259_v47  ;;  %v4132_v25 = vmul.f32 %v4004_v34, %v1992_v10  ;;  %v12263_v7 = vld [vmem:[#allocation111_spill] sm:$0xff]  ;;  %v12265_v10 = vld [vmem:[#allocation30_spill] sm:$0xff]  ;;  %v2003_v34 = vadd.f32 %v10385_v5, %v10063_v14 }
 0x2ea   : > { %v7307_v28 = vpop.eup %7306  ;;  %7316 = vrcp.f32 %v12258_v40  ;;  %v3629_v42 = vpop.xlane.xlu1 %3628 }
 0x2eb   : > { %7318 = vrcp.f32 %v12260_v44  ;;  %v4002_v49 = vmul.f32 %v7307_v28, %v12261_v59  ;;  %v4131_v50 = vmul.f32 %v4003_v17, %v1987_v36  ;;  %v4233_v47 = vpack.c.bf16 %v4133_v3, %v4132_v25  ;;  %v10566_v44 = vpop.f32.mrf.mxu1  ;;  %v12266_v28 = vld [vmem:[#allocation25_spill] sm:$0xff] }
 0x2ec   : > { %7320 = vrcp.f32 %v3629_v42  ;;  %v3626_v21 = vpop.xlane.xlu0 %3625  ;;  %12264 = vst [vmem:[#allocation76_spill] sm:$0xff] %v10566_v44  ;;  %v12267_v42 = vld [vmem:[#allocation29_spill] sm:$0xff] }
 0x2ed   : > { %7322 = vrcp.f32 %v3626_v21  ;;  %v4130_v54 = vmul.f32 %v4002_v49, %v1984_v61  ;;  %v12268_v49 = vld [vmem:[#allocation185_spill] sm:$0xff]  ;;  %v10582_v25 = vpop.f32.mrf.mxu1 }
 0x2ee   : > { %7324 = vrcp.f32 %v12263_v7  ;;  %v3623_v11 = vpop.xlane.xlu1 %3622  ;;  %12269 = vst [vmem:[#allocation27_spill] sm:$0xff] %v10582_v25  ;;  %v12270_v3 = vld [vmem:[#allocation125_spill] sm:$0xff]  ;;  %v12271_v7 = vld [vmem:[#allocation15_spill] sm:$0xff] }
 0x2ef   : > { %v4232_v40 = vpack.c.bf16 %v4131_v50, %v4130_v54  ;;  %7326 = vrcp.f32 %v3623_v11  ;;  %v10590_v1 = vpop.f32.mrf.mxu1  ;;  %v12283_v25 = vld [vmem:[#allocation17_spill] sm:$0xff] }
 0x2f0   : > { %v3620_v31 = vpop.xlane.xlu0 %3619  ;;  %v7309_v35 = vpop.eup %7308 }
 0x2f1   : > { %7328 = vrcp.f32 %v3620_v31  ;;  %6866 = vmatprep.mubr.msk.bf16.mxu0 %vm980_vm0, %v4232_v40  ;;  %v4009_v17 = vmul.f32 %v7309_v35, %v12266_v28  ;;  %v12272_v40 = vld [vmem:[#allocation33_spill] sm:$0xff] }
 0x2f2   : > { %v7311_v36 = vpop.eup %7310  ;;  %7330 = vrcp.f32 %v12265_v10  ;;  %6867 = vmatmul.mubr.msk.bf16.gmra.mxu0 %vm980_vm0, %v4233_v47  ;;  %v3029_v61 = vpop.xlane.xlu1 %3028  ;;  %v12273_v47 = vld [vmem:[#allocation181_spill] sm:$0xff] }
 0x2f3   : > { %7332 = vrcp.f32 %v9949_v57  ;;  %v4008_v59 = vmul.f32 %v7311_v36, %v12267_v42  ;;  %v3173_v21 = vsub.f32 %v12268_v49, %v3029_v61  ;;  %v4137_v49 = vmul.f32 %v4009_v17, %v2011_v55 }
 0x2f4   : > { %7334 = vrcp.f32 %v9953_v18  ;;  %v3026_v50 = vpop.xlane.xlu0 %3025  ;;  %v7313_v16 = vpop.eup %7312  ;;  %v2032_v55 = vadd.f32 %v10385_v5, %v10210_v37 }
 0x2f5   : > { %v3172_v14 = vsub.f32 %v12270_v3, %v3026_v50  ;;  %v3420_v57 = vmul.f32 1.442695, %v3173_v21  ;;  %v4007_v11 = vmul.f32 %v7313_v16, %v12271_v7  ;;  %7336 = vrcp.f32 %v12272_v40  ;;  %v12274_v7 = vld [vmem:[#allocation119_spill] sm:$0xff] }
 0x2f6   : > { %v7315_v54 = vpop.eup %7314  ;;  %v3659_v31 = vpop.xlane.xlu1 %3658  ;;  %v4136_v42 = vmul.f32 %v4008_v59, %v2008_v19  ;;  %v2024_v16 = vadd.f32 %v10385_v5, %v10090_v45  ;;  %v2019_v19 = vadd.f32 %v10385_v5, %v10163_v15  ;;  %v12276_v45 = vld [vmem:[#allocation183_spill] sm:$0xff]  ;;  %v2035_v15 = vadd.f32 %v10385_v5, %v10246_v46 }
 0x2f7   : > { %v7317_v18 = vpop.eup %7316  ;;  %v3418_v35 = vmul.f32 1.442695, %v3172_v14  ;;  %v4006_v36 = vmul.f32 %v7315_v54, %v12273_v47  ;;  %7338 = vpow2.f32 %v3420_v57  ;;  %v4135_v28 = vmul.f32 %v4007_v11, %v2003_v34 }
 0x2f8   : > { %v7319_v10 = vpop.eup %7318  ;;  %v3656_v61 = vpop.xlane.xlu0 %3655  ;;  %v2016_v14 = vadd.f32 %v10385_v5, %v10108_v58  ;;  %v2027_v54 = vadd.f32 %v10385_v5, %v10134_v63  ;;  %v4235_v40 = vpack.c.bf16 %v4137_v49, %v4136_v42  ;;  %v12278_v63 = vld [vmem:[#allocation20_spill] sm:$0xff]  ;;  %v2048_v46 = vadd.f32 %v10385_v5, %v10291_v38 }
 0x2f9   : > { %v7321_v50 = vpop.eup %7320  ;;  %7340 = vpow2.f32 %v3418_v35  ;;  %v4134_v21 = vmul.f32 %v4006_v36, %v2000_v60  ;;  %v12275_v60 = vld [vmem:[#allocation182_spill] sm:$0xff]  ;;  %v10605_v35 = vpop.f32.mrf.mxu1  ;;  %v4014_v36 = vmul.f32 %v7319_v10, %v12278_v63  ;;  %v2043_v10 = vadd.f32 %v10385_v5, %v10233_v53 }
 0x2fa   : > { %v7323_v3 = vpop.eup %7322  ;;  %7342 = vrcp.f32 %v12274_v7  ;;  %v3665_v34 = vpop.xlane.xlu1 %3664  ;;  %v4013_v57 = vmul.f32 %v7321_v50, %v12275_v60  ;;  %12277 = vst [vmem:[#allocation35_spill] sm:$0xff] %v10605_v35  ;;  %v12279_v7 = vld [vmem:[#allocation19_spill] sm:$0xff]  ;;  %v2040_v50 = vadd.f32 %v10385_v5, %v10186_v9 }
 0x2fb   : > { %v4234_v17 = vpack.c.bf16 %v4135_v28, %v4134_v21  ;;  %v7325_v59 = vpop.eup %7324  ;;  %v4012_v11 = vmul.f32 %v7323_v3, %v12276_v45  ;;  %7344 = vrcp.f32 %v3659_v31  ;;  %v4015_v37 = vmul.f32 %v7317_v18, %v12279_v7  ;;  %v12280_v31 = vld [vmem:[#allocation37_spill] sm:$0xff]  ;;  %v12281_v21 = vld [vmem:[#allocation184_spill] sm:$0xff]  ;;  %v10624_v63 = vpop.f32.mrf.mxu1 }
 0x2fc   : > { %v3662_v58 = vpop.xlane.xlu0 %3661  ;;  %v7327_v47 = vpop.eup %7326  ;;  %7346 = vrcp.f32 %v3656_v61  ;;  %v2051_v18 = vadd.f32 %v10385_v5, %v10330_v23  ;;  %v4142_v53 = vmul.f32 %v4014_v36, %v2032_v55  ;;  %v4017_v44 = vmul.f32 %v7325_v59, %v12283_v25 }
 0x2fd   : > { %6870 = vmatprep.mubr.msk.bf16.mxu0 %vm980_vm0, %v4234_v17  ;;  %v4011_v42 = vmul.f32 %v7327_v47, %v12280_v31  ;;  %v4141_v47 = vmul.f32 %v4013_v57, %v2027_v54  ;;  %v4143_v31 = vmul.f32 %v4015_v37, %v2035_v15  ;;  %7348 = vrcp.f32 %v3665_v34  ;;  %v10632_v36 = vpop.f32.mrf.mxu1  ;;  %v12286_v34 = vld [vmem:[#allocation130_spill] sm:$0xff] }
 0x2fe   : > { %v7329_v28 = vpop.eup %7328  ;;  %6871 = vmatmul.mubr.msk.bf16.gmra.mxu0 %vm980_vm0, %v4235_v40  ;;  %v3035_v61 = vpop.xlane.xlu1 %3034  ;;  %v4140_v40 = vmul.f32 %v4012_v11, %v2024_v16  ;;  %7350 = vrcp.f32 %v3662_v58  ;;  %v12285_v11 = vld [vmem:[#allocation31_spill] sm:$0xff]  ;;  %v4145_v37 = vmul.f32 %v4017_v44, %v2043_v10  ;;  %v2056_v44 = vadd.f32 %v10385_v5, %v10260_v27 }
 0x2ff   : > { %v7331_v49 = vpop.eup %7330  ;;  %v4010_v3 = vmul.f32 %v7329_v28, %v12281_v21  ;;  %v3175_v9 = vsub.f32 %v9945_v52, %v3035_v61  ;;  %v4139_v45 = vmul.f32 %v4011_v42, %v2019_v19  ;;  %v12284_v21 = vld [vmem:[#allocation28_spill] sm:$0xff]  ;;  %v4238_v25 = vpack.c.bf16 %v4143_v31, %v4142_v53 }
 0x300   : > { %v7333_v17 = vpop.eup %7332  ;;  %v3032_v60 = vpop.xlane.xlu0 %3031  ;;  %v4016_v23 = vmul.f32 %v7331_v49, %v12282_v32  ;;  %v2059_v31 = vadd.f32 %v10385_v5, %v10319_v20  ;;  %v12290_v20 = vld [vmem:[#allocation118_spill] sm:$0xff] }
 0x301   : > { %v7335_v7 = vpop.eup %7334  ;;  %v3174_v38 = vsub.f32 %v9899_v22, %v3032_v60  ;;  %v4138_v35 = vmul.f32 %v4010_v3, %v2016_v14  ;;  %v3424_v28 = vmul.f32 1.442695, %v3175_v9  ;;  %v4019_v52 = vmul.f32 %v7333_v17, %v12284_v21 }
 0x302   : > { %v3041_v16 = vpop.xlane.xlu1 %3040  ;;  %v7337_v57 = vpop.eup %7336  ;;  %v4018_v42 = vmul.f32 %v7335_v7, %v12285_v11  ;;  %v4237_v14 = vpack.c.bf16 %v4141_v47, %v4140_v40  ;;  %v4144_v17 = vmul.f32 %v4016_v23, %v2040_v50  ;;  %v12287_v7 = vld [vmem:[#allocation23_spill] sm:$0xff] }
 0x303   : > { %v3422_v19 = vmul.f32 1.442695, %v3174_v38  ;;  %v4236_v54 = vpack.c.bf16 %v4139_v45, %v4138_v35  ;;  %7352 = vpow2.f32 %v3424_v28  ;;  %v3177_v55 = vsub.f32 %v9957_v39, %v3041_v16  ;;  %v10646_v40 = vpop.f32.mrf.mxu1  ;;  %v12288_v38 = vld [vmem:[#allocation22_spill] sm:$0xff] }
 0x304   : > { %v3038_v22 = vpop.xlane.xlu0 %3037  ;;  %v10634_v32 = vpop.eup %7338  ;;  %v4146_v9 = vmul.f32 %v4018_v42, %v2048_v46  ;;  %v4147_v60 = vmul.f32 %v4019_v52, %v2051_v18  ;;  %v4021_v50 = vmul.f32 %v7337_v57, %v12288_v38  ;;  %v4239_v18 = vpack.c.bf16 %v4145_v37, %v4144_v17  ;;  %v12289_v52 = vld [vmem:[#allocation81_spill] sm:$0xff] }
 0x305   : > { %7354 = vpow2.f32 %v3422_v19  ;;  %v3176_v59 = vsub.f32 %v12286_v34, %v3038_v22  ;;  %6874 = vmatprep.mubr.msk.bf16.mxu0 %vm980_vm0, %v4236_v54  ;;  %v3428_v35 = vmul.f32 1.442695, %v3177_v55  ;;  %v3795_v39 = vsel %vm980_vm0, %v10634_v32, 0.0  ;;  %v10656_v27 = vpop.f32.mrf.mxu1 }
 0x306   : > { %v10638_v58 = vpop.eup %7340  ;;  %6875 = vmatmul.mubr.msk.bf16.gmra.mxu0 %vm980_vm0, %v4237_v14  ;;  %3796 = vadd.xlane.f32.xlu1 %v3795_v39  ;;  %v3671_v61 = vpop.xlane.xlu1 %3670  ;;  %v4240_v23 = vpack.c.bf16 %v4147_v60, %v4146_v9  ;;  %v2064_v28 = vadd.f32 %v10385_v5, %v10370_v12  ;;  %v2067_v16 = vadd.f32 %v10385_v5, %v10415_v30 }
 0x307   : > { %v7343_v15 = vpop.eup %7342  ;;  %v3426_v49 = vmul.f32 1.442695, %v3176_v59  ;;  %6878 = vmatprep.mubr.msk.bf16.mxu0 %vm980_vm0, %v4238_v25  ;;  %v3792_v3 = vsel %vm980_vm0, %v10638_v58, 0.0  ;;  %7356 = vpow2.f32 %v3428_v35  ;;  %v4149_v11 = vmul.f32 %v4021_v50, %v2059_v31  ;;  %v10665_v25 = vpop.f32.mrf.mxu1 }
 0x308   : > { %3793 = vadd.xlane.f32.xlu0 %v3792_v3  ;;  %v3668_v45 = vpop.xlane.xlu0 %3667  ;;  %v7345_v47 = vpop.eup %7344  ;;  %v4020_v53 = vmul.f32 %v7343_v15, %v12287_v7  ;;  %v2083_v50 = vadd.f32 %v10385_v5, %v10479_v48 }
 0x309   : > { %7358 = vpow2.f32 %v3426_v49  ;;  %v7347_v10 = vpop.eup %7346  ;;  %v4023_v54 = vmul.f32 %v7345_v47, %v12290_v20  ;;  %v10683_v7 = vpop.f32.mrf.mxu1 }
 0x30a   : > { %7360 = vrcp.f32 %v3671_v61  ;;  %v3677_v46 = vpop.xlane.xlu1 %3676  ;;  %v4022_v19 = vmul.f32 %v7347_v10, %v12289_v52  ;;  %v4148_v57 = vmul.f32 %v4020_v53, %v2056_v44  ;;  %v7349_v42 = vpop.eup %7348  ;;  %v2072_v61 = vadd.f32 %v10385_v5, %v10347_v33 }
 0x30b   : > { %7362 = vrcp.f32 %v3668_v45  ;;  %v7351_v55 = vpop.eup %7350  ;;  %v4151_v59 = vmul.f32 %v4023_v54, %v2067_v16  ;;  %v12292_v45 = vld [vmem:[#allocation83_spill] sm:$0xff]  ;;  %v10701_v54 = vpop.f32.mrf.mxu1 }
 0x30c   : > { %7364 = vrcp.f32 %v3677_v46  ;;  %v3674_v21 = vpop.xlane.xlu0 %3673  ;;  %v4150_v30 = vmul.f32 %v4022_v19, %v2064_v28  ;;  %v4241_v15 = vpack.c.bf16 %v4149_v11, %v4148_v57  ;;  %v4025_v47 = vmul.f32 %v7349_v42, %v12292_v45  ;;  %v12293_v19 = vld [vmem:[#allocation41_spill] sm:$0xff] }
 0x30d   : > { %7366 = vrcp.f32 %v3674_v21 }
 0x30e   : > { %6879 = vmatmul.mubr.msk.bf16.gmra.mxu0 %vm980_vm0, %v4239_v18  ;;  %v3047_v12 = vpop.xlane.xlu1 %3046  ;;  %v2080_v18 = vadd.f32 %v10385_v5, %v10443_v6  ;;  %v12294_v6 = vld [vmem:[#allocation72_spill] sm:$0xff] }
 0x30f   : > { %6882 = vmatprep.mubr.msk.bf16.mxu0 %vm980_vm0, %v4240_v23  ;;  %v3179_v22 = vsub.f32 %v10045_v4, %v3047_v12  ;;  %v2075_v4 = vadd.f32 %v10385_v5, %v10396_v2  ;;  %v4242_v2 = vpack.c.bf16 %v4151_v59, %v4150_v30 }
 0x310   : > { %v3044_v14 = vpop.xlane.xlu0 %3043  ;;  %v10667_v34 = vpop.eup %7352 }
 0x311   : > { %v3178_v35 = vsub.f32 %v10035_v51, %v3044_v14  ;;  %v3432_v37 = vmul.f32 1.442695, %v3179_v22  ;;  %v3801_v49 = vsel %vm980_vm0, %v10667_v34, 0.0  ;;  %v12291_v51 = vld [vmem:[#allocation69_spill] sm:$0xff]  ;;  %v4153_v48 = vmul.f32 %v4025_v47, %v2075_v4  ;;  %v10710_v4 = vpop.f32.mrf.mxu1 }
 0x312   : > { %v10670_v39 = vpop.eup %7354  ;;  %3802 = vadd.xlane.f32.xlu1 %v3801_v49  ;;  %v3053_v17 = vpop.xlane.xlu1 %3052  ;;  %v4024_v60 = vmul.f32 %v7351_v55, %v12291_v51  ;;  %v2088_v55 = vadd.f32 %v10385_v5, %v10425_v41  ;;  %v2091_v14 = vadd.f32 %v10385_v5, %v10459_v43 }
 0x313   : > { %v3430_v3 = vmul.f32 1.442695, %v3178_v35  ;;  %v3798_v9 = vsel %vm980_vm0, %v10670_v39, 0.0  ;;  %7368 = vpow2.f32 %v3432_v37  ;;  %v3181_v44 = vsub.f32 %v10051_v13, %v3053_v17  ;;  %v12295_v35 = vld [vmem:[#allocation131_spill] sm:$0xff]  ;;  %v12296_v37 = vld [vmem:[#allocation86_spill] sm:$0xff]  ;;  %v10714_v51 = vpop.f32.mrf.mxu1 }
 0x314   : > { %3799 = vadd.xlane.f32.xlu0 %v3798_v9  ;;  %v3050_v10 = vpop.xlane.xlu0 %3049  ;;  %v10685_v33 = vpop.eup %7356  ;;  %v4152_v52 = vmul.f32 %v4024_v60, %v2072_v61 }
 0x315   : > { %7370 = vpow2.f32 %v3430_v3  ;;  %v3180_v53 = vsub.f32 %v10007_v26, %v3050_v10  ;;  %v3436_v38 = vmul.f32 1.442695, %v3181_v44  ;;  %v3807_v13 = vsel %vm980_vm0, %v10685_v33, 0.0 }
 0x316   : > { %v10688_v31 = vpop.eup %7358  ;;  %6883 = vmatmul.mubr.msk.bf16.gmra.mxu0 %vm980_vm0, %v4241_v15  ;;  %3808 = vadd.xlane.f32.xlu1 %v3807_v13  ;;  %v3683_v26 = vpop.xlane.xlu1 %3682  ;;  %v4243_v59 = vpack.c.bf16 %v4153_v48, %v4152_v52  ;;  %v2107_v48 = vadd.f32 %v10385_v5, %v10517_v24 }
 0x317   : > { %v7361_v46 = vpop.eup %7360  ;;  %v3434_v23 = vmul.f32 1.442695, %v3180_v53  ;;  %6886 = vmatprep.mubr.msk.bf16.mxu0 %vm980_vm0, %v4242_v2  ;;  %v3804_v28 = vsel %vm980_vm0, %v10688_v31, 0.0  ;;  %7372 = vpow2.f32 %v3436_v38  ;;  %v10724_v38 = vpop.f32.mrf.mxu1 }
 0x318   : > { %v7363_v21 = vpop.eup %7362  ;;  %v4027_v16 = vmul.f32 %v7361_v46, %v12293_v19  ;;  %3805 = vadd.xlane.f32.xlu0 %v3804_v28  ;;  %v3680_v20 = vpop.xlane.xlu0 %3679  ;;  %v2099_v46 = vadd.f32 %v10385_v5, %v10524_v0  ;;  %v12297_v19 = vld [vmem:[#allocation45_spill] sm:$0xff] }
 0x319   : > { %v7365_v57 = vpop.eup %7364  ;;  %v4026_v11 = vmul.f32 %v7363_v21, %v12294_v6  ;;  %7374 = vpow2.f32 %v3434_v23  ;;  %v12298_v6 = vld [vmem:[#allocation71_spill] sm:$0xff] }
 0x31a   : > { %v7367_v42 = vpop.eup %7366  ;;  %v4155_v12 = vmul.f32 %v4027_v16, %v2083_v50  ;;  %7376 = vrcp.f32 %v3683_v26  ;;  %v3689_v30 = vpop.xlane.xlu1 %3688  ;;  %v4029_v49 = vmul.f32 %v7365_v57, %v12296_v37  ;;  %v2096_v26 = vadd.f32 %v10385_v5, %v10504_v29 }
 0x31b   : > { %v4154_v22 = vmul.f32 %v4026_v11, %v2080_v18  ;;  %7378 = vrcp.f32 %v3680_v20  ;;  %v4028_v15 = vmul.f32 %v7367_v42, %v12295_v35  ;;  %v10742_v20 = vpop.f32.mrf.mxu1  ;;  %v2104_v29 = vadd.f32 %v10385_v5, %v10483_v8 }
 0x31c   : > { %7380 = vrcp.f32 %v3689_v30  ;;  %v3686_v61 = vpop.xlane.xlu0 %3685  ;;  %v4157_v43 = vmul.f32 %v4029_v49, %v2091_v14  ;;  %v12300_v14 = vld [vmem:[#allocation7_spill] sm:$0xff]  ;;  %v2115_v37 = vadd.f32 %v10385_v5, %v10555_v56  ;;  %v10761_v56 = vld [vmem:[%s11480_s6] ss:$0 sm:$0xff] }
 0x31d   : > { %v4244_v3 = vpack.c.bf16 %v4155_v12, %v4154_v22  ;;  %7382 = vrcp.f32 %v3686_v61  ;;  %v4156_v17 = vmul.f32 %v4028_v15, %v2088_v55  ;;  %v12299_v12 = vld [vmem:[#allocation42_spill] sm:$0xff]  ;;  %v10751_v49 = vpop.f32.mrf.mxu1 }
 0x31e   : > { %6887 = vmatmul.mubr.msk.bf16.gmra.mxu0 %vm980_vm0, %v4243_v59  ;;  %v3695_v41 = vpop.xlane.xlu1 %3694 }
 0x31f   : > { %6890 = vmatprep.mubr.msk.bf16.mxu0 %vm980_vm0, %v4244_v3  ;;  %7384 = vrcp.f32 %v3695_v41  ;;  %v4245_v2 = vpack.c.bf16 %v4157_v43, %v4156_v17  ;;  %v2112_v41 = vadd.f32 %v10385_v5, %v10541_v62  ;;  %v12301_v43 = vld [vmem:[#allocation49_spill] sm:$0xff]  ;;  %v10765_v62 = vpop.f32.mrf.mxu1 }
 0x320   : > { %v3692_v9 = vpop.xlane.xlu0 %3691  ;;  %v10716_v60 = vpop.eup %7368 }
 0x321   : > { %7386 = vrcp.f32 %v3692_v9  ;;  %v3813_v47 = vsel %vm980_vm0, %v10716_v60, 0.0 }
 0x322   : > { %v10718_v45 = vpop.eup %7370  ;;  %3814 = vadd.xlane.f32.xlu1 %v3813_v47  ;;  %v3701_v44 = vpop.xlane.xlu1 %3700 }
 0x323   : > { %v3810_v10 = vsel %vm980_vm0, %v10718_v45, 0.0  ;;  %7388 = vrcp.f32 %v3701_v44  ;;  %v12302_v44 = vld [vmem:[#allocation91_spill] sm:$0xff] }
 0x324   : > { %3811 = vadd.xlane.f32.xlu0 %v3810_v10  ;;  %v3698_v53 = vpop.xlane.xlu0 %3697  ;;  %v10726_v50 = vpop.eup %7372 }
 0x325   : > { %7390 = vrcp.f32 %v3698_v53  ;;  %v3819_v18 = vsel %vm980_vm0, %v10726_v50, 0.0  ;;  %v12303_v53 = vld [vmem:[#allocation6_spill] sm:$0xff] }
 0x326   : > { %v10728_v13 = vpop.eup %7374  ;;  %6891 = vmatmul.mubr.msk.bf16.gmra.mxu0 %vm980_vm0, %v4245_v2  ;;  %3820 = vadd.xlane.f32.xlu1 %v3819_v18  ;;  %v3707_v28 = vpop.xlane.xlu1 %3706 }
 0x327   : > { %v7377_v23 = vpop.eup %7376  ;;  %v3816_v21 = vsel %vm980_vm0, %v10728_v13, 0.0  ;;  %7392 = vrcp.f32 %v3707_v28 }
 0x328   : > { %v7379_v52 = vpop.eup %7378  ;;  %v4031_v0 = vmul.f32 %v7377_v23, %v12297_v19  ;;  %3817 = vadd.xlane.f32.xlu0 %v3816_v21  ;;  %v3704_v16 = vpop.xlane.xlu0 %3703 }
 0x329   : > { %v7381_v57 = vpop.eup %7380  ;;  %v4030_v11 = vmul.f32 %v7379_v52, %v12298_v6  ;;  %7394 = vrcp.f32 %v3704_v16  ;;  %v10775_v6 = vld [vmem:[%s11482_s8] ss:$0 sm:$0xff] }
 0x32a   : > { %v7383_v42 = vpop.eup %7382  ;;  %v4033_v55 = vmul.f32 %v7381_v57, %v12299_v12  ;;  %v4159_v22 = vmul.f32 %v4031_v0, %v2099_v46  ;;  %v3713_v59 = vpop.xlane.xlu1 %3712  ;;  %v2123_v46 = vadd.f32 %v10761_v56, %v12303_v53  ;;  %v12306_v0 = vld [vmem:[#allocation46_spill] sm:$0xff]  ;;  %v2131_v12 = vadd.f32 %v10761_v56, %v10590_v1 }
 0x32b   : > { %v4032_v24 = vmul.f32 %v7383_v42, %v12300_v14  ;;  %v4158_v30 = vmul.f32 %v4030_v11, %v2096_v26  ;;  %7396 = vrcp.f32 %v3713_v59  ;;  %v12304_v26 = vld [vmem:[#allocation39_spill] sm:$0xff] }
 0x32c   : > { %v4161_v35 = vmul.f32 %v4033_v55, %v2107_v48  ;;  %v3710_v15 = vpop.xlane.xlu0 %3709  ;;  %v7385_v8 = vpop.eup %7384  ;;  %v2120_v28 = vadd.f32 %v10761_v56, %v12304_v26  ;;  %v12305_v48 = vld [vmem:[#allocation134_spill] sm:$0xff] }
 0x32d   : > { %v4160_v61 = vmul.f32 %v4032_v24, %v2104_v29  ;;  %v4246_v3 = vpack.c.bf16 %v4159_v22, %v4158_v30  ;;  %7398 = vrcp.f32 %v3710_v15  ;;  %v4035_v9 = vmul.f32 %v7385_v8, %v12301_v43  ;;  %v10779_v55 = vpop.f32.mrf.mxu1  ;;  %v12307_v24 = vld [vmem:[#allocation76_spill] sm:$0xff] }
 0x32e   : > { %v7387_v17 = vpop.eup %7386  ;;  %v2128_v30 = vadd.f32 %v10761_v56, %v12307_v24  ;;  %v7477_v24 = vld [vmem:[%s7687_s20] sm:$0xff] }
 0x32f   : > { %v4247_v47 = vpack.c.bf16 %v4161_v35, %v4160_v61  ;;  %v4034_v10 = vmul.f32 %v7387_v17, %v12302_v44  ;;  %6894 = vmatprep.mubr.msk.bf16.mxu0 %vm980_vm0, %v4246_v3  ;;  %v3719_v2 = vpop.xlane.xlu1 %3718  ;;  %v4163_v18 = vmul.f32 %v4035_v9, %v2115_v37  ;;  %v12308_v37 = vld [vmem:[#allocation75_spill] sm:$0xff]  ;;  %v12309_v3 = vld [vmem:[#allocation5_spill] sm:$0xff]  ;;  %v10790_v53 = vpop.f32.mrf.mxu1 }
 0x330   : > { %7400 = vrcp.f32 %v3719_v2  ;;  %v3716_v5 = vpop.xlane.xlu0 %3715  ;;  %v7389_v23 = vpop.eup %7388 }
 0x331   : > { %v4162_v21 = vmul.f32 %v4034_v10, %v2112_v41  ;;  %7402 = vrcp.f32 %v3716_v5  ;;  %6895 = vmatmul.mubr.msk.bf16.gmra.mxu0 %vm980_vm0, %v4247_v47  ;;  %v4037_v19 = vmul.f32 %v7389_v23, %v12305_v48  ;;  %v12310_v41 = vld [vmem:[#allocation27_spill] sm:$0xff]  ;;  %v7476_v48 = vld [vmem:[%s7687_s20 + $0x10] sm:$0xff] }
 0x332   : > { %v7391_v52 = vpop.eup %7390  ;;  %v2139_v17 = vadd.f32 %v10761_v56, %v12310_v41 }
 0x333   : > { %v4036_v16 = vmul.f32 %v7391_v52, %v12306_v0  ;;  %v4248_v57 = vpack.c.bf16 %v4163_v18, %v4162_v21  ;;  %v3725_v29 = vpop.xlane.xlu1 %3724  ;;  %v4165_v11 = vmul.f32 %v4037_v19, %v2123_v46  ;;  %v12311_v18 = vld [vmem:[#allocation40_spill] sm:$0xff]  ;;  %v12312_v21 = vld [vmem:[#allocation87_spill] sm:$0xff] }
 0x334   : > { %7404 = vrcp.f32 %v3725_v29  ;;  %v3722_v42 = vpop.xlane.xlu0 %3721  ;;  %v7393_v22 = vpop.eup %7392  ;;  %v2136_v5 = vadd.f32 %v10761_v56, %v12311_v18  ;;  %v2155_v18 = vadd.f32 %v10761_v56, %v10632_v36 }
 0x335   : > { %v4164_v14 = vmul.f32 %v4036_v16, %v2120_v28  ;;  %7406 = vrcp.f32 %v3722_v42  ;;  %v6816_v59 = vpop.f32.mrf.mxu0  ;;  %6898 = vmatprep.mubr.msk.bf16.mxu0 %vm980_vm0, %v4248_v57  ;;  %v4039_v8 = vmul.f32 %v7393_v22, %v12308_v37  ;;  %v12313_v57 = vld [vmem:[#allocation50_spill] sm:$0xff]  ;;  %v2147_v22 = vadd.f32 %v10761_v56, %v10646_v40  ;;  %v10812_v37 = vpop.f32.mrf.mxu1 }
 0x336   : > { %v7395_v35 = vpop.eup %7394  ;;  %v4528_v15 = vadd.f32 %v6816_v59, %v10775_v6 }
 0x337   : > { %v4249_v61 = vpack.c.bf16 %v4165_v11, %v4164_v14  ;;  %v4038_v1 = vmul.f32 %v7395_v35, %v12309_v3  ;;  %v4519_v43 = vpop.f32.mrf.mxu0  ;;  %v3731_v9 = vpop.xlane.xlu1 %3730  ;;  %v4167_v44 = vmul.f32 %v4039_v8, %v2131_v12  ;;  %v2144_v3 = vadd.f32 %v10761_v56, %v10624_v63  ;;  %v7479_v63 = vld [vmem:[%s7687_s20 + $0x8] sm:$0xff] }
 0x338   : > { %v5032_v47 = vmax.f32 %v4528_v15, 0.0  ;;  %v4520_v10 = vadd.f32 %v10775_v6, %v4519_v43  ;;  %7408 = vrcp.f32 %v3731_v9  ;;  %v3728_v2 = vpop.xlane.xlu0 %3727  ;;  %v7397_v46 = vpop.eup %7396  ;;  %v12314_v43 = vld [vmem:[#allocation78_spill] sm:$0xff] }
 0x339   : > { %v4166_v23 = vmul.f32 %v4038_v1, %v2128_v30  ;;  %7410 = vrcp.f32 %v3728_v2  ;;  %v6817_v26 = vpop.f32.mrf.mxu0  ;;  %6899 = vmatmul.mubr.msk.bf16.gmra.mxu0 %vm980_vm0, %v4249_v61  ;;  %v4041_v52 = vmul.f32 %v7397_v46, %v12312_v21  ;;  %v7478_v1 = vld [vmem:[%s7687_s20 + $0x18] sm:$0xff]  ;;  %v12316_v21 = vld [vmem:[#allocation35_spill] sm:$0xff] }
 0x33a   : > { %v7399_v28 = vpop.eup %7398  ;;  %v5160_v19 = vadd.f32 %v7476_v48, %v5032_v47  ;;  %v5030_v0 = vmax.f32 %v4520_v10, 0.0  ;;  %v4531_v16 = vadd.f32 %v6817_v26, %v10775_v6  ;;  %v10827_v26 = vpop.f32.mrf.mxu1 }
 0x33b   : > { %v4040_v29 = vmul.f32 %v7399_v28, %v12313_v57  ;;  %v4250_v11 = vpack.c.bf16 %v4167_v44, %v4166_v23  ;;  %v4522_v42 = vpop.f32.mrf.mxu0  ;;  %v3737_v12 = vpop.xlane.xlu1 %3736  ;;  %v4169_v14 = vmul.f32 %v4041_v52, %v2139_v17  ;;  %v12315_v44 = vld [vmem:[#allocation94_spill] sm:$0xff]  ;;  %v2152_v52 = vadd.f32 %v10761_v56, %v12316_v21  ;;  %v12318_v57 = vld [vmem:[#allocation53_spill] sm:$0xff] }
 0x33c   : > { %5288 = vst.msk [vmem:[%s10797_s15 + $0x10] sm:$0xff] %vm980_vm0, %v5160_v19  ;;  %v5158_v30 = vadd.f32 %v7477_v24, %v5030_v0  ;;  %v5033_v59 = vmax.f32 %v4531_v16, 0.0  ;;  %v4523_v35 = vadd.f32 %v10775_v6, %v4522_v42  ;;  %v3734_v15 = vpop.xlane.xlu0 %3733  ;;  %7412 = vrcp.f32 %v3737_v12  ;;  %v12317_v0 = vld [vmem:[#allocation52_spill] sm:$0xff] }
 0x33d   : > { %v7401_v8 = vpop.eup %7400  ;;  %v4168_v61 = vmul.f32 %v4040_v29, %v2136_v5  ;;  %6902 = vmatprep.mubr.msk.bf16.mxu0 %vm980_vm0, %v4250_v11  ;;  %7414 = vrcp.f32 %v3734_v15 }
 0x33e   : > { %v7403_v40 = vpop.eup %7402  ;;  %5286 = vst.msk [vmem:[%s10797_s15] sm:$0xff] %vm980_vm0, %v5158_v30  ;;  %v5161_v41 = vadd.f32 %v7478_v1, %v5033_v59  ;;  %v5031_v17 = vmax.f32 %v4523_v35, 0.0  ;;  %v4043_v9 = vmul.f32 %v7401_v8, %v12314_v43  ;;  %v2160_v59 = vadd.f32 %v10761_v56, %v10665_v25  ;;  %v12320_v1 = vld [vmem:[#allocation77_spill] sm:$0xff] }
 0x33f   : > { %v4251_v47 = vpack.c.bf16 %v4169_v14, %v4168_v61  ;;  %v4042_v10 = vmul.f32 %v7403_v40, %v12315_v44  ;;  %v3743_v2 = vpop.xlane.xlu1 %3742  ;;  %v10838_v14 = vpop.f32.mrf.mxu1  ;;  %v12319_v61 = vld [vmem:[#allocation57_spill] sm:$0xff] }
 0x340   : > { %5289 = vst.msk [vmem:[%s10797_s15 + $0x18] sm:$0xff] %vm980_vm0, %v5161_v41  ;;  %v5159_v46 = vadd.f32 %v7479_v63, %v5031_v17  ;;  %v4171_v5 = vmul.f32 %v4043_v9, %v2147_v22  ;;  %7416 = vrcp.f32 %v3743_v2  ;;  %v3740_v23 = vpop.xlane.xlu0 %3739  ;;  %v2163_v22 = vadd.f32 %v10761_v56, %v10701_v54 }
 0x341   : > { %v7405_v28 = vpop.eup %7404  ;;  %v4170_v48 = vmul.f32 %v4042_v10, %v2144_v3  ;;  %7418 = vrcp.f32 %v3740_v23  ;;  %6903 = vmatmul.mubr.msk.bf16.gmra.mxu0 %vm980_vm0, %v4251_v47  ;;  %v10847_v44 = vpop.f32.mrf.mxu1  ;;  %v2171_v2 = vadd.f32 %v10761_v56, %v10683_v7 }
 0x342   : > { %v7407_v19 = vpop.eup %7406  ;;  %5287 = vst.msk [vmem:[%s10797_s15 + $0x8] sm:$0xff] %vm980_vm0, %v5159_v46  ;;  %v4045_v16 = vmul.f32 %v7405_v28, %v12317_v0 }
 0x343   : > { %v4044_v36 = vmul.f32 %v7407_v19, %v12318_v57  ;;  %v4252_v29 = vpack.c.bf16 %v4171_v5, %v4170_v48  ;;  %v3749_v11 = vpop.xlane.xlu1 %3748  ;;  %v7480_v5 = vld [vmem:[%s7687_s20 + $0x30] sm:$0xff]  ;;  %v12321_v48 = vld [vmem:[#allocation90_spill] sm:$0xff] }
 0x344   : > { %v4173_v42 = vmul.f32 %v4045_v16, %v2155_v18  ;;  %7420 = vrcp.f32 %v3749_v11  ;;  %v3746_v12 = vpop.xlane.xlu0 %3745  ;;  %v2168_v18 = vadd.f32 %v10761_v56, %v10656_v27  ;;  %v12322_v57 = vld [vmem:[#allocation56_spill] sm:$0xff] }
 0x345   : > { %v7409_v24 = vpop.eup %7408  ;;  %v4172_v30 = vmul.f32 %v4044_v36, %v2152_v52  ;;  %7422 = vrcp.f32 %v3746_v12  ;;  %v6820_v35 = vpop.f32.mrf.mxu0  ;;  %6906 = vmatprep.mubr.msk.bf16.mxu0 %vm980_vm0, %v4252_v29  ;;  %v7481_v29 = vld [vmem:[%s7687_s20 + $0x20] sm:$0xff] }
 0x346   : > { %v7411_v15 = vpop.eup %7410  ;;  %v4544_v8 = vadd.f32 %v6820_v35, %v10775_v6  ;;  %v4047_v3 = vmul.f32 %v7409_v24, %v12319_v61  ;;  %v2179_v35 = vadd.f32 %v10761_v56, %v10742_v20  ;;  %v7482_v61 = vld [vmem:[%s7687_s20 + $0x38] sm:$0xff]  ;;  %v2187_v20 = vadd.f32 %v10761_v56, %v10724_v38  ;;  %v12326_v38 = vld [vmem:[#allocation62_spill] sm:$0xff] }
 0x347   : > { %v4253_v40 = vpack.c.bf16 %v4173_v42, %v4172_v30  ;;  %v4046_v41 = vmul.f32 %v7411_v15, %v12320_v1  ;;  %v4535_v54 = vpop.f32.mrf.mxu0  ;;  %v3755_v17 = vpop.xlane.xlu1 %3754  ;;  %v12323_v1 = vld [vmem:[#allocation102_spill] sm:$0xff] }
 0x348   : > { %v5036_v43 = vmax.f32 %v4544_v8, 0.0  ;;  %v4175_v9 = vmul.f32 %v4047_v3, %v2163_v22  ;;  %v4536_v47 = vadd.f32 %v10775_v6, %v4535_v54  ;;  %7424 = vrcp.f32 %v3755_v17  ;;  %v3752_v25 = vpop.xlane.xlu0 %3751  ;;  %v10862_v22 = vpop.f32.mrf.mxu1  ;;  %v12324_v54 = vld [vmem:[#allocation97_spill] sm:$0xff] }
 0x349   : > { %v4174_v10 = vmul.f32 %v4046_v41, %v2160_v59  ;;  %7426 = vrcp.f32 %v3752_v25  ;;  %v6821_v63 = vpop.f32.mrf.mxu0  ;;  %6907 = vmatmul.mubr.msk.bf16.gmra.mxu0 %vm980_vm0, %v4253_v40  ;;  %v7413_v46 = vpop.eup %7412  ;;  %v2176_v59 = vadd.f32 %v10761_v56, %v10714_v51 }
 0x34a   : > { %v5164_v23 = vadd.f32 %v7480_v5, %v5036_v43  ;;  %v5034_v28 = vmax.f32 %v4536_v47, 0.0  ;;  %v4547_v21 = vadd.f32 %v6821_v63, %v10775_v6  ;;  %v7415_v52 = vpop.eup %7414  ;;  %v4049_v19 = vmul.f32 %v7413_v46, %v12321_v48 }
 0x34b   : > { %v4254_v0 = vpack.c.bf16 %v4175_v9, %v4174_v10  ;;  %v4538_v7 = vpop.f32.mrf.mxu0  ;;  %v3761_v16 = vpop.xlane.xlu1 %3760  ;;  %v4048_v36 = vmul.f32 %v7415_v52, %v12322_v57  ;;  %v7483_v9 = vld [vmem:[%s7687_s20 + $0x28] sm:$0xff]  ;;  %v2184_v63 = vadd.f32 %v10761_v56, %v10710_v4  ;;  %v2195_v4 = vadd.f32 %v10761_v56, %v10790_v53 }
 0x34c   : > { %5292 = vst.msk [vmem:[%s10797_s15 + $0x30] sm:$0xff] %vm980_vm0, %v5164_v23  ;;  %v5162_v11 = vadd.f32 %v7481_v29, %v5034_v28  ;;  %v5037_v27 = vmax.f32 %v4547_v21, 0.0  ;;  %v4539_v42 = vadd.f32 %v10775_v6, %v4538_v7  ;;  %v3758_v12 = vpop.xlane.xlu0 %3757  ;;  %v4177_v30 = vmul.f32 %v4049_v19, %v2171_v2  ;;  %v10879_v10 = vpop.f32.mrf.mxu1  ;;  %v12325_v28 = vld [vmem:[#allocation61_spill] sm:$0xff] }
 0x34d   : > { %v7417_v24 = vpop.eup %7416  ;;  %7428 = vrcp.f32 %v3761_v16  ;;  %6910 = vmatprep.mubr.msk.bf16.mxu0 %vm980_vm0, %v4254_v0  ;;  %v4176_v8 = vmul.f32 %v4048_v36, %v2168_v18 }
 0x34e   : > { %v7419_v15 = vpop.eup %7418  ;;  %5290 = vst.msk [vmem:[%s10797_s15 + $0x20] sm:$0xff] %vm980_vm0, %v5162_v11  ;;  %v5165_v3 = vadd.f32 %v7482_v61, %v5037_v27  ;;  %v5035_v40 = vmax.f32 %v4539_v42, 0.0  ;;  %7430 = vrcp.f32 %v3758_v12  ;;  %v4051_v17 = vmul.f32 %v7417_v24, %v12324_v54  ;;  %v10892_v11 = vpop.f32.mrf.mxu1 }
 0x34f   : > { %v4050_v41 = vmul.f32 %v7419_v15, %v12323_v1  ;;  %v3767_v51 = vpop.xlane.xlu1 %3766  ;;  %v4255_v43 = vpack.c.bf16 %v4177_v30, %v4176_v8  ;;  %v2192_v12 = vadd.f32 %v10761_v56, %v10765_v62  ;;  %v7484_v30 = vld [vmem:[%s7687_s20 + $0x50] sm:$0xff]  ;;  %v7485_v62 = vld [vmem:[%s7687_s20 + $0x40] sm:$0xff] }
 0x350   : > { %5293 = vst.msk [vmem:[%s10797_s15 + $0x38] sm:$0xff] %vm980_vm0, %v5165_v3  ;;  %v5163_v47 = vadd.f32 %v7483_v9, %v5035_v40  ;;  %7432 = vrcp.f32 %v3767_v51  ;;  %v3764_v25 = vpop.xlane.xlu0 %3763  ;;  %v4179_v18 = vmul.f32 %v4051_v17, %v2179_v35  ;;  %v12327_v8 = vld [vmem:[#allocation100_spill] sm:$0xff]  ;;  %v12328_v40 = vld [vmem:[#allocation105_spill] sm:$0xff] }
 0x351   : > { %v7421_v2 = vpop.eup %7420  ;;  %v4178_v46 = vmul.f32 %v4050_v41, %v2176_v59  ;;  %7434 = vrcp.f32 %v3764_v25  ;;  %v6824_v5 = vpop.f32.mrf.mxu0  ;;  %6911 = vmatmul.mubr.msk.bf16.gmra.mxu0 %vm980_vm0, %v4255_v43  ;;  %v2200_v25 = vadd.f32 %v10761_v56, %v10751_v49 }
 0x352   : > { %v7423_v23 = vpop.eup %7422  ;;  %5291 = vst.msk [vmem:[%s10797_s15 + $0x28] sm:$0xff] %vm980_vm0, %v5163_v47  ;;  %v4053_v21 = vmul.f32 %v7421_v2, %v12325_v28  ;;  %v4560_v52 = vadd.f32 %v6824_v5, %v10775_v6  ;;  %v7486_v5 = vld [vmem:[%s7687_s20 + $0x58] sm:$0xff] }
 0x353   : > { %v4052_v48 = vmul.f32 %v7423_v23, %v12326_v38  ;;  %v4256_v19 = vpack.c.bf16 %v4179_v18, %v4178_v46  ;;  %v4551_v0 = vpop.f32.mrf.mxu0  ;;  %v3773_v7 = vpop.xlane.xlu1 %3772 }
 0x354   : > { %v4181_v16 = vmul.f32 %v4053_v21, %v2187_v20  ;;  %v5040_v57 = vmax.f32 %v4560_v52, 0.0  ;;  %v4552_v36 = vadd.f32 %v10775_v6, %v4551_v0  ;;  %7436 = vrcp.f32 %v3773_v7  ;;  %v3770_v29 = vpop.xlane.xlu0 %3769  ;;  %v10905_v20 = vpop.f32.mrf.mxu1  ;;  %v12329_v52 = vld [vmem:[#allocation65_spill] sm:$0xff]  ;;  %v12330_v7 = vld [vmem:[#allocation108_spill] sm:$0xff] }
 0x355   : > { %v7425_v27 = vpop.eup %7424  ;;  %v4180_v42 = vmul.f32 %v4052_v48, %v2184_v63  ;;  %7438 = vrcp.f32 %v3770_v29  ;;  %v6825_v24 = vpop.f32.mrf.mxu0  ;;  %6914 = vmatprep.mubr.msk.bf16.mxu0 %vm980_vm0, %v4256_v19  ;;  %v2203_v63 = vadd.f32 %v10761_v56, %v10779_v55  ;;  %v2216_v55 = vadd.f32 %v10761_v56, %v10812_v37 }
 0x356   : > { %v7427_v53 = vpop.eup %7426  ;;  %v5168_v59 = vadd.f32 %v7484_v30, %v5040_v57  ;;  %v5038_v35 = vmax.f32 %v4552_v36, 0.0  ;;  %v4563_v15 = vadd.f32 %v6825_v24, %v10775_v6  ;;  %v4055_v61 = vmul.f32 %v7425_v27, %v12327_v8 }
 0x357   : > { %v4257_v3 = vpack.c.bf16 %v4181_v16, %v4180_v42  ;;  %v4054_v1 = vmul.f32 %v7427_v53, %v12328_v40  ;;  %v4554_v41 = vpop.f32.mrf.mxu0  ;;  %v3779_v54 = vpop.xlane.xlu1 %3778  ;;  %v7487_v16 = vld [vmem:[%s7687_s20 + $0x48] sm:$0xff]  ;;  %v2208_v37 = vadd.f32 %v10761_v56, %v10827_v26  ;;  %v2211_v30 = vadd.f32 %v10761_v56, %v10847_v44 }
 0x358   : > { %5296 = vst.msk [vmem:[%s10797_s15 + $0x50] sm:$0xff] %vm980_vm0, %v5168_v59  ;;  %v5166_v17 = vadd.f32 %v7485_v62, %v5038_v35  ;;  %v5041_v51 = vmax.f32 %v4563_v15, 0.0  ;;  %v4183_v43 = vmul.f32 %v4055_v61, %v2195_v4  ;;  %v4555_v9 = vadd.f32 %v10775_v6, %v4554_v41  ;;  %v3776_v47 = vpop.xlane.xlu0 %3775  ;;  %v10924_v42 = vpop.f32.mrf.mxu1  ;;  %v7488_v15 = vld [vmem:[%s7687_s20 + $0x70] sm:$0xff]  ;;  %v12332_v41 = vld [vmem:[#allocation110_spill] sm:$0xff] }
 0x359   : > { %v4182_v2 = vmul.f32 %v4054_v1, %v2192_v12  ;;  %7440 = vrcp.f32 %v3779_v54  ;;  %v6828_v46 = vpop.f32.mrf.mxu0  ;;  %6915 = vmatmul.mubr.msk.bf16.gmra.mxu0 %vm980_vm0, %v4257_v3  ;;  %v12331_v3 = vld [vmem:[#allocation114_spill] sm:$0xff]  ;;  %v2219_v26 = vadd.f32 %v10761_v56, %v10838_v14 }
 0x35a   : > { %v7429_v18 = vpop.eup %7428  ;;  %5294 = vst.msk [vmem:[%s10797_s15 + $0x40] sm:$0xff] %vm980_vm0, %v5166_v17  ;;  %v5169_v23 = vadd.f32 %v7486_v5, %v5041_v51  ;;  %v5039_v28 = vmax.f32 %v4555_v9, 0.0  ;;  %7442 = vrcp.f32 %v3776_v47  ;;  %v4576_v21 = vadd.f32 %v6828_v46, %v10775_v6  ;;  %v7489_v51 = vld [vmem:[%s7687_s20 + $0x60] sm:$0xff] }
 0x35b   : > { %v7431_v49 = vpop.eup %7430  ;;  %v4057_v38 = vmul.f32 %v7429_v18, %v12329_v52  ;;  %v4258_v48 = vpack.c.bf16 %v4183_v43, %v4182_v2  ;;  %v4567_v19 = vpop.f32.mrf.mxu0  ;;  %v12334_v52 = vld [vmem:[#allocation117_spill] sm:$0xff] }
 0x35c   : > { %v3785_v0 = vpop.xlane.xlu1 %3784  ;;  %v4056_v4 = vmul.f32 %v7431_v49, %v12330_v7  ;;  %5297 = vst.msk [vmem:[%s10797_s15 + $0x58] sm:$0xff] %vm980_vm0, %v5169_v23  ;;  %v5167_v57 = vadd.f32 %v7487_v16, %v5039_v28  ;;  %v5044_v36 = vmax.f32 %v4576_v21, 0.0  ;;  %v4568_v29 = vadd.f32 %v10775_v6, %v4567_v19  ;;  %v3782_v27 = vpop.xlane.xlu0 %3781  ;;  %v12333_v23 = vld [vmem:[#allocation66_spill] sm:$0xff]  ;;  %v7491_v16 = vld [vmem:[%s7687_s20 + $0x68] sm:$0xff] }
 0x35d   : > { %v7433_v12 = vpop.eup %7432  ;;  %v4185_v24 = vmul.f32 %v4057_v38, %v2203_v63  ;;  %7444 = vrcp.f32 %v3785_v0  ;;  %v6829_v53 = vpop.f32.mrf.mxu0  ;;  %6918 = vmatprep.mubr.msk.bf16.mxu0 %vm980_vm0, %v4258_v48  ;;  %v7490_v48 = vld [vmem:[%s7687_s20 + $0x78] sm:$0xff] }
 0x35e   : > { %v7435_v59 = vpop.eup %7434  ;;  %v4184_v35 = vmul.f32 %v4056_v4, %v2200_v25  ;;  %5295 = vst.msk [vmem:[%s10797_s15 + $0x48] sm:$0xff] %vm980_vm0, %v5167_v57  ;;  %v5172_v8 = vadd.f32 %v7488_v15, %v5044_v36  ;;  %v5042_v61 = vmax.f32 %v4568_v29, 0.0  ;;  %7446 = vrcp.f32 %v3782_v27  ;;  %v10943_v25 = vpop.f32.mrf.mxu1 }
 0x35f   : > { %v4058_v40 = vmul.f32 %v7435_v59, %v12331_v3  ;;  %v4579_v1 = vadd.f32 %v6829_v53, %v10775_v6  ;;  %v4059_v54 = vmul.f32 %v7433_v12, %v12332_v41  ;;  %v4570_v62 = vpop.f32.mrf.mxu0  ;;  %v12335_v3 = vld [vmem:[#allocation4_spill] sm:$0xff]  ;;  %v7493_v41 = vld [vmem:[%s7687_s20 + $0x80] sm:$0xff] }
 0x360   : > { %v3791_v44 = vpop.xlane.xlu1 %3790  ;;  %v4259_v17 = vpack.c.bf16 %v4185_v24, %v4184_v35  ;;  %5300 = vst.msk [vmem:[%s10797_s15 + $0x70] sm:$0xff] %vm980_vm0, %v5172_v8  ;;  %v5170_v43 = vadd.f32 %v7489_v51, %v5042_v61  ;;  %v4571_v9 = vadd.f32 %v10775_v6, %v4570_v62  ;;  %v3788_v47 = vpop.xlane.xlu0 %3787  ;;  %v2224_v35 = vadd.f32 %v10761_v56, %v10879_v10 }
 0x361   : > { %7448 = vrcp.f32 %v3791_v44  ;;  %v7437_v14 = vpop.eup %7436  ;;  %v4186_v2 = vmul.f32 %v4058_v40, %v2208_v37  ;;  %v5045_v63 = vmax.f32 %v4579_v1, 0.0  ;;  %v4187_v46 = vmul.f32 %v4059_v54, %v2211_v30  ;;  %v6832_v18 = vpop.f32.mrf.mxu0  ;;  %v7492_v30 = vld [vmem:[%s7687_s20 + $0x90] sm:$0xff] }
 0x362   : > { %7450 = vrcp.f32 %v3788_v47  ;;  %v7439_v5 = vpop.eup %7438  ;;  %5298 = vst.msk [vmem:[%s10797_s15 + $0x60] sm:$0xff] %vm980_vm0, %v5170_v43  ;;  %v4061_v28 = vmul.f32 %v7437_v14, %v12333_v23  ;;  %v5043_v21 = vmax.f32 %v4571_v9, 0.0  ;;  %v4592_v49 = vadd.f32 %v6832_v18, %v10775_v6  ;;  %6919 = vmatmul.mubr.msk.bf16.gmra.mxu0 %vm980_vm0, %v4259_v17  ;;  %v10954_v27 = vpop.f32.mrf.mxu1 }
 0x363   : > { %v4060_v38 = vmul.f32 %v7439_v5, %v12334_v52  ;;  %v5173_v19 = vadd.f32 %v7490_v48, %v5045_v63  ;;  %v4260_v0 = vpack.c.bf16 %v4187_v46, %v4186_v2  ;;  %v4583_v7 = vpop.f32.mrf.mxu0  ;;  %v2227_v37 = vadd.f32 %v10761_v56, %v10905_v20  ;;  %v12336_v20 = vld [vmem:[#allocation32_spill] sm:$0xff]  ;;  %v7494_v2 = vld [vmem:[%s7687_s20 + $0x98] sm:$0xff] }
 0x364   : > { %v4189_v4 = vmul.f32 %v4061_v28, %v2219_v26  ;;  %v5171_v57 = vadd.f32 %v7491_v16, %v5043_v21  ;;  %v5048_v36 = vmax.f32 %v4592_v49, 0.0  ;;  %v4584_v29 = vadd.f32 %v10775_v6, %v4583_v7  ;;  %v2242_v10 = vpop.f32.mrf.mxu1  ;;  %v12338_v21 = vld [vmem:[#allocation44_spill] sm:$0xff] }
 0x365   : > { %v4188_v12 = vmul.f32 %v4060_v38, %v2216_v55  ;;  %5301 = vst.msk [vmem:[%s10797_s15 + $0x78] sm:$0xff] %vm980_vm0, %v5173_v19  ;;  %v6833_v24 = vpop.f32.mrf.mxu0  ;;  %6922 = vmatprep.mubr.msk.bf16.mxu0 %vm980_vm0, %v4260_v0  ;;  %v2232_v17 = vadd.f32 %v10761_v56, %v10862_v22  ;;  %v2235_v51 = vadd.f32 %v10761_v56, %v10892_v11  ;;  %v12337_v22 = vld [vmem:[#allocation70_spill] sm:$0xff]  ;;  %v7495_v38 = vld [vmem:[%s7687_s20 + $0x88] sm:$0xff] }
 0x366   : > { %v7441_v53 = vpop.eup %7440  ;;  %5299 = vst.msk [vmem:[%s10797_s15 + $0x68] sm:$0xff] %vm980_vm0, %v5171_v57  ;;  %v5176_v59 = vadd.f32 %v7492_v30, %v5048_v36  ;;  %v5046_v15 = vmax.f32 %v4584_v29, 0.0  ;;  %v4595_v55 = vadd.f32 %v6833_v24, %v10775_v6  ;;  %v2243_v28 = vadd.f32 %v10761_v56, %v2242_v10 }
 0x367   : > { %v7443_v8 = vpop.eup %7442  ;;  %v4261_v61 = vpack.c.bf16 %v4189_v4, %v4188_v12  ;;  %v4063_v40 = vmul.f32 %v7441_v53, %v12335_v3  ;;  %v4586_v26 = vpop.f32.mrf.mxu0  ;;  %v2240_v4 = vadd.f32 %v10761_v56, %v10943_v25  ;;  %v7496_v12 = vld [vmem:[%s7687_s20 + $0xb0] sm:$0xff]  ;;  %v12339_v53 = vld [vmem:[#allocation21_spill] sm:$0xff] }
 0x368   : > { %5304 = vst.msk [vmem:[%s10797_s15 + $0x90] sm:$0xff] %vm980_vm0, %v5176_v59  ;;  %v4062_v1 = vmul.f32 %v7443_v8, %v12336_v20  ;;  %v5174_v54 = vadd.f32 %v7493_v41, %v5046_v15  ;;  %v5049_v62 = vmax.f32 %v4595_v55, 0.0  ;;  %v4587_v44 = vadd.f32 %v10775_v6, %v4586_v26  ;;  %v12340_v59 = vld [vmem:[#allocation24_spill] sm:$0xff]  ;;  %v7497_v26 = vld [vmem:[%s7687_s20 + $0xa0] sm:$0xff]  ;;  %v7498_v41 = vld [vmem:[%s7687_s20 + $0xb8] sm:$0xff] }
 0x369   : > { %v4191_v43 = vmul.f32 %v4063_v40, %v2227_v37  ;;  %v6836_v9 = vpop.f32.mrf.mxu0 }
 0x36a   : > { %v7445_v47 = vpop.eup %7444  ;;  %v4190_v14 = vmul.f32 %v4062_v1, %v2224_v35  ;;  %5302 = vst.msk [vmem:[%s10797_s15 + $0x80] sm:$0xff] %vm980_vm0, %v5174_v54  ;;  %v5177_v63 = vadd.f32 %v7494_v2, %v5049_v62  ;;  %v5047_v46 = vmax.f32 %v4587_v44, 0.0  ;;  %v4608_v18 = vadd.f32 %v6836_v9, %v10775_v6  ;;  %6923 = vmatmul.mubr.msk.bf16.gmra.mxu0 %vm980_vm0, %v4261_v61  ;;  %v7500_v2 = vld [vmem:[%s7687_s20 + $0xd0] sm:$0xff] }
 0x36b   : > { %v7447_v5 = vpop.eup %7446  ;;  %v4065_v23 = vmul.f32 %v7445_v47, %v12337_v22  ;;  %v4599_v11 = vpop.f32.mrf.mxu0  ;;  %v7501_v22 = vld [vmem:[%s7687_s20 + $0xc0] sm:$0xff] }
 0x36c   : > { %v4064_v49 = vmul.f32 %v7447_v5, %v12338_v21  ;;  %5305 = vst.msk [vmem:[%s10797_s15 + $0x98] sm:$0xff] %vm980_vm0, %v5177_v63  ;;  %v4262_v52 = vpack.c.bf16 %v4191_v43, %v4190_v14  ;;  %v5175_v48 = vadd.f32 %v7495_v38, %v5047_v46  ;;  %v5052_v19 = vmax.f32 %v4608_v18, 0.0 }
 0x36d   : > { %v4193_v7 = vmul.f32 %v4065_v23, %v2235_v51  ;;  %v4600_v16 = vadd.f32 %v10775_v6, %v4599_v11  ;;  %v6837_v57 = vpop.f32.mrf.mxu0  ;;  %v7499_v51 = vld [vmem:[%s7687_s20 + $0xa8] sm:$0xff] }
 0x36e   : > { %v7449_v0 = vpop.eup %7448  ;;  %v4192_v29 = vmul.f32 %v4064_v49, %v2232_v17  ;;  %5303 = vst.msk [vmem:[%s10797_s15 + $0x88] sm:$0xff] %vm980_vm0, %v5175_v48  ;;  %v5180_v24 = vadd.f32 %v7496_v12, %v5052_v19  ;;  %v4611_v37 = vadd.f32 %v6837_v57, %v10775_v6  ;;  %6926 = vmatprep.mubr.msk.bf16.mxu0 %vm980_vm0, %v4262_v52  ;;  %v7502_v49 = vld [vmem:[%s7687_s20 + $0xd8] sm:$0xff] }
 0x36f   : > { %v7451_v36 = vpop.eup %7450  ;;  %v4067_v30 = vmul.f32 %v7449_v0, %v12339_v53  ;;  %v5050_v25 = vmax.f32 %v4600_v16, 0.0  ;;  %v4602_v15 = vpop.f32.mrf.mxu0  ;;  %v7503_v0 = vld [vmem:[%s7687_s20 + $0xc8] sm:$0xff]  ;;  %v7505_v53 = vld [vmem:[%s7687_s20 + $0xe0] sm:$0xff] }
 0x370   : > { %v4066_v35 = vmul.f32 %v7451_v36, %v12340_v59  ;;  %v4263_v55 = vpack.c.bf16 %v4193_v7, %v4192_v29  ;;  %5308 = vst.msk [vmem:[%s10797_s15 + $0xb0] sm:$0xff] %vm980_vm0, %v5180_v24  ;;  %v5053_v8 = vmax.f32 %v4611_v37, 0.0  ;;  %v4603_v3 = vadd.f32 %v10775_v6, %v4602_v15  ;;  %v7504_v36 = vld [vmem:[%s7687_s20 + $0xf0] sm:$0xff]  ;;  %v7506_v15 = vld [vmem:[%s7687_s20 + $0xf8] sm:$0xff] }
 0x371   : > { %v4195_v61 = vmul.f32 %v4067_v30, %v2243_v28  ;;  %v5178_v20 = vadd.f32 %v7497_v26, %v5050_v25  ;;  %v6840_v1 = vpop.f32.mrf.mxu0 }
 0x372   : > { %v4194_v40 = vmul.f32 %v4066_v35, %v2240_v4  ;;  %v5181_v54 = vadd.f32 %v7498_v41, %v5053_v8  ;;  %v5051_v62 = vmax.f32 %v4603_v3, 0.0  ;;  %v4624_v44 = vadd.f32 %v6840_v1, %v10775_v6  ;;  %6927 = vmatmul.mubr.msk.bf16.gmra.mxu0 %vm980_vm0, %v4263_v55 }
 0x373   : > { %5306 = vst.msk [vmem:[%s10797_s15 + $0xa0] sm:$0xff] %vm980_vm0, %v5178_v20  ;;  %v4615_v17 = vpop.f32.mrf.mxu0 }
 0x374   : > { %v4264_v10 = vpack.c.bf16 %v4195_v61, %v4194_v40  ;;  %5309 = vst.msk [vmem:[%s10797_s15 + $0xb8] sm:$0xff] %vm980_vm0, %v5181_v54  ;;  %v5179_v43 = vadd.f32 %v7499_v51, %v5051_v62  ;;  %v5056_v9 = vmax.f32 %v4624_v44, 0.0  ;;  %v4616_v47 = vadd.f32 %v10775_v6, %v4615_v17  ;;  %v7507_v40 = vld [vmem:[%s7687_s20 + $0xe8] sm:$0xff]  ;;  %v7508_v54 = vld [vmem:[%s7687_s20 + $0x110] sm:$0xff]  ;;  %v7509_v51 = vld [vmem:[%s7687_s20 + $0x100] sm:$0xff] }
 0x375   : > { %v6841_v14 = vpop.f32.mrf.mxu0 }
 0x376   : > { %6930 = vmatprep.mubr.msk.bf16.mxu0 %vm980_vm0, %v4264_v10  ;;  %5307 = vst.msk [vmem:[%s10797_s15 + $0xa8] sm:$0xff] %vm980_vm0, %v5179_v43  ;;  %v5184_v63 = vadd.f32 %v7500_v2, %v5056_v9  ;;  %v5054_v46 = vmax.f32 %v4616_v47, 0.0  ;;  %v4627_v18 = vadd.f32 %v6841_v14, %v10775_v6  ;;  %v7510_v2 = vld [vmem:[%s7687_s20 + $0x118] sm:$0xff] }
 0x377   : > { %v4618_v5 = vpop.f32.mrf.mxu0 }
 0x378   : > { %5312 = vst.msk [vmem:[%s10797_s15 + $0xd0] sm:$0xff] %vm980_vm0, %v5184_v63  ;;  %v5182_v23 = vadd.f32 %v7501_v22, %v5054_v46  ;;  %v5057_v11 = vmax.f32 %v4627_v18, 0.0  ;;  %v4619_v28 = vadd.f32 %v10775_v6, %v4618_v5  ;;  %v7511_v22 = vld [vmem:[%s7687_s20 + $0x108] sm:$0xff] }
 0x37a   : > { %v6844_v21 = vpop.f32.mrf.mxu0  ;;  %5310 = vst.msk [vmem:[%s10797_s15 + $0xc0] sm:$0xff] %vm980_vm0, %v5182_v23  ;;  %v5185_v52 = vadd.f32 %v7502_v49, %v5057_v11  ;;  %v5055_v38 = vmax.f32 %v4619_v28, 0.0  ;;  %v7512_v49 = vld [vmem:[%s7687_s20 + $0x130] sm:$0xff] }
 0x37b   : > { %v4640_v48 = vadd.f32 %v6844_v21, %v10775_v6 }
 0x37c   : > { %v4631_v19 = vpop.f32.mrf.mxu0  ;;  %5313 = vst.msk [vmem:[%s10797_s15 + $0xd8] sm:$0xff] %vm980_vm0, %v5185_v52  ;;  %v5183_v7 = vadd.f32 %v7503_v0, %v5055_v38  ;;  %v7513_v0 = vld [vmem:[%s7687_s20 + $0x120] sm:$0xff] }
 0x37d   : > { %v5060_v4 = vmax.f32 %v4640_v48, 0.0  ;;  %v4632_v16 = vadd.f32 %v10775_v6, %v4631_v19 }
 0x37e   : > { %v6845_v57 = vpop.f32.mrf.mxu0  ;;  %5311 = vst.msk [vmem:[%s10797_s15 + $0xc8] sm:$0xff] %vm980_vm0, %v5183_v7 }
 0x37f   : > { %v5188_v29 = vadd.f32 %v7504_v36, %v5060_v4  ;;  %v5058_v12 = vmax.f32 %v4632_v16, 0.0  ;;  %v4643_v24 = vadd.f32 %v6845_v57, %v10775_v6 }
 0x380   : > { %v4634_v37 = vpop.f32.mrf.mxu0 }
 0x381   : > { %5316 = vst.msk [vmem:[%s10797_s15 + $0xf0] sm:$0xff] %vm980_vm0, %v5188_v29  ;;  %v5186_v30 = vadd.f32 %v7505_v53, %v5058_v12  ;;  %v5061_v59 = vmax.f32 %v4643_v24, 0.0  ;;  %v4635_v35 = vadd.f32 %v10775_v6, %v4634_v37  ;;  %v7514_v12 = vld [vmem:[%s7687_s20 + $0x138] sm:$0xff] }
 0x382   : > { %v6848_v25 = vpop.f32.mrf.mxu0 }
 0x383   : > { %5314 = vst.msk [vmem:[%s10797_s15 + $0xe0] sm:$0xff] %vm980_vm0, %v5186_v30  ;;  %v5189_v55 = vadd.f32 %v7506_v15, %v5061_v59  ;;  %v5059_v8 = vmax.f32 %v4635_v35, 0.0  ;;  %v4656_v61 = vadd.f32 %v6848_v25, %v10775_v6  ;;  %v7515_v59 = vld [vmem:[%s7687_s20 + $0x128] sm:$0xff] }
 0x384   : > { %v4647_v3 = vpop.f32.mrf.mxu0 }
 0x385   : > { %5317 = vst.msk [vmem:[%s10797_s15 + $0xf8] sm:$0xff] %vm980_vm0, %v5189_v55  ;;  %v5187_v26 = vadd.f32 %v7507_v40, %v5059_v8  ;;  %v5064_v20 = vmax.f32 %v4656_v61, 0.0  ;;  %v4648_v1 = vadd.f32 %v10775_v6, %v4647_v3  ;;  %v7516_v8 = vld [vmem:[%s7687_s20 + $0x150] sm:$0xff] }
 0x386   : > { %v6849_v41 = vpop.f32.mrf.mxu0 }
 0x387   : > { %5315 = vst.msk [vmem:[%s10797_s15 + $0xe8] sm:$0xff] %vm980_vm0, %v5187_v26  ;;  %v5192_v62 = vadd.f32 %v7508_v54, %v5064_v20  ;;  %v5062_v44 = vmax.f32 %v4648_v1, 0.0  ;;  %v4659_v10 = vadd.f32 %v6849_v41, %v10775_v6  ;;  %v7517_v20 = vld [vmem:[%s7687_s20 + $0x140] sm:$0xff] }
 0x388   : > { %v4650_v17 = vpop.f32.mrf.mxu0 }
 0x389   : > { %5320 = vst.msk [vmem:[%s10797_s15 + $0x110] sm:$0xff] %vm980_vm0, %v5192_v62  ;;  %v5190_v43 = vadd.f32 %v7509_v51, %v5062_v44  ;;  %v5065_v9 = vmax.f32 %v4659_v10, 0.0  ;;  %v4651_v47 = vadd.f32 %v10775_v6, %v4650_v17  ;;  %v7518_v44 = vld [vmem:[%s7687_s20 + $0x158] sm:$0xff] }
 0x38a   : > { %v6852_v14 = vpop.f32.mrf.mxu0 }
 0x38b   : > { %5318 = vst.msk [vmem:[%s10797_s15 + $0x100] sm:$0xff] %vm980_vm0, %v5190_v43  ;;  %v5193_v63 = vadd.f32 %v7510_v2, %v5065_v9  ;;  %v5063_v46 = vmax.f32 %v4651_v47, 0.0  ;;  %v4672_v18 = vadd.f32 %v6852_v14, %v10775_v6  ;;  %v11088_v43 = vpop.f32.mrf.mxu1  ;;  %v7519_v47 = vld [vmem:[%s7687_s20 + $0x148] sm:$0xff] }
 0x38c   : > { %v4663_v5 = vpop.f32.mrf.mxu0 }
 0x38d   : > { %5321 = vst.msk [vmem:[%s10797_s15 + $0x118] sm:$0xff] %vm980_vm0, %v5193_v63  ;;  %v5191_v23 = vadd.f32 %v7511_v22, %v5063_v46  ;;  %v5068_v11 = vmax.f32 %v4672_v18, 0.0  ;;  %v4664_v28 = vadd.f32 %v10775_v6, %v4663_v5  ;;  %v2248_v18 = vadd.f32 %v10761_v56, %v10924_v42  ;;  %v2255_v42 = vpop.f32.mrf.mxu1 }
 0x38e   : > { %v6853_v21 = vpop.f32.mrf.mxu0  ;;  %v2251_v5 = vadd.f32 %v10761_v56, %v10954_v27 }
 0x38f   : > { %5319 = vst.msk [vmem:[%s10797_s15 + $0x108] sm:$0xff] %vm980_vm0, %v5191_v23  ;;  %v5196_v52 = vadd.f32 %v7512_v49, %v5068_v11  ;;  %v5066_v38 = vmax.f32 %v4664_v28, 0.0  ;;  %v4675_v48 = vadd.f32 %v6853_v21, %v10775_v6  ;;  %v3797_v57 = vpop.xlane.xlu1 %3796  ;;  %v7520_v28 = vld [vmem:[%s7687_s20 + $0x170] sm:$0xff] }
 0x390   : > { %v4666_v19 = vpop.f32.mrf.mxu0  ;;  %7452 = vrcp.f32 %v3797_v57 }
 0x391   : > { %5324 = vst.msk [vmem:[%s10797_s15 + $0x130] sm:$0xff] %vm980_vm0, %v5196_v52  ;;  %v5194_v7 = vadd.f32 %v7513_v0, %v5066_v38  ;;  %v5069_v4 = vmax.f32 %v4675_v48, 0.0  ;;  %v4667_v16 = vadd.f32 %v10775_v6, %v4666_v19  ;;  %v3794_v29 = vpop.xlane.xlu0 %3793  ;;  %v7521_v0 = vld [vmem:[%s7687_s20 + $0x160] sm:$0xff] }
 0x392   : > { %v6856_v36 = vpop.f32.mrf.mxu0  ;;  %7454 = vrcp.f32 %v3794_v29 }
 0x393   : > { %5322 = vst.msk [vmem:[%s10797_s15 + $0x120] sm:$0xff] %vm980_vm0, %v5194_v7  ;;  %v5197_v24 = vadd.f32 %v7514_v12, %v5069_v4  ;;  %v5067_v37 = vmax.f32 %v4667_v16, 0.0  ;;  %v4688_v53 = vadd.f32 %v6856_v36, %v10775_v6 }
 0x394   : > { %v4679_v30 = vpop.f32.mrf.mxu0 }
 0x395   : > { %5325 = vst.msk [vmem:[%s10797_s15 + $0x138] sm:$0xff] %vm980_vm0, %v5197_v24  ;;  %v5195_v35 = vadd.f32 %v7515_v59, %v5067_v37  ;;  %v5072_v25 = vmax.f32 %v4688_v53, 0.0  ;;  %v4680_v15 = vadd.f32 %v10775_v6, %v4679_v30  ;;  %v6805_v37 = vpop.f32.mrf.mxu1  ;;  %v7523_v53 = vld [vmem:[%s7687_s20 + $0x168] sm:$0xff] }
 0x396   : > { %v6857_v55 = vpop.f32.mrf.mxu0 }
 0x397   : > { %5323 = vst.msk [vmem:[%s10797_s15 + $0x128] sm:$0xff] %vm980_vm0, %v5195_v35  ;;  %v5200_v61 = vadd.f32 %v7516_v8, %v5072_v25  ;;  %v5070_v3 = vmax.f32 %v4680_v15, 0.0  ;;  %v4691_v40 = vadd.f32 %v6857_v55, %v10775_v6  ;;  %v2258_v25 = vpop.f32.mrf.mxu1 }
 0x398   : > { %v4682_v26 = vpop.f32.mrf.mxu0 }
 0x399   : > { %5328 = vst.msk [vmem:[%s10797_s15 + $0x150] sm:$0xff] %vm980_vm0, %v5200_v61  ;;  %v5198_v1 = vadd.f32 %v7517_v20, %v5070_v3  ;;  %v5073_v41 = vmax.f32 %v4691_v40, 0.0  ;;  %v4683_v54 = vadd.f32 %v10775_v6, %v4682_v26  ;;  %v2259_v3 = vadd.f32 %v10761_v56, %v2258_v25 }
 0x39a   : > { %v6860_v62 = vpop.f32.mrf.mxu0  ;;  %v2256_v26 = vadd.f32 %v10761_v56, %v2255_v42 }
 0x39b   : > { %5326 = vst.msk [vmem:[%s10797_s15 + $0x140] sm:$0xff] %vm980_vm0, %v5198_v1  ;;  %v5201_v10 = vadd.f32 %v7518_v44, %v5073_v41  ;;  %v5071_v17 = vmax.f32 %v4683_v54, 0.0  ;;  %v4704_v51 = vadd.f32 %v6860_v62, %v10775_v6  ;;  %v3803_v46 = vpop.xlane.xlu1 %3802  ;;  %v7524_v41 = vld [vmem:[%s7687_s20 + $0x190] sm:$0xff] }
 0x39c   : > { %v4695_v9 = vpop.f32.mrf.mxu0  ;;  %7456 = vrcp.f32 %v3803_v46 }
 0x39d   : > { %5329 = vst.msk [vmem:[%s10797_s15 + $0x158] sm:$0xff] %vm980_vm0, %v5201_v10  ;;  %v5199_v14 = vadd.f32 %v7519_v47, %v5071_v17  ;;  %v5076_v2 = vmax.f32 %v4704_v51, 0.0  ;;  %v4696_v63 = vadd.f32 %v10775_v6, %v4695_v9  ;;  %v3800_v23 = vpop.xlane.xlu0 %3799  ;;  %v7453_v11 = vpop.eup %7452  ;;  %v11128_v51 = vld [vmem:[%s11480_s6] ss:$0 sm:$0xff] }
 0x39e   : > { %v6861_v22 = vpop.f32.mrf.mxu0  ;;  %7458 = vrcp.f32 %v3800_v23  ;;  %v4069_v27 = vmul.f32 %v7453_v11, %v10634_v32  ;;  %v7522_v32 = vld [vmem:[%s7687_s20 + $0x178] sm:$0xff]  ;;  %v2267_v9 = vadd.f32 %v11128_v51, %v6805_v37 }
 0x39f   : > { %5327 = vst.msk [vmem:[%s10797_s15 + $0x148] sm:$0xff] %vm980_vm0, %v5199_v14  ;;  %v5204_v21 = vadd.f32 %v7520_v28, %v5076_v2  ;;  %v5074_v49 = vmax.f32 %v4696_v63, 0.0  ;;  %v4707_v52 = vadd.f32 %v6861_v22, %v10775_v6  ;;  %v7455_v38 = vpop.eup %7454  ;;  %v3809_v57 = vpop.xlane.xlu1 %3808  ;;  %v7526_v14 = vld [vmem:[%s7687_s20 + $0x180] sm:$0xff]  ;;  %v2264_v22 = vadd.f32 %v11128_v51, %v11088_v43  ;;  %v7528_v43 = vld [vmem:[%s7687_s20 + $0x188] sm:$0xff] }
 0x3a0   : > { %v4698_v48 = vpop.f32.mrf.mxu0  ;;  %v4068_v19 = vmul.f32 %v7455_v38, %v10638_v58  ;;  %7460 = vrcp.f32 %v3809_v57  ;;  %v4197_v29 = vmul.f32 %v4069_v27, %v2251_v5 }
 0x3a1   : > { %5332 = vst.msk [vmem:[%s10797_s15 + $0x170] sm:$0xff] %vm980_vm0, %v5204_v21  ;;  %v5202_v7 = vadd.f32 %v7521_v0, %v5074_v49  ;;  %v5077_v4 = vmax.f32 %v4707_v52, 0.0  ;;  %v4699_v16 = vadd.f32 %v10775_v6, %v4698_v48  ;;  %v3806_v36 = vpop.xlane.xlu0 %3805  ;;  %v7527_v21 = vld [vmem:[%s7687_s20 + $0x198] sm:$0xff] }
 0x3a2   : > { %7462 = vrcp.f32 %v3806_v36  ;;  %v4196_v58 = vmul.f32 %v4068_v19, %v2248_v18  ;;  %v11135_v18 = vpop.f32.mrf.mxu1 }
 0x3a3   : > { %5330 = vst.msk [vmem:[%s10797_s15 + $0x160] sm:$0xff] %vm980_vm0, %v5202_v7  ;;  %v5205_v12 = vadd.f32 %v7522_v32, %v5077_v4  ;;  %v5075_v24 = vmax.f32 %v4699_v16, 0.0 }
 0x3a4   : > { %v4265_v59 = vpack.c.bf16 %v4197_v29, %v4196_v58  ;;  %v2271_v0 = vpop.f32.mrf.mxu1 }
 0x3a5   : > { %5333 = vst.msk [vmem:[%s10797_s15 + $0x178] sm:$0xff] %vm980_vm0, %v5205_v12  ;;  %v5203_v30 = vadd.f32 %v7523_v53, %v5075_v24  ;;  %v7530_v24 = vld [vmem:[%s7687_s20 + $0x1b0] sm:$0xff] }
 0x3a6   : > { %v6864_v35 = vpop.f32.mrf.mxu0  ;;  %6931 = vmatmul.mubr.msk.bf16.gmra.mxu0 %vm980_vm0, %v4265_v59  ;;  %v6809_v32 = vpop.f32.mrf.mxu1  ;;  %v7531_v59 = vld [vmem:[%s7687_s20 + $0x1a0] sm:$0xff] }
 0x3a7   : > { %5331 = vst.msk [vmem:[%s10797_s15 + $0x168] sm:$0xff] %vm980_vm0, %v5203_v30  ;;  %v4720_v15 = vadd.f32 %v6864_v35, %v10775_v6 }
 0x3a8   : > { %v4711_v55 = vpop.f32.mrf.mxu0 }
 0x3a9   : > { %v5080_v8 = vmax.f32 %v4720_v15, 0.0  ;;  %v4712_v61 = vadd.f32 %v10775_v6, %v4711_v55  ;;  %v7457_v40 = vpop.eup %7456  ;;  %v2274_v15 = vpop.f32.mrf.mxu1 }
 0x3aa   : > { %v6865_v20 = vpop.f32.mrf.mxu0  ;;  %v4071_v10 = vmul.f32 %v7457_v40, %v10667_v34 }
 0x3ab   : > { %v7459_v1 = vpop.eup %7458  ;;  %v5208_v54 = vadd.f32 %v7524_v41, %v5080_v8  ;;  %v5078_v62 = vmax.f32 %v4712_v61, 0.0  ;;  %v4723_v44 = vadd.f32 %v6865_v20, %v10775_v6  ;;  %v3815_v47 = vpop.xlane.xlu1 %3814  ;;  %v7532_v61 = vld [vmem:[%s7687_s20 + $0x1b8] sm:$0xff]  ;;  %v2275_v20 = vadd.f32 %v11128_v51, %v2274_v15 }
 0x3ac   : > { %v4070_v17 = vmul.f32 %v7459_v1, %v10670_v39  ;;  %v4714_v56 = vpop.f32.mrf.mxu0  ;;  %v4199_v46 = vmul.f32 %v4071_v10, %v2259_v3  ;;  %7464 = vrcp.f32 %v3815_v47  ;;  %v2272_v41 = vadd.f32 %v11128_v51, %v2271_v0 }
 0x3ad   : > { %5336 = vst.msk [vmem:[%s10797_s15 + $0x190] sm:$0xff] %vm980_vm0, %v5208_v54  ;;  %v5206_v2 = vadd.f32 %v7526_v14, %v5078_v62  ;;  %v5081_v63 = vmax.f32 %v4723_v44, 0.0  ;;  %v4715_v34 = vadd.f32 %v10775_v6, %v4714_v56  ;;  %v3812_v39 = vpop.xlane.xlu0 %3811  ;;  %v7461_v5 = vpop.eup %7460  ;;  %v7533_v62 = vld [vmem:[%s7687_s20 + $0x1a8] sm:$0xff]  ;;  %v2283_v14 = vadd.f32 %v11128_v51, %v6809_v32 }
 0x3ae   : > { %v4198_v23 = vmul.f32 %v4070_v17, %v2256_v26  ;;  %v4073_v28 = vmul.f32 %v7461_v5, %v10685_v33  ;;  %7466 = vrcp.f32 %v3812_v39 }
 0x3af   : > { %v7463_v11 = vpop.eup %7462  ;;  %5334 = vst.msk [vmem:[%s10797_s15 + $0x180] sm:$0xff] %vm980_vm0, %v5206_v2  ;;  %v5209_v49 = vadd.f32 %v7527_v21, %v5081_v63  ;;  %v5079_v52 = vmax.f32 %v4715_v34, 0.0  ;;  %v3821_v38 = vpop.xlane.xlu1 %3820 }
 0x3b0   : > { %v4072_v6 = vmul.f32 %v7463_v11, %v10688_v31  ;;  %v4266_v42 = vpack.c.bf16 %v4199_v46, %v4198_v23  ;;  %v4201_v27 = vmul.f32 %v4073_v28, %v2267_v9  ;;  %7468 = vrcp.f32 %v3821_v38  ;;  %v11153_v31 = vld [vmem:[%s11482_s8] ss:$0 sm:$0xff]  ;;  %v7534_v11 = vld [vmem:[%s7687_s20 + $0x1d0] sm:$0xff] }
 0x3b1   : > { %5337 = vst.msk [vmem:[%s10797_s15 + $0x198] sm:$0xff] %vm980_vm0, %v5209_v49  ;;  %v5207_v48 = vadd.f32 %v7528_v43, %v5079_v52  ;;  %v3818_v19 = vpop.xlane.xlu0 %3817 }
 0x3b2   : > { %v4200_v7 = vmul.f32 %v4072_v6, %v2264_v22  ;;  %7470 = vrcp.f32 %v3818_v19  ;;  %v6868_v33 = vpop.f32.mrf.mxu0  ;;  %6934 = vmatprep.mubr.msk.bf16.mxu0 %vm980_vm0, %v4266_v42 }
 0x3b3   : > { %5335 = vst.msk [vmem:[%s10797_s15 + $0x188] sm:$0xff] %vm980_vm0, %v5207_v48  ;;  %v4736_v4 = vadd.f32 %v11153_v31, %v6868_v33 }
 0x3b4   : > { %v4267_v16 = vpack.c.bf16 %v4201_v27, %v4200_v7  ;;  %v4727_v57 = vpop.f32.mrf.mxu0  ;;  %v7536_v27 = vld [vmem:[%s7687_s20 + $0x1d8] sm:$0xff]  ;;  %v7537_v7 = vld [vmem:[%s7687_s20 + $0x1c8] sm:$0xff] }
 0x3b5   : > { %v5084_v36 = vmax.f32 %v4736_v4, 0.0  ;;  %v4728_v29 = vadd.f32 %v11153_v31, %v4727_v57 }
 0x3b6   : > { %v6869_v12 = vpop.f32.mrf.mxu0  ;;  %6935 = vmatmul.mubr.msk.bf16.gmra.mxu0 %vm980_vm0, %v4267_v16 }
 0x3b7   : > { %v5212_v58 = vadd.f32 %v7530_v24, %v5084_v36  ;;  %v5082_v37 = vmax.f32 %v4728_v29, 0.0  ;;  %v4739_v53 = vadd.f32 %v11153_v31, %v6869_v12  ;;  %v7538_v36 = vld [vmem:[%s7687_s20 + $0x1f0] sm:$0xff] }
 0x3b8   : > { %v4730_v30 = vpop.f32.mrf.mxu0 }
 0x3b9   : > { %5340 = vst.msk [vmem:[%s10797_s15 + $0x1b0] sm:$0xff] %vm980_vm0, %v5212_v58  ;;  %v5210_v35 = vadd.f32 %v7531_v59, %v5082_v37  ;;  %v5085_v25 = vmax.f32 %v4739_v53, 0.0  ;;  %v4731_v55 = vadd.f32 %v11153_v31, %v4730_v30  ;;  %v7465_v8 = vpop.eup %7464  ;;  %v7539_v58 = vld [vmem:[%s7687_s20 + $0x1e0] sm:$0xff] }
 0x3ba   : > { %v4075_v1 = vmul.f32 %v7465_v8, %v10716_v60 }
 0x3bb   : > { %5338 = vst.msk [vmem:[%s10797_s15 + $0x1a0] sm:$0xff] %vm980_vm0, %v5210_v35  ;;  %v5213_v3 = vadd.f32 %v7532_v61, %v5085_v25  ;;  %v5083_v40 = vmax.f32 %v4731_v55, 0.0  ;;  %v7467_v26 = vpop.eup %7466  ;;  %v7540_v35 = vld [vmem:[%s7687_s20 + $0x1f8] sm:$0xff]  ;;  %v7541_v61 = vld [vmem:[%s7687_s20 + $0x1e8] sm:$0xff] }
 0x3bc   : > { %v4074_v54 = vmul.f32 %v7467_v26, %v10718_v45  ;;  %v4203_v17 = vmul.f32 %v4075_v1, %v2275_v20  ;;  %v2280_v45 = vadd.f32 %v11128_v51, %v11135_v18  ;;  %v7535_v18 = vld [vmem:[%s7687_s20 + $0x1c0] sm:$0xff]  ;;  %v7542_v1 = vld [vmem:[%s7687_s20 + $0x210] sm:$0xff] }
 0x3bd   : > { %5341 = vst.msk [vmem:[%s10797_s15 + $0x1b8] sm:$0xff] %vm980_vm0, %v5213_v3  ;;  %v5211_v44 = vadd.f32 %v7533_v62, %v5083_v40  ;;  %v7469_v10 = vpop.eup %7468 }
 0x3be   : > { %v6872_v9 = vpop.f32.mrf.mxu0  ;;  %v4202_v47 = vmul.f32 %v4074_v54, %v2272_v41  ;;  %v4077_v2 = vmul.f32 %v7469_v10, %v10726_v50  ;;  %v7543_v10 = vld [vmem:[%s7687_s20 + $0x200] sm:$0xff] }
 0x3bf   : > { %v7471_v56 = vpop.eup %7470  ;;  %5339 = vst.msk [vmem:[%s10797_s15 + $0x1a8] sm:$0xff] %vm980_vm0, %v5211_v44  ;;  %v4752_v60 = vadd.f32 %v11153_v31, %v6872_v9 }
 0x3c0   : > { %v4076_v63 = vmul.f32 %v7471_v56, %v10728_v13  ;;  %v4743_v46 = vpop.f32.mrf.mxu0  ;;  %v4205_v34 = vmul.f32 %v4077_v2, %v2283_v14  ;;  %v4268_v39 = vpack.c.bf16 %v4203_v17, %v4202_v47  ;;  %v7544_v14 = vld [vmem:[%s7687_s20 + $0x218] sm:$0xff] }
 0x3c1   : > { %v5088_v5 = vmax.f32 %v4752_v60, 0.0  ;;  %v4744_v22 = vadd.f32 %v11153_v31, %v4743_v46  ;;  %v7545_v46 = vld [vmem:[%s7687_s20 + $0x208] sm:$0xff] }
 0x3c2   : > { %v4204_v23 = vmul.f32 %v4076_v63, %v2280_v45  ;;  %v6873_v50 = vpop.f32.mrf.mxu0  ;;  %6938 = vmatprep.mubr.msk.bf16.mxu0 %vm980_vm0, %v4268_v39 }
 0x3c3   : > { %v5216_v28 = vadd.f32 %v7534_v11, %v5088_v5  ;;  %v5086_v21 = vmax.f32 %v4744_v22, 0.0  ;;  %v4755_v49 = vadd.f32 %v11153_v31, %v6873_v50 }
 0x3c4   : > { %v4269_v13 = vpack.c.bf16 %v4205_v34, %v4204_v23  ;;  %v4746_v51 = vpop.f32.mrf.mxu0  ;;  %v7546_v23 = vld [vmem:[%s7687_s20 + $0x230] sm:$0xff] }
 0x3c5   : > { %5344 = vst.msk [vmem:[%s10797_s15 + $0x1d0] sm:$0xff] %vm980_vm0, %v5216_v28  ;;  %v5214_v52 = vadd.f32 %v7535_v18, %v5086_v21  ;;  %v5089_v6 = vmax.f32 %v4755_v49, 0.0  ;;  %v4747_v42 = vadd.f32 %v11153_v31, %v4746_v51  ;;  %v7547_v49 = vld [vmem:[%s7687_s20 + $0x220] sm:$0xff] }
 0x3c6   : > { %v6876_v38 = vpop.f32.mrf.mxu0  ;;  %6939 = vmatmul.mubr.msk.bf16.gmra.mxu0 %vm980_vm0, %v4269_v13 }
 0x3c7   : > { %5342 = vst.msk [vmem:[%s10797_s15 + $0x1c0] sm:$0xff] %vm980_vm0, %v5214_v52  ;;  %v5217_v43 = vadd.f32 %v7536_v27, %v5089_v6  ;;  %v5087_v48 = vmax.f32 %v4747_v42, 0.0  ;;  %v4768_v19 = vadd.f32 %v11153_v31, %v6876_v38  ;;  %v7548_v6 = vld [vmem:[%s7687_s20 + $0x238] sm:$0xff] }
 0x3c8   : > { %v4759_v0 = vpop.f32.mrf.mxu0 }
 0x3c9   : > { %5345 = vst.msk [vmem:[%s10797_s15 + $0x1d8] sm:$0xff] %vm980_vm0, %v5217_v43  ;;  %v5215_v33 = vadd.f32 %v7537_v7, %v5087_v48  ;;  %v5092_v4 = vmax.f32 %v4768_v19, 0.0  ;;  %v4760_v16 = vadd.f32 %v11153_v31, %v4759_v0  ;;  %v7549_v48 = vld [vmem:[%s7687_s20 + $0x228] sm:$0xff] }
 0x3ca   : > { %v6877_v57 = vpop.f32.mrf.mxu0 }
 0x3cb   : > { %5343 = vst.msk [vmem:[%s10797_s15 + $0x1c8] sm:$0xff] %vm980_vm0, %v5215_v33  ;;  %v5220_v29 = vadd.f32 %v7538_v36, %v5092_v4  ;;  %v5090_v32 = vmax.f32 %v4760_v16, 0.0  ;;  %v4771_v12 = vadd.f32 %v11153_v31, %v6877_v57  ;;  %v7550_v4 = vld [vmem:[%s7687_s20 + $0x250] sm:$0xff] }
 0x3cc   : > { %v4762_v24 = vpop.f32.mrf.mxu0 }
 0x3cd   : > { %5348 = vst.msk [vmem:[%s10797_s15 + $0x1f0] sm:$0xff] %vm980_vm0, %v5220_v29  ;;  %v5218_v37 = vadd.f32 %v7539_v58, %v5090_v32  ;;  %v5093_v53 = vmax.f32 %v4771_v12, 0.0  ;;  %v4763_v30 = vadd.f32 %v11153_v31, %v4762_v24  ;;  %v7551_v32 = vld [vmem:[%s7687_s20 + $0x240] sm:$0xff] }
 0x3ce   : > { %v6880_v59 = vpop.f32.mrf.mxu0 }
 0x3cf   : > { %5346 = vst.msk [vmem:[%s10797_s15 + $0x1e0] sm:$0xff] %vm980_vm0, %v5218_v37  ;;  %v5221_v25 = vadd.f32 %v7540_v35, %v5093_v53  ;;  %v5091_v15 = vmax.f32 %v4763_v30, 0.0  ;;  %v4784_v55 = vadd.f32 %v11153_v31, %v6880_v59  ;;  %v7552_v53 = vld [vmem:[%s7687_s20 + $0x258] sm:$0xff] }
 0x3d0   : > { %v4775_v8 = vpop.f32.mrf.mxu0 }
 0x3d1   : > { %5349 = vst.msk [vmem:[%s10797_s15 + $0x1f8] sm:$0xff] %vm980_vm0, %v5221_v25  ;;  %v5219_v3 = vadd.f32 %v7541_v61, %v5091_v15  ;;  %v5096_v40 = vmax.f32 %v4784_v55, 0.0  ;;  %v4776_v26 = vadd.f32 %v11153_v31, %v4775_v8  ;;  %v7553_v15 = vld [vmem:[%s7687_s20 + $0x248] sm:$0xff] }
 0x3d2   : > { %v6881_v20 = vpop.f32.mrf.mxu0 }
 0x3d3   : > { %5347 = vst.msk [vmem:[%s10797_s15 + $0x1e8] sm:$0xff] %vm980_vm0, %v5219_v3  ;;  %v5224_v41 = vadd.f32 %v7542_v1, %v5096_v40  ;;  %v5094_v54 = vmax.f32 %v4776_v26, 0.0  ;;  %v4787_v62 = vadd.f32 %v11153_v31, %v6881_v20  ;;  %v7554_v40 = vld [vmem:[%s7687_s20 + $0x270] sm:$0xff] }
 0x3d4   : > { %v4778_v44 = vpop.f32.mrf.mxu0 }
 0x3d5   : > { %5352 = vst.msk [vmem:[%s10797_s15 + $0x210] sm:$0xff] %vm980_vm0, %v5224_v41  ;;  %v5222_v17 = vadd.f32 %v7543_v10, %v5094_v54  ;;  %v5097_v9 = vmax.f32 %v4787_v62, 0.0  ;;  %v4779_v56 = vadd.f32 %v11153_v31, %v4778_v44  ;;  %v7555_v54 = vld [vmem:[%s7687_s20 + $0x260] sm:$0xff] }
 0x3d6   : > { %v6884_v47 = vpop.f32.mrf.mxu0 }
 0x3d7   : > { %5350 = vst.msk [vmem:[%s10797_s15 + $0x200] sm:$0xff] %vm980_vm0, %v5222_v17  ;;  %v5225_v2 = vadd.f32 %v7544_v14, %v5097_v9  ;;  %v5095_v60 = vmax.f32 %v4779_v56, 0.0  ;;  %v4800_v45 = vadd.f32 %v11153_v31, %v6884_v47  ;;  %v7556_v17 = vld [vmem:[%s7687_s20 + $0x278] sm:$0xff]  ;;  %v7557_v47 = vld [vmem:[%s7687_s20 + $0x268] sm:$0xff] }
 0x3d8   : > { %v4791_v63 = vpop.f32.mrf.mxu0 }
 0x3d9   : > { %5353 = vst.msk [vmem:[%s10797_s15 + $0x218] sm:$0xff] %vm980_vm0, %v5225_v2  ;;  %v5223_v34 = vadd.f32 %v7545_v46, %v5095_v60  ;;  %v5100_v39 = vmax.f32 %v4800_v45, 0.0  ;;  %v4792_v5 = vadd.f32 %v11153_v31, %v4791_v63 }
 0x3da   : > { %v6885_v22 = vpop.f32.mrf.mxu0 }
 0x3db   : > { %5351 = vst.msk [vmem:[%s10797_s15 + $0x208] sm:$0xff] %vm980_vm0, %v5223_v34  ;;  %v5228_v50 = vadd.f32 %v7546_v23, %v5100_v39  ;;  %v5098_v11 = vmax.f32 %v4792_v5, 0.0  ;;  %v4803_v28 = vadd.f32 %v11153_v31, %v6885_v22  ;;  %v7558_v39 = vld [vmem:[%s7687_s20 + $0x290] sm:$0xff] }
 0x3dc   : > { %v4794_v21 = vpop.f32.mrf.mxu0 }
 0x3dd   : > { %5356 = vst.msk [vmem:[%s10797_s15 + $0x230] sm:$0xff] %vm980_vm0, %v5228_v50  ;;  %v5226_v13 = vadd.f32 %v7547_v49, %v5098_v11  ;;  %v5101_v51 = vmax.f32 %v4803_v28, 0.0  ;;  %v4795_v18 = vadd.f32 %v11153_v31, %v4794_v21  ;;  %v7559_v11 = vld [vmem:[%s7687_s20 + $0x280] sm:$0xff] }
 0x3de   : > { %v6888_v52 = vpop.f32.mrf.mxu0 }
 0x3df   : > { %5354 = vst.msk [vmem:[%s10797_s15 + $0x220] sm:$0xff] %vm980_vm0, %v5226_v13  ;;  %v5229_v42 = vadd.f32 %v7548_v6, %v5101_v51  ;;  %v5099_v38 = vmax.f32 %v4795_v18, 0.0  ;;  %v4816_v27 = vadd.f32 %v11153_v31, %v6888_v52  ;;  %v7560_v51 = vld [vmem:[%s7687_s20 + $0x298] sm:$0xff] }
 0x3e0   : > { %v4807_v43 = vpop.f32.mrf.mxu0 }
 0x3e1   : > { %5357 = vst.msk [vmem:[%s10797_s15 + $0x238] sm:$0xff] %vm980_vm0, %v5229_v42  ;;  %v5227_v19 = vadd.f32 %v7549_v48, %v5099_v38  ;;  %v5104_v0 = vmax.f32 %v4816_v27, 0.0  ;;  %v4808_v7 = vadd.f32 %v11153_v31, %v4807_v43  ;;  %v7561_v38 = vld [vmem:[%s7687_s20 + $0x288] sm:$0xff] }
 0x3e2   : > { %v6889_v33 = vpop.f32.mrf.mxu0 }
 0x3e3   : > { %5355 = vst.msk [vmem:[%s10797_s15 + $0x228] sm:$0xff] %vm980_vm0, %v5227_v19  ;;  %v5232_v16 = vadd.f32 %v7550_v4, %v5104_v0  ;;  %v5102_v57 = vmax.f32 %v4808_v7, 0.0  ;;  %v4819_v36 = vadd.f32 %v11153_v31, %v6889_v33  ;;  %v7562_v0 = vld [vmem:[%s7687_s20 + $0x2b0] sm:$0xff] }
 0x3e4   : > { %v4810_v29 = vpop.f32.mrf.mxu0 }
 0x3e5   : > { %5360 = vst.msk [vmem:[%s10797_s15 + $0x250] sm:$0xff] %vm980_vm0, %v5232_v16  ;;  %v5230_v12 = vadd.f32 %v7551_v32, %v5102_v57  ;;  %v5105_v24 = vmax.f32 %v4819_v36, 0.0  ;;  %v4811_v58 = vadd.f32 %v11153_v31, %v4810_v29  ;;  %v7563_v57 = vld [vmem:[%s7687_s20 + $0x2a0] sm:$0xff] }
 0x3e6   : > { %v6892_v37 = vpop.f32.mrf.mxu0 }
 0x3e7   : > { %5358 = vst.msk [vmem:[%s10797_s15 + $0x240] sm:$0xff] %vm980_vm0, %v5230_v12  ;;  %v5233_v30 = vadd.f32 %v7552_v53, %v5105_v24  ;;  %v5103_v59 = vmax.f32 %v4811_v58, 0.0  ;;  %v4832_v35 = vadd.f32 %v11153_v31, %v6892_v37  ;;  %v7564_v24 = vld [vmem:[%s7687_s20 + $0x2b8] sm:$0xff] }
 0x3e8   : > { %v4823_v25 = vpop.f32.mrf.mxu0 }
 0x3e9   : > { %5361 = vst.msk [vmem:[%s10797_s15 + $0x258] sm:$0xff] %vm980_vm0, %v5233_v30  ;;  %v5231_v55 = vadd.f32 %v7553_v15, %v5103_v59  ;;  %v5108_v8 = vmax.f32 %v4832_v35, 0.0  ;;  %v4824_v61 = vadd.f32 %v11153_v31, %v4823_v25  ;;  %v7565_v59 = vld [vmem:[%s7687_s20 + $0x2a8] sm:$0xff] }
 0x3ea   : > { %v6893_v3 = vpop.f32.mrf.mxu0 }
 0x3eb   : > { %5359 = vst.msk [vmem:[%s10797_s15 + $0x248] sm:$0xff] %vm980_vm0, %v5231_v55  ;;  %v5236_v26 = vadd.f32 %v7554_v40, %v5108_v8  ;;  %v5106_v20 = vmax.f32 %v4824_v61, 0.0  ;;  %v4835_v1 = vadd.f32 %v11153_v31, %v6893_v3  ;;  %v7566_v8 = vld [vmem:[%s7687_s20 + $0x2d0] sm:$0xff] }
 0x3ec   : > { %v4826_v41 = vpop.f32.mrf.mxu0 }
 0x3ed   : > { %5364 = vst.msk [vmem:[%s10797_s15 + $0x270] sm:$0xff] %vm980_vm0, %v5236_v26  ;;  %v5234_v62 = vadd.f32 %v7555_v54, %v5106_v20  ;;  %v5109_v44 = vmax.f32 %v4835_v1, 0.0  ;;  %v4827_v10 = vadd.f32 %v11153_v31, %v4826_v41  ;;  %v7567_v20 = vld [vmem:[%s7687_s20 + $0x2c0] sm:$0xff] }
 0x3ef   : > { %5362 = vst.msk [vmem:[%s10797_s15 + $0x260] sm:$0xff] %vm980_vm0, %v5234_v62  ;;  %v5237_v9 = vadd.f32 %v7556_v17, %v5109_v44  ;;  %v5107_v56 = vmax.f32 %v4827_v10, 0.0  ;;  %v7568_v44 = vld [vmem:[%s7687_s20 + $0x2d8] sm:$0xff] }
 0x3f1   : > { %5365 = vst.msk [vmem:[%s10797_s15 + $0x278] sm:$0xff] %vm980_vm0, %v5237_v9  ;;  %v5235_v14 = vadd.f32 %v7557_v47, %v5107_v56  ;;  %v6896_v2 = vpop.f32.mrf.mxu0  ;;  %v7569_v47 = vld [vmem:[%s7687_s20 + $0x2c8] sm:$0xff] }
 0x3f2   : > { %v4848_v60 = vadd.f32 %v11153_v31, %v6896_v2 }
 0x3f3   : > { %5363 = vst.msk [vmem:[%s10797_s15 + $0x268] sm:$0xff] %vm980_vm0, %v5235_v14  ;;  %v4839_v45 = vpop.f32.mrf.mxu0 }
 0x3f4   : > { %v5112_v63 = vmax.f32 %v4848_v60, 0.0  ;;  %v4840_v46 = vadd.f32 %v11153_v31, %v4839_v45 }
 0x3f5   : > { %v6897_v34 = vpop.f32.mrf.mxu0 }
 0x3f6   : > { %v5240_v5 = vadd.f32 %v7558_v39, %v5112_v63  ;;  %v5110_v22 = vmax.f32 %v4840_v46, 0.0  ;;  %v4851_v23 = vadd.f32 %v11153_v31, %v6897_v34  ;;  %v7570_v63 = vld [vmem:[%s7687_s20 + $0x2f0] sm:$0xff] }
 0x3f7   : > { %v4842_v50 = vpop.f32.mrf.mxu0 }
 0x3f8   : > { %5368 = vst.msk [vmem:[%s10797_s15 + $0x290] sm:$0xff] %vm980_vm0, %v5240_v5  ;;  %v5238_v28 = vadd.f32 %v7559_v11, %v5110_v22  ;;  %v5113_v21 = vmax.f32 %v4851_v23, 0.0  ;;  %v4843_v49 = vadd.f32 %v11153_v31, %v4842_v50  ;;  %v7571_v22 = vld [vmem:[%s7687_s20 + $0x2e0] sm:$0xff] }
 0x3f9   : > { %v6900_v13 = vpop.f32.mrf.mxu0 }
 0x3fa   : > { %5366 = vst.msk [vmem:[%s10797_s15 + $0x280] sm:$0xff] %vm980_vm0, %v5238_v28  ;;  %v5241_v18 = vadd.f32 %v7560_v51, %v5113_v21  ;;  %v5111_v52 = vmax.f32 %v4843_v49, 0.0  ;;  %v4864_v6 = vadd.f32 %v11153_v31, %v6900_v13  ;;  %v7572_v28 = vld [vmem:[%s7687_s20 + $0x2f8] sm:$0xff] }
 0x3fb   : > { %v4855_v42 = vpop.f32.mrf.mxu0 }
 0x3fc   : > { %5369 = vst.msk [vmem:[%s10797_s15 + $0x298] sm:$0xff] %vm980_vm0, %v5241_v18  ;;  %v5239_v27 = vadd.f32 %v7561_v38, %v5111_v52  ;;  %v5116_v43 = vmax.f32 %v4864_v6, 0.0  ;;  %v4856_v48 = vadd.f32 %v11153_v31, %v4855_v42  ;;  %v7573_v18 = vld [vmem:[%s7687_s20 + $0x2e8] sm:$0xff] }
 0x3fd   : > { %v6901_v19 = vpop.f32.mrf.mxu0 }
 0x3fe   : > { %5367 = vst.msk [vmem:[%s10797_s15 + $0x288] sm:$0xff] %vm980_vm0, %v5239_v27  ;;  %v5244_v7 = vadd.f32 %v7562_v0, %v5116_v43  ;;  %v5114_v33 = vmax.f32 %v4856_v48, 0.0  ;;  %v4867_v4 = vadd.f32 %v11153_v31, %v6901_v19  ;;  %v7574_v43 = vld [vmem:[%s7687_s20 + $0x310] sm:$0xff] }
 0x3ff   : > { %v4858_v16 = vpop.f32.mrf.mxu0 }
 0x400   : > { %5372 = vst.msk [vmem:[%s10797_s15 + $0x2b0] sm:$0xff] %vm980_vm0, %v5244_v7  ;;  %v5242_v36 = vadd.f32 %v7563_v57, %v5114_v33  ;;  %v5117_v29 = vmax.f32 %v4867_v4, 0.0  ;;  %v4859_v32 = vadd.f32 %v11153_v31, %v4858_v16  ;;  %v7575_v33 = vld [vmem:[%s7687_s20 + $0x300] sm:$0xff] }
 0x401   : > { %v6904_v12 = vpop.f32.mrf.mxu0 }
 0x402   : > { %5370 = vst.msk [vmem:[%s10797_s15 + $0x2a0] sm:$0xff] %vm980_vm0, %v5242_v36  ;;  %v5245_v58 = vadd.f32 %v7564_v24, %v5117_v29  ;;  %v5115_v37 = vmax.f32 %v4859_v32, 0.0  ;;  %v4880_v53 = vadd.f32 %v11153_v31, %v6904_v12  ;;  %v7576_v29 = vld [vmem:[%s7687_s20 + $0x318] sm:$0xff] }
 0x403   : > { %v4871_v30 = vpop.f32.mrf.mxu0 }
 0x404   : > { %5373 = vst.msk [vmem:[%s10797_s15 + $0x2b8] sm:$0xff] %vm980_vm0, %v5245_v58  ;;  %v5243_v35 = vadd.f32 %v7565_v59, %v5115_v37  ;;  %v5120_v25 = vmax.f32 %v4880_v53, 0.0  ;;  %v4872_v15 = vadd.f32 %v11153_v31, %v4871_v30  ;;  %v7577_v37 = vld [vmem:[%s7687_s20 + $0x308] sm:$0xff] }
 0x405   : > { %v6905_v55 = vpop.f32.mrf.mxu0 }
 0x406   : > { %5371 = vst.msk [vmem:[%s10797_s15 + $0x2a8] sm:$0xff] %vm980_vm0, %v5243_v35  ;;  %v5248_v61 = vadd.f32 %v7566_v8, %v5120_v25  ;;  %v5118_v3 = vmax.f32 %v4872_v15, 0.0  ;;  %v4883_v40 = vadd.f32 %v11153_v31, %v6905_v55  ;;  %v7578_v25 = vld [vmem:[%s7687_s20 + $0x330] sm:$0xff] }
 0x407   : > { %v4874_v26 = vpop.f32.mrf.mxu0 }
 0x408   : > { %5376 = vst.msk [vmem:[%s10797_s15 + $0x2d0] sm:$0xff] %vm980_vm0, %v5248_v61  ;;  %v5246_v1 = vadd.f32 %v7567_v20, %v5118_v3  ;;  %v5121_v41 = vmax.f32 %v4883_v40, 0.0  ;;  %v4875_v54 = vadd.f32 %v11153_v31, %v4874_v26  ;;  %v7579_v3 = vld [vmem:[%s7687_s20 + $0x320] sm:$0xff] }
 0x409   : > { %v6908_v62 = vpop.f32.mrf.mxu0 }
 0x40a   : > { %5374 = vst.msk [vmem:[%s10797_s15 + $0x2c0] sm:$0xff] %vm980_vm0, %v5246_v1  ;;  %v5249_v10 = vadd.f32 %v7568_v44, %v5121_v41  ;;  %v5119_v17 = vmax.f32 %v4875_v54, 0.0  ;;  %v4896_v9 = vadd.f32 %v11153_v31, %v6908_v62  ;;  %v7580_v41 = vld [vmem:[%s7687_s20 + $0x338] sm:$0xff] }
 0x40b   : > { %v4887_v56 = vpop.f32.mrf.mxu0 }
 0x40c   : > { %5377 = vst.msk [vmem:[%s10797_s15 + $0x2d8] sm:$0xff] %vm980_vm0, %v5249_v10  ;;  %v5247_v14 = vadd.f32 %v7569_v47, %v5119_v17  ;;  %v5124_v2 = vmax.f32 %v4896_v9, 0.0  ;;  %v4888_v60 = vadd.f32 %v11153_v31, %v4887_v56  ;;  %v7581_v17 = vld [vmem:[%s7687_s20 + $0x328] sm:$0xff] }
 0x40d   : > { %v6909_v45 = vpop.f32.mrf.mxu0 }
 0x40e   : > { %5375 = vst.msk [vmem:[%s10797_s15 + $0x2c8] sm:$0xff] %vm980_vm0, %v5247_v14  ;;  %v5252_v46 = vadd.f32 %v7570_v63, %v5124_v2  ;;  %v5122_v34 = vmax.f32 %v4888_v60, 0.0  ;;  %v4899_v39 = vadd.f32 %v11153_v31, %v6909_v45  ;;  %v7582_v2 = vld [vmem:[%s7687_s20 + $0x350] sm:$0xff] }
 0x40f   : > { %v4890_v5 = vpop.f32.mrf.mxu0 }
 0x410   : > { %5380 = vst.msk [vmem:[%s10797_s15 + $0x2f0] sm:$0xff] %vm980_vm0, %v5252_v46  ;;  %v5250_v23 = vadd.f32 %v7571_v22, %v5122_v34  ;;  %v5125_v50 = vmax.f32 %v4899_v39, 0.0  ;;  %v4891_v11 = vadd.f32 %v11153_v31, %v4890_v5  ;;  %v7583_v34 = vld [vmem:[%s7687_s20 + $0x340] sm:$0xff] }
 0x411   : > { %v6912_v13 = vpop.f32.mrf.mxu0 }
 0x412   : > { %5378 = vst.msk [vmem:[%s10797_s15 + $0x2e0] sm:$0xff] %vm980_vm0, %v5250_v23  ;;  %v5253_v21 = vadd.f32 %v7572_v28, %v5125_v50  ;;  %v5123_v49 = vmax.f32 %v4891_v11, 0.0  ;;  %v4912_v51 = vadd.f32 %v11153_v31, %v6912_v13  ;;  %v7584_v50 = vld [vmem:[%s7687_s20 + $0x358] sm:$0xff]  ;;  %v7585_v13 = vld [vmem:[%s7687_s20 + $0x348] sm:$0xff] }
 0x413   : > { %v4903_v6 = vpop.f32.mrf.mxu0 }
 0x414   : > { %5381 = vst.msk [vmem:[%s10797_s15 + $0x2f8] sm:$0xff] %vm980_vm0, %v5253_v21  ;;  %v5251_v52 = vadd.f32 %v7573_v18, %v5123_v49  ;;  %v5128_v42 = vmax.f32 %v4912_v51, 0.0  ;;  %v4904_v38 = vadd.f32 %v11153_v31, %v4903_v6 }
 0x415   : > { %v6913_v27 = vpop.f32.mrf.mxu0 }
 0x416   : > { %5379 = vst.msk [vmem:[%s10797_s15 + $0x2e8] sm:$0xff] %vm980_vm0, %v5251_v52  ;;  %v5256_v48 = vadd.f32 %v7574_v43, %v5128_v42  ;;  %v5126_v19 = vmax.f32 %v4904_v38, 0.0  ;;  %v4915_v0 = vadd.f32 %v11153_v31, %v6913_v27  ;;  %v7586_v42 = vld [vmem:[%s7687_s20 + $0x370] sm:$0xff] }
 0x417   : > { %v4906_v7 = vpop.f32.mrf.mxu0 }
 0x418   : > { %5384 = vst.msk [vmem:[%s10797_s15 + $0x310] sm:$0xff] %vm980_vm0, %v5256_v48  ;;  %v5254_v4 = vadd.f32 %v7575_v33, %v5126_v19  ;;  %v5129_v16 = vmax.f32 %v4915_v0, 0.0  ;;  %v4907_v57 = vadd.f32 %v11153_v31, %v4906_v7  ;;  %v7587_v19 = vld [vmem:[%s7687_s20 + $0x360] sm:$0xff] }
 0x419   : > { %v6916_v36 = vpop.f32.mrf.mxu0 }
 0x41a   : > { %5382 = vst.msk [vmem:[%s10797_s15 + $0x300] sm:$0xff] %vm980_vm0, %v5254_v4  ;;  %v5257_v32 = vadd.f32 %v7576_v29, %v5129_v16  ;;  %v5127_v12 = vmax.f32 %v4907_v57, 0.0  ;;  %v4928_v24 = vadd.f32 %v11153_v31, %v6916_v36  ;;  %v7588_v16 = vld [vmem:[%s7687_s20 + $0x378] sm:$0xff] }
 0x41b   : > { %v4919_v58 = vpop.f32.mrf.mxu0 }
 0x41c   : > { %5385 = vst.msk [vmem:[%s10797_s15 + $0x318] sm:$0xff] %vm980_vm0, %v5257_v32  ;;  %v5255_v53 = vadd.f32 %v7577_v37, %v5127_v12  ;;  %v5132_v30 = vmax.f32 %v4928_v24, 0.0  ;;  %v4920_v59 = vadd.f32 %v11153_v31, %v4919_v58  ;;  %v7589_v12 = vld [vmem:[%s7687_s20 + $0x368] sm:$0xff] }
 0x41d   : > { %v6917_v35 = vpop.f32.mrf.mxu0 }
 0x41e   : > { %5383 = vst.msk [vmem:[%s10797_s15 + $0x308] sm:$0xff] %vm980_vm0, %v5255_v53  ;;  %v5260_v15 = vadd.f32 %v7578_v25, %v5132_v30  ;;  %v5130_v55 = vmax.f32 %v4920_v59, 0.0  ;;  %v4931_v8 = vadd.f32 %v11153_v31, %v6917_v35  ;;  %v7590_v30 = vld [vmem:[%s7687_s20 + $0x390] sm:$0xff] }
 0x41f   : > { %v4922_v61 = vpop.f32.mrf.mxu0 }
 0x420   : > { %5388 = vst.msk [vmem:[%s10797_s15 + $0x330] sm:$0xff] %vm980_vm0, %v5260_v15  ;;  %v5258_v40 = vadd.f32 %v7579_v3, %v5130_v55  ;;  %v5133_v26 = vmax.f32 %v4931_v8, 0.0  ;;  %v4923_v20 = vadd.f32 %v11153_v31, %v4922_v61  ;;  %v7591_v55 = vld [vmem:[%s7687_s20 + $0x380] sm:$0xff] }
 0x422   : > { %v6920_v1 = vpop.f32.mrf.mxu0  ;;  %5386 = vst.msk [vmem:[%s10797_s15 + $0x320] sm:$0xff] %vm980_vm0, %v5258_v40  ;;  %v5261_v54 = vadd.f32 %v7580_v41, %v5133_v26  ;;  %v5131_v62 = vmax.f32 %v4923_v20, 0.0  ;;  %v7592_v40 = vld [vmem:[%s7687_s20 + $0x398] sm:$0xff] }
 0x423   : > { %v4944_v44 = vadd.f32 %v11153_v31, %v6920_v1  ;;  %v7593_v1 = vld [vmem:[%s7687_s20 + $0x388] sm:$0xff] }
 0x424   : > { %v4935_v10 = vpop.f32.mrf.mxu0  ;;  %5389 = vst.msk [vmem:[%s10797_s15 + $0x338] sm:$0xff] %vm980_vm0, %v5261_v54  ;;  %v5259_v9 = vadd.f32 %v7581_v17, %v5131_v62 }
 0x425   : > { %v5136_v56 = vmax.f32 %v4944_v44, 0.0  ;;  %v4936_v47 = vadd.f32 %v11153_v31, %v4935_v10 }
 0x426   : > { %v6921_v14 = vpop.f32.mrf.mxu0  ;;  %5387 = vst.msk [vmem:[%s10797_s15 + $0x328] sm:$0xff] %vm980_vm0, %v5259_v9 }
 0x427   : > { %v5264_v60 = vadd.f32 %v7582_v2, %v5136_v56  ;;  %v5134_v45 = vmax.f32 %v4936_v47, 0.0  ;;  %v4947_v63 = vadd.f32 %v11153_v31, %v6921_v14  ;;  %v7594_v56 = vld [vmem:[%s7687_s20 + $0x3b0] sm:$0xff] }
 0x428   : > { %v4938_v46 = vpop.f32.mrf.mxu0 }
 0x429   : > { %5392 = vst.msk [vmem:[%s10797_s15 + $0x350] sm:$0xff] %vm980_vm0, %v5264_v60  ;;  %v5262_v39 = vadd.f32 %v7583_v34, %v5134_v45  ;;  %v5137_v5 = vmax.f32 %v4947_v63, 0.0  ;;  %v4939_v22 = vadd.f32 %v11153_v31, %v4938_v46  ;;  %v7595_v45 = vld [vmem:[%s7687_s20 + $0x3a0] sm:$0xff] }
 0x42a   : > { %v6924_v23 = vpop.f32.mrf.mxu0 }
 0x42b   : > { %5390 = vst.msk [vmem:[%s10797_s15 + $0x340] sm:$0xff] %vm980_vm0, %v5262_v39  ;;  %v5265_v11 = vadd.f32 %v7584_v50, %v5137_v5  ;;  %v5135_v28 = vmax.f32 %v4939_v22, 0.0  ;;  %v4960_v21 = vadd.f32 %v11153_v31, %v6924_v23  ;;  %v7596_v39 = vld [vmem:[%s7687_s20 + $0x3b8] sm:$0xff]  ;;  %v7597_v23 = vld [vmem:[%s7687_s20 + $0x3a8] sm:$0xff] }
 0x42c   : > { %v4951_v49 = vpop.f32.mrf.mxu0 }
 0x42d   : > { %5393 = vst.msk [vmem:[%s10797_s15 + $0x358] sm:$0xff] %vm980_vm0, %v5265_v11  ;;  %v5263_v51 = vadd.f32 %v7585_v13, %v5135_v28  ;;  %v5140_v18 = vmax.f32 %v4960_v21, 0.0  ;;  %v4952_v52 = vadd.f32 %v11153_v31, %v4951_v49 }
 0x42e   : > { %v6925_v6 = vpop.f32.mrf.mxu0 }
 0x42f   : > { %5391 = vst.msk [vmem:[%s10797_s15 + $0x348] sm:$0xff] %vm980_vm0, %v5263_v51  ;;  %v5268_v38 = vadd.f32 %v7586_v42, %v5140_v18  ;;  %v5138_v27 = vmax.f32 %v4952_v52, 0.0  ;;  %v4963_v43 = vadd.f32 %v11153_v31, %v6925_v6  ;;  %v7598_v18 = vld [vmem:[%s7687_s20 + $0x3d0] sm:$0xff] }
 0x430   : > { %v4954_v48 = vpop.f32.mrf.mxu0 }
 0x431   : > { %5396 = vst.msk [vmem:[%s10797_s15 + $0x370] sm:$0xff] %vm980_vm0, %v5268_v38  ;;  %v5266_v0 = vadd.f32 %v7587_v19, %v5138_v27  ;;  %v5141_v7 = vmax.f32 %v4963_v43, 0.0  ;;  %v4955_v33 = vadd.f32 %v11153_v31, %v4954_v48  ;;  %v7599_v27 = vld [vmem:[%s7687_s20 + $0x3c0] sm:$0xff] }
 0x432   : > { %v6928_v4 = vpop.f32.mrf.mxu0 }
 0x433   : > { %5394 = vst.msk [vmem:[%s10797_s15 + $0x360] sm:$0xff] %vm980_vm0, %v5266_v0  ;;  %v5269_v57 = vadd.f32 %v7588_v16, %v5141_v7  ;;  %v5139_v36 = vmax.f32 %v4955_v33, 0.0  ;;  %v4976_v29 = vadd.f32 %v11153_v31, %v6928_v4  ;;  %v7600_v0 = vld [vmem:[%s7687_s20 + $0x3d8] sm:$0xff]  ;;  %v7601_v4 = vld [vmem:[%s7687_s20 + $0x3c8] sm:$0xff] }
 0x434   : > { %v4967_v32 = vpop.f32.mrf.mxu0 }
 0x435   : > { %5397 = vst.msk [vmem:[%s10797_s15 + $0x378] sm:$0xff] %vm980_vm0, %v5269_v57  ;;  %v5267_v24 = vadd.f32 %v7589_v12, %v5139_v36  ;;  %v5144_v58 = vmax.f32 %v4976_v29, 0.0  ;;  %v4968_v37 = vadd.f32 %v11153_v31, %v4967_v32 }
 0x436   : > { %v6929_v53 = vpop.f32.mrf.mxu0 }
 0x437   : > { %5395 = vst.msk [vmem:[%s10797_s15 + $0x368] sm:$0xff] %vm980_vm0, %v5267_v24  ;;  %v5272_v59 = vadd.f32 %v7590_v30, %v5144_v58  ;;  %v5142_v35 = vmax.f32 %v4968_v37, 0.0  ;;  %v4979_v25 = vadd.f32 %v11153_v31, %v6929_v53  ;;  %v7602_v58 = vld [vmem:[%s7687_s20 + $0x3f0] sm:$0xff] }
 0x438   : > { %v4970_v15 = vpop.f32.mrf.mxu0 }
 0x439   : > { %5400 = vst.msk [vmem:[%s10797_s15 + $0x390] sm:$0xff] %vm980_vm0, %v5272_v59  ;;  %v5270_v8 = vadd.f32 %v7591_v55, %v5142_v35  ;;  %v5145_v61 = vmax.f32 %v4979_v25, 0.0  ;;  %v4971_v3 = vadd.f32 %v11153_v31, %v4970_v15  ;;  %v7603_v35 = vld [vmem:[%s7687_s20 + $0x3e0] sm:$0xff] }
 0x43b   : > { %5398 = vst.msk [vmem:[%s10797_s15 + $0x380] sm:$0xff] %vm980_vm0, %v5270_v8  ;;  %v5273_v26 = vadd.f32 %v7592_v40, %v5145_v61  ;;  %v5143_v20 = vmax.f32 %v4971_v3, 0.0  ;;  %v7604_v8 = vld [vmem:[%s7687_s20 + $0x3f8] sm:$0xff]  ;;  %v7605_v40 = vld [vmem:[%s7687_s20 + $0x3e8] sm:$0xff] }
 0x43d   : > { %5401 = vst.msk [vmem:[%s10797_s15 + $0x398] sm:$0xff] %vm980_vm0, %v5273_v26  ;;  %v5271_v41 = vadd.f32 %v7593_v1, %v5143_v20 }
 0x43f   : > { %5399 = vst.msk [vmem:[%s10797_s15 + $0x388] sm:$0xff] %vm980_vm0, %v5271_v41 }
 0x466   : > { %v6932_v54 = vpop.f32.mrf.mxu0 }
 0x467   : > { %v4992_v62 = vadd.f32 %v11153_v31, %v6932_v54 }
 0x468   : > { %v4983_v44 = vpop.f32.mrf.mxu0 }
 0x469   : > { %v5148_v10 = vmax.f32 %v4992_v62, 0.0  ;;  %v4984_v17 = vadd.f32 %v11153_v31, %v4983_v44 }
 0x46a   : > { %v6933_v9 = vpop.f32.mrf.mxu0 }
 0x46b   : > { %v5276_v47 = vadd.f32 %v7594_v56, %v5148_v10  ;;  %v5146_v14 = vmax.f32 %v4984_v17, 0.0  ;;  %v4995_v2 = vadd.f32 %v11153_v31, %v6933_v9 }
 0x46c   : > { %v4986_v60 = vpop.f32.mrf.mxu0 }
 0x46d   : > { %5404 = vst.msk [vmem:[%s10797_s15 + $0x3b0] sm:$0xff] %vm980_vm0, %v5276_v47  ;;  %v5274_v63 = vadd.f32 %v7595_v45, %v5146_v14  ;;  %v5149_v46 = vmax.f32 %v4995_v2, 0.0  ;;  %v4987_v34 = vadd.f32 %v11153_v31, %v4986_v60 }
 0x46f   : > { %5402 = vst.msk [vmem:[%s10797_s15 + $0x3a0] sm:$0xff] %vm980_vm0, %v5274_v63  ;;  %v5277_v5 = vadd.f32 %v7596_v39, %v5149_v46  ;;  %v5147_v22 = vmax.f32 %v4987_v34, 0.0 }
 0x471   : > { %5405 = vst.msk [vmem:[%s10797_s15 + $0x3b8] sm:$0xff] %vm980_vm0, %v5277_v5  ;;  %v5275_v50 = vadd.f32 %v7597_v23, %v5147_v22 }
 0x473   : > { %5403 = vst.msk [vmem:[%s10797_s15 + $0x3a8] sm:$0xff] %vm980_vm0, %v5275_v50 }
 0x476   : > { %v6936_v11 = vpop.f32.mrf.mxu0 }
 0x477   : > { %v5008_v28 = vadd.f32 %v11153_v31, %v6936_v11 }
 0x478   : > { %v4999_v21 = vpop.f32.mrf.mxu0 }
 0x479   : > { %v5152_v49 = vmax.f32 %v5008_v28, 0.0  ;;  %v5000_v13 = vadd.f32 %v11153_v31, %v4999_v21 }
 0x47a   : > { %v6937_v51 = vpop.f32.mrf.mxu0 }
 0x47b   : > { %v5280_v52 = vadd.f32 %v7598_v18, %v5152_v49  ;;  %v5150_v6 = vmax.f32 %v5000_v13, 0.0  ;;  %v5011_v42 = vadd.f32 %v11153_v31, %v6937_v51 }
 0x47c   : > { %v5002_v38 = vpop.f32.mrf.mxu0 }
 0x47d   : > { %5408 = vst.msk [vmem:[%s10797_s15 + $0x3d0] sm:$0xff] %vm980_vm0, %v5280_v52  ;;  %v5278_v43 = vadd.f32 %v7599_v27, %v5150_v6  ;;  %v5153_v48 = vmax.f32 %v5011_v42, 0.0  ;;  %v5003_v19 = vadd.f32 %v11153_v31, %v5002_v38 }
 0x47f   : > { %5406 = vst.msk [vmem:[%s10797_s15 + $0x3c0] sm:$0xff] %vm980_vm0, %v5278_v43  ;;  %v5281_v7 = vadd.f32 %v7600_v0, %v5153_v48  ;;  %v5151_v33 = vmax.f32 %v5003_v19, 0.0 }
 0x481   : > { %5409 = vst.msk [vmem:[%s10797_s15 + $0x3d8] sm:$0xff] %vm980_vm0, %v5281_v7  ;;  %v5279_v16 = vadd.f32 %v7601_v4, %v5151_v33 }
 0x483   : > { %5407 = vst.msk [vmem:[%s10797_s15 + $0x3c8] sm:$0xff] %vm980_vm0, %v5279_v16 }
 0x486   : > { %v6940_v57 = vpop.f32.mrf.mxu0 }
 0x487   : > { %v5024_v36 = vadd.f32 %v11153_v31, %v6940_v57 }
 0x488   : > { %v5015_v29 = vpop.f32.mrf.mxu0 }
 0x489   : > { %v5156_v32 = vmax.f32 %v5024_v36, 0.0  ;;  %v5016_v12 = vadd.f32 %v11153_v31, %v5015_v29 }
 0x48a   : > { %v6941_v24 = vpop.f32.mrf.mxu0 }
 0x48b   : > { %v5284_v37 = vadd.f32 %v7602_v58, %v5156_v32  ;;  %v5154_v53 = vmax.f32 %v5016_v12, 0.0  ;;  %v5027_v30 = vadd.f32 %v11153_v31, %v6941_v24 }
 0x48c   : > { %v5018_v59 = vpop.f32.mrf.mxu0 }
 0x48d   : > { %5412 = vst.msk [vmem:[%s10797_s15 + $0x3f0] sm:$0xff] %vm980_vm0, %v5284_v37  ;;  %v5282_v25 = vadd.f32 %v7603_v35, %v5154_v53  ;;  %v5157_v15 = vmax.f32 %v5027_v30, 0.0  ;;  %v5019_v55 = vadd.f32 %v11153_v31, %v5018_v59 }
 0x48f   : > { %5410 = vst.msk [vmem:[%s10797_s15 + $0x3e0] sm:$0xff] %vm980_vm0, %v5282_v25  ;;  %v5285_v61 = vadd.f32 %v7604_v8, %v5157_v15  ;;  %v5155_v3 = vmax.f32 %v5019_v55, 0.0 }
 0x491   : > { %5413 = vst.msk [vmem:[%s10797_s15 + $0x3f8] sm:$0xff] %vm980_vm0, %v5285_v61  ;;  %v5283_v26 = vadd.f32 %v7605_v40, %v5155_v3 }
 0x493   : > { %5411 = vst.msk [vmem:[%s10797_s15 + $0x3e8] sm:$0xff] %vm980_vm0, %v5283_v26 }
 0x494 PF: > { %s19_s30 = sadd.s32 1, %s7612_s30  }
 0x495   : > { %p16_p4 = scmp.ge.s32.totalorder %s19_s30, 4  }
 0x497   :  { %18 = sbr.rel (!%p16_p4) target bundleno = 1 (0x1), region = 92 }

</bundles_post_ra>
